<compile_context>
chip_gen: v7x
topology: tpu7x:2x2x1
jax: 0.10.0
libtpu: 0.0.40
codegen_flags: <defaults>
</compile_context>

<pallas_src>
import functools

import jax
import jax.numpy as jnp
from jax.experimental import pallas as pl
from jax.experimental.pallas import tpu as pltpu


def _round_up(x, m):
    return (x + m - 1) // m * m


# --------------------------------------------------------------------------
# Pallas kernels
# --------------------------------------------------------------------------

def _fused_mm_kernel(*refs, n_seg, act):
    """acc += sum_s x_s @ w_s over the K grid axis; bias+act at the last K step."""
    x_refs = refs[0:2 * n_seg:2]
    w_refs = refs[1:2 * n_seg:2]
    b_ref = refs[2 * n_seg]
    o_ref = refs[2 * n_seg + 1]
    acc_ref = refs[2 * n_seg + 2]

    @pl.when(pl.program_id(2) == 0)
    def _():
        acc_ref[...] = jnp.zeros_like(acc_ref)

    acc = acc_ref[...]
    for x_ref, w_ref in zip(x_refs, w_refs):
        acc = acc + jnp.dot(x_ref[...], w_ref[...],
                            preferred_element_type=jnp.float32)
    acc_ref[...] = acc

    @pl.when(pl.program_id(2) == pl.num_programs(2) - 1)
    def _():
        out = acc_ref[...] + b_ref[...]
        if act == "relu":
            out = jnp.maximum(out, 0.0)
        o_ref[...] = out.astype(o_ref.dtype)


def _pad2d(x, rows, cols, dtype):
    x = x.astype(dtype)
    if rows or cols:
        x = jnp.pad(x, ((0, rows), (0, cols)))
    return x


def fused_matmul_bias_act(pairs, b, act="none", out_dtype=jnp.bfloat16):
    """sum_s x_s @ w_s + b (+ReLU).  bf16 operands, f32 accumulation, K-tiled.

    pairs: list of (x_s (M, K_s), w_s (K_s, N)); all segments share M and N.
    """
    n_seg = len(pairs)
    M = pairs[0][0].shape[0]
    N = pairs[0][1].shape[1]
    Ks = []
    for x, w in pairs:
        assert x.shape[0] == M and w.shape[1] == N and x.shape[1] == w.shape[0]
        Ks.append(x.shape[1])

    # ---- tile selection ---------------------------------------------------
    Np = _round_up(N, 128)
    tn = Np if Np <= 512 else 256          # N<=512 here: weights stay VMEM-resident
    Np = _round_up(Np, tn)

    Kp0 = _round_up(max(Ks), 128)
    tk = Kp0 if Kp0 <= 1024 else 512       # bound per-step VMEM; accumulate over K
    Kp = _round_up(Kp0, tk)

    tm = min(256, _round_up(M, 16))        # large M tiles; pad rows, don't shrink
    Mp = _round_up(M, tm)

    # ---- pad / cast operands (bf16 halves HBM bytes, feeds bf16 MXU) -------
    operands = []
    for (x, w), K in zip(pairs, Ks):
        operands.append(_pad2d(x, Mp - M, Kp - K, jnp.bfloat16))
        operands.append(_pad2d(w, Kp - K, Np - N, jnp.bfloat16))
    bp = _pad2d(b.reshape(1, N), 0, Np - N, jnp.float32)

    in_specs = []
    for _ in range(n_seg):
        in_specs.append(pl.BlockSpec((tm, tk), lambda i, j, k: (i, k)))
        in_specs.append(pl.BlockSpec((tk, tn), lambda i, j, k: (k, j)))
    in_specs.append(pl.BlockSpec((1, tn), lambda i, j, k: (0, j)))

    flops = int(2 * Mp * Kp * Np * n_seg)
    bytes_accessed = int(n_seg * (Mp * Kp + Kp * Np) * 2 + Np * 4
                         + Mp * Np * jnp.dtype(out_dtype).itemsize)

    out = pl.pallas_call(
        functools.partial(_fused_mm_kernel, n_seg=n_seg, act=act),
        out_shape=jax.ShapeDtypeStruct((Mp, Np), out_dtype),
        grid_spec=pltpu.PrefetchScalarGridSpec(
            num_scalar_prefetch=0,
            grid=(Mp // tm, Np // tn, Kp // tk),
            in_specs=in_specs,
            out_specs=pl.BlockSpec((tm, tn), lambda i, j, k: (i, j)),
            scratch_shapes=[pltpu.VMEM((tm, tn), jnp.float32)],
        ),
        compiler_params=pltpu.CompilerParams(
            dimension_semantics=("parallel", "parallel", "arbitrary")),
        cost_estimate=pl.CostEstimate(flops=flops, transcendentals=0,
                                      bytes_accessed=bytes_accessed),
    )(*operands, bp)
    return out[:M, :N]


def _gap_kernel(x_ref, o_ref, *, inv_count):
    @pl.when(pl.program_id(1) == 0)
    def _():
        o_ref[...] = jnp.zeros_like(o_ref)
    x = x_ref[...].astype(jnp.float32)                     # (1, th, W, Cp)
    o_ref[...] += jnp.sum(x, axis=(1, 2))[:, None, :]       # (1, 1, Cp)

    @pl.when(pl.program_id(1) == pl.num_programs(1) - 1)
    def _():
        o_ref[...] = o_ref[...] * inv_count


def global_avg_pool(x):
    """(B, H, W, C) -> (B, C) spatial mean (ASPP image-level branch), row-tiled."""
    B, H, W, C = x.shape
    Cp = _round_up(C, 128)
    x = x.astype(jnp.bfloat16)
    if Cp != C:
        x = jnp.pad(x, ((0, 0), (0, 0), (0, 0), (0, Cp - C)))
    # row-chunk that keeps the input block under ~2 MiB (safe on v7x's 64 MiB VMEM)
    cap = max(1, (2 * 1024 * 1024) // (W * Cp * 2))
    th = 1
    for d in range(min(H, cap), 0, -1):
        if H % d == 0:
            th = d
            break
    out = pl.pallas_call(
        functools.partial(_gap_kernel, inv_count=1.0 / float(H * W)),
        out_shape=jax.ShapeDtypeStruct((B, 1, Cp), jnp.float32),
        grid_spec=pltpu.PrefetchScalarGridSpec(
            num_scalar_prefetch=0,
            grid=(B, H // th),
            in_specs=[pl.BlockSpec((1, th, W, Cp), lambda b, h: (b, h, 0, 0))],
            out_specs=pl.BlockSpec((1, 1, Cp), lambda b, h: (b, 0, 0)),
        ),
        compiler_params=pltpu.CompilerParams(
            dimension_semantics=("parallel", "arbitrary")),
    )(x)
    return out[:, 0, :C]


# --------------------------------------------------------------------------
# Conv = im2col (glue, bf16) + Pallas fused multi-segment matmul
# --------------------------------------------------------------------------

def conv2d(branches, b, *, stride=1, padding=0, dilation=1, act="none",
           out_dtype=jnp.bfloat16):
    """branches: list of (x, w); x (B,H,W,Cin_s) NHWC, w (kh,kw,Cin_s,Cout).

    Per-branch contributions are summed inside the fused matmul kernel
    (K-accumulation), so channel-concats feeding a conv never hit HBM.
    """
    kh, kw, _, Cout = branches[0][1].shape
    B, H, W, _ = branches[0][0].shape
    eff_h = dilation * (kh - 1) + 1
    eff_w = dilation * (kw - 1) + 1
    out_h = (H + 2 * padding - eff_h) // stride + 1
    out_w = (W + 2 * padding - eff_w) // stride + 1

    pairs = []
    for x, w in branches:
        Cin = x.shape[-1]
        x = x.astype(jnp.bfloat16)
        if kh == 1 and kw == 1 and stride == 1 and padding == 0:
            a = x.reshape(B * out_h * out_w, Cin)
        else:
            # TODO(synk): fold the kh*kw taps directly into the kernel's K grid
            # axis (shifted BlockSpecs over the padded NHWC input) to avoid this
            # kh*kw-times-inflated im2col copy in HBM (now bf16, half the bytes).
            xp = jnp.pad(x, ((0, 0), (padding, padding),
                             (padding, padding), (0, 0)))
            cols = []
            for i in range(kh):
                for j in range(kw):
                    cols.append(jax.lax.slice(
                        xp,
                        (0, i * dilation, j * dilation, 0),
                        (B, i * dilation + (out_h - 1) * stride + 1,
                         j * dilation + (out_w - 1) * stride + 1, Cin),
                        (1, stride, stride, 1)))
            a = jnp.concatenate(cols, axis=-1).reshape(
                B * out_h * out_w, kh * kw * Cin)
        pairs.append((a, w.reshape(kh * kw * Cin, Cout)))

    y = fused_matmul_bias_act(pairs, b, act=act, out_dtype=out_dtype)
    return y.reshape(B, out_h, out_w, Cout)


def upsample2x(x):
    """Nearest-neighbor 2x spatial upsampling, NHWC."""
    x = jnp.repeat(x, 2, axis=1)
    return jnp.repeat(x, 2, axis=2)


# --------------------------------------------------------------------------
# Parameters (deterministic, in-script, f32 master copies)
# --------------------------------------------------------------------------

def _conv_param(key, kh, kw, cin, cout):
    k1, k2 = jax.random.split(key)
    scale = 1.0 / jnp.sqrt(float(kh * kw * cin))
    w = jax.random.normal(k1, (kh, kw, cin, cout), jnp.float32) * scale
    b = jax.random.normal(k2, (cout,), jnp.float32) * 0.01
    return w, b


def init_params(key):
    keys = jax.random.split(key, 12)
    p = {}
    # Shared encoder: (3 img + 1 guidance) -> 32 (stride 2) -> 512 (stride 2)
    p["enc_conv1"] = _conv_param(keys[0], 3, 3, 4, 32)
    p["enc_conv2"] = _conv_param(keys[1], 3, 3, 32, 512)
    # afmodule: fuse 3-frame mid features (3 * 32 -> 32), 1x1
    p["af"] = _conv_param(keys[2], 1, 1, 96, 32)
    # ASPP(in_channel=512, out_channel=512)
    p["aspp_b1"] = _conv_param(keys[3], 1, 1, 512, 512)
    p["aspp_b2"] = _conv_param(keys[4], 3, 3, 512, 512)   # dilation 2
    p["aspp_b3"] = _conv_param(keys[5], 3, 3, 512, 512)   # dilation 3
    p["aspp_pool"] = _conv_param(keys[6], 1, 1, 512, 512)
    p["aspp_proj"] = _conv_param(keys[7], 1, 1, 4 * 512, 512)
    # Decoder
    p["dec_conv1"] = _conv_param(keys[8], 1, 1, 512, 32)
    p["dec_conv2"] = _conv_param(keys[9], 3, 3, 64, 32)
    p["dec_conv3"] = _conv_param(keys[10], 3, 3, 32, 16)
    p["dec_pred"] = _conv_param(keys[11], 1, 1, 16, 1)
    return p


# --------------------------------------------------------------------------
# Module pieces
# --------------------------------------------------------------------------

def encoder(params, x):
    w1, b1 = params["enc_conv1"]
    f1 = conv2d([(x, w1)], b1, stride=2, padding=1, act="relu")   # (N, H/2, W/2, 32)
    w2, b2 = params["enc_conv2"]
    emb = conv2d([(f1, w2)], b2, stride=2, padding=1, act="relu") # (N, H/4, W/4, 512)
    return emb, [f1]


def aspp(params, x):
    B, H, W, C = x.shape
    w, b = params["aspp_b1"]
    br1 = conv2d([(x, w)], b, act="relu")
    w, b = params["aspp_b2"]
    br2 = conv2d([(x, w)], b, padding=2, dilation=2, act="relu")
    w, b = params["aspp_b3"]
    br3 = conv2d([(x, w)], b, padding=3, dilation=3, act="relu")
    pooled = global_avg_pool(x)                                   # (B, C) f32
    w, b = params["aspp_pool"]
    pb = fused_matmul_bias_act([(pooled, w.reshape(C, -1))], b, act="relu")
    br4 = jnp.broadcast_to(pb[:, None, None, :], (B, H, W, pb.shape[-1]))
    # Projection over the 4 branches as K-accumulation (no 2048-ch HBM concat).
    w, bproj = params["aspp_proj"]                                # (1,1,2048,512)
    return conv2d([(br1, w[:, :, 0:512, :]),
                   (br2, w[:, :, 512:1024, :]),
                   (br3, w[:, :, 1024:1536, :]),
                   (br4, w[:, :, 1536:2048, :])], bproj, act="relu")


def afmodule(params, mid_fea_in):
    w, b = params["af"]
    return conv2d([(mid_fea_in, w)], b, act="relu")


def decoder(params, x, mid_fea):
    w, b = params["dec_conv1"]
    y = conv2d([(x, w)], b, act="relu")                  # (B, H/4, W/4, 32)
    y = upsample2x(y)                                    # (B, H/2, W/2, 32)
    # Skip-concat folded into the matmul K axis: two 32-ch segments.
    w, b = params["dec_conv2"]                           # (3,3,64,32)
    y = conv2d([(y, w[:, :, 0:32, :]),
                (mid_fea, w[:, :, 32:64, :])], b, padding=1, act="relu")
    y = upsample2x(y)                                    # (B, H, W, 32)
    w, b = params["dec_conv3"]
    y = conv2d([(y, w)], b, padding=1, act="relu")
    w, b = params["dec_pred"]
    return conv2d([(y, w)], b)                           # (B, H, W, 1)


def generator_for_video_forward(params, image, guidance):
    """image: (3, B, 3, H, W) NCHW frames; guidance: (3, B, 1, H, W).

    Returns pred: (B, 1, H, W) NCHW float32 (matching the PyTorch forward).
    """
    def to_nhwc(t):
        return jnp.transpose(t, (0, 2, 3, 1))

    # torch.cat((image[i], guidance[i]), dim=1) -> channel concat, per frame.
    inputs = [to_nhwc(jnp.concatenate((image[i], guidance[i]), axis=1))
              for i in range(3)]
    B = inputs[0].shape[0]

    # Batch the three frames through ONE encoder call (shared weights).
    stacked = jnp.concatenate(inputs, axis=0).astype(jnp.bfloat16)  # (3B, H, W, 4)
    emb, mid = encoder(params, stacked)
    mid = mid[0]
    embedding2 = emb[B:2 * B]                                       # frame 2 embedding

    # torch.cat(mid_fea1 + mid_fea2 + mid_fea3, dim=1) -> channel concat in NHWC.
    mid_fea_in = jnp.concatenate([mid[0:B], mid[B:2 * B], mid[2 * B:3 * B]],
                                 axis=-1)                           # (B, H/2, W/2, 96)
    mid_fea_out = afmodule(params, mid_fea_in)

    out = aspp(params, embedding2)
    pred = decoder(params, out, mid_fea_out)
    return jnp.transpose(pred, (0, 3, 1, 2)).astype(jnp.float32)    # NCHW


# --------------------------------------------------------------------------

if __name__ == "__main__":
    key = jax.random.PRNGKey(0)
    kimg, kgdn = jax.random.split(key)
    B, H, W = 2, 16, 16
    image = jax.random.normal(kimg, (3, B, 3, H, W), jnp.float32)
    guidance = jax.random.normal(kgdn, (3, B, 1, H, W), jnp.float32)
    params = init_params(jax.random.PRNGKey(42))

    fwd = jax.jit(functools.partial(generator_for_video_forward, params))
    pred = fwd(image, guidance)
    jax.block_until_ready(pred)
    assert pred.shape == (B, 1, H, W), pred.shape
    assert bool(jnp.all(jnp.isfinite(pred)))
    print("KERNEL_OK")
</pallas_src>

<mosaic_0001>
module attributes {stable_mosaic.version = 11 : i64} {
  func.func @_fused_mm_kernel(%arg0: i32, %arg1: i32, %arg2: i32, %arg3: memref<256x128xbf16, #tpu.memory_space<vmem>>, %arg4: memref<128x128xbf16, #tpu.memory_space<vmem>>, %arg5: memref<1x128xf32, #tpu.memory_space<vmem>>, %arg6: memref<256x128xbf16, #tpu.memory_space<vmem>>, %arg7: memref<256x128xf32, #tpu.memory_space<vmem>>) attributes {dimension_semantics = [#tpu.dimension_semantics<parallel>, #tpu.dimension_semantics<parallel>, #tpu.dimension_semantics<arbitrary>], iteration_bounds = array<i64: 2, 1, 1>, scalar_prefetch = 0 : i64, scratch_operands = 1 : i64, tpu.core_type = #tpu.core_type<tc>, window_params = [{transform_indices = @transform_0, window_bounds = array<i64: 256, 128>}, {transform_indices = @transform_1, window_bounds = array<i64: 128, 128>}, {transform_indices = @transform_2, window_bounds = array<i64: 1, 128>}, {transform_indices = @transform_3, window_bounds = array<i64: 256, 128>}]} {
    %c0_i32 = arith.constant 0 : i32
    %0 = arith.cmpi eq, %arg2, %c0_i32 : i32
    %1 = arith.extui %0 : i1 to i32
    %c0_i32_0 = arith.constant 0 : i32
    %2 = arith.cmpi ne, %1, %c0_i32_0 : i32
    scf.if %2 {
      %cst_10 = arith.constant 0.000000e+00 : f32
      %12 = vector.broadcast %cst_10 : f32 to vector<256x128xf32>
      %c0_11 = arith.constant 0 : index
      %c0_12 = arith.constant 0 : index
      %13 = vector.load %arg7[%c0_11, %c0_12] : memref<256x128xf32, #tpu.memory_space<vmem>>, vector<256x128xf32>
      tpu.vector_store %arg7[%c0_11, %c0_12], %12 {strides = array<i32>} : memref<256x128xf32, #tpu.memory_space<vmem>>, vector<256x128xf32>,
    } else {
    }
    %c0 = arith.constant 0 : index
    %c0_1 = arith.constant 0 : index
    %3 = vector.load %arg7[%c0, %c0_1] : memref<256x128xf32, #tpu.memory_space<vmem>>, vector<256x128xf32>
    %c0_2 = arith.constant 0 : index
    %c0_3 = arith.constant 0 : index
    %4 = vector.load %arg3[%c0_2, %c0_3] : memref<256x128xbf16, #tpu.memory_space<vmem>>, vector<256x128xbf16>
    %c0_4 = arith.constant 0 : index
    %c0_5 = arith.constant 0 : index
    %5 = vector.load %arg4[%c0_4, %c0_5] : memref<128x128xbf16, #tpu.memory_space<vmem>>, vector<128x128xbf16>
    %cst = arith.constant dense<0.000000e+00> : vector<256x128xf32>
    %6 = tpu.matmul %4, %5, %cst {dimension_numbers = #tpu.dot_dimension_numbers<[1], [0], [0], [1], [0, 0, 1, 1], [], []>} : vector<256x128xbf16>, vector<128x128xbf16>, vector<256x128xf32> -> vector<256x128xf32>
    %7 = arith.addf %3, %6 : vector<256x128xf32>
    %c0_6 = arith.constant 0 : index
    %c0_7 = arith.constant 0 : index
    %8 = vector.load %arg7[%c0_6, %c0_7] : memref<256x128xf32, #tpu.memory_space<vmem>>, vector<256x128xf32>
    tpu.vector_store %arg7[%c0_6, %c0_7], %7 {strides = array<i32>} : memref<256x128xf32, #tpu.memory_space<vmem>>, vector<256x128xf32>,
    %c0_i32_8 = arith.constant 0 : i32
    %9 = arith.cmpi eq, %arg2, %c0_i32_8 : i32
    %10 = arith.extui %9 : i1 to i32
    %c0_i32_9 = arith.constant 0 : i32
    %11 = arith.cmpi ne, %10, %c0_i32_9 : i32
    scf.if %11 {
      %c0_10 = arith.constant 0 : index
      %c0_11 = arith.constant 0 : index
      %12 = vector.load %arg7[%c0_10, %c0_11] : memref<256x128xf32, #tpu.memory_space<vmem>>, vector<256x128xf32>
      %c0_12 = arith.constant 0 : index
      %c0_13 = arith.constant 0 : index
      %13 = vector.load %arg5[%c0_12, %c0_13] : memref<1x128xf32, #tpu.memory_space<vmem>>, vector<1x128xf32>
      %14 = vector.broadcast %13 : vector<1x128xf32> to vector<256x128xf32>
      %15 = arith.addf %12, %14 : vector<256x128xf32>
      %cst_14 = arith.constant 0.000000e+00 : f32
      %16 = vector.broadcast %cst_14 : f32 to vector<256x128xf32>
      %17 = arith.maximumf %15, %16 : vector<256x128xf32>
      %18 = arith.truncf %17 : vector<256x128xf32> to vector<256x128xbf16>
      %c0_15 = arith.constant 0 : index
      %c0_16 = arith.constant 0 : index
      %19 = vector.load %arg6[%c0_15, %c0_16] : memref<256x128xbf16, #tpu.memory_space<vmem>>, vector<256x128xbf16>
      tpu.vector_store %arg6[%c0_15, %c0_16], %18 {strides = array<i32>} : memref<256x128xbf16, #tpu.memory_space<vmem>>, vector<256x128xbf16>,
    } else {
    }
    return
  }
  func.func @transform_0(%arg0: i32, %arg1: i32, %arg2: i32) -> (i32, i32) {
    %c0_i32 = arith.constant 0 : i32
    return %arg0, %arg2 : i32, i32
  }
  func.func @transform_1(%arg0: i32, %arg1: i32, %arg2: i32) -> (i32, i32) {
    %c0_i32 = arith.constant 0 : i32
    return %arg2, %arg1 : i32, i32
  }
  func.func @transform_2(%arg0: i32, %arg1: i32, %arg2: i32) -> (i32, i32) {
    %c0_i32 = arith.constant 0 : i32
    %c0_i32_0 = arith.constant 0 : i32
    return %c0_i32, %arg1 : i32, i32
  }
  func.func @transform_3(%arg0: i32, %arg1: i32, %arg2: i32) -> (i32, i32) {
    %c0_i32 = arith.constant 0 : i32
    return %arg0, %arg1 : i32, i32
  }
}

module attributes {stable_mosaic.version = 11 : i64} {
  func.func @_fused_mm_kernel(%arg0: i32, %arg1: i32, %arg2: i32, %arg3: memref<128x128xbf16, #tpu.memory_space<vmem>>, %arg4: memref<128x128xbf16, #tpu.memory_space<vmem>>, %arg5: memref<1x128xf32, #tpu.memory_space<vmem>>, %arg6: memref<128x128xbf16, #tpu.memory_space<vmem>>, %arg7: memref<128x128xf32, #tpu.memory_space<vmem>>) attributes {dimension_semantics = [#tpu.dimension_semantics<parallel>, #tpu.dimension_semantics<parallel>, #tpu.dimension_semantics<arbitrary>], iteration_bounds = array<i64: 1, 1, 1>, scalar_prefetch = 0 : i64, scratch_operands = 1 : i64, tpu.core_type = #tpu.core_type<tc>, window_params = [{transform_indices = @transform_0, window_bounds = array<i64: 128, 128>}, {transform_indices = @transform_1, window_bounds = array<i64: 128, 128>}, {transform_indices = @transform_2, window_bounds = array<i64: 1, 128>}, {transform_indices = @transform_3, window_bounds = array<i64: 128, 128>}]} {
    %c0_i32 = arith.constant 0 : i32
    %0 = arith.cmpi eq, %arg2, %c0_i32 : i32
    %1 = arith.extui %0 : i1 to i32
    %c0_i32_0 = arith.constant 0 : i32
    %2 = arith.cmpi ne, %1, %c0_i32_0 : i32
    scf.if %2 {
      %cst_10 = arith.constant 0.000000e+00 : f32
      %12 = vector.broadcast %cst_10 : f32 to vector<128x128xf32>
      %c0_11 = arith.constant 0 : index
      %c0_12 = arith.constant 0 : index
      %13 = vector.load %arg7[%c0_11, %c0_12] : memref<128x128xf32, #tpu.memory_space<vmem>>, vector<128x128xf32>
      tpu.vector_store %arg7[%c0_11, %c0_12], %12 {strides = array<i32>} : memref<128x128xf32, #tpu.memory_space<vmem>>, vector<128x128xf32>,
    } else {
    }
    %c0 = arith.constant 0 : index
    %c0_1 = arith.constant 0 : index
    %3 = vector.load %arg7[%c0, %c0_1] : memref<128x128xf32, #tpu.memory_space<vmem>>, vector<128x128xf32>
    %c0_2 = arith.constant 0 : index
    %c0_3 = arith.constant 0 : index
    %4 = vector.load %arg3[%c0_2, %c0_3] : memref<128x128xbf16, #tpu.memory_space<vmem>>, vector<128x128xbf16>
    %c0_4 = arith.constant 0 : index
    %c0_5 = arith.constant 0 : index
    %5 = vector.load %arg4[%c0_4, %c0_5] : memref<128x128xbf16, #tpu.memory_space<vmem>>, vector<128x128xbf16>
    %cst = arith.constant dense<0.000000e+00> : vector<128x128xf32>
    %6 = tpu.matmul %4, %5, %cst {dimension_numbers = #tpu.dot_dimension_numbers<[1], [0], [0], [1], [0, 0, 1, 1], [], []>} : vector<128x128xbf16>, vector<128x128xbf16>, vector<128x128xf32> -> vector<128x128xf32>
    %7 = arith.addf %3, %6 : vector<128x128xf32>
    %c0_6 = arith.constant 0 : index
    %c0_7 = arith.constant 0 : index
    %8 = vector.load %arg7[%c0_6, %c0_7] : memref<128x128xf32, #tpu.memory_space<vmem>>, vector<128x128xf32>
    tpu.vector_store %arg7[%c0_6, %c0_7], %7 {strides = array<i32>} : memref<128x128xf32, #tpu.memory_space<vmem>>, vector<128x128xf32>,
    %c0_i32_8 = arith.constant 0 : i32
    %9 = arith.cmpi eq, %arg2, %c0_i32_8 : i32
    %10 = arith.extui %9 : i1 to i32
    %c0_i32_9 = arith.constant 0 : i32
    %11 = arith.cmpi ne, %10, %c0_i32_9 : i32
    scf.if %11 {
      %c0_10 = arith.constant 0 : index
      %c0_11 = arith.constant 0 : index
      %12 = vector.load %arg7[%c0_10, %c0_11] : memref<128x128xf32, #tpu.memory_space<vmem>>, vector<128x128xf32>
      %c0_12 = arith.constant 0 : index
      %c0_13 = arith.constant 0 : index
      %13 = vector.load %arg5[%c0_12, %c0_13] : memref<1x128xf32, #tpu.memory_space<vmem>>, vector<1x128xf32>
      %14 = vector.broadcast %13 : vector<1x128xf32> to vector<128x128xf32>
      %15 = arith.addf %12, %14 : vector<128x128xf32>
      %cst_14 = arith.constant 0.000000e+00 : f32
      %16 = vector.broadcast %cst_14 : f32 to vector<128x128xf32>
      %17 = arith.maximumf %15, %16 : vector<128x128xf32>
      %18 = arith.truncf %17 : vector<128x128xf32> to vector<128x128xbf16>
      %c0_15 = arith.constant 0 : index
      %c0_16 = arith.constant 0 : index
      %19 = vector.load %arg6[%c0_15, %c0_16] : memref<128x128xbf16, #tpu.memory_space<vmem>>, vector<128x128xbf16>
      tpu.vector_store %arg6[%c0_15, %c0_16], %18 {strides = array<i32>} : memref<128x128xbf16, #tpu.memory_space<vmem>>, vector<128x128xbf16>,
    } else {
    }
    return
  }
  func.func @transform_0(%arg0: i32, %arg1: i32, %arg2: i32) -> (i32, i32) {
    %c0_i32 = arith.constant 0 : i32
    return %arg0, %arg2 : i32, i32
  }
  func.func @transform_1(%arg0: i32, %arg1: i32, %arg2: i32) -> (i32, i32) {
    %c0_i32 = arith.constant 0 : i32
    return %arg2, %arg1 : i32, i32
  }
  func.func @transform_2(%arg0: i32, %arg1: i32, %arg2: i32) -> (i32, i32) {
    %c0_i32 = arith.constant 0 : i32
    %c0_i32_0 = arith.constant 0 : i32
    return %c0_i32, %arg1 : i32, i32
  }
  func.func @transform_3(%arg0: i32, %arg1: i32, %arg2: i32) -> (i32, i32) {
    %c0_i32 = arith.constant 0 : i32
    return %arg0, %arg1 : i32, i32
  }
}

module attributes {stable_mosaic.version = 11 : i64} {
  func.func @_fused_mm_kernel(%arg0: i32, %arg1: i32, %arg2: i32, %arg3: memref<96x384xbf16, #tpu.memory_space<vmem>>, %arg4: memref<384x512xbf16, #tpu.memory_space<vmem>>, %arg5: memref<1x512xf32, #tpu.memory_space<vmem>>, %arg6: memref<96x512xbf16, #tpu.memory_space<vmem>>, %arg7: memref<96x512xf32, #tpu.memory_space<vmem>>) attributes {dimension_semantics = [#tpu.dimension_semantics<parallel>, #tpu.dimension_semantics<parallel>, #tpu.dimension_semantics<arbitrary>], iteration_bounds = array<i64: 1, 1, 1>, scalar_prefetch = 0 : i64, scratch_operands = 1 : i64, tpu.core_type = #tpu.core_type<tc>, window_params = [{transform_indices = @transform_0, window_bounds = array<i64: 96, 384>}, {transform_indices = @transform_1, window_bounds = array<i64: 384, 512>}, {transform_indices = @transform_2, window_bounds = array<i64: 1, 512>}, {transform_indices = @transform_3, window_bounds = array<i64: 96, 512>}]} {
    %c0_i32 = arith.constant 0 : i32
    %0 = arith.cmpi eq, %arg2, %c0_i32 : i32
    %1 = arith.extui %0 : i1 to i32
    %c0_i32_0 = arith.constant 0 : i32
    %2 = arith.cmpi ne, %1, %c0_i32_0 : i32
    scf.if %2 {
      %cst_10 = arith.constant 0.000000e+00 : f32
      %12 = vector.broadcast %cst_10 : f32 to vector<96x512xf32>
      %c0_11 = arith.constant 0 : index
      %c0_12 = arith.constant 0 : index
      %13 = vector.load %arg7[%c0_11, %c0_12] : memref<96x512xf32, #tpu.memory_space<vmem>>, vector<96x512xf32>
      tpu.vector_store %arg7[%c0_11, %c0_12], %12 {strides = array<i32>} : memref<96x512xf32, #tpu.memory_space<vmem>>, vector<96x512xf32>,
    } else {
    }
    %c0 = arith.constant 0 : index
    %c0_1 = arith.constant 0 : index
    %3 = vector.load %arg7[%c0, %c0_1] : memref<96x512xf32, #tpu.memory_space<vmem>>, vector<96x512xf32>
    %c0_2 = arith.constant 0 : index
    %c0_3 = arith.constant 0 : index
    %4 = vector.load %arg3[%c0_2, %c0_3] : memref<96x384xbf16, #tpu.memory_space<vmem>>, vector<96x384xbf16>
    %c0_4 = arith.constant 0 : index
    %c0_5 = arith.constant 0 : index
    %5 = vector.load %arg4[%c0_4, %c0_5] : memref<384x512xbf16, #tpu.memory_space<vmem>>, vector<384x512xbf16>
    %cst = arith.constant dense<0.000000e+00> : vector<96x512xf32>
    %6 = tpu.matmul %4, %5, %cst {dimension_numbers = #tpu.dot_dimension_numbers<[1], [0], [0], [1], [0, 0, 1, 1], [], []>} : vector<96x384xbf16>, vector<384x512xbf16>, vector<96x512xf32> -> vector<96x512xf32>
    %7 = arith.addf %3, %6 : vector<96x512xf32>
    %c0_6 = arith.constant 0 : index
    %c0_7 = arith.constant 0 : index
    %8 = vector.load %arg7[%c0_6, %c0_7] : memref<96x512xf32, #tpu.memory_space<vmem>>, vector<96x512xf32>
    tpu.vector_store %arg7[%c0_6, %c0_7], %7 {strides = array<i32>} : memref<96x512xf32, #tpu.memory_space<vmem>>, vector<96x512xf32>,
    %c0_i32_8 = arith.constant 0 : i32
    %9 = arith.cmpi eq, %arg2, %c0_i32_8 : i32
    %10 = arith.extui %9 : i1 to i32
    %c0_i32_9 = arith.constant 0 : i32
    %11 = arith.cmpi ne, %10, %c0_i32_9 : i32
    scf.if %11 {
      %c0_10 = arith.constant 0 : index
      %c0_11 = arith.constant 0 : index
      %12 = vector.load %arg7[%c0_10, %c0_11] : memref<96x512xf32, #tpu.memory_space<vmem>>, vector<96x512xf32>
      %c0_12 = arith.constant 0 : index
      %c0_13 = arith.constant 0 : index
      %13 = vector.load %arg5[%c0_12, %c0_13] : memref<1x512xf32, #tpu.memory_space<vmem>>, vector<1x512xf32>
      %14 = vector.broadcast %13 : vector<1x512xf32> to vector<96x512xf32>
      %15 = arith.addf %12, %14 : vector<96x512xf32>
      %cst_14 = arith.constant 0.000000e+00 : f32
      %16 = vector.broadcast %cst_14 : f32 to vector<96x512xf32>
      %17 = arith.maximumf %15, %16 : vector<96x512xf32>
      %18 = arith.truncf %17 : vector<96x512xf32> to vector<96x512xbf16>
      %c0_15 = arith.constant 0 : index
      %c0_16 = arith.constant 0 : index
      %19 = vector.load %arg6[%c0_15, %c0_16] : memref<96x512xbf16, #tpu.memory_space<vmem>>, vector<96x512xbf16>
      tpu.vector_store %arg6[%c0_15, %c0_16], %18 {strides = array<i32>} : memref<96x512xbf16, #tpu.memory_space<vmem>>, vector<96x512xbf16>,
    } else {
    }
    return
  }
  func.func @transform_0(%arg0: i32, %arg1: i32, %arg2: i32) -> (i32, i32) {
    %c0_i32 = arith.constant 0 : i32
    return %arg0, %arg2 : i32, i32
  }
  func.func @transform_1(%arg0: i32, %arg1: i32, %arg2: i32) -> (i32, i32) {
    %c0_i32 = arith.constant 0 : i32
    return %arg2, %arg1 : i32, i32
  }
  func.func @transform_2(%arg0: i32, %arg1: i32, %arg2: i32) -> (i32, i32) {
    %c0_i32 = arith.constant 0 : i32
    %c0_i32_0 = arith.constant 0 : i32
    return %c0_i32, %arg1 : i32, i32
  }
  func.func @transform_3(%arg0: i32, %arg1: i32, %arg2: i32) -> (i32, i32) {
    %c0_i32 = arith.constant 0 : i32
    return %arg0, %arg1 : i32, i32
  }
}

module attributes {stable_mosaic.version = 11 : i64} {
  func.func @_fused_mm_kernel(%arg0: i32, %arg1: i32, %arg2: i32, %arg3: memref<32x512xbf16, #tpu.memory_space<vmem>>, %arg4: memref<512x512xbf16, #tpu.memory_space<vmem>>, %arg5: memref<1x512xf32, #tpu.memory_space<vmem>>, %arg6: memref<32x512xbf16, #tpu.memory_space<vmem>>, %arg7: memref<32x512xf32, #tpu.memory_space<vmem>>) attributes {dimension_semantics = [#tpu.dimension_semantics<parallel>, #tpu.dimension_semantics<parallel>, #tpu.dimension_semantics<arbitrary>], iteration_bounds = array<i64: 1, 1, 9>, scalar_prefetch = 0 : i64, scratch_operands = 1 : i64, tpu.core_type = #tpu.core_type<tc>, window_params = [{transform_indices = @transform_0, window_bounds = array<i64: 32, 512>}, {transform_indices = @transform_1, window_bounds = array<i64: 512, 512>}, {transform_indices = @transform_2, window_bounds = array<i64: 1, 512>}, {transform_indices = @transform_3, window_bounds = array<i64: 32, 512>}]} {
    %c0_i32 = arith.constant 0 : i32
    %0 = arith.cmpi eq, %arg2, %c0_i32 : i32
    %1 = arith.extui %0 : i1 to i32
    %c0_i32_0 = arith.constant 0 : i32
    %2 = arith.cmpi ne, %1, %c0_i32_0 : i32
    scf.if %2 {
      %cst_9 = arith.constant 0.000000e+00 : f32
      %12 = vector.broadcast %cst_9 : f32 to vector<32x512xf32>
      %c0_10 = arith.constant 0 : index
      %c0_11 = arith.constant 0 : index
      %13 = vector.load %arg7[%c0_10, %c0_11] : memref<32x512xf32, #tpu.memory_space<vmem>>, vector<32x512xf32>
      tpu.vector_store %arg7[%c0_10, %c0_11], %12 {strides = array<i32>} : memref<32x512xf32, #tpu.memory_space<vmem>>, vector<32x512xf32>,
    } else {
    }
    %c0 = arith.constant 0 : index
    %c0_1 = arith.constant 0 : index
    %3 = vector.load %arg7[%c0, %c0_1] : memref<32x512xf32, #tpu.memory_space<vmem>>, vector<32x512xf32>
    %c0_2 = arith.constant 0 : index
    %c0_3 = arith.constant 0 : index
    %4 = vector.load %arg3[%c0_2, %c0_3] : memref<32x512xbf16, #tpu.memory_space<vmem>>, vector<32x512xbf16>
    %c0_4 = arith.constant 0 : index
    %c0_5 = arith.constant 0 : index
    %5 = vector.load %arg4[%c0_4, %c0_5] : memref<512x512xbf16, #tpu.memory_space<vmem>>, vector<512x512xbf16>
    %cst = arith.constant dense<0.000000e+00> : vector<32x512xf32>
    %6 = tpu.matmul %4, %5, %cst {dimension_numbers = #tpu.dot_dimension_numbers<[1], [0], [0], [1], [0, 0, 1, 1], [], []>} : vector<32x512xbf16>, vector<512x512xbf16>, vector<32x512xf32> -> vector<32x512xf32>
    %7 = arith.addf %3, %6 : vector<32x512xf32>
    %c0_6 = arith.constant 0 : index
    %c0_7 = arith.constant 0 : index
    %8 = vector.load %arg7[%c0_6, %c0_7] : memref<32x512xf32, #tpu.memory_space<vmem>>, vector<32x512xf32>
    tpu.vector_store %arg7[%c0_6, %c0_7], %7 {strides = array<i32>} : memref<32x512xf32, #tpu.memory_space<vmem>>, vector<32x512xf32>,
    %c8_i32 = arith.constant 8 : i32
    %9 = arith.cmpi eq, %arg2, %c8_i32 : i32
    %10 = arith.extui %9 : i1 to i32
    %c0_i32_8 = arith.constant 0 : i32
    %11 = arith.cmpi ne, %10, %c0_i32_8 : i32
    scf.if %11 {
      %c0_9 = arith.constant 0 : index
      %c0_10 = arith.constant 0 : index
      %12 = vector.load %arg7[%c0_9, %c0_10] : memref<32x512xf32, #tpu.memory_space<vmem>>, vector<32x512xf32>
      %c0_11 = arith.constant 0 : index
      %c0_12 = arith.constant 0 : index
      %13 = vector.load %arg5[%c0_11, %c0_12] : memref<1x512xf32, #tpu.memory_space<vmem>>, vector<1x512xf32>
      %14 = vector.broadcast %13 : vector<1x512xf32> to vector<32x512xf32>
      %15 = arith.addf %12, %14 : vector<32x512xf32>
      %cst_13 = arith.constant 0.000000e+00 : f32
      %16 = vector.broadcast %cst_13 : f32 to vector<32x512xf32>
      %17 = arith.maximumf %15, %16 : vector<32x512xf32>
      %18 = arith.truncf %17 : vector<32x512xf32> to vector<32x512xbf16>
      %c0_14 = arith.constant 0 : index
      %c0_15 = arith.constant 0 : index
      %19 = vector.load %arg6[%c0_14, %c0_15] : memref<32x512xbf16, #tpu.memory_space<vmem>>, vector<32x512xbf16>
      tpu.vector_store %arg6[%c0_14, %c0_15], %18 {strides = array<i32>} : memref<32x512xbf16, #tpu.memory_space<vmem>>, vector<32x512xbf16>,
    } else {
    }
    return
  }
  func.func @transform_0(%arg0: i32, %arg1: i32, %arg2: i32) -> (i32, i32) {
    %c0_i32 = arith.constant 0 : i32
    return %arg0, %arg2 : i32, i32
  }
  func.func @transform_1(%arg0: i32, %arg1: i32, %arg2: i32) -> (i32, i32) {
    %c0_i32 = arith.constant 0 : i32
    return %arg2, %arg1 : i32, i32
  }
  func.func @transform_2(%arg0: i32, %arg1: i32, %arg2: i32) -> (i32, i32) {
    %c0_i32 = arith.constant 0 : i32
    %c0_i32_0 = arith.constant 0 : i32
    return %c0_i32, %arg1 : i32, i32
  }
  func.func @transform_3(%arg0: i32, %arg1: i32, %arg2: i32) -> (i32, i32) {
    %c0_i32 = arith.constant 0 : i32
    return %arg0, %arg1 : i32, i32
  }
}

module attributes {stable_mosaic.version = 11 : i64} {
  func.func @_gap_kernel(%arg0: i32, %arg1: i32, %arg2: memref<1x4x4x512xbf16, #tpu.memory_space<vmem>>, %arg3: memref<1x1x512xf32, #tpu.memory_space<vmem>>) attributes {dimension_semantics = [#tpu.dimension_semantics<parallel>, #tpu.dimension_semantics<arbitrary>], iteration_bounds = array<i64: 2, 1>, scalar_prefetch = 0 : i64, scratch_operands = 0 : i64, tpu.core_type = #tpu.core_type<tc>, window_params = [{transform_indices = @transform_0, window_bounds = array<i64: 1, 4, 4, 512>}, {transform_indices = @transform_1, window_bounds = array<i64: 1, 1, 512>}]} {
    %c0_i32 = arith.constant 0 : i32
    %0 = arith.cmpi eq, %arg1, %c0_i32 : i32
    %1 = arith.extui %0 : i1 to i32
    %c0_i32_0 = arith.constant 0 : i32
    %2 = arith.cmpi ne, %1, %c0_i32_0 : i32
    scf.if %2 {
      %cst_12 = arith.constant 0.000000e+00 : f32
      %13 = vector.broadcast %cst_12 : f32 to vector<1x1x512xf32>
      %c0_13 = arith.constant 0 : index
      %c0_14 = arith.constant 0 : index
      %c0_15 = arith.constant 0 : index
      %14 = vector.load %arg3[%c0_13, %c0_14, %c0_15] : memref<1x1x512xf32, #tpu.memory_space<vmem>>, vector<1x1x512xf32>
      tpu.vector_store %arg3[%c0_13, %c0_14, %c0_15], %13 {strides = array<i32>} : memref<1x1x512xf32, #tpu.memory_space<vmem>>, vector<1x1x512xf32>,
    } else {
    }
    %c0 = arith.constant 0 : index
    %c0_1 = arith.constant 0 : index
    %c0_2 = arith.constant 0 : index
    %c0_3 = arith.constant 0 : index
    %3 = vector.load %arg2[%c0, %c0_1, %c0_2, %c0_3] : memref<1x4x4x512xbf16, #tpu.memory_space<vmem>>, vector<1x4x4x512xbf16>
    %4 = arith.extf %3 : vector<1x4x4x512xbf16> to vector<1x4x4x512xf32>
    %c0_4 = arith.constant 0 : index
    %c0_5 = arith.constant 0 : index
    %c0_6 = arith.constant 0 : index
    %5 = vector.load %arg3[%c0_4, %c0_5, %c0_6] : memref<1x1x512xf32, #tpu.memory_space<vmem>>, vector<1x1x512xf32>
    %cst = arith.constant dense<0.000000e+00> : vector<1x512xf32>
    %6 = vector.multi_reduction <add>, %4, %cst [1, 2] : vector<1x4x4x512xf32> to vector<1x512xf32>
    %7 = vector.shape_cast %6 : vector<1x512xf32> to vector<1x1x512xf32>
    %8 = arith.addf %5, %7 : vector<1x1x512xf32>
    %c0_7 = arith.constant 0 : index
    %c0_8 = arith.constant 0 : index
    %c0_9 = arith.constant 0 : index
    %9 = vector.load %arg3[%c0_7, %c0_8, %c0_9] : memref<1x1x512xf32, #tpu.memory_space<vmem>>, vector<1x1x512xf32>
    tpu.vector_store %arg3[%c0_7, %c0_8, %c0_9], %8 {strides = array<i32>} : memref<1x1x512xf32, #tpu.memory_space<vmem>>, vector<1x1x512xf32>,
    %c0_i32_10 = arith.constant 0 : i32
    %10 = arith.cmpi eq, %arg1, %c0_i32_10 : i32
    %11 = arith.extui %10 : i1 to i32
    %c0_i32_11 = arith.constant 0 : i32
    %12 = arith.cmpi ne, %11, %c0_i32_11 : i32
    scf.if %12 {
      %c0_12 = arith.constant 0 : index
      %c0_13 = arith.constant 0 : index
      %c0_14 = arith.constant 0 : index
      %13 = vector.load %arg3[%c0_12, %c0_13, %c0_14] : memref<1x1x512xf32, #tpu.memory_space<vmem>>, vector<1x1x512xf32>
      %cst_15 = arith.constant 6.250000e-02 : f32
      %14 = vector.broadcast %cst_15 : f32 to vector<1x1x512xf32>
      %15 = arith.mulf %13, %14 : vector<1x1x512xf32>
      %c0_16 = arith.constant 0 : index
      %c0_17 = arith.constant 0 : index
      %c0_18 = arith.constant 0 : index
      %16 = vector.load %arg3[%c0_16, %c0_17, %c0_18] : memref<1x1x512xf32, #tpu.memory_space<vmem>>, vector<1x1x512xf32>
      tpu.vector_store %arg3[%c0_16, %c0_17, %c0_18], %15 {strides = array<i32>} : memref<1x1x512xf32, #tpu.memory_space<vmem>>, vector<1x1x512xf32>,
    } else {
    }
    return
  }
  func.func @transform_0(%arg0: i32, %arg1: i32) -> (i32, i32, i32, i32) {
    %c0_i32 = arith.constant 0 : i32
    %c0_i32_0 = arith.constant 0 : i32
    %c0_i32_1 = arith.constant 0 : i32
    return %arg0, %arg1, %c0_i32, %c0_i32_0 : i32, i32, i32, i32
  }
  func.func @transform_1(%arg0: i32, %arg1: i32) -> (i32, i32, i32) {
    %c0_i32 = arith.constant 0 : i32
    %c0_i32_0 = arith.constant 0 : i32
    %c0_i32_1 = arith.constant 0 : i32
    return %arg0, %c0_i32, %c0_i32_0 : i32, i32, i32
  }
}

module attributes {stable_mosaic.version = 11 : i64} {
  func.func @_fused_mm_kernel(%arg0: i32, %arg1: i32, %arg2: i32, %arg3: memref<16x512xbf16, #tpu.memory_space<vmem>>, %arg4: memref<512x512xbf16, #tpu.memory_space<vmem>>, %arg5: memref<1x512xf32, #tpu.memory_space<vmem>>, %arg6: memref<16x512xbf16, #tpu.memory_space<vmem>>, %arg7: memref<16x512xf32, #tpu.memory_space<vmem>>) attributes {dimension_semantics = [#tpu.dimension_semantics<parallel>, #tpu.dimension_semantics<parallel>, #tpu.dimension_semantics<arbitrary>], iteration_bounds = array<i64: 1, 1, 1>, scalar_prefetch = 0 : i64, scratch_operands = 1 : i64, tpu.core_type = #tpu.core_type<tc>, window_params = [{transform_indices = @transform_0, window_bounds = array<i64: 16, 512>}, {transform_indices = @transform_1, window_bounds = array<i64: 512, 512>}, {transform_indices = @transform_2, window_bounds = array<i64: 1, 512>}, {transform_indices = @transform_3, window_bounds = array<i64: 16, 512>}]} {
    %c0_i32 = arith.constant 0 : i32
    %0 = arith.cmpi eq, %arg2, %c0_i32 : i32
    %1 = arith.extui %0 : i1 to i32
    %c0_i32_0 = arith.constant 0 : i32
    %2 = arith.cmpi ne, %1, %c0_i32_0 : i32
    scf.if %2 {
      %cst_10 = arith.constant 0.000000e+00 : f32
      %12 = vector.broadcast %cst_10 : f32 to vector<16x512xf32>
      %c0_11 = arith.constant 0 : index
      %c0_12 = arith.constant 0 : index
      %13 = vector.load %arg7[%c0_11, %c0_12] : memref<16x512xf32, #tpu.memory_space<vmem>>, vector<16x512xf32>
      tpu.vector_store %arg7[%c0_11, %c0_12], %12 {strides = array<i32>} : memref<16x512xf32, #tpu.memory_space<vmem>>, vector<16x512xf32>,
    } else {
    }
    %c0 = arith.constant 0 : index
    %c0_1 = arith.constant 0 : index
    %3 = vector.load %arg7[%c0, %c0_1] : memref<16x512xf32, #tpu.memory_space<vmem>>, vector<16x512xf32>
    %c0_2 = arith.constant 0 : index
    %c0_3 = arith.constant 0 : index
    %4 = vector.load %arg3[%c0_2, %c0_3] : memref<16x512xbf16, #tpu.memory_space<vmem>>, vector<16x512xbf16>
    %c0_4 = arith.constant 0 : index
    %c0_5 = arith.constant 0 : index
    %5 = vector.load %arg4[%c0_4, %c0_5] : memref<512x512xbf16, #tpu.memory_space<vmem>>, vector<512x512xbf16>
    %cst = arith.constant dense<0.000000e+00> : vector<16x512xf32>
    %6 = tpu.matmul %4, %5, %cst {dimension_numbers = #tpu.dot_dimension_numbers<[1], [0], [0], [1], [0, 0, 1, 1], [], []>} : vector<16x512xbf16>, vector<512x512xbf16>, vector<16x512xf32> -> vector<16x512xf32>
    %7 = arith.addf %3, %6 : vector<16x512xf32>
    %c0_6 = arith.constant 0 : index
    %c0_7 = arith.constant 0 : index
    %8 = vector.load %arg7[%c0_6, %c0_7] : memref<16x512xf32, #tpu.memory_space<vmem>>, vector<16x512xf32>
    tpu.vector_store %arg7[%c0_6, %c0_7], %7 {strides = array<i32>} : memref<16x512xf32, #tpu.memory_space<vmem>>, vector<16x512xf32>,
    %c0_i32_8 = arith.constant 0 : i32
    %9 = arith.cmpi eq, %arg2, %c0_i32_8 : i32
    %10 = arith.extui %9 : i1 to i32
    %c0_i32_9 = arith.constant 0 : i32
    %11 = arith.cmpi ne, %10, %c0_i32_9 : i32
    scf.if %11 {
      %c0_10 = arith.constant 0 : index
      %c0_11 = arith.constant 0 : index
      %12 = vector.load %arg7[%c0_10, %c0_11] : memref<16x512xf32, #tpu.memory_space<vmem>>, vector<16x512xf32>
      %c0_12 = arith.constant 0 : index
      %c0_13 = arith.constant 0 : index
      %13 = vector.load %arg5[%c0_12, %c0_13] : memref<1x512xf32, #tpu.memory_space<vmem>>, vector<1x512xf32>
      %14 = vector.broadcast %13 : vector<1x512xf32> to vector<16x512xf32>
      %15 = arith.addf %12, %14 : vector<16x512xf32>
      %cst_14 = arith.constant 0.000000e+00 : f32
      %16 = vector.broadcast %cst_14 : f32 to vector<16x512xf32>
      %17 = arith.maximumf %15, %16 : vector<16x512xf32>
      %18 = arith.truncf %17 : vector<16x512xf32> to vector<16x512xbf16>
      %c0_15 = arith.constant 0 : index
      %c0_16 = arith.constant 0 : index
      %19 = vector.load %arg6[%c0_15, %c0_16] : memref<16x512xbf16, #tpu.memory_space<vmem>>, vector<16x512xbf16>
      tpu.vector_store %arg6[%c0_15, %c0_16], %18 {strides = array<i32>} : memref<16x512xbf16, #tpu.memory_space<vmem>>, vector<16x512xbf16>,
    } else {
    }
    return
  }
  func.func @transform_0(%arg0: i32, %arg1: i32, %arg2: i32) -> (i32, i32) {
    %c0_i32 = arith.constant 0 : i32
    return %arg0, %arg2 : i32, i32
  }
  func.func @transform_1(%arg0: i32, %arg1: i32, %arg2: i32) -> (i32, i32) {
    %c0_i32 = arith.constant 0 : i32
    return %arg2, %arg1 : i32, i32
  }
  func.func @transform_2(%arg0: i32, %arg1: i32, %arg2: i32) -> (i32, i32) {
    %c0_i32 = arith.constant 0 : i32
    %c0_i32_0 = arith.constant 0 : i32
    return %c0_i32, %arg1 : i32, i32
  }
  func.func @transform_3(%arg0: i32, %arg1: i32, %arg2: i32) -> (i32, i32) {
    %c0_i32 = arith.constant 0 : i32
    return %arg0, %arg1 : i32, i32
  }
}

module attributes {stable_mosaic.version = 11 : i64} {
  func.func @_fused_mm_kernel(%arg0: i32, %arg1: i32, %arg2: i32, %arg3: memref<32x512xbf16, #tpu.memory_space<vmem>>, %arg4: memref<512x512xbf16, #tpu.memory_space<vmem>>, %arg5: memref<1x512xf32, #tpu.memory_space<vmem>>, %arg6: memref<32x512xbf16, #tpu.memory_space<vmem>>, %arg7: memref<32x512xf32, #tpu.memory_space<vmem>>) attributes {dimension_semantics = [#tpu.dimension_semantics<parallel>, #tpu.dimension_semantics<parallel>, #tpu.dimension_semantics<arbitrary>], iteration_bounds = array<i64: 1, 1, 1>, scalar_prefetch = 0 : i64, scratch_operands = 1 : i64, tpu.core_type = #tpu.core_type<tc>, window_params = [{transform_indices = @transform_0, window_bounds = array<i64: 32, 512>}, {transform_indices = @transform_1, window_bounds = array<i64: 512, 512>}, {transform_indices = @transform_2, window_bounds = array<i64: 1, 512>}, {transform_indices = @transform_3, window_bounds = array<i64: 32, 512>}]} {
    %c0_i32 = arith.constant 0 : i32
    %0 = arith.cmpi eq, %arg2, %c0_i32 : i32
    %1 = arith.extui %0 : i1 to i32
    %c0_i32_0 = arith.constant 0 : i32
    %2 = arith.cmpi ne, %1, %c0_i32_0 : i32
    scf.if %2 {
      %cst_10 = arith.constant 0.000000e+00 : f32
      %12 = vector.broadcast %cst_10 : f32 to vector<32x512xf32>
      %c0_11 = arith.constant 0 : index
      %c0_12 = arith.constant 0 : index
      %13 = vector.load %arg7[%c0_11, %c0_12] : memref<32x512xf32, #tpu.memory_space<vmem>>, vector<32x512xf32>
      tpu.vector_store %arg7[%c0_11, %c0_12], %12 {strides = array<i32>} : memref<32x512xf32, #tpu.memory_space<vmem>>, vector<32x512xf32>,
    } else {
    }
    %c0 = arith.constant 0 : index
    %c0_1 = arith.constant 0 : index
    %3 = vector.load %arg7[%c0, %c0_1] : memref<32x512xf32, #tpu.memory_space<vmem>>, vector<32x512xf32>
    %c0_2 = arith.constant 0 : index
    %c0_3 = arith.constant 0 : index
    %4 = vector.load %arg3[%c0_2, %c0_3] : memref<32x512xbf16, #tpu.memory_space<vmem>>, vector<32x512xbf16>
    %c0_4 = arith.constant 0 : index
    %c0_5 = arith.constant 0 : index
    %5 = vector.load %arg4[%c0_4, %c0_5] : memref<512x512xbf16, #tpu.memory_space<vmem>>, vector<512x512xbf16>
    %cst = arith.constant dense<0.000000e+00> : vector<32x512xf32>
    %6 = tpu.matmul %4, %5, %cst {dimension_numbers = #tpu.dot_dimension_numbers<[1], [0], [0], [1], [0, 0, 1, 1], [], []>} : vector<32x512xbf16>, vector<512x512xbf16>, vector<32x512xf32> -> vector<32x512xf32>
    %7 = arith.addf %3, %6 : vector<32x512xf32>
    %c0_6 = arith.constant 0 : index
    %c0_7 = arith.constant 0 : index
    %8 = vector.load %arg7[%c0_6, %c0_7] : memref<32x512xf32, #tpu.memory_space<vmem>>, vector<32x512xf32>
    tpu.vector_store %arg7[%c0_6, %c0_7], %7 {strides = array<i32>} : memref<32x512xf32, #tpu.memory_space<vmem>>, vector<32x512xf32>,
    %c0_i32_8 = arith.constant 0 : i32
    %9 = arith.cmpi eq, %arg2, %c0_i32_8 : i32
    %10 = arith.extui %9 : i1 to i32
    %c0_i32_9 = arith.constant 0 : i32
    %11 = arith.cmpi ne, %10, %c0_i32_9 : i32
    scf.if %11 {
      %c0_10 = arith.constant 0 : index
      %c0_11 = arith.constant 0 : index
      %12 = vector.load %arg7[%c0_10, %c0_11] : memref<32x512xf32, #tpu.memory_space<vmem>>, vector<32x512xf32>
      %c0_12 = arith.constant 0 : index
      %c0_13 = arith.constant 0 : index
      %13 = vector.load %arg5[%c0_12, %c0_13] : memref<1x512xf32, #tpu.memory_space<vmem>>, vector<1x512xf32>
      %14 = vector.broadcast %13 : vector<1x512xf32> to vector<32x512xf32>
      %15 = arith.addf %12, %14 : vector<32x512xf32>
      %cst_14 = arith.constant 0.000000e+00 : f32
      %16 = vector.broadcast %cst_14 : f32 to vector<32x512xf32>
      %17 = arith.maximumf %15, %16 : vector<32x512xf32>
      %18 = arith.truncf %17 : vector<32x512xf32> to vector<32x512xbf16>
      %c0_15 = arith.constant 0 : index
      %c0_16 = arith.constant 0 : index
      %19 = vector.load %arg6[%c0_15, %c0_16] : memref<32x512xbf16, #tpu.memory_space<vmem>>, vector<32x512xbf16>
      tpu.vector_store %arg6[%c0_15, %c0_16], %18 {strides = array<i32>} : memref<32x512xbf16, #tpu.memory_space<vmem>>, vector<32x512xbf16>,
    } else {
    }
    return
  }
  func.func @transform_0(%arg0: i32, %arg1: i32, %arg2: i32) -> (i32, i32) {
    %c0_i32 = arith.constant 0 : i32
    return %arg0, %arg2 : i32, i32
  }
  func.func @transform_1(%arg0: i32, %arg1: i32, %arg2: i32) -> (i32, i32) {
    %c0_i32 = arith.constant 0 : i32
    return %arg2, %arg1 : i32, i32
  }
  func.func @transform_2(%arg0: i32, %arg1: i32, %arg2: i32) -> (i32, i32) {
    %c0_i32 = arith.constant 0 : i32
    %c0_i32_0 = arith.constant 0 : i32
    return %c0_i32, %arg1 : i32, i32
  }
  func.func @transform_3(%arg0: i32, %arg1: i32, %arg2: i32) -> (i32, i32) {
    %c0_i32 = arith.constant 0 : i32
    return %arg0, %arg1 : i32, i32
  }
}

module attributes {stable_mosaic.version = 11 : i64} {
  func.func @_fused_mm_kernel(%arg0: i32, %arg1: i32, %arg2: i32, %arg3: memref<32x512xbf16, #tpu.memory_space<vmem>>, %arg4: memref<512x512xbf16, #tpu.memory_space<vmem>>, %arg5: memref<32x512xbf16, #tpu.memory_space<vmem>>, %arg6: memref<512x512xbf16, #tpu.memory_space<vmem>>, %arg7: memref<32x512xbf16, #tpu.memory_space<vmem>>, %arg8: memref<512x512xbf16, #tpu.memory_space<vmem>>, %arg9: memref<32x512xbf16, #tpu.memory_space<vmem>>, %arg10: memref<512x512xbf16, #tpu.memory_space<vmem>>, %arg11: memref<1x512xf32, #tpu.memory_space<vmem>>, %arg12: memref<32x512xbf16, #tpu.memory_space<vmem>>, %arg13: memref<32x512xf32, #tpu.memory_space<vmem>>) attributes {dimension_semantics = [#tpu.dimension_semantics<parallel>, #tpu.dimension_semantics<parallel>, #tpu.dimension_semantics<arbitrary>], iteration_bounds = array<i64: 1, 1, 1>, scalar_prefetch = 0 : i64, scratch_operands = 1 : i64, tpu.core_type = #tpu.core_type<tc>, window_params = [{transform_indices = @transform_0, window_bounds = array<i64: 32, 512>}, {transform_indices = @transform_1, window_bounds = array<i64: 512, 512>}, {transform_indices = @transform_2, window_bounds = array<i64: 32, 512>}, {transform_indices = @transform_3, window_bounds = array<i64: 512, 512>}, {transform_indices = @transform_4, window_bounds = array<i64: 32, 512>}, {transform_indices = @transform_5, window_bounds = array<i64: 512, 512>}, {transform_indices = @transform_6, window_bounds = array<i64: 32, 512>}, {transform_indices = @transform_7, window_bounds = array<i64: 512, 512>}, {transform_indices = @transform_8, window_bounds = array<i64: 1, 512>}, {transform_indices = @transform_9, window_bounds = array<i64: 32, 512>}]} {
    %c0_i32 = arith.constant 0 : i32
    %0 = arith.cmpi eq, %arg2, %c0_i32 : i32
    %1 = arith.extui %0 : i1 to i32
    %c0_i32_0 = arith.constant 0 : i32
    %2 = arith.cmpi ne, %1, %c0_i32_0 : i32
    scf.if %2 {
      %cst_25 = arith.constant 0.000000e+00 : f32
      %24 = vector.broadcast %cst_25 : f32 to vector<32x512xf32>
      %c0_26 = arith.constant 0 : index
      %c0_27 = arith.constant 0 : index
      %25 = vector.load %arg13[%c0_26, %c0_27] : memref<32x512xf32, #tpu.memory_space<vmem>>, vector<32x512xf32>
      tpu.vector_store %arg13[%c0_26, %c0_27], %24 {strides = array<i32>} : memref<32x512xf32, #tpu.memory_space<vmem>>, vector<32x512xf32>,
    } else {
    }
    %c0 = arith.constant 0 : index
    %c0_1 = arith.constant 0 : index
    %3 = vector.load %arg13[%c0, %c0_1] : memref<32x512xf32, #tpu.memory_space<vmem>>, vector<32x512xf32>
    %c0_2 = arith.constant 0 : index
    %c0_3 = arith.constant 0 : index
    %4 = vector.load %arg3[%c0_2, %c0_3] : memref<32x512xbf16, #tpu.memory_space<vmem>>, vector<32x512xbf16>
    %c0_4 = arith.constant 0 : index
    %c0_5 = arith.constant 0 : index
    %5 = vector.load %arg4[%c0_4, %c0_5] : memref<512x512xbf16, #tpu.memory_space<vmem>>, vector<512x512xbf16>
    %cst = arith.constant dense<0.000000e+00> : vector<32x512xf32>
    %6 = tpu.matmul %4, %5, %cst {dimension_numbers = #tpu.dot_dimension_numbers<[1], [0], [0], [1], [0, 0, 1, 1], [], []>} : vector<32x512xbf16>, vector<512x512xbf16>, vector<32x512xf32> -> vector<32x512xf32>
    %7 = arith.addf %3, %6 : vector<32x512xf32>
    %c0_6 = arith.constant 0 : index
    %c0_7 = arith.constant 0 : index
    %8 = vector.load %arg5[%c0_6, %c0_7] : memref<32x512xbf16, #tpu.memory_space<vmem>>, vector<32x512xbf16>
    %c0_8 = arith.constant 0 : index
    %c0_9 = arith.constant 0 : index
    %9 = vector.load %arg6[%c0_8, %c0_9] : memref<512x512xbf16, #tpu.memory_space<vmem>>, vector<512x512xbf16>
    %cst_10 = arith.constant dense<0.000000e+00> : vector<32x512xf32>
    %10 = tpu.matmul %8, %9, %cst_10 {dimension_numbers = #tpu.dot_dimension_numbers<[1], [0], [0], [1], [0, 0, 1, 1], [], []>} : vector<32x512xbf16>, vector<512x512xbf16>, vector<32x512xf32> -> vector<32x512xf32>
    %11 = arith.addf %7, %10 : vector<32x512xf32>
    %c0_11 = arith.constant 0 : index
    %c0_12 = arith.constant 0 : index
    %12 = vector.load %arg7[%c0_11, %c0_12] : memref<32x512xbf16, #tpu.memory_space<vmem>>, vector<32x512xbf16>
    %c0_13 = arith.constant 0 : index
    %c0_14 = arith.constant 0 : index
    %13 = vector.load %arg8[%c0_13, %c0_14] : memref<512x512xbf16, #tpu.memory_space<vmem>>, vector<512x512xbf16>
    %cst_15 = arith.constant dense<0.000000e+00> : vector<32x512xf32>
    %14 = tpu.matmul %12, %13, %cst_15 {dimension_numbers = #tpu.dot_dimension_numbers<[1], [0], [0], [1], [0, 0, 1, 1], [], []>} : vector<32x512xbf16>, vector<512x512xbf16>, vector<32x512xf32> -> vector<32x512xf32>
    %15 = arith.addf %11, %14 : vector<32x512xf32>
    %c0_16 = arith.constant 0 : index
    %c0_17 = arith.constant 0 : index
    %16 = vector.load %arg9[%c0_16, %c0_17] : memref<32x512xbf16, #tpu.memory_space<vmem>>, vector<32x512xbf16>
    %c0_18 = arith.constant 0 : index
    %c0_19 = arith.constant 0 : index
    %17 = vector.load %arg10[%c0_18, %c0_19] : memref<512x512xbf16, #tpu.memory_space<vmem>>, vector<512x512xbf16>
    %cst_20 = arith.constant dense<0.000000e+00> : vector<32x512xf32>
    %18 = tpu.matmul %16, %17, %cst_20 {dimension_numbers = #tpu.dot_dimension_numbers<[1], [0], [0], [1], [0, 0, 1, 1], [], []>} : vector<32x512xbf16>, vector<512x512xbf16>, vector<32x512xf32> -> vector<32x512xf32>
    %19 = arith.addf %15, %18 : vector<32x512xf32>
    %c0_21 = arith.constant 0 : index
    %c0_22 = arith.constant 0 : index
    %20 = vector.load %arg13[%c0_21, %c0_22] : memref<32x512xf32, #tpu.memory_space<vmem>>, vector<32x512xf32>
    tpu.vector_store %arg13[%c0_21, %c0_22], %19 {strides = array<i32>} : memref<32x512xf32, #tpu.memory_space<vmem>>, vector<32x512xf32>,
    %c0_i32_23 = arith.constant 0 : i32
    %21 = arith.cmpi eq, %arg2, %c0_i32_23 : i32
    %22 = arith.extui %21 : i1 to i32
    %c0_i32_24 = arith.constant 0 : i32
    %23 = arith.cmpi ne, %22, %c0_i32_24 : i32
    scf.if %23 {
      %c0_25 = arith.constant 0 : index
      %c0_26 = arith.constant 0 : index
      %24 = vector.load %arg13[%c0_25, %c0_26] : memref<32x512xf32, #tpu.memory_space<vmem>>, vector<32x512xf32>
      %c0_27 = arith.constant 0 : index
      %c0_28 = arith.constant 0 : index
      %25 = vector.load %arg11[%c0_27, %c0_28] : memref<1x512xf32, #tpu.memory_space<vmem>>, vector<1x512xf32>
      %26 = vector.broadcast %25 : vector<1x512xf32> to vector<32x512xf32>
      %27 = arith.addf %24, %26 : vector<32x512xf32>
      %cst_29 = arith.constant 0.000000e+00 : f32
      %28 = vector.broadcast %cst_29 : f32 to vector<32x512xf32>
      %29 = arith.maximumf %27, %28 : vector<32x512xf32>
      %30 = arith.truncf %29 : vector<32x512xf32> to vector<32x512xbf16>
      %c0_30 = arith.constant 0 : index
      %c0_31 = arith.constant 0 : index
      %31 = vector.load %arg12[%c0_30, %c0_31] : memref<32x512xbf16, #tpu.memory_space<vmem>>, vector<32x512xbf16>
      tpu.vector_store %arg12[%c0_30, %c0_31], %30 {strides = array<i32>} : memref<32x512xbf16, #tpu.memory_space<vmem>>, vector<32x512xbf16>,
    } else {
    }
    return
  }
  func.func @transform_0(%arg0: i32, %arg1: i32, %arg2: i32) -> (i32, i32) {
    %c0_i32 = arith.constant 0 : i32
    return %arg0, %arg2 : i32, i32
  }
  func.func @transform_1(%arg0: i32, %arg1: i32, %arg2: i32) -> (i32, i32) {
    %c0_i32 = arith.constant 0 : i32
    return %arg2, %arg1 : i32, i32
  }
  func.func @transform_2(%arg0: i32, %arg1: i32, %arg2: i32) -> (i32, i32) {
    %c0_i32 = arith.constant 0 : i32
    return %arg0, %arg2 : i32, i32
  }
  func.func @transform_3(%arg0: i32, %arg1: i32, %arg2: i32) -> (i32, i32) {
    %c0_i32 = arith.constant 0 : i32
    return %arg2, %arg1 : i32, i32
  }
  func.func @transform_4(%arg0: i32, %arg1: i32, %arg2: i32) -> (i32, i32) {
    %c0_i32 = arith.constant 0 : i32
    return %arg0, %arg2 : i32, i32
  }
  func.func @transform_5(%arg0: i32, %arg1: i32, %arg2: i32) -> (i32, i32) {
    %c0_i32 = arith.constant 0 : i32
    return %arg2, %arg1 : i32, i32
  }
  func.func @transform_6(%arg0: i32, %arg1: i32, %arg2: i32) -> (i32, i32) {
    %c0_i32 = arith.constant 0 : i32
    return %arg0, %arg2 : i32, i32
  }
  func.func @transform_7(%arg0: i32, %arg1: i32, %arg2: i32) -> (i32, i32) {
    %c0_i32 = arith.constant 0 : i32
    return %arg2, %arg1 : i32, i32
  }
  func.func @transform_8(%arg0: i32, %arg1: i32, %arg2: i32) -> (i32, i32) {
    %c0_i32 = arith.constant 0 : i32
    %c0_i32_0 = arith.constant 0 : i32
    return %c0_i32, %arg1 : i32, i32
  }
  func.func @transform_9(%arg0: i32, %arg1: i32, %arg2: i32) -> (i32, i32) {
    %c0_i32 = arith.constant 0 : i32
    return %arg0, %arg1 : i32, i32
  }
}

module attributes {stable_mosaic.version = 11 : i64} {
  func.func @_fused_mm_kernel(%arg0: i32, %arg1: i32, %arg2: i32, %arg3: memref<32x512xbf16, #tpu.memory_space<vmem>>, %arg4: memref<512x128xbf16, #tpu.memory_space<vmem>>, %arg5: memref<1x128xf32, #tpu.memory_space<vmem>>, %arg6: memref<32x128xbf16, #tpu.memory_space<vmem>>, %arg7: memref<32x128xf32, #tpu.memory_space<vmem>>) attributes {dimension_semantics = [#tpu.dimension_semantics<parallel>, #tpu.dimension_semantics<parallel>, #tpu.dimension_semantics<arbitrary>], iteration_bounds = array<i64: 1, 1, 1>, scalar_prefetch = 0 : i64, scratch_operands = 1 : i64, tpu.core_type = #tpu.core_type<tc>, window_params = [{transform_indices = @transform_0, window_bounds = array<i64: 32, 512>}, {transform_indices = @transform_1, window_bounds = array<i64: 512, 128>}, {transform_indices = @transform_2, window_bounds = array<i64: 1, 128>}, {transform_indices = @transform_3, window_bounds = array<i64: 32, 128>}]} {
    %c0_i32 = arith.constant 0 : i32
    %0 = arith.cmpi eq, %arg2, %c0_i32 : i32
    %1 = arith.extui %0 : i1 to i32
    %c0_i32_0 = arith.constant 0 : i32
    %2 = arith.cmpi ne, %1, %c0_i32_0 : i32
    scf.if %2 {
      %cst_10 = arith.constant 0.000000e+00 : f32
      %12 = vector.broadcast %cst_10 : f32 to vector<32x128xf32>
      %c0_11 = arith.constant 0 : index
      %c0_12 = arith.constant 0 : index
      %13 = vector.load %arg7[%c0_11, %c0_12] : memref<32x128xf32, #tpu.memory_space<vmem>>, vector<32x128xf32>
      tpu.vector_store %arg7[%c0_11, %c0_12], %12 {strides = array<i32>} : memref<32x128xf32, #tpu.memory_space<vmem>>, vector<32x128xf32>,
    } else {
    }
    %c0 = arith.constant 0 : index
    %c0_1 = arith.constant 0 : index
    %3 = vector.load %arg7[%c0, %c0_1] : memref<32x128xf32, #tpu.memory_space<vmem>>, vector<32x128xf32>
    %c0_2 = arith.constant 0 : index
    %c0_3 = arith.constant 0 : index
    %4 = vector.load %arg3[%c0_2, %c0_3] : memref<32x512xbf16, #tpu.memory_space<vmem>>, vector<32x512xbf16>
    %c0_4 = arith.constant 0 : index
    %c0_5 = arith.constant 0 : index
    %5 = vector.load %arg4[%c0_4, %c0_5] : memref<512x128xbf16, #tpu.memory_space<vmem>>, vector<512x128xbf16>
    %cst = arith.constant dense<0.000000e+00> : vector<32x128xf32>
    %6 = tpu.matmul %4, %5, %cst {dimension_numbers = #tpu.dot_dimension_numbers<[1], [0], [0], [1], [0, 0, 1, 1], [], []>} : vector<32x512xbf16>, vector<512x128xbf16>, vector<32x128xf32> -> vector<32x128xf32>
    %7 = arith.addf %3, %6 : vector<32x128xf32>
    %c0_6 = arith.constant 0 : index
    %c0_7 = arith.constant 0 : index
    %8 = vector.load %arg7[%c0_6, %c0_7] : memref<32x128xf32, #tpu.memory_space<vmem>>, vector<32x128xf32>
    tpu.vector_store %arg7[%c0_6, %c0_7], %7 {strides = array<i32>} : memref<32x128xf32, #tpu.memory_space<vmem>>, vector<32x128xf32>,
    %c0_i32_8 = arith.constant 0 : i32
    %9 = arith.cmpi eq, %arg2, %c0_i32_8 : i32
    %10 = arith.extui %9 : i1 to i32
    %c0_i32_9 = arith.constant 0 : i32
    %11 = arith.cmpi ne, %10, %c0_i32_9 : i32
    scf.if %11 {
      %c0_10 = arith.constant 0 : index
      %c0_11 = arith.constant 0 : index
      %12 = vector.load %arg7[%c0_10, %c0_11] : memref<32x128xf32, #tpu.memory_space<vmem>>, vector<32x128xf32>
      %c0_12 = arith.constant 0 : index
      %c0_13 = arith.constant 0 : index
      %13 = vector.load %arg5[%c0_12, %c0_13] : memref<1x128xf32, #tpu.memory_space<vmem>>, vector<1x128xf32>
      %14 = vector.broadcast %13 : vector<1x128xf32> to vector<32x128xf32>
      %15 = arith.addf %12, %14 : vector<32x128xf32>
      %cst_14 = arith.constant 0.000000e+00 : f32
      %16 = vector.broadcast %cst_14 : f32 to vector<32x128xf32>
      %17 = arith.maximumf %15, %16 : vector<32x128xf32>
      %18 = arith.truncf %17 : vector<32x128xf32> to vector<32x128xbf16>
      %c0_15 = arith.constant 0 : index
      %c0_16 = arith.constant 0 : index
      %19 = vector.load %arg6[%c0_15, %c0_16] : memref<32x128xbf16, #tpu.memory_space<vmem>>, vector<32x128xbf16>
      tpu.vector_store %arg6[%c0_15, %c0_16], %18 {strides = array<i32>} : memref<32x128xbf16, #tpu.memory_space<vmem>>, vector<32x128xbf16>,
    } else {
    }
    return
  }
  func.func @transform_0(%arg0: i32, %arg1: i32, %arg2: i32) -> (i32, i32) {
    %c0_i32 = arith.constant 0 : i32
    return %arg0, %arg2 : i32, i32
  }
  func.func @transform_1(%arg0: i32, %arg1: i32, %arg2: i32) -> (i32, i32) {
    %c0_i32 = arith.constant 0 : i32
    return %arg2, %arg1 : i32, i32
  }
  func.func @transform_2(%arg0: i32, %arg1: i32, %arg2: i32) -> (i32, i32) {
    %c0_i32 = arith.constant 0 : i32
    %c0_i32_0 = arith.constant 0 : i32
    return %c0_i32, %arg1 : i32, i32
  }
  func.func @transform_3(%arg0: i32, %arg1: i32, %arg2: i32) -> (i32, i32) {
    %c0_i32 = arith.constant 0 : i32
    return %arg0, %arg1 : i32, i32
  }
}

module attributes {stable_mosaic.version = 11 : i64} {
  func.func @_fused_mm_kernel(%arg0: i32, %arg1: i32, %arg2: i32, %arg3: memref<128x384xbf16, #tpu.memory_space<vmem>>, %arg4: memref<384x128xbf16, #tpu.memory_space<vmem>>, %arg5: memref<128x384xbf16, #tpu.memory_space<vmem>>, %arg6: memref<384x128xbf16, #tpu.memory_space<vmem>>, %arg7: memref<1x128xf32, #tpu.memory_space<vmem>>, %arg8: memref<128x128xbf16, #tpu.memory_space<vmem>>, %arg9: memref<128x128xf32, #tpu.memory_space<vmem>>) attributes {dimension_semantics = [#tpu.dimension_semantics<parallel>, #tpu.dimension_semantics<parallel>, #tpu.dimension_semantics<arbitrary>], iteration_bounds = array<i64: 1, 1, 1>, scalar_prefetch = 0 : i64, scratch_operands = 1 : i64, tpu.core_type = #tpu.core_type<tc>, window_params = [{transform_indices = @transform_0, window_bounds = array<i64: 128, 384>}, {transform_indices = @transform_1, window_bounds = array<i64: 384, 128>}, {transform_indices = @transform_2, window_bounds = array<i64: 128, 384>}, {transform_indices = @transform_3, window_bounds = array<i64: 384, 128>}, {transform_indices = @transform_4, window_bounds = array<i64: 1, 128>}, {transform_indices = @transform_5, window_bounds = array<i64: 128, 128>}]} {
    %c0_i32 = arith.constant 0 : i32
    %0 = arith.cmpi eq, %arg2, %c0_i32 : i32
    %1 = arith.extui %0 : i1 to i32
    %c0_i32_0 = arith.constant 0 : i32
    %2 = arith.cmpi ne, %1, %c0_i32_0 : i32
    scf.if %2 {
      %cst_15 = arith.constant 0.000000e+00 : f32
      %16 = vector.broadcast %cst_15 : f32 to vector<128x128xf32>
      %c0_16 = arith.constant 0 : index
      %c0_17 = arith.constant 0 : index
      %17 = vector.load %arg9[%c0_16, %c0_17] : memref<128x128xf32, #tpu.memory_space<vmem>>, vector<128x128xf32>
      tpu.vector_store %arg9[%c0_16, %c0_17], %16 {strides = array<i32>} : memref<128x128xf32, #tpu.memory_space<vmem>>, vector<128x128xf32>,
    } else {
    }
    %c0 = arith.constant 0 : index
    %c0_1 = arith.constant 0 : index
    %3 = vector.load %arg9[%c0, %c0_1] : memref<128x128xf32, #tpu.memory_space<vmem>>, vector<128x128xf32>
    %c0_2 = arith.constant 0 : index
    %c0_3 = arith.constant 0 : index
    %4 = vector.load %arg3[%c0_2, %c0_3] : memref<128x384xbf16, #tpu.memory_space<vmem>>, vector<128x384xbf16>
    %c0_4 = arith.constant 0 : index
    %c0_5 = arith.constant 0 : index
    %5 = vector.load %arg4[%c0_4, %c0_5] : memref<384x128xbf16, #tpu.memory_space<vmem>>, vector<384x128xbf16>
    %cst = arith.constant dense<0.000000e+00> : vector<128x128xf32>
    %6 = tpu.matmul %4, %5, %cst {dimension_numbers = #tpu.dot_dimension_numbers<[1], [0], [0], [1], [0, 0, 1, 1], [], []>} : vector<128x384xbf16>, vector<384x128xbf16>, vector<128x128xf32> -> vector<128x128xf32>
    %7 = arith.addf %3, %6 : vector<128x128xf32>
    %c0_6 = arith.constant 0 : index
    %c0_7 = arith.constant 0 : index
    %8 = vector.load %arg5[%c0_6, %c0_7] : memref<128x384xbf16, #tpu.memory_space<vmem>>, vector<128x384xbf16>
    %c0_8 = arith.constant 0 : index
    %c0_9 = arith.constant 0 : index
    %9 = vector.load %arg6[%c0_8, %c0_9] : memref<384x128xbf16, #tpu.memory_space<vmem>>, vector<384x128xbf16>
    %cst_10 = arith.constant dense<0.000000e+00> : vector<128x128xf32>
    %10 = tpu.matmul %8, %9, %cst_10 {dimension_numbers = #tpu.dot_dimension_numbers<[1], [0], [0], [1], [0, 0, 1, 1], [], []>} : vector<128x384xbf16>, vector<384x128xbf16>, vector<128x128xf32> -> vector<128x128xf32>
    %11 = arith.addf %7, %10 : vector<128x128xf32>
    %c0_11 = arith.constant 0 : index
    %c0_12 = arith.constant 0 : index
    %12 = vector.load %arg9[%c0_11, %c0_12] : memref<128x128xf32, #tpu.memory_space<vmem>>, vector<128x128xf32>
    tpu.vector_store %arg9[%c0_11, %c0_12], %11 {strides = array<i32>} : memref<128x128xf32, #tpu.memory_space<vmem>>, vector<128x128xf32>,
    %c0_i32_13 = arith.constant 0 : i32
    %13 = arith.cmpi eq, %arg2, %c0_i32_13 : i32
    %14 = arith.extui %13 : i1 to i32
    %c0_i32_14 = arith.constant 0 : i32
    %15 = arith.cmpi ne, %14, %c0_i32_14 : i32
    scf.if %15 {
      %c0_15 = arith.constant 0 : index
      %c0_16 = arith.constant 0 : index
      %16 = vector.load %arg9[%c0_15, %c0_16] : memref<128x128xf32, #tpu.memory_space<vmem>>, vector<128x128xf32>
      %c0_17 = arith.constant 0 : index
      %c0_18 = arith.constant 0 : index
      %17 = vector.load %arg7[%c0_17, %c0_18] : memref<1x128xf32, #tpu.memory_space<vmem>>, vector<1x128xf32>
      %18 = vector.broadcast %17 : vector<1x128xf32> to vector<128x128xf32>
      %19 = arith.addf %16, %18 : vector<128x128xf32>
      %cst_19 = arith.constant 0.000000e+00 : f32
      %20 = vector.broadcast %cst_19 : f32 to vector<128x128xf32>
      %21 = arith.maximumf %19, %20 : vector<128x128xf32>
      %22 = arith.truncf %21 : vector<128x128xf32> to vector<128x128xbf16>
      %c0_20 = arith.constant 0 : index
      %c0_21 = arith.constant 0 : index
      %23 = vector.load %arg8[%c0_20, %c0_21] : memref<128x128xbf16, #tpu.memory_space<vmem>>, vector<128x128xbf16>
      tpu.vector_store %arg8[%c0_20, %c0_21], %22 {strides = array<i32>} : memref<128x128xbf16, #tpu.memory_space<vmem>>, vector<128x128xbf16>,
    } else {
    }
    return
  }
  func.func @transform_0(%arg0: i32, %arg1: i32, %arg2: i32) -> (i32, i32) {
    %c0_i32 = arith.constant 0 : i32
    return %arg0, %arg2 : i32, i32
  }
  func.func @transform_1(%arg0: i32, %arg1: i32, %arg2: i32) -> (i32, i32) {
    %c0_i32 = arith.constant 0 : i32
    return %arg2, %arg1 : i32, i32
  }
  func.func @transform_2(%arg0: i32, %arg1: i32, %arg2: i32) -> (i32, i32) {
    %c0_i32 = arith.constant 0 : i32
    return %arg0, %arg2 : i32, i32
  }
  func.func @transform_3(%arg0: i32, %arg1: i32, %arg2: i32) -> (i32, i32) {
    %c0_i32 = arith.constant 0 : i32
    return %arg2, %arg1 : i32, i32
  }
  func.func @transform_4(%arg0: i32, %arg1: i32, %arg2: i32) -> (i32, i32) {
    %c0_i32 = arith.constant 0 : i32
    %c0_i32_0 = arith.constant 0 : i32
    return %c0_i32, %arg1 : i32, i32
  }
  func.func @transform_5(%arg0: i32, %arg1: i32, %arg2: i32) -> (i32, i32) {
    %c0_i32 = arith.constant 0 : i32
    return %arg0, %arg1 : i32, i32
  }
}

module attributes {stable_mosaic.version = 11 : i64} {
  func.func @_fused_mm_kernel(%arg0: i32, %arg1: i32, %arg2: i32, %arg3: memref<256x384xbf16, #tpu.memory_space<vmem>>, %arg4: memref<384x128xbf16, #tpu.memory_space<vmem>>, %arg5: memref<1x128xf32, #tpu.memory_space<vmem>>, %arg6: memref<256x128xbf16, #tpu.memory_space<vmem>>, %arg7: memref<256x128xf32, #tpu.memory_space<vmem>>) attributes {dimension_semantics = [#tpu.dimension_semantics<parallel>, #tpu.dimension_semantics<parallel>, #tpu.dimension_semantics<arbitrary>], iteration_bounds = array<i64: 2, 1, 1>, scalar_prefetch = 0 : i64, scratch_operands = 1 : i64, tpu.core_type = #tpu.core_type<tc>, window_params = [{transform_indices = @transform_0, window_bounds = array<i64: 256, 384>}, {transform_indices = @transform_1, window_bounds = array<i64: 384, 128>}, {transform_indices = @transform_2, window_bounds = array<i64: 1, 128>}, {transform_indices = @transform_3, window_bounds = array<i64: 256, 128>}]} {
    %c0_i32 = arith.constant 0 : i32
    %0 = arith.cmpi eq, %arg2, %c0_i32 : i32
    %1 = arith.extui %0 : i1 to i32
    %c0_i32_0 = arith.constant 0 : i32
    %2 = arith.cmpi ne, %1, %c0_i32_0 : i32
    scf.if %2 {
      %cst_10 = arith.constant 0.000000e+00 : f32
      %12 = vector.broadcast %cst_10 : f32 to vector<256x128xf32>
      %c0_11 = arith.constant 0 : index
      %c0_12 = arith.constant 0 : index
      %13 = vector.load %arg7[%c0_11, %c0_12] : memref<256x128xf32, #tpu.memory_space<vmem>>, vector<256x128xf32>
      tpu.vector_store %arg7[%c0_11, %c0_12], %12 {strides = array<i32>} : memref<256x128xf32, #tpu.memory_space<vmem>>, vector<256x128xf32>,
    } else {
    }
    %c0 = arith.constant 0 : index
    %c0_1 = arith.constant 0 : index
    %3 = vector.load %arg7[%c0, %c0_1] : memref<256x128xf32, #tpu.memory_space<vmem>>, vector<256x128xf32>
    %c0_2 = arith.constant 0 : index
    %c0_3 = arith.constant 0 : index
    %4 = vector.load %arg3[%c0_2, %c0_3] : memref<256x384xbf16, #tpu.memory_space<vmem>>, vector<256x384xbf16>
    %c0_4 = arith.constant 0 : index
    %c0_5 = arith.constant 0 : index
    %5 = vector.load %arg4[%c0_4, %c0_5] : memref<384x128xbf16, #tpu.memory_space<vmem>>, vector<384x128xbf16>
    %cst = arith.constant dense<0.000000e+00> : vector<256x128xf32>
    %6 = tpu.matmul %4, %5, %cst {dimension_numbers = #tpu.dot_dimension_numbers<[1], [0], [0], [1], [0, 0, 1, 1], [], []>} : vector<256x384xbf16>, vector<384x128xbf16>, vector<256x128xf32> -> vector<256x128xf32>
    %7 = arith.addf %3, %6 : vector<256x128xf32>
    %c0_6 = arith.constant 0 : index
    %c0_7 = arith.constant 0 : index
    %8 = vector.load %arg7[%c0_6, %c0_7] : memref<256x128xf32, #tpu.memory_space<vmem>>, vector<256x128xf32>
    tpu.vector_store %arg7[%c0_6, %c0_7], %7 {strides = array<i32>} : memref<256x128xf32, #tpu.memory_space<vmem>>, vector<256x128xf32>,
    %c0_i32_8 = arith.constant 0 : i32
    %9 = arith.cmpi eq, %arg2, %c0_i32_8 : i32
    %10 = arith.extui %9 : i1 to i32
    %c0_i32_9 = arith.constant 0 : i32
    %11 = arith.cmpi ne, %10, %c0_i32_9 : i32
    scf.if %11 {
      %c0_10 = arith.constant 0 : index
      %c0_11 = arith.constant 0 : index
      %12 = vector.load %arg7[%c0_10, %c0_11] : memref<256x128xf32, #tpu.memory_space<vmem>>, vector<256x128xf32>
      %c0_12 = arith.constant 0 : index
      %c0_13 = arith.constant 0 : index
      %13 = vector.load %arg5[%c0_12, %c0_13] : memref<1x128xf32, #tpu.memory_space<vmem>>, vector<1x128xf32>
      %14 = vector.broadcast %13 : vector<1x128xf32> to vector<256x128xf32>
      %15 = arith.addf %12, %14 : vector<256x128xf32>
      %cst_14 = arith.constant 0.000000e+00 : f32
      %16 = vector.broadcast %cst_14 : f32 to vector<256x128xf32>
      %17 = arith.maximumf %15, %16 : vector<256x128xf32>
      %18 = arith.truncf %17 : vector<256x128xf32> to vector<256x128xbf16>
      %c0_15 = arith.constant 0 : index
      %c0_16 = arith.constant 0 : index
      %19 = vector.load %arg6[%c0_15, %c0_16] : memref<256x128xbf16, #tpu.memory_space<vmem>>, vector<256x128xbf16>
      tpu.vector_store %arg6[%c0_15, %c0_16], %18 {strides = array<i32>} : memref<256x128xbf16, #tpu.memory_space<vmem>>, vector<256x128xbf16>,
    } else {
    }
    return
  }
  func.func @transform_0(%arg0: i32, %arg1: i32, %arg2: i32) -> (i32, i32) {
    %c0_i32 = arith.constant 0 : i32
    return %arg0, %arg2 : i32, i32
  }
  func.func @transform_1(%arg0: i32, %arg1: i32, %arg2: i32) -> (i32, i32) {
    %c0_i32 = arith.constant 0 : i32
    return %arg2, %arg1 : i32, i32
  }
  func.func @transform_2(%arg0: i32, %arg1: i32, %arg2: i32) -> (i32, i32) {
    %c0_i32 = arith.constant 0 : i32
    %c0_i32_0 = arith.constant 0 : i32
    return %c0_i32, %arg1 : i32, i32
  }
  func.func @transform_3(%arg0: i32, %arg1: i32, %arg2: i32) -> (i32, i32) {
    %c0_i32 = arith.constant 0 : i32
    return %arg0, %arg1 : i32, i32
  }
}

module attributes {stable_mosaic.version = 11 : i64} {
  func.func @_fused_mm_kernel(%arg0: i32, %arg1: i32, %arg2: i32, %arg3: memref<256x128xbf16, #tpu.memory_space<vmem>>, %arg4: memref<128x128xbf16, #tpu.memory_space<vmem>>, %arg5: memref<1x128xf32, #tpu.memory_space<vmem>>, %arg6: memref<256x128xbf16, #tpu.memory_space<vmem>>, %arg7: memref<256x128xf32, #tpu.memory_space<vmem>>) attributes {dimension_semantics = [#tpu.dimension_semantics<parallel>, #tpu.dimension_semantics<parallel>, #tpu.dimension_semantics<arbitrary>], iteration_bounds = array<i64: 2, 1, 1>, scalar_prefetch = 0 : i64, scratch_operands = 1 : i64, tpu.core_type = #tpu.core_type<tc>, window_params = [{transform_indices = @transform_0, window_bounds = array<i64: 256, 128>}, {transform_indices = @transform_1, window_bounds = array<i64: 128, 128>}, {transform_indices = @transform_2, window_bounds = array<i64: 1, 128>}, {transform_indices = @transform_3, window_bounds = array<i64: 256, 128>}]} {
    %c0_i32 = arith.constant 0 : i32
    %0 = arith.cmpi eq, %arg2, %c0_i32 : i32
    %1 = arith.extui %0 : i1 to i32
    %c0_i32_0 = arith.constant 0 : i32
    %2 = arith.cmpi ne, %1, %c0_i32_0 : i32
    scf.if %2 {
      %cst_10 = arith.constant 0.000000e+00 : f32
      %12 = vector.broadcast %cst_10 : f32 to vector<256x128xf32>
      %c0_11 = arith.constant 0 : index
      %c0_12 = arith.constant 0 : index
      %13 = vector.load %arg7[%c0_11, %c0_12] : memref<256x128xf32, #tpu.memory_space<vmem>>, vector<256x128xf32>
      tpu.vector_store %arg7[%c0_11, %c0_12], %12 {strides = array<i32>} : memref<256x128xf32, #tpu.memory_space<vmem>>, vector<256x128xf32>,
    } else {
    }
    %c0 = arith.constant 0 : index
    %c0_1 = arith.constant 0 : index
    %3 = vector.load %arg7[%c0, %c0_1] : memref<256x128xf32, #tpu.memory_space<vmem>>, vector<256x128xf32>
    %c0_2 = arith.constant 0 : index
    %c0_3 = arith.constant 0 : index
    %4 = vector.load %arg3[%c0_2, %c0_3] : memref<256x128xbf16, #tpu.memory_space<vmem>>, vector<256x128xbf16>
    %c0_4 = arith.constant 0 : index
    %c0_5 = arith.constant 0 : index
    %5 = vector.load %arg4[%c0_4, %c0_5] : memref<128x128xbf16, #tpu.memory_space<vmem>>, vector<128x128xbf16>
    %cst = arith.constant dense<0.000000e+00> : vector<256x128xf32>
    %6 = tpu.matmul %4, %5, %cst {dimension_numbers = #tpu.dot_dimension_numbers<[1], [0], [0], [1], [0, 0, 1, 1], [], []>} : vector<256x128xbf16>, vector<128x128xbf16>, vector<256x128xf32> -> vector<256x128xf32>
    %7 = arith.addf %3, %6 : vector<256x128xf32>
    %c0_6 = arith.constant 0 : index
    %c0_7 = arith.constant 0 : index
    %8 = vector.load %arg7[%c0_6, %c0_7] : memref<256x128xf32, #tpu.memory_space<vmem>>, vector<256x128xf32>
    tpu.vector_store %arg7[%c0_6, %c0_7], %7 {strides = array<i32>} : memref<256x128xf32, #tpu.memory_space<vmem>>, vector<256x128xf32>,
    %c0_i32_8 = arith.constant 0 : i32
    %9 = arith.cmpi eq, %arg2, %c0_i32_8 : i32
    %10 = arith.extui %9 : i1 to i32
    %c0_i32_9 = arith.constant 0 : i32
    %11 = arith.cmpi ne, %10, %c0_i32_9 : i32
    scf.if %11 {
      %c0_10 = arith.constant 0 : index
      %c0_11 = arith.constant 0 : index
      %12 = vector.load %arg7[%c0_10, %c0_11] : memref<256x128xf32, #tpu.memory_space<vmem>>, vector<256x128xf32>
      %c0_12 = arith.constant 0 : index
      %c0_13 = arith.constant 0 : index
      %13 = vector.load %arg5[%c0_12, %c0_13] : memref<1x128xf32, #tpu.memory_space<vmem>>, vector<1x128xf32>
      %14 = vector.broadcast %13 : vector<1x128xf32> to vector<256x128xf32>
      %15 = arith.addf %12, %14 : vector<256x128xf32>
      %16 = arith.truncf %15 : vector<256x128xf32> to vector<256x128xbf16>
      %c0_14 = arith.constant 0 : index
      %c0_15 = arith.constant 0 : index
      %17 = vector.load %arg6[%c0_14, %c0_15] : memref<256x128xbf16, #tpu.memory_space<vmem>>, vector<256x128xbf16>
      tpu.vector_store %arg6[%c0_14, %c0_15], %16 {strides = array<i32>} : memref<256x128xbf16, #tpu.memory_space<vmem>>, vector<256x128xbf16>,
    } else {
    }
    return
  }
  func.func @transform_0(%arg0: i32, %arg1: i32, %arg2: i32) -> (i32, i32) {
    %c0_i32 = arith.constant 0 : i32
    return %arg0, %arg2 : i32, i32
  }
  func.func @transform_1(%arg0: i32, %arg1: i32, %arg2: i32) -> (i32, i32) {
    %c0_i32 = arith.constant 0 : i32
    return %arg2, %arg1 : i32, i32
  }
  func.func @transform_2(%arg0: i32, %arg1: i32, %arg2: i32) -> (i32, i32) {
    %c0_i32 = arith.constant 0 : i32
    %c0_i32_0 = arith.constant 0 : i32
    return %c0_i32, %arg1 : i32, i32
  }
  func.func @transform_3(%arg0: i32, %arg1: i32, %arg2: i32) -> (i32, i32) {
    %c0_i32 = arith.constant 0 : i32
    return %arg0, %arg1 : i32, i32
  }
}

</mosaic_0001>

<bundles_post_ra>
// kernel: generator_for_video_forward.15
= control target key start
LH: loop header
LB: loop body
LE: loop exit
PB: predicated region body
PF: predicated region fallthrough
CT: control target
= control target key end

     0   :  { %s721_s1 = inlined_call_operand.vmem [shape: bf16[128,128], index: 1, kind: input, shape index: {}]   ;;  %s722_s0 = inlined_call_operand.vmem [shape: bf16[128,128], index: 0, kind: input, shape index: {}]   ;;  %s723_s2 = inlined_call_operand.vmem [shape: f32[1,128], index: 2, kind: input, shape index: {}]   ;;  %s724_s3 = inlined_call_operand.vmem [shape: bf16[128,128], index: 3, kind: output, shape index: {}]  }
   0x1   :  { %v610_v0 = vld [vmem:[%s721_s1] sm:$0xff]   ;;  %v611_v1 = vld [vmem:[%s721_s1 + $0x8] sm:$0xff]   ;;  %v612_v2 = vld [vmem:[%s721_s1 + $0x10] sm:$0xff]  }
   0x2   :  { %562 = vmatprep.subr.bf16.mxu0 %v610_v0  ;;  %594 = vmatprep.subr.bf16.mxu1 %v610_v0  ;;  %v613_v3 = vld [vmem:[%s721_s1 + $0x18] sm:$0xff]   ;;  %v618_v4 = vld [vmem:[%s722_s0] sm:$0xff]   ;;  %v615_v7 = vld [vmem:[%s721_s1 + $0x28] sm:$0xff]  }
   0x3   :  { %563 = vmatpush3.bf16.msra.mxu0 %v610_v0  ;;  %602 = vmatpush3.bf16.msra.mxu1 %v610_v0  ;;  %v619_v5 = vld [vmem:[%s722_s0 + $0x20] sm:$0xff]   ;;  %v616_v8 = vld [vmem:[%s721_s1 + $0x30] sm:$0xff]   ;;  %v617_v9 = vld [vmem:[%s721_s1 + $0x38] sm:$0xff]  }
   0x4   :  { %564 = vmatprep.subr.bf16.mxu0 %v611_v1  ;;  %595 = vmatprep.subr.bf16.mxu1 %v611_v1  ;;  %v614_v6 = vld [vmem:[%s721_s1 + $0x20] sm:$0xff]   ;;  %v620_v10 = vld [vmem:[%s722_s0 + $0x8] sm:$0xff]   ;;  %v622_v12 = vld [vmem:[%s722_s0 + $0x10] sm:$0xff]  }
   0x5   :  { %578 = vmatprep.mubr.bf16.mxu0 %v618_v4  ;;  %586 = vmatprep.mubr.bf16.mxu1 %v619_v5  ;;  %v621_v11 = vld [vmem:[%s722_s0 + $0x28] sm:$0xff]   ;;  %v623_v13 = vld [vmem:[%s722_s0 + $0x30] sm:$0xff]   ;;  %v624_v14 = vld [vmem:[%s722_s0 + $0x18] sm:$0xff]  }
   0x6   :  { %v625_v15 = vld [vmem:[%s722_s0 + $0x38] sm:$0xff]   ;;  %v466_v16 = vld [vmem:[%s723_s2] ss:$0 sm:$0xff] }
   0x7   :  { %565 = vmatpush3.bf16.msra.mxu0 %v611_v1  ;;  %603 = vmatpush3.bf16.msra.mxu1 %v611_v1 }
   0x8   :  { %566 = vmatprep.subr.bf16.mxu0 %v612_v2  ;;  %596 = vmatprep.subr.bf16.mxu1 %v612_v2 }
   0xb   :  { %567 = vmatpush3.bf16.msra.mxu0 %v612_v2  ;;  %604 = vmatpush3.bf16.msra.mxu1 %v612_v2 }
   0xc   :  { %568 = vmatprep.subr.bf16.mxu0 %v613_v3  ;;  %597 = vmatprep.subr.bf16.mxu1 %v613_v3 }
   0xf   :  { %569 = vmatpush3.bf16.msra.mxu0 %v613_v3  ;;  %605 = vmatpush3.bf16.msra.mxu1 %v613_v3 }
  0x10   :  { %570 = vmatprep.subr.bf16.mxu0 %v614_v6  ;;  %598 = vmatprep.subr.bf16.mxu1 %v614_v6 }
  0x13   :  { %571 = vmatpush3.bf16.msra.mxu0 %v614_v6  ;;  %606 = vmatpush3.bf16.msra.mxu1 %v614_v6 }
  0x14   :  { %572 = vmatprep.subr.bf16.mxu0 %v615_v7  ;;  %599 = vmatprep.subr.bf16.mxu1 %v615_v7 }
  0x17   :  { %573 = vmatpush3.bf16.msra.mxu0 %v615_v7  ;;  %607 = vmatpush3.bf16.msra.mxu1 %v615_v7 }
  0x18   :  { %574 = vmatprep.subr.bf16.mxu0 %v616_v8  ;;  %600 = vmatprep.subr.bf16.mxu1 %v616_v8 }
  0x1b   :  { %575 = vmatpush3.bf16.msra.mxu0 %v616_v8  ;;  %608 = vmatpush3.bf16.msra.mxu1 %v616_v8 }
  0x1c   :  { %576 = vmatprep.subr.bf16.mxu0 %v617_v9  ;;  %601 = vmatprep.subr.bf16.mxu1 %v617_v9 }
  0x1f   :  { %577 = vmatpush3.bf16.msra.mxu0 %v617_v9  ;;  %609 = vmatpush3.bf16.msra.mxu1 %v617_v9 }
  0x22   :  { %579 = vmatmul.mubr.bf16.vlgmr.msra.gmra.mrb[0].mxu0 %v620_v10  ;;  %587 = vmatmul.mubr.bf16.vlgmr.msra.gmra.mrb[0].mxu1 %v621_v11 }
  0x23   :  { %582 = vmatprep.mubr.bf16.mxu0 %v622_v12  ;;  %590 = vmatprep.mubr.bf16.mxu1 %v623_v13 }
  0x2a   :  { %583 = vmatmul.mubr.bf16.gmra.mrb[4].mxu0 %v624_v14  ;;  %591 = vmatmul.mubr.bf16.gmra.mrb[4].mxu1 %v625_v15 }
  0xf5   :  { %v580_v17 = vpop.f32.mrb[0].mxu0  ;;  %v588_v18 = vpop.f32.mrb[0].mxu1 }
  0xf6   :  { %v336_v19 = vadd.f32 %v580_v17, %v466_v16  ;;  %v344_v20 = vadd.f32 %v588_v18, %v466_v16  ;;  %v213_v21 = vpop.f32.mrb[1].mxu0  ;;  %v245_v22 = vpop.f32.mrb[1].mxu1 }
  0xf7   :  { %v334_v23 = vadd.f32 %v466_v16, %v213_v21  ;;  %v342_v24 = vadd.f32 %v466_v16, %v245_v22  ;;  %v581_v25 = vpop.f32.mrb[2].mxu0  ;;  %v589_v26 = vpop.f32.mrb[2].mxu1 }
  0xf8   :  { %v337_v27 = vadd.f32 %v581_v25, %v466_v16  ;;  %v345_v28 = vadd.f32 %v589_v26, %v466_v16  ;;  %v216_v29 = vpop.f32.mrb[3].mxu0  ;;  %v248_v30 = vpop.f32.mrb[3].mxu1  ;;  %v352_v33 = vmax.f32 %v336_v19, 0.0  ;;  %v360_v34 = vmax.f32 %v344_v20, 0.0 }
  0xf9   :  { %v335_v31 = vadd.f32 %v466_v16, %v216_v29  ;;  %v343_v32 = vadd.f32 %v466_v16, %v248_v30  ;;  %v350_v37 = vmax.f32 %v334_v23, 0.0  ;;  %v358_v38 = vmax.f32 %v342_v24, 0.0 }
  0xfa   :  { %v353_v35 = vmax.f32 %v337_v27, 0.0  ;;  %v361_v36 = vmax.f32 %v345_v28, 0.0 }
  0xfb   :  { %v351_v39 = vmax.f32 %v335_v31, 0.0  ;;  %v359_v40 = vmax.f32 %v343_v32, 0.0 }
  0xfc   :  { %v507_v41 = vpack.c.bf16 %v353_v35, %v352_v33  ;;  %v527_v42 = vpack.c.bf16 %v361_v36, %v360_v34 }
  0xfd   :  { %v502_v43 = vpack.c.bf16 %v351_v39, %v350_v37  ;;  %v522_v44 = vpack.c.bf16 %v359_v40, %v358_v38  ;;  %v584_v45 = vpop.f32.mrb[4].mxu0  ;;  %v592_v46 = vpop.f32.mrb[4].mxu1 }
  0xfe   :  { %539 = vst [vmem:[%s724_s3 + $0x8] sm:$0xff] %v507_v41   ;;  %543 = vst [vmem:[%s724_s3 + $0x28] sm:$0xff] %v527_v42   ;;  %v340_v47 = vadd.f32 %v584_v45, %v466_v16  ;;  %v348_v48 = vadd.f32 %v592_v46, %v466_v16  ;;  %v229_v49 = vpop.f32.mrb[5].mxu0  ;;  %v261_v50 = vpop.f32.mrb[5].mxu1 }
  0xff   :  { %503 = vst [vmem:[%s724_s3] sm:$0xff] %v502_v43   ;;  %542 = vst [vmem:[%s724_s3 + $0x20] sm:$0xff] %v522_v44   ;;  %v338_v51 = vadd.f32 %v466_v16, %v229_v49  ;;  %v346_v52 = vadd.f32 %v466_v16, %v261_v50  ;;  %v585_v53 = vpop.f32.mrb[6].mxu0  ;;  %v593_v54 = vpop.f32.mrb[6].mxu1 }
 0x100   :  { %v341_v55 = vadd.f32 %v585_v53, %v466_v16  ;;  %v349_v56 = vadd.f32 %v593_v54, %v466_v16  ;;  %v232_v57 = vpop.f32.mrb[7].mxu0  ;;  %v264_v58 = vpop.f32.mrb[7].mxu1  ;;  %v356_v61 = vmax.f32 %v340_v47, 0.0  ;;  %v364_v62 = vmax.f32 %v348_v48, 0.0 }
 0x101   :  { %v339_v59 = vadd.f32 %v466_v16, %v232_v57  ;;  %v347_v60 = vadd.f32 %v466_v16, %v264_v58  ;;  %v354_v1 = vmax.f32 %v338_v51, 0.0  ;;  %v362_v2 = vmax.f32 %v346_v52, 0.0 }
 0x102   :  { %v357_v63 = vmax.f32 %v341_v55, 0.0  ;;  %v365_v0 = vmax.f32 %v349_v56, 0.0 }
 0x103   :  { %v355_v3 = vmax.f32 %v339_v59, 0.0  ;;  %v363_v4 = vmax.f32 %v347_v60, 0.0 }
 0x104   :  { %v517_v5 = vpack.c.bf16 %v357_v63, %v356_v61  ;;  %v537_v6 = vpack.c.bf16 %v365_v0, %v364_v62 }
 0x105   :  { %v512_v7 = vpack.c.bf16 %v355_v3, %v354_v1  ;;  %v532_v8 = vpack.c.bf16 %v363_v4, %v362_v2 }
 0x106   :  { %541 = vst [vmem:[%s724_s3 + $0x18] sm:$0xff] %v517_v5   ;;  %545 = vst [vmem:[%s724_s3 + $0x38] sm:$0xff] %v537_v6  }
 0x107   :  { %540 = vst [vmem:[%s724_s3 + $0x10] sm:$0xff] %v512_v7   ;;  %544 = vst [vmem:[%s724_s3 + $0x30] sm:$0xff] %v532_v8  }

// kernel: generator_for_video_forward.13
= control target key start
LH: loop header
LB: loop body
LE: loop exit
PB: predicated region body
PF: predicated region fallthrough
CT: control target
= control target key end

     0   :  { %8 = vsyncpa [#allocation4], 0  ;;  %s1780_s0 = inlined_call_operand.vmem [shape: bf16[512,128], index: 0, kind: input, shape index: {}]   ;;  %s1781_s1 = inlined_call_operand.hbm [shape: bf16[128,128], index: 1, kind: input, shape index: {}]   ;;  %s1782_s2 = inlined_call_operand.hbm [shape: f32[1,128], index: 2, kind: input, shape index: {}]   ;;  %s1783_s3 = inlined_call_operand.vmem [shape: bf16[512,128], index: 3, kind: output, shape index: {}]  }
   0x1   :  { %9 = vsyncpa [#allocation6], 0  ;;  %s1590_s12 = smov 0   ;;  %s1592_s13 = smov 0  }
   0x2   :  { %s1594_s14 = smov 0  }
   0x3 LB: > { %s1120_s15 = sadd.s32 4294967295, %s1564_s14   ;;  %s34_s16 = sadd.s32 1, %s1560_s13  ;;  %s1564_s14 = sphi %s1594_s14, %s15_s14   ;;  %s1560_s13 = sphi %s1592_s13, %s1793_s13   ;;  %s1556_s12 = sphi %s1590_s12, %s1792_s12  }
   0x4   : > { %p36_p0 = scmp.ge.s32.totalorder %s34_s16, 2  ;;  %p1122_p1 = scmp.ge.s32.totalorder %s1564_s14, 1 }
   0x5   : > { %p149_p2 = scmp.lt.s32.totalorder %s1564_s14, 3  ;;  %p1615_p4 = scmp.eq.s32.totalorder %s1120_s15, 0 }
   0x6   : > { %s1795_s16 = smov (%p36_p0, %s34_s16), 0  ;;  %s1566_s19 = smov [#allocation3]  }
   0x7   : > { %p1611_p3 = pnand %p1122_p1, %p149_p2  ;;  %s165_s20 = sshll.u32 %s1566_s19, 4  ;;  %s166_s20 = int_to_ptr.vmem [resolvable:$true] %s165_s20 }
   0x8   : > { %s1788_s18 = scalar_select %p1615_p4, 1, 0 }
   0x9   : > { %s1787_s17 = scalar_select %p1611_p3, 1, 0 }
   0xa   : > { %p1415_p5 = pneg %p1611_p3  ;;  %s1567_s22 = smov [#allocation5]  }
   0xb   : > { %s181_s23 = sshll.u32 %s1567_s22, 4  ;;  %s1478_s26 = scalar_lea.hbm %s1781_s1, 1024  ;;  %s1627_s23 = int_to_ptr.vmem [resolvable:$true] %s181_s23 }
   0xc   : > { %p1623_p6 = pnand %p1615_p4, %p1415_p5  ;;  %p1479_p7 = scmp.ne.s32.totalorder %s1781_s1, %s1478_s26 }
   0xd   : > { %p1485_p11 = scmp.lt.u32.totalorder %s1478_s26, %s1781_s1 }
   0xe   : > { %p1480_p8 = pneg %p1623_p6 }
  0x10   : > { %p1481_p9 = pnand %p1480_p8, %p1479_p7 }
  0x12   : > { %p1482_p10 = pneg %p1481_p9 }
  0x14   : > { %p1487_p12 = pnand %p1485_p11, %p1482_p10 }
  0x16   : > { %1490 = shalt.err (!%p1487_p12)
}
  0x17   : > { %s1491_s4 = scalar_lea.vmem %s166_s20, 1024  ;;  %p1499_p2 = scmp.lt.s32.totalorder %s166_s20, %s166_s20 }
  0x18   : > { %p1492_p13 = scmp.ne.s32.totalorder %s166_s20, %s1491_s4  ;;  %p1500_p5 = scmp.lt.s32.totalorder %s1491_s4, %s1491_s4 }
  0x1a   : > { %p1494_p0 = pnand %p1492_p13, %p1480_p8  ;;  %p1501_p4 = por %p1500_p5, %p1499_p2 }
  0x1c   : > { %p1495_p1 = pneg %p1494_p0 }
  0x1e   : > { %p1502_p3 = pnand %p1501_p4, %p1495_p1 }
  0x20   : > { %1505 = shalt.err (!%p1502_p3)
}
  0x21   : > { %s1568_s5 = smov 64   ;;  %s1569_s6 = smov 4  }
  0x22   : > { %1418 = dma.hbm_to_vmem [thread:$0]  (!%p1623_p6), %s1781_s1, 1024, %s166_s20, [#allocation4], %s1568_s5, %s1568_s5, %s1569_s6  }
  0x23   : > { %s1506_s11 = scalar_lea.hbm %s1782_s2, 16 }
  0x24   : > { %p1507_p7 = scmp.ne.s32.totalorder %s1782_s2, %s1506_s11  ;;  %p1513_p9 = scmp.lt.u32.totalorder %s1506_s11, %s1782_s2 }
  0x26   : > { %p1509_p3 = pnand %p1507_p7, %p1480_p8 }
  0x28   : > { %p1510_p4 = pneg %p1509_p3 }
  0x2a   : > { %p1515_p10 = pnand %p1513_p9, %p1510_p4 }
  0x2c   : > { %1518 = shalt.err (!%p1515_p10)
}
  0x2d   : > { %s1519_s20 = scalar_lea.vmem %s1627_s23, 16  ;;  %s1526_s25 = scalar_lea.vmem %s1627_s23, 32 }
  0x2e   : > { %p1520_p11 = scmp.ne.s32.totalorder %s1627_s23, %s1519_s20  ;;  %p1527_p0 = scmp.lt.s32.totalorder %s1627_s23, %s1627_s23 }
  0x2f   : > { %p1528_p1 = scmp.lt.s32.totalorder %s1526_s25, %s1519_s20 }
  0x30   : > { %p1522_p12 = pnand %p1520_p11, %p1480_p8 }
  0x31   : > { %p1529_p2 = por %p1528_p1, %p1527_p0 }
  0x32   : > { %p1523_p13 = pneg %p1522_p12 }
  0x34   : > { %p1530_p5 = pnand %p1529_p2, %p1523_p13 }
  0x36   : > { %1533 = shalt.err (!%p1530_p5)
}
  0x37   : > { %1421 = dma.hbm_to_vmem [thread:$0]  (!%p1623_p6), %s1782_s2, 16, %s1627_s23, [#allocation6]  }
  0x38   : > { %p1790_p7 = scmp.ne.s32.totalorder %s1787_s17, 0 }
  0x39   : > { %p1791_p8 = scmp.ne.s32.totalorder (!%p1790_p7), %s1788_s18, 0 }
  0x3a   : > { %206 = sbr.rel (%p1790_p7) target bundleno = 347 (0x15b), region = 32 }
  0x41   : > { %1547 = dma.done.wait (%p1791_p8), [#allocation4], 1024  }
  0x42   : > { %1549 = vsyncadd (%p1791_p8), [#allocation4], 4294966272 }
  0x43   : > { %1551 = dma.done.wait (%p1791_p8), [#allocation6], 16  }
  0x44   : > { %1553 = vsyncadd (%p1791_p8), [#allocation6], 4294967280  ;;  %s1129_s21 = sshll.u32 %s1556_s12, 5  ;;  %v1454_v0 = vld [vmem:[#allocation3] sm:$0xff]   ;;  %v1455_v1 = vld [vmem:[#allocation3 + $0x8] sm:$0xff]  }
  0x45   : > { %p241_p3 = scmp.lt.s32.totalorder %s1129_s21, 63  ;;  %1343 = vmatprep.subr.bf16.mxu0 %v1454_v0  ;;  %1391 = vmatprep.subr.bf16.mxu1 %v1454_v0  ;;  %v1456_v2 = vld [vmem:[#allocation3 + $0x10] sm:$0xff]   ;;  %v1457_v3 = vld [vmem:[#allocation3 + $0x18] sm:$0xff]   ;;  %v1458_v6 = vld [vmem:[#allocation3 + $0x20] sm:$0xff]  }
  0x46   : > { %1344 = vmatpush3.bf16.msra.mxu0 %v1454_v0  ;;  %1399 = vmatpush3.bf16.msra.mxu1 %v1454_v0  ;;  %v1459_v7 = vld [vmem:[#allocation3 + $0x28] sm:$0xff]   ;;  %v1460_v8 = vld [vmem:[#allocation3 + $0x30] sm:$0xff]   ;;  %v1461_v9 = vld [vmem:[#allocation3 + $0x38] sm:$0xff]  }
  0x47   : > { %s1797_s21 = smov (!%p241_p3, %s1129_s21), 63  ;;  %1345 = vmatprep.subr.bf16.mxu0 %v1455_v1  ;;  %1392 = vmatprep.subr.bf16.mxu1 %v1455_v1  ;;  %v1714_v24 = vld [vmem:[#allocation5] ss:$0 sm:$0xff] }
  0x48   : > { %s1130_s17 = sshll.u32 %s1797_s21, 2 }
  0x49   : > { %s1696_s12 = scalar_lea.vmem %s1780_s0, %s1130_s17  ;;  %s1729_s30 = scalar_lea.vmem %s1783_s3, %s1130_s17 }
  0x4a   : > { %1346 = vmatpush3.bf16.msra.mxu0 %v1455_v1  ;;  %1400 = vmatpush3.bf16.msra.mxu1 %v1455_v1  ;;  %v1462_v4 = vld [vmem:[%s1696_s12] sm:$0xff]   ;;  %v1464_v10 = vld [vmem:[%s1696_s12 + $0x8] sm:$0xff]   ;;  %v1466_v12 = vld [vmem:[%s1696_s12 + $0x10] sm:$0xff]  }
  0x4b   : > { %1347 = vmatprep.subr.bf16.mxu0 %v1456_v2  ;;  %1393 = vmatprep.subr.bf16.mxu1 %v1456_v2  ;;  %v1463_v5 = vld [vmem:[%s1696_s12 + $0x40] sm:$0xff]   ;;  %v1465_v11 = vld [vmem:[%s1696_s12 + $0x48] sm:$0xff]   ;;  %v1467_v13 = vld [vmem:[%s1696_s12 + $0x50] sm:$0xff]  }
  0x4c   : > { %1359 = vmatprep.mubr.bf16.mxu0 %v1462_v4  ;;  %1375 = vmatprep.mubr.bf16.mxu1 %v1463_v5  ;;  %v1468_v14 = vld [vmem:[%s1696_s12 + $0x18] sm:$0xff]   ;;  %v1470_v16 = vld [vmem:[%s1696_s12 + $0x20] sm:$0xff]   ;;  %v1472_v18 = vld [vmem:[%s1696_s12 + $0x28] sm:$0xff]  }
  0x4d   : > { %v1469_v15 = vld [vmem:[%s1696_s12 + $0x58] sm:$0xff]   ;;  %v1471_v17 = vld [vmem:[%s1696_s12 + $0x60] sm:$0xff]   ;;  %v1473_v19 = vld [vmem:[%s1696_s12 + $0x68] sm:$0xff]  }
  0x4e   : > { %1348 = vmatpush3.bf16.msra.mxu0 %v1456_v2  ;;  %1401 = vmatpush3.bf16.msra.mxu1 %v1456_v2  ;;  %v1474_v20 = vld [vmem:[%s1696_s12 + $0x30] sm:$0xff]   ;;  %v1476_v22 = vld [vmem:[%s1696_s12 + $0x38] sm:$0xff]  }
  0x4f   : > { %1349 = vmatprep.subr.bf16.mxu0 %v1457_v3  ;;  %1394 = vmatprep.subr.bf16.mxu1 %v1457_v3  ;;  %v1475_v21 = vld [vmem:[%s1696_s12 + $0x70] sm:$0xff]   ;;  %v1477_v23 = vld [vmem:[%s1696_s12 + $0x78] sm:$0xff]  }
  0x52   : > { %1350 = vmatpush3.bf16.msra.mxu0 %v1457_v3  ;;  %1402 = vmatpush3.bf16.msra.mxu1 %v1457_v3 }
  0x53   : > { %1351 = vmatprep.subr.bf16.mxu0 %v1458_v6  ;;  %1395 = vmatprep.subr.bf16.mxu1 %v1458_v6 }
  0x56   : > { %1352 = vmatpush3.bf16.msra.mxu0 %v1458_v6  ;;  %1403 = vmatpush3.bf16.msra.mxu1 %v1458_v6 }
  0x57   : > { %1353 = vmatprep.subr.bf16.mxu0 %v1459_v7  ;;  %1396 = vmatprep.subr.bf16.mxu1 %v1459_v7 }
  0x5a   : > { %1354 = vmatpush3.bf16.msra.mxu0 %v1459_v7  ;;  %1404 = vmatpush3.bf16.msra.mxu1 %v1459_v7 }
  0x5b   : > { %1355 = vmatprep.subr.bf16.mxu0 %v1460_v8  ;;  %1397 = vmatprep.subr.bf16.mxu1 %v1460_v8 }
  0x5e   : > { %1356 = vmatpush3.bf16.msra.mxu0 %v1460_v8  ;;  %1405 = vmatpush3.bf16.msra.mxu1 %v1460_v8 }
  0x5f   : > { %1357 = vmatprep.subr.bf16.mxu0 %v1461_v9  ;;  %1398 = vmatprep.subr.bf16.mxu1 %v1461_v9 }
  0x62   : > { %1358 = vmatpush3.bf16.msra.mxu0 %v1461_v9  ;;  %1406 = vmatpush3.bf16.msra.mxu1 %v1461_v9 }
  0x65   : > { %1360 = vmatmul.mubr.bf16.vlgmr.msra.gmra.mrb[0].mxu0 %v1464_v10  ;;  %1376 = vmatmul.mubr.bf16.vlgmr.msra.gmra.mrb[0].mxu1 %v1465_v11 }
  0x66   : > { %1363 = vmatprep.mubr.bf16.mxu0 %v1466_v12  ;;  %1379 = vmatprep.mubr.bf16.mxu1 %v1467_v13 }
  0x6d   : > { %1364 = vmatmul.mubr.bf16.gmra.mrb[4].mxu0 %v1468_v14  ;;  %1380 = vmatmul.mubr.bf16.gmra.mrb[4].mxu1 %v1469_v15 }
  0x6e   : > { %1367 = vmatprep.mubr.bf16.mxu0 %v1470_v16  ;;  %1383 = vmatprep.mubr.bf16.mxu1 %v1471_v17 }
  0x75   : > { %1368 = vmatmul.mubr.bf16.gmra.mrb[8].mxu0 %v1472_v18  ;;  %1384 = vmatmul.mubr.bf16.gmra.mrb[8].mxu1 %v1473_v19 }
  0x76   : > { %1371 = vmatprep.mubr.bf16.mxu0 %v1474_v20  ;;  %1387 = vmatprep.mubr.bf16.mxu1 %v1475_v21 }
  0x7d   : > { %1372 = vmatmul.mubr.bf16.gmra.mrb[12].mxu0 %v1476_v22  ;;  %1388 = vmatmul.mubr.bf16.gmra.mrb[12].mxu1 %v1477_v23 }
 0x138   : > { %v1361_v25 = vpop.f32.mrb[0].mxu0  ;;  %v1377_v26 = vpop.f32.mrb[0].mxu1 }
 0x139   : > { %v789_v27 = vadd.f32 %v1361_v25, %v1714_v24  ;;  %v805_v28 = vadd.f32 %v1377_v26, %v1714_v24  ;;  %v554_v29 = vpop.f32.mrb[1].mxu0  ;;  %v618_v30 = vpop.f32.mrb[1].mxu1 }
 0x13a   : > { %v787_v31 = vadd.f32 %v1714_v24, %v554_v29  ;;  %v803_v32 = vadd.f32 %v1714_v24, %v618_v30  ;;  %v1362_v33 = vpop.f32.mrb[2].mxu0  ;;  %v1378_v34 = vpop.f32.mrb[2].mxu1 }
 0x13b   : > { %v790_v35 = vadd.f32 %v1362_v33, %v1714_v24  ;;  %v806_v36 = vadd.f32 %v1378_v34, %v1714_v24  ;;  %v557_v37 = vpop.f32.mrb[3].mxu0  ;;  %v621_v38 = vpop.f32.mrb[3].mxu1  ;;  %v821_v41 = vmax.f32 %v789_v27, 0.0  ;;  %v837_v42 = vmax.f32 %v805_v28, 0.0 }
 0x13c   : > { %v788_v39 = vadd.f32 %v1714_v24, %v557_v37  ;;  %v804_v40 = vadd.f32 %v1714_v24, %v621_v38  ;;  %v819_v45 = vmax.f32 %v787_v31, 0.0  ;;  %v835_v46 = vmax.f32 %v803_v32, 0.0 }
 0x13d   : > { %v822_v43 = vmax.f32 %v790_v35, 0.0  ;;  %v838_v44 = vmax.f32 %v806_v36, 0.0 }
 0x13e   : > { %v820_v47 = vmax.f32 %v788_v39, 0.0  ;;  %v836_v48 = vmax.f32 %v804_v40, 0.0 }
 0x13f   : > { %v1232_v49 = vpack.c.bf16 %v822_v43, %v821_v41  ;;  %v1272_v50 = vpack.c.bf16 %v838_v44, %v837_v42 }
 0x140   : > { %v1227_v51 = vpack.c.bf16 %v820_v47, %v819_v45  ;;  %v1267_v52 = vpack.c.bf16 %v836_v48, %v835_v46  ;;  %v1365_v53 = vpop.f32.mrb[4].mxu0  ;;  %v1381_v54 = vpop.f32.mrb[4].mxu1 }
 0x141   : > { %1304 = vst [vmem:[%s1729_s30 + $0x8] sm:$0xff] %v1232_v49   ;;  %1312 = vst [vmem:[%s1729_s30 + $0x48] sm:$0xff] %v1272_v50   ;;  %v793_v55 = vadd.f32 %v1365_v53, %v1714_v24  ;;  %v809_v56 = vadd.f32 %v1381_v54, %v1714_v24  ;;  %v570_v57 = vpop.f32.mrb[5].mxu0  ;;  %v634_v58 = vpop.f32.mrb[5].mxu1 }
 0x142   : > { %1228 = vst [vmem:[%s1729_s30] sm:$0xff] %v1227_v51   ;;  %1311 = vst [vmem:[%s1729_s30 + $0x40] sm:$0xff] %v1267_v52   ;;  %v791_v59 = vadd.f32 %v1714_v24, %v570_v57  ;;  %v807_v60 = vadd.f32 %v1714_v24, %v634_v58  ;;  %v1366_v61 = vpop.f32.mrb[6].mxu0  ;;  %v1382_v62 = vpop.f32.mrb[6].mxu1 }
 0x143   : > { %v794_v63 = vadd.f32 %v1366_v61, %v1714_v24  ;;  %v810_v0 = vadd.f32 %v1382_v62, %v1714_v24  ;;  %v573_v1 = vpop.f32.mrb[7].mxu0  ;;  %v637_v2 = vpop.f32.mrb[7].mxu1  ;;  %v825_v5 = vmax.f32 %v793_v55, 0.0  ;;  %v841_v6 = vmax.f32 %v809_v56, 0.0 }
 0x144   : > { %v792_v3 = vadd.f32 %v1714_v24, %v573_v1  ;;  %v808_v4 = vadd.f32 %v1714_v24, %v637_v2  ;;  %v823_v9 = vmax.f32 %v791_v59, 0.0  ;;  %v839_v10 = vmax.f32 %v807_v60, 0.0 }
 0x145   : > { %v826_v7 = vmax.f32 %v794_v63, 0.0  ;;  %v842_v8 = vmax.f32 %v810_v0, 0.0 }
 0x146   : > { %v824_v11 = vmax.f32 %v792_v3, 0.0  ;;  %v840_v12 = vmax.f32 %v808_v4, 0.0 }
 0x147   : > { %v1242_v13 = vpack.c.bf16 %v826_v7, %v825_v5  ;;  %v1282_v14 = vpack.c.bf16 %v842_v8, %v841_v6 }
 0x148   : > { %v1237_v15 = vpack.c.bf16 %v824_v11, %v823_v9  ;;  %v1277_v16 = vpack.c.bf16 %v840_v12, %v839_v10  ;;  %v1369_v17 = vpop.f32.mrb[8].mxu0  ;;  %v1385_v18 = vpop.f32.mrb[8].mxu1 }
 0x149   : > { %1306 = vst [vmem:[%s1729_s30 + $0x18] sm:$0xff] %v1242_v13   ;;  %1314 = vst [vmem:[%s1729_s30 + $0x58] sm:$0xff] %v1282_v14   ;;  %v797_v19 = vadd.f32 %v1369_v17, %v1714_v24  ;;  %v813_v20 = vadd.f32 %v1385_v18, %v1714_v24  ;;  %v586_v21 = vpop.f32.mrb[9].mxu0  ;;  %v650_v22 = vpop.f32.mrb[9].mxu1 }
 0x14a   : > { %1305 = vst [vmem:[%s1729_s30 + $0x10] sm:$0xff] %v1237_v15   ;;  %1313 = vst [vmem:[%s1729_s30 + $0x50] sm:$0xff] %v1277_v16   ;;  %v795_v23 = vadd.f32 %v1714_v24, %v586_v21  ;;  %v811_v25 = vadd.f32 %v1714_v24, %v650_v22  ;;  %v1370_v26 = vpop.f32.mrb[10].mxu0  ;;  %v1386_v27 = vpop.f32.mrb[10].mxu1 }
 0x14b   : > { %v798_v28 = vadd.f32 %v1370_v26, %v1714_v24  ;;  %v814_v29 = vadd.f32 %v1386_v27, %v1714_v24  ;;  %v589_v30 = vpop.f32.mrb[11].mxu0  ;;  %v653_v31 = vpop.f32.mrb[11].mxu1  ;;  %v829_v34 = vmax.f32 %v797_v19, 0.0  ;;  %v845_v35 = vmax.f32 %v813_v20, 0.0 }
 0x14c   : > { %v796_v32 = vadd.f32 %v1714_v24, %v589_v30  ;;  %v812_v33 = vadd.f32 %v1714_v24, %v653_v31  ;;  %v827_v38 = vmax.f32 %v795_v23, 0.0  ;;  %v843_v39 = vmax.f32 %v811_v25, 0.0 }
 0x14d   : > { %v830_v36 = vmax.f32 %v798_v28, 0.0  ;;  %v846_v37 = vmax.f32 %v814_v29, 0.0 }
 0x14e   : > { %v828_v40 = vmax.f32 %v796_v32, 0.0  ;;  %v844_v41 = vmax.f32 %v812_v33, 0.0 }
 0x14f   : > { %v1252_v42 = vpack.c.bf16 %v830_v36, %v829_v34  ;;  %v1292_v43 = vpack.c.bf16 %v846_v37, %v845_v35 }
 0x150   : > { %v1247_v44 = vpack.c.bf16 %v828_v40, %v827_v38  ;;  %v1287_v45 = vpack.c.bf16 %v844_v41, %v843_v39  ;;  %v1373_v46 = vpop.f32.mrb[12].mxu0  ;;  %v1389_v47 = vpop.f32.mrb[12].mxu1 }
 0x151   : > { %1308 = vst [vmem:[%s1729_s30 + $0x28] sm:$0xff] %v1252_v42   ;;  %1316 = vst [vmem:[%s1729_s30 + $0x68] sm:$0xff] %v1292_v43   ;;  %v801_v48 = vadd.f32 %v1373_v46, %v1714_v24  ;;  %v817_v49 = vadd.f32 %v1389_v47, %v1714_v24  ;;  %v602_v50 = vpop.f32.mrb[13].mxu0  ;;  %v666_v51 = vpop.f32.mrb[13].mxu1 }
 0x152   : > { %1307 = vst [vmem:[%s1729_s30 + $0x20] sm:$0xff] %v1247_v44   ;;  %1315 = vst [vmem:[%s1729_s30 + $0x60] sm:$0xff] %v1287_v45   ;;  %v799_v52 = vadd.f32 %v1714_v24, %v602_v50  ;;  %v815_v53 = vadd.f32 %v1714_v24, %v666_v51  ;;  %v1374_v54 = vpop.f32.mrb[14].mxu0  ;;  %v1390_v55 = vpop.f32.mrb[14].mxu1 }
 0x153   : > { %v802_v56 = vadd.f32 %v1374_v54, %v1714_v24  ;;  %v818_v57 = vadd.f32 %v1390_v55, %v1714_v24  ;;  %v605_v58 = vpop.f32.mrb[15].mxu0  ;;  %v669_v59 = vpop.f32.mrb[15].mxu1  ;;  %v833_v62 = vmax.f32 %v801_v48, 0.0  ;;  %v849_v63 = vmax.f32 %v817_v49, 0.0 }
 0x154   : > { %v800_v60 = vadd.f32 %v1714_v24, %v605_v58  ;;  %v816_v61 = vadd.f32 %v1714_v24, %v669_v59  ;;  %v831_v2 = vmax.f32 %v799_v52, 0.0  ;;  %v847_v3 = vmax.f32 %v815_v53, 0.0 }
 0x155   : > { %v834_v0 = vmax.f32 %v802_v56, 0.0  ;;  %v850_v1 = vmax.f32 %v818_v57, 0.0 }
 0x156   : > { %v832_v4 = vmax.f32 %v800_v60, 0.0  ;;  %v848_v5 = vmax.f32 %v816_v61, 0.0 }
 0x157   : > { %v1262_v6 = vpack.c.bf16 %v834_v0, %v833_v62  ;;  %v1302_v7 = vpack.c.bf16 %v850_v1, %v849_v63 }
 0x158   : > { %v1257_v8 = vpack.c.bf16 %v832_v4, %v831_v2  ;;  %v1297_v9 = vpack.c.bf16 %v848_v5, %v847_v3 }
 0x159   : > { %1310 = vst [vmem:[%s1729_s30 + $0x38] sm:$0xff] %v1262_v6   ;;  %1318 = vst [vmem:[%s1729_s30 + $0x78] sm:$0xff] %v1302_v7  }
 0x15a   : > { %1309 = vst [vmem:[%s1729_s30 + $0x30] sm:$0xff] %v1257_v8   ;;  %1317 = vst [vmem:[%s1729_s30 + $0x70] sm:$0xff] %v1297_v9  }
 0x15b PF: > { %s15_s14 = sadd.s32 1, %s1564_s14   ;;  %s1792_s12 = smov %s1560_s13 }
 0x15c   : > { %p12_p6 = scmp.ge.s32.totalorder %s15_s14, 4   ;;  %s1793_s13 = smov %s1795_s16 }
 0x15e   :  { %14 = sbr.rel (!%p12_p6) target bundleno = 3 (0x3), region = 81 }
 0x165   :  { %1039 = vsyncpa [#allocation4], 1 }
 0x166   :  { %1041 = vsyncpa [#allocation4 + $0x1], 1 }
 0x167   :  { %1042 = vsyncpa [#allocation6], 1 }

// kernel: generator_for_video_forward.14
= control target key start
LH: loop header
LB: loop body
LE: loop exit
PB: predicated region body
PF: predicated region fallthrough
CT: control target
= control target key end

     0   :  { %s2493_s1 = inlined_call_operand.vmem [shape: bf16[384,512], index: 1, kind: input, shape index: {}]   ;;  %s2494_s0 = inlined_call_operand.vmem [shape: bf16[96,384], index: 0, kind: input, shape index: {}]   ;;  %s2495_s2 = inlined_call_operand.vmem [shape: f32[1,512], index: 2, kind: input, shape index: {}]   ;;  %s2496_s3 = inlined_call_operand.vmem [shape: bf16[96,512], index: 3, kind: output, shape index: {}]  }
   0x1   :  { %v1831_v0 = vld [vmem:[%s2493_s1 + $0x4] ss:$16 sps:$4 sm:$0xff]   ;;  %v1833_v1 = vld [vmem:[%s2493_s1 + $0xc] ss:$16 sps:$4 sm:$0xff]   ;;  %v1835_v2 = vld [vmem:[%s2493_s1] ss:$16 sps:$4 sm:$0xff]  }
   0x2   :  { %811 = vmatprep.subr.bf16.mxu0 %v1831_v0  ;;  %v1836_v3 = vld [vmem:[%s2493_s1 + $0x8] ss:$16 sps:$4 sm:$0xff]   ;;  %997 = vmatprep.subr.bf16.mxu1 %v1833_v1  ;;  %v1837_v4 = vld [vmem:[%s2493_s1 + $0x24] ss:$16 sps:$4 sm:$0xff]   ;;  %v1839_v5 = vld [vmem:[%s2493_s1 + $0x2c] ss:$16 sps:$4 sm:$0xff]  }
   0x3   :  { %812 = vmatpush1.bf16.msra.mxu0 %v1835_v2  ;;  %998 = vmatpush1.bf16.msra.mxu1 %v1836_v3  ;;  %v1841_v6 = vld [vmem:[%s2493_s1 + $0x20] ss:$16 sps:$4 sm:$0xff]   ;;  %v1842_v7 = vld [vmem:[%s2493_s1 + $0x28] ss:$16 sps:$4 sm:$0xff]   ;;  %v1843_v8 = vld [vmem:[%s2493_s1 + $0x44] ss:$16 sps:$4 sm:$0xff]  }
   0x4   :  { %813 = vmatprep.subr.bf16.mxu0 %v1837_v4  ;;  %999 = vmatprep.subr.bf16.mxu1 %v1839_v5  ;;  %v1845_v9 = vld [vmem:[%s2493_s1 + $0x4c] ss:$16 sps:$4 sm:$0xff]   ;;  %v1847_v10 = vld [vmem:[%s2493_s1 + $0x40] ss:$16 sps:$4 sm:$0xff]   ;;  %v1848_v11 = vld [vmem:[%s2493_s1 + $0x48] ss:$16 sps:$4 sm:$0xff]  }
   0x5   :  { %v1849_v12 = vld [vmem:[%s2493_s1 + $0x64] ss:$16 sps:$4 sm:$0xff]   ;;  %v1851_v13 = vld [vmem:[%s2493_s1 + $0x6c] ss:$16 sps:$4 sm:$0xff]   ;;  %v1853_v14 = vld [vmem:[%s2493_s1 + $0x60] ss:$16 sps:$4 sm:$0xff]  }
   0x6   :  { %v1854_v15 = vld [vmem:[%s2493_s1 + $0x68] ss:$16 sps:$4 sm:$0xff]   ;;  %v1855_v16 = vld [vmem:[%s2493_s1 + $0x84] ss:$16 sps:$4 sm:$0xff]   ;;  %v1857_v17 = vld [vmem:[%s2493_s1 + $0x8c] ss:$16 sps:$4 sm:$0xff]  }
   0x7   :  { %814 = vmatpush1.bf16.msra.mxu0 %v1841_v6  ;;  %1000 = vmatpush1.bf16.msra.mxu1 %v1842_v7  ;;  %v1859_v18 = vld [vmem:[%s2493_s1 + $0x80] ss:$16 sps:$4 sm:$0xff]   ;;  %v1860_v19 = vld [vmem:[%s2493_s1 + $0x88] ss:$16 sps:$4 sm:$0xff]   ;;  %v1861_v20 = vld [vmem:[%s2493_s1 + $0xa4] ss:$16 sps:$4 sm:$0xff]  }
   0x8   :  { %815 = vmatprep.subr.bf16.mxu0 %v1843_v8  ;;  %1001 = vmatprep.subr.bf16.mxu1 %v1845_v9  ;;  %v1863_v21 = vld [vmem:[%s2493_s1 + $0xac] ss:$16 sps:$4 sm:$0xff]   ;;  %v1865_v22 = vld [vmem:[%s2493_s1 + $0xa0] ss:$16 sps:$4 sm:$0xff]   ;;  %v1866_v23 = vld [vmem:[%s2493_s1 + $0xa8] ss:$16 sps:$4 sm:$0xff]  }
   0x9   :  { %v1867_v24 = vld [vmem:[%s2493_s1 + $0xc4] ss:$16 sps:$4 sm:$0xff]   ;;  %v1869_v25 = vld [vmem:[%s2493_s1 + $0xcc] ss:$16 sps:$4 sm:$0xff]   ;;  %v1871_v26 = vld [vmem:[%s2493_s1 + $0xc0] ss:$16 sps:$4 sm:$0xff]  }
   0xa   :  { %v1872_v27 = vld [vmem:[%s2493_s1 + $0xc8] ss:$16 sps:$4 sm:$0xff]   ;;  %v1873_v28 = vld [vmem:[%s2493_s1 + $0xe4] ss:$16 sps:$4 sm:$0xff]   ;;  %v1875_v29 = vld [vmem:[%s2493_s1 + $0xec] ss:$16 sps:$4 sm:$0xff]  }
   0xb   :  { %816 = vmatpush1.bf16.msra.mxu0 %v1847_v10  ;;  %1002 = vmatpush1.bf16.msra.mxu1 %v1848_v11  ;;  %v1877_v30 = vld [vmem:[%s2493_s1 + $0xe0] ss:$16 sps:$4 sm:$0xff]   ;;  %v1878_v31 = vld [vmem:[%s2493_s1 + $0xe8] ss:$16 sps:$4 sm:$0xff]   ;;  %v1879_v32 = vld [vmem:[%s2493_s1 + $0x104] ss:$16 sps:$4 sm:$0xff]  }
   0xc   :  { %817 = vmatprep.subr.bf16.mxu0 %v1849_v12  ;;  %1003 = vmatprep.subr.bf16.mxu1 %v1851_v13  ;;  %v1881_v33 = vld [vmem:[%s2493_s1 + $0x10c] ss:$16 sps:$4 sm:$0xff]   ;;  %v1883_v34 = vld [vmem:[%s2493_s1 + $0x100] ss:$16 sps:$4 sm:$0xff]   ;;  %v1884_v35 = vld [vmem:[%s2493_s1 + $0x108] ss:$16 sps:$4 sm:$0xff]  }
   0xd   :  { %v1885_v36 = vld [vmem:[%s2493_s1 + $0x124] ss:$16 sps:$4 sm:$0xff]   ;;  %v1887_v37 = vld [vmem:[%s2493_s1 + $0x12c] ss:$16 sps:$4 sm:$0xff]   ;;  %v1889_v38 = vld [vmem:[%s2493_s1 + $0x120] ss:$16 sps:$4 sm:$0xff]  }
   0xe   :  { %v1890_v39 = vld [vmem:[%s2493_s1 + $0x128] ss:$16 sps:$4 sm:$0xff]   ;;  %v1891_v40 = vld [vmem:[%s2493_s1 + $0x144] ss:$16 sps:$4 sm:$0xff]   ;;  %v1893_v41 = vld [vmem:[%s2493_s1 + $0x14c] ss:$16 sps:$4 sm:$0xff]  }
   0xf   :  { %818 = vmatpush1.bf16.msra.mxu0 %v1853_v14  ;;  %1004 = vmatpush1.bf16.msra.mxu1 %v1854_v15  ;;  %v1895_v42 = vld [vmem:[%s2493_s1 + $0x140] ss:$16 sps:$4 sm:$0xff]   ;;  %v1896_v43 = vld [vmem:[%s2493_s1 + $0x148] ss:$16 sps:$4 sm:$0xff]   ;;  %v1897_v44 = vld [vmem:[%s2493_s1 + $0x164] ss:$16 sps:$4 sm:$0xff]  }
  0x10   :  { %819 = vmatprep.subr.bf16.mxu0 %v1855_v16  ;;  %1005 = vmatprep.subr.bf16.mxu1 %v1857_v17  ;;  %v1899_v45 = vld [vmem:[%s2493_s1 + $0x16c] ss:$16 sps:$4 sm:$0xff]   ;;  %v1901_v46 = vld [vmem:[%s2493_s1 + $0x160] ss:$16 sps:$4 sm:$0xff]   ;;  %v1902_v47 = vld [vmem:[%s2493_s1 + $0x168] ss:$16 sps:$4 sm:$0xff]  }
  0x11   :  { %v1929_v48 = vld [vmem:[%s2494_s0 + $0x4] ss:$12 sps:$4 sm:$0xff]   ;;  %v1905_v50 = vld [vmem:[%s2493_s1 + $0x18c] ss:$16 sps:$4 sm:$0xff]   ;;  %v1908_v52 = vld [vmem:[%s2493_s1 + $0x188] ss:$16 sps:$4 sm:$0xff]  }
  0x12   :  { %v1903_v49 = vld [vmem:[%s2493_s1 + $0x184] ss:$16 sps:$4 sm:$0xff]   ;;  %843 = vmatprep.mubr.bf16.mxu0 %v1929_v48  ;;  %1029 = vmatprep.mubr.bf16.mxu1 %v1929_v48  ;;  %v1907_v51 = vld [vmem:[%s2493_s1 + $0x180] ss:$16 sps:$4 sm:$0xff]   ;;  %v1911_v54 = vld [vmem:[%s2493_s1 + $0x1ac] ss:$16 sps:$4 sm:$0xff]  }
  0x13   :  { %820 = vmatpush1.bf16.msra.mxu0 %v1859_v18  ;;  %1006 = vmatpush1.bf16.msra.mxu1 %v1860_v19  ;;  %v1909_v53 = vld [vmem:[%s2493_s1 + $0x1a4] ss:$16 sps:$4 sm:$0xff]   ;;  %v1913_v55 = vld [vmem:[%s2493_s1 + $0x1a0] ss:$16 sps:$4 sm:$0xff]   ;;  %v1914_v56 = vld [vmem:[%s2493_s1 + $0x1a8] ss:$16 sps:$4 sm:$0xff]  }
  0x14   :  { %821 = vmatprep.subr.bf16.mxu0 %v1861_v20  ;;  %1007 = vmatprep.subr.bf16.mxu1 %v1863_v21  ;;  %v1915_v57 = vld [vmem:[%s2493_s1 + $0x1c4] ss:$16 sps:$4 sm:$0xff]   ;;  %v1917_v58 = vld [vmem:[%s2493_s1 + $0x1cc] ss:$16 sps:$4 sm:$0xff]   ;;  %v1919_v59 = vld [vmem:[%s2493_s1 + $0x1c0] ss:$16 sps:$4 sm:$0xff]  }
  0x15   :  { %v1920_v60 = vld [vmem:[%s2493_s1 + $0x1c8] ss:$16 sps:$4 sm:$0xff]   ;;  %v1921_v61 = vld [vmem:[%s2493_s1 + $0x1e4] ss:$16 sps:$4 sm:$0xff]   ;;  %v1923_v62 = vld [vmem:[%s2493_s1 + $0x1ec] ss:$16 sps:$4 sm:$0xff]  }
  0x16   :  { %v1925_v63 = vld [vmem:[%s2493_s1 + $0x1e0] ss:$16 sps:$4 sm:$0xff]   ;;  %v1926_v0 = vld [vmem:[%s2493_s1 + $0x1e8] ss:$16 sps:$4 sm:$0xff]   ;;  %v1932_v1 = vld [vmem:[%s2493_s1 + $0x204] ss:$16 sps:$4 sm:$0xff]  }
  0x17   :  { %822 = vmatpush1.bf16.msra.mxu0 %v1865_v22  ;;  %1008 = vmatpush1.bf16.msra.mxu1 %v1866_v23  ;;  %v1935_v2 = vld [vmem:[%s2493_s1 + $0x20c] ss:$16 sps:$4 sm:$0xff]   ;;  %v1930_v4 = vld [vmem:[%s2493_s1 + $0x200] ss:$16 sps:$4 sm:$0xff]   ;;  %v1933_v5 = vld [vmem:[%s2493_s1 + $0x208] ss:$16 sps:$4 sm:$0xff]  }
  0x18   :  { %823 = vmatprep.subr.bf16.mxu0 %v1867_v24  ;;  %1009 = vmatprep.subr.bf16.mxu1 %v1869_v25  ;;  %v1927_v3 = vld [vmem:[%s2494_s0] ss:$12 sps:$4 sm:$0xff]   ;;  %v1938_v6 = vld [vmem:[%s2493_s1 + $0x224] ss:$16 sps:$4 sm:$0xff]   ;;  %v1942_v8 = vld [vmem:[%s2494_s0 + $0x1c] ss:$12 sps:$4 sm:$0xff]  }
  0x19   :  { %v1941_v7 = vld [vmem:[%s2493_s1 + $0x22c] ss:$16 sps:$4 sm:$0xff]   ;;  %v1936_v9 = vld [vmem:[%s2493_s1 + $0x220] ss:$16 sps:$4 sm:$0xff]   ;;  %v1939_v10 = vld [vmem:[%s2493_s1 + $0x228] ss:$16 sps:$4 sm:$0xff]  }
  0x1a   :  { %v1947_v11 = vld [vmem:[%s2493_s1 + $0x244] ss:$16 sps:$4 sm:$0xff]   ;;  %v1950_v12 = vld [vmem:[%s2493_s1 + $0x24c] ss:$16 sps:$4 sm:$0xff]   ;;  %v1945_v14 = vld [vmem:[%s2493_s1 + $0x240] ss:$16 sps:$4 sm:$0xff]  }
  0x1b   :  { %824 = vmatpush1.bf16.msra.mxu0 %v1871_v26  ;;  %1010 = vmatpush1.bf16.msra.mxu1 %v1872_v27  ;;  %v1944_v13 = vld [vmem:[%s2494_s0 + $0x18] ss:$12 sps:$4 sm:$0xff]   ;;  %v1951_v16 = vld [vmem:[%s2494_s0 + $0x34] ss:$12 sps:$4 sm:$0xff]   ;;  %v1959_v19 = vld [vmem:[%s2493_s1 + $0x26c] ss:$16 sps:$4 sm:$0xff]  }
  0x1c   :  { %825 = vmatprep.subr.bf16.mxu0 %v1873_v28  ;;  %1011 = vmatprep.subr.bf16.mxu1 %v1875_v29  ;;  %v1948_v15 = vld [vmem:[%s2493_s1 + $0x248] ss:$16 sps:$4 sm:$0xff]   ;;  %v1956_v17 = vld [vmem:[%s2493_s1 + $0x264] ss:$16 sps:$4 sm:$0xff]   ;;  %v1954_v18 = vld [vmem:[%s2493_s1 + $0x260] ss:$16 sps:$4 sm:$0xff]  }
  0x1d   :  { %v1957_v20 = vld [vmem:[%s2493_s1 + $0x268] ss:$16 sps:$4 sm:$0xff]   ;;  %v1965_v21 = vld [vmem:[%s2493_s1 + $0x284] ss:$16 sps:$4 sm:$0xff]   ;;  %v1968_v22 = vld [vmem:[%s2493_s1 + $0x28c] ss:$16 sps:$4 sm:$0xff]  }
  0x1e   :  { %v1953_v23 = vld [vmem:[%s2494_s0 + $0x30] ss:$12 sps:$4 sm:$0xff]   ;;  %v1960_v24 = vld [vmem:[%s2494_s0 + $0x4c] ss:$12 sps:$4 sm:$0xff]   ;;  %v1971_v27 = vld [vmem:[%s2493_s1 + $0x2a4] ss:$16 sps:$4 sm:$0xff]  }
  0x1f   :  { %826 = vmatpush1.bf16.msra.mxu0 %v1877_v30  ;;  %1012 = vmatpush1.bf16.msra.mxu1 %v1878_v31  ;;  %v1963_v25 = vld [vmem:[%s2493_s1 + $0x280] ss:$16 sps:$4 sm:$0xff]   ;;  %v1966_v26 = vld [vmem:[%s2493_s1 + $0x288] ss:$16 sps:$4 sm:$0xff]   ;;  %v1974_v28 = vld [vmem:[%s2493_s1 + $0x2ac] ss:$16 sps:$4 sm:$0xff]  }
  0x20   :  { %827 = vmatprep.subr.bf16.mxu0 %v1879_v32  ;;  %1013 = vmatprep.subr.bf16.mxu1 %v1881_v33  ;;  %v1969_v29 = vld [vmem:[%s2493_s1 + $0x2a0] ss:$16 sps:$4 sm:$0xff]   ;;  %v1972_v30 = vld [vmem:[%s2493_s1 + $0x2a8] ss:$16 sps:$4 sm:$0xff]   ;;  %v1980_v31 = vld [vmem:[%s2493_s1 + $0x2c4] ss:$16 sps:$4 sm:$0xff]  }
  0x21   :  { %v1983_v32 = vld [vmem:[%s2493_s1 + $0x2cc] ss:$16 sps:$4 sm:$0xff]   ;;  %v1962_v33 = vld [vmem:[%s2494_s0 + $0x48] ss:$12 sps:$4 sm:$0xff]  }
  0x22   :  { %v1996_v48 = vld [vmem:[%s2494_s0 + $0x50] ss:$12 sps:$4 sm:$0xff]  }
  0x23   :  { %828 = vmatpush1.bf16.msra.mxu0 %v1883_v34  ;;  %1014 = vmatpush1.bf16.msra.mxu1 %v1884_v35  ;;  %v1975_v34 = vld [vmem:[%s2494_s0 + $0x64] ss:$12 sps:$4 sm:$0xff]  }
  0x24   :  { %829 = vmatprep.subr.bf16.mxu0 %v1885_v36  ;;  %1015 = vmatprep.subr.bf16.mxu1 %v1887_v37  ;;  %v1978_v35 = vld [vmem:[%s2493_s1 + $0x2c0] ss:$16 sps:$4 sm:$0xff]   ;;  %v1981_v36 = vld [vmem:[%s2493_s1 + $0x2c8] ss:$16 sps:$4 sm:$0xff]   ;;  %v1989_v37 = vld [vmem:[%s2493_s1 + $0x2e4] ss:$16 sps:$4 sm:$0xff]  }
  0x27   :  { %830 = vmatpush1.bf16.msra.mxu0 %v1889_v38  ;;  %1016 = vmatpush1.bf16.msra.mxu1 %v1890_v39  ;;  %v1992_v38 = vld [vmem:[%s2493_s1 + $0x2ec] ss:$16 sps:$4 sm:$0xff]   ;;  %v1987_v39 = vld [vmem:[%s2493_s1 + $0x2e0] ss:$16 sps:$4 sm:$0xff]  }
  0x28   :  { %831 = vmatprep.subr.bf16.mxu0 %v1891_v40  ;;  %1017 = vmatprep.subr.bf16.mxu1 %v1893_v41  ;;  %v1990_v40 = vld [vmem:[%s2493_s1 + $0x2e8] ss:$16 sps:$4 sm:$0xff]   ;;  %v1977_v41 = vld [vmem:[%s2494_s0 + $0x60] ss:$12 sps:$4 sm:$0xff]  }
  0x2b   :  { %832 = vmatpush1.bf16.msra.mxu0 %v1895_v42  ;;  %1018 = vmatpush1.bf16.msra.mxu1 %v1896_v43  ;;  %v1984_v42 = vld [vmem:[%s2494_s0 + $0x7c] ss:$12 sps:$4 sm:$0xff]   ;;  %v1986_v43 = vld [vmem:[%s2494_s0 + $0x78] ss:$12 sps:$4 sm:$0xff]  }
  0x2c   :  { %833 = vmatprep.subr.bf16.mxu0 %v1897_v44  ;;  %1019 = vmatprep.subr.bf16.mxu1 %v1899_v45  ;;  %v1999_v44 = vmov 0   ;;  %v1993_v45 = vld [vmem:[%s2494_s0 + $0x8] ss:$12 sps:$4 sm:$0xff]  }
  0x2f   :  { %834 = vmatpush1.bf16.msra.mxu0 %v1901_v46  ;;  %1020 = vmatpush1.bf16.msra.mxu1 %v1902_v47  ;;  %v1994_v46 = vld [vmem:[%s2494_s0 + $0x20] ss:$12 sps:$4 sm:$0xff]   ;;  %v1995_v47 = vld [vmem:[%s2494_s0 + $0x38] ss:$12 sps:$4 sm:$0xff]  }
  0x30   :  { %835 = vmatprep.subr.bf16.mxu0 %v1903_v49  ;;  %1021 = vmatprep.subr.bf16.mxu1 %v1905_v50  ;;  %v1997_v49 = vld [vmem:[%s2494_s0 + $0x68] ss:$12 sps:$4 sm:$0xff]   ;;  %v1998_v50 = vld [vmem:[%s2494_s0 + $0x80] ss:$12 sps:$4 sm:$0xff]  }
  0x33   :  { %836 = vmatpush1.bf16.msra.mxu0 %v1907_v51  ;;  %1022 = vmatpush1.bf16.msra.mxu1 %v1908_v52  ;;  %v1332_v51 = vlaneseq }
  0x34   :  { %837 = vmatprep.subr.bf16.mxu0 %v1909_v53  ;;  %1023 = vmatprep.subr.bf16.mxu1 %v1911_v54 }
  0x35   :  { %v1333_v52 = vshrl.u32 %v1332_v51, 7 }
  0x37   :  { %838 = vmatpush1.bf16.msra.mxu0 %v1913_v55  ;;  %1024 = vmatpush1.bf16.msra.mxu1 %v1914_v56  ;;  %v1334_v53 = vsub.s32 0, %v1333_v52  ;;  %v1342_v54 = vsub.s32 2, %v1333_v52  ;;  %v1330_v55 = vld [vmem:[%s2495_s2] sm:$0xf]  ;;  %v1338_v56 = vsub.s32 1, %v1333_v52 }
  0x38   :  { %839 = vmatprep.subr.bf16.mxu0 %v1915_v57  ;;  %1025 = vmatprep.subr.bf16.mxu1 %v1917_v58  ;;  %v1346_v57 = vsub.s32 3, %v1333_v52 }
  0x39   :  { %v2365_v58 = vrot.slane %v1330_v55, %v1334_v53 }
  0x3b   :  { %840 = vmatpush1.bf16.msra.mxu0 %v1919_v59  ;;  %1026 = vmatpush1.bf16.msra.mxu1 %v1920_v60  ;;  %v2367_v59 = vrot.slane %v1330_v55, %v1342_v54  ;;  %v2369_v60 = vrot.slane %v1330_v55, %v1338_v56 }
  0x3c   :  { %841 = vmatprep.subr.bf16.mxu0 %v1921_v61  ;;  %1027 = vmatprep.subr.bf16.mxu1 %v1923_v62  ;;  %v2371_v61 = vrot.slane %v1330_v55, %v1346_v57 }
  0x3f   :  { %842 = vmatpush1.bf16.msra.mxu0 %v1925_v63  ;;  %1028 = vmatpush1.bf16.msra.mxu1 %v1926_v0 }
  0x40   :  { %904 = vmatprep.subr.bf16.mxu0 %v1932_v1  ;;  %1090 = vmatprep.subr.bf16.mxu1 %v1935_v2 }
  0x42   :  { %844 = vmatmul.mubr.bf16.vlgmr.msra.gmra.mrb[0].mxu0 %v1927_v3  ;;  %1030 = vmatmul.mubr.bf16.vlgmr.msra.gmra.mrb[0].mxu1 %v1927_v3 }
  0x43   :  { %905 = vmatpush1.bf16.msra.mxu0 %v1930_v4  ;;  %1091 = vmatpush1.bf16.msra.mxu1 %v1933_v5 }
  0x44   :  { %906 = vmatprep.subr.bf16.mxu0 %v1938_v6  ;;  %1092 = vmatprep.subr.bf16.mxu1 %v1941_v7 }
  0x45   :  { %853 = vmatprep.mubr.bf16.mxu0 %v1942_v8  ;;  %1039 = vmatprep.mubr.bf16.mxu1 %v1942_v8 }
  0x47   :  { %907 = vmatpush1.bf16.msra.mxu0 %v1936_v9  ;;  %1093 = vmatpush1.bf16.msra.mxu1 %v1939_v10 }
  0x48   :  { %908 = vmatprep.subr.bf16.mxu0 %v1947_v11  ;;  %1094 = vmatprep.subr.bf16.mxu1 %v1950_v12 }
  0x4a   :  { %854 = vmatmul.mubr.bf16.gmra.mrb[4].mxu0 %v1944_v13  ;;  %1040 = vmatmul.mubr.bf16.gmra.mrb[4].mxu1 %v1944_v13 }
  0x4b   :  { %909 = vmatpush1.bf16.msra.mxu0 %v1945_v14  ;;  %1095 = vmatpush1.bf16.msra.mxu1 %v1948_v15 }
  0x4c   :  { %863 = vmatprep.mubr.bf16.mxu0 %v1951_v16  ;;  %1049 = vmatprep.mubr.bf16.mxu1 %v1951_v16 }
  0x4d   :  { %910 = vmatprep.subr.bf16.mxu0 %v1956_v17  ;;  %1096 = vmatprep.subr.bf16.mxu1 %v1959_v19 }
  0x4f   :  { %911 = vmatpush1.bf16.msra.mxu0 %v1954_v18  ;;  %1097 = vmatpush1.bf16.msra.mxu1 %v1957_v20 }
  0x50   :  { %912 = vmatprep.subr.bf16.mxu0 %v1965_v21  ;;  %1098 = vmatprep.subr.bf16.mxu1 %v1968_v22 }
  0x52   :  { %864 = vmatmul.mubr.bf16.gmra.mrb[8].mxu0 %v1953_v23  ;;  %1050 = vmatmul.mubr.bf16.gmra.mrb[8].mxu1 %v1953_v23 }
  0x53   :  { %873 = vmatprep.mubr.bf16.mxu0 %v1960_v24  ;;  %1059 = vmatprep.mubr.bf16.mxu1 %v1960_v24 }
  0x54   :  { %913 = vmatpush1.bf16.msra.mxu0 %v1963_v25  ;;  %1099 = vmatpush1.bf16.msra.mxu1 %v1966_v26 }
  0x55   :  { %914 = vmatprep.subr.bf16.mxu0 %v1971_v27  ;;  %1100 = vmatprep.subr.bf16.mxu1 %v1974_v28 }
  0x58   :  { %915 = vmatpush1.bf16.msra.mxu0 %v1969_v29  ;;  %1101 = vmatpush1.bf16.msra.mxu1 %v1972_v30 }
  0x59   :  { %916 = vmatprep.subr.bf16.mxu0 %v1980_v31  ;;  %1102 = vmatprep.subr.bf16.mxu1 %v1983_v32 }
  0x5a   :  { %874 = vmatmul.mubr.bf16.gmra.mrb[12].mxu0 %v1962_v33  ;;  %1060 = vmatmul.mubr.bf16.gmra.mrb[12].mxu1 %v1962_v33 }
  0x5b   :  { %883 = vmatprep.mubr.bf16.mxu0 %v1975_v34  ;;  %1069 = vmatprep.mubr.bf16.mxu1 %v1975_v34 }
  0x5c   :  { %917 = vmatpush1.bf16.msra.mxu0 %v1978_v35  ;;  %1103 = vmatpush1.bf16.msra.mxu1 %v1981_v36 }
  0x5d   :  { %918 = vmatprep.subr.bf16.mxu0 %v1989_v37  ;;  %1104 = vmatprep.subr.bf16.mxu1 %v1992_v38 }
  0x60   :  { %919 = vmatpush1.bf16.msra.mxu0 %v1987_v39  ;;  %1105 = vmatpush1.bf16.msra.mxu1 %v1990_v40 }
  0x62   :  { %884 = vmatmul.mubr.bf16.gmra.mrb[16].mxu0 %v1977_v41  ;;  %1070 = vmatmul.mubr.bf16.gmra.mrb[16].mxu1 %v1977_v41 }
  0x63   :  { %893 = vmatprep.mubr.bf16.mxu0 %v1984_v42  ;;  %1079 = vmatprep.mubr.bf16.mxu1 %v1984_v42 }
  0x6a   :  { %894 = vmatmul.mubr.bf16.gmra.mrb[20].mxu0 %v1986_v43  ;;  %1080 = vmatmul.mubr.bf16.gmra.mrb[20].mxu1 %v1986_v43 }
  0x6b   :  { %936 = vmatprep.mubr.bf16.mxu0 %v1999_v44  ;;  %1122 = vmatprep.mubr.bf16.mxu1 %v1999_v44 }
  0x72   :  { %937 = vmatmul.mubr.bf16.vlgmr.msra.gmra.mrb[0].mxu0 %v1993_v45  ;;  %1123 = vmatmul.mubr.bf16.vlgmr.msra.gmra.mrb[0].mxu1 %v1993_v45 }
  0x73   :  { %946 = vmatprep.mubr.bf16.mxu0 %v1999_v44  ;;  %1132 = vmatprep.mubr.bf16.mxu1 %v1999_v44 }
  0x7a   :  { %947 = vmatmul.mubr.bf16.gmra.mrb[4].mxu0 %v1994_v46  ;;  %1133 = vmatmul.mubr.bf16.gmra.mrb[4].mxu1 %v1994_v46 }
  0x7b   :  { %956 = vmatprep.mubr.bf16.mxu0 %v1999_v44  ;;  %1142 = vmatprep.mubr.bf16.mxu1 %v1999_v44 }
  0x82   :  { %957 = vmatmul.mubr.bf16.gmra.mrb[8].mxu0 %v1995_v47  ;;  %1143 = vmatmul.mubr.bf16.gmra.mrb[8].mxu1 %v1995_v47 }
  0x83   :  { %966 = vmatprep.mubr.bf16.mxu0 %v1999_v44  ;;  %1152 = vmatprep.mubr.bf16.mxu1 %v1999_v44 }
  0x8a   :  { %967 = vmatmul.mubr.bf16.gmra.mrb[12].mxu0 %v1996_v48  ;;  %1153 = vmatmul.mubr.bf16.gmra.mrb[12].mxu1 %v1996_v48 }
  0x8b   :  { %976 = vmatprep.mubr.bf16.mxu0 %v1999_v44  ;;  %1162 = vmatprep.mubr.bf16.mxu1 %v1999_v44 }
  0x92   :  { %977 = vmatmul.mubr.bf16.gmra.mrb[16].mxu0 %v1997_v49  ;;  %1163 = vmatmul.mubr.bf16.gmra.mrb[16].mxu1 %v1997_v49 }
  0x93   :  { %986 = vmatprep.mubr.bf16.mxu0 %v1999_v44  ;;  %1172 = vmatprep.mubr.bf16.mxu1 %v1999_v44 }
  0x9a   :  { %987 = vmatmul.mubr.bf16.gmra.mrb[20].mxu0 %v1998_v50  ;;  %1173 = vmatmul.mubr.bf16.gmra.mrb[20].mxu1 %v1998_v50 }
 0x145   :  { %v938_v62 = vpop.f32.mrb[0].mxu0  ;;  %v1124_v63 = vpop.f32.mrb[0].mxu1 }
 0x146   :  { %v1352_v0 = vadd.f32 %v2365_v58, %v938_v62  ;;  %v1354_v1 = vadd.f32 %v2367_v59, %v1124_v63  ;;  %v940_v2 = vpop.f32.mrb[1].mxu0  ;;  %v1126_v3 = vpop.f32.mrb[1].mxu1 }
 0x147   :  { %v1353_v4 = vadd.f32 %v2369_v60, %v940_v2  ;;  %v1355_v5 = vadd.f32 %v2371_v61, %v1126_v3  ;;  %v942_v6 = vpop.f32.mrb[2].mxu0  ;;  %v1128_v7 = vpop.f32.mrb[2].mxu1 }
 0x148   :  { %v1400_v8 = vmax.f32 %v1352_v0, 0.0  ;;  %v1402_v9 = vmax.f32 %v1354_v1, 0.0  ;;  %v1356_v10 = vadd.f32 %v2365_v58, %v942_v6  ;;  %v1358_v11 = vadd.f32 %v2367_v59, %v1128_v7  ;;  %v944_v12 = vpop.f32.mrb[3].mxu0  ;;  %v1130_v13 = vpop.f32.mrb[3].mxu1 }
 0x149   :  { %v1401_v14 = vmax.f32 %v1353_v4, 0.0  ;;  %v1403_v15 = vmax.f32 %v1355_v5, 0.0  ;;  %v1357_v16 = vadd.f32 %v2369_v60, %v944_v12  ;;  %v1359_v17 = vadd.f32 %v2371_v61, %v1130_v13 }
 0x14a   :  { %v1404_v18 = vmax.f32 %v1356_v10, 0.0  ;;  %v1406_v19 = vmax.f32 %v1358_v11, 0.0 }
 0x14b   :  { %v1758_v20 = vpack.c.bf16 %v1401_v14, %v1400_v8  ;;  %v1759_v21 = vpack.c.bf16 %v1403_v15, %v1402_v9  ;;  %v1405_v22 = vmax.f32 %v1357_v16, 0.0  ;;  %v1407_v23 = vmax.f32 %v1359_v17, 0.0 }
 0x14d   :  { %1592 = vst [vmem:[%s2496_s3] sm:$0xff] %v1758_v20  ;;  %1593 = vst [vmem:[%s2496_s3 + $0x8] sm:$0xff] %v1759_v21  ;;  %v1760_v24 = vpack.c.bf16 %v1405_v22, %v1404_v18  ;;  %v1761_v25 = vpack.c.bf16 %v1407_v23, %v1406_v19  ;;  %v948_v26 = vpop.f32.mrb[4].mxu0  ;;  %v1134_v27 = vpop.f32.mrb[4].mxu1 }
 0x14e   :  { %v1360_v28 = vadd.f32 %v2365_v58, %v948_v26  ;;  %v1362_v29 = vadd.f32 %v2367_v59, %v1134_v27  ;;  %v950_v30 = vpop.f32.mrb[5].mxu0  ;;  %v1136_v31 = vpop.f32.mrb[5].mxu1 }
 0x14f   :  { %1594 = vst [vmem:[%s2496_s3 + $0x10] sm:$0xff] %v1760_v24  ;;  %1595 = vst [vmem:[%s2496_s3 + $0x18] sm:$0xff] %v1761_v25  ;;  %v1361_v32 = vadd.f32 %v2369_v60, %v950_v30  ;;  %v1363_v33 = vadd.f32 %v2371_v61, %v1136_v31  ;;  %v952_v34 = vpop.f32.mrb[6].mxu0  ;;  %v1138_v35 = vpop.f32.mrb[6].mxu1 }
 0x150   :  { %v1408_v36 = vmax.f32 %v1360_v28, 0.0  ;;  %v1410_v37 = vmax.f32 %v1362_v29, 0.0  ;;  %v1364_v38 = vadd.f32 %v2365_v58, %v952_v34  ;;  %v1366_v39 = vadd.f32 %v2367_v59, %v1138_v35  ;;  %v954_v40 = vpop.f32.mrb[7].mxu0  ;;  %v1140_v41 = vpop.f32.mrb[7].mxu1 }
 0x151   :  { %v1409_v42 = vmax.f32 %v1361_v32, 0.0  ;;  %v1411_v43 = vmax.f32 %v1363_v33, 0.0  ;;  %v1365_v44 = vadd.f32 %v2369_v60, %v954_v40  ;;  %v1367_v45 = vadd.f32 %v2371_v61, %v1140_v41 }
 0x152   :  { %v1412_v46 = vmax.f32 %v1364_v38, 0.0  ;;  %v1414_v47 = vmax.f32 %v1366_v39, 0.0 }
 0x153   :  { %v1762_v48 = vpack.c.bf16 %v1409_v42, %v1408_v36  ;;  %v1763_v49 = vpack.c.bf16 %v1411_v43, %v1410_v37  ;;  %v1413_v50 = vmax.f32 %v1365_v44, 0.0  ;;  %v1415_v51 = vmax.f32 %v1367_v45, 0.0 }
 0x155   :  { %1596 = vst [vmem:[%s2496_s3 + $0x20] sm:$0xff] %v1762_v48  ;;  %1597 = vst [vmem:[%s2496_s3 + $0x28] sm:$0xff] %v1763_v49  ;;  %v1764_v52 = vpack.c.bf16 %v1413_v50, %v1412_v46  ;;  %v1765_v53 = vpack.c.bf16 %v1415_v51, %v1414_v47  ;;  %v958_v54 = vpop.f32.mrb[8].mxu0  ;;  %v1144_v55 = vpop.f32.mrb[8].mxu1 }
 0x156   :  { %v1368_v56 = vadd.f32 %v2365_v58, %v958_v54  ;;  %v1370_v57 = vadd.f32 %v2367_v59, %v1144_v55  ;;  %v960_v62 = vpop.f32.mrb[9].mxu0  ;;  %v1146_v63 = vpop.f32.mrb[9].mxu1 }
 0x157   :  { %1598 = vst [vmem:[%s2496_s3 + $0x30] sm:$0xff] %v1764_v52  ;;  %1599 = vst [vmem:[%s2496_s3 + $0x38] sm:$0xff] %v1765_v53  ;;  %v1369_v0 = vadd.f32 %v2369_v60, %v960_v62  ;;  %v1371_v1 = vadd.f32 %v2371_v61, %v1146_v63  ;;  %v962_v2 = vpop.f32.mrb[10].mxu0  ;;  %v1148_v3 = vpop.f32.mrb[10].mxu1 }
 0x158   :  { %v1416_v4 = vmax.f32 %v1368_v56, 0.0  ;;  %v1418_v5 = vmax.f32 %v1370_v57, 0.0  ;;  %v1372_v6 = vadd.f32 %v2365_v58, %v962_v2  ;;  %v1374_v7 = vadd.f32 %v2367_v59, %v1148_v3  ;;  %v964_v8 = vpop.f32.mrb[11].mxu0  ;;  %v1150_v9 = vpop.f32.mrb[11].mxu1 }
 0x159   :  { %v1417_v10 = vmax.f32 %v1369_v0, 0.0  ;;  %v1419_v11 = vmax.f32 %v1371_v1, 0.0  ;;  %v1373_v12 = vadd.f32 %v2369_v60, %v964_v8  ;;  %v1375_v13 = vadd.f32 %v2371_v61, %v1150_v9 }
 0x15a   :  { %v1420_v14 = vmax.f32 %v1372_v6, 0.0  ;;  %v1422_v15 = vmax.f32 %v1374_v7, 0.0 }
 0x15b   :  { %v1766_v16 = vpack.c.bf16 %v1417_v10, %v1416_v4  ;;  %v1767_v17 = vpack.c.bf16 %v1419_v11, %v1418_v5  ;;  %v1421_v18 = vmax.f32 %v1373_v12, 0.0  ;;  %v1423_v19 = vmax.f32 %v1375_v13, 0.0 }
 0x15d   :  { %1600 = vst [vmem:[%s2496_s3 + $0x40] sm:$0xff] %v1766_v16  ;;  %1601 = vst [vmem:[%s2496_s3 + $0x48] sm:$0xff] %v1767_v17  ;;  %v1768_v20 = vpack.c.bf16 %v1421_v18, %v1420_v14  ;;  %v1769_v21 = vpack.c.bf16 %v1423_v19, %v1422_v15  ;;  %v968_v22 = vpop.f32.mrb[12].mxu0  ;;  %v1154_v23 = vpop.f32.mrb[12].mxu1 }
 0x15e   :  { %v1376_v24 = vadd.f32 %v2365_v58, %v968_v22  ;;  %v1378_v25 = vadd.f32 %v2367_v59, %v1154_v23  ;;  %v970_v26 = vpop.f32.mrb[13].mxu0  ;;  %v1156_v27 = vpop.f32.mrb[13].mxu1 }
 0x15f   :  { %1602 = vst [vmem:[%s2496_s3 + $0x50] sm:$0xff] %v1768_v20  ;;  %1603 = vst [vmem:[%s2496_s3 + $0x58] sm:$0xff] %v1769_v21  ;;  %v1377_v28 = vadd.f32 %v2369_v60, %v970_v26  ;;  %v1379_v29 = vadd.f32 %v2371_v61, %v1156_v27  ;;  %v972_v30 = vpop.f32.mrb[14].mxu0  ;;  %v1158_v31 = vpop.f32.mrb[14].mxu1 }
 0x160   :  { %v1424_v32 = vmax.f32 %v1376_v24, 0.0  ;;  %v1426_v33 = vmax.f32 %v1378_v25, 0.0  ;;  %v1380_v34 = vadd.f32 %v2365_v58, %v972_v30  ;;  %v1382_v35 = vadd.f32 %v2367_v59, %v1158_v31  ;;  %v974_v36 = vpop.f32.mrb[15].mxu0  ;;  %v1160_v37 = vpop.f32.mrb[15].mxu1 }
 0x161   :  { %v1425_v38 = vmax.f32 %v1377_v28, 0.0  ;;  %v1427_v39 = vmax.f32 %v1379_v29, 0.0  ;;  %v1381_v40 = vadd.f32 %v2369_v60, %v974_v36  ;;  %v1383_v41 = vadd.f32 %v2371_v61, %v1160_v37 }
 0x162   :  { %v1428_v42 = vmax.f32 %v1380_v34, 0.0  ;;  %v1430_v43 = vmax.f32 %v1382_v35, 0.0 }
 0x163   :  { %v1770_v44 = vpack.c.bf16 %v1425_v38, %v1424_v32  ;;  %v1771_v45 = vpack.c.bf16 %v1427_v39, %v1426_v33  ;;  %v1429_v46 = vmax.f32 %v1381_v40, 0.0  ;;  %v1431_v47 = vmax.f32 %v1383_v41, 0.0 }
 0x165   :  { %1604 = vst [vmem:[%s2496_s3 + $0x60] sm:$0xff] %v1770_v44  ;;  %1605 = vst [vmem:[%s2496_s3 + $0x68] sm:$0xff] %v1771_v45  ;;  %v1772_v48 = vpack.c.bf16 %v1429_v46, %v1428_v42  ;;  %v1773_v49 = vpack.c.bf16 %v1431_v47, %v1430_v43  ;;  %v978_v50 = vpop.f32.mrb[16].mxu0  ;;  %v1164_v51 = vpop.f32.mrb[16].mxu1 }
 0x166   :  { %v1384_v52 = vadd.f32 %v2365_v58, %v978_v50  ;;  %v1386_v53 = vadd.f32 %v2367_v59, %v1164_v51  ;;  %v980_v54 = vpop.f32.mrb[17].mxu0  ;;  %v1166_v55 = vpop.f32.mrb[17].mxu1 }
 0x167   :  { %1606 = vst [vmem:[%s2496_s3 + $0x70] sm:$0xff] %v1772_v48  ;;  %1607 = vst [vmem:[%s2496_s3 + $0x78] sm:$0xff] %v1773_v49  ;;  %v1385_v56 = vadd.f32 %v2369_v60, %v980_v54  ;;  %v1387_v57 = vadd.f32 %v2371_v61, %v1166_v55  ;;  %v982_v62 = vpop.f32.mrb[18].mxu0  ;;  %v1168_v63 = vpop.f32.mrb[18].mxu1 }
 0x168   :  { %v1432_v0 = vmax.f32 %v1384_v52, 0.0  ;;  %v1434_v1 = vmax.f32 %v1386_v53, 0.0  ;;  %v1388_v2 = vadd.f32 %v2365_v58, %v982_v62  ;;  %v1390_v3 = vadd.f32 %v2367_v59, %v1168_v63  ;;  %v984_v4 = vpop.f32.mrb[19].mxu0  ;;  %v1170_v5 = vpop.f32.mrb[19].mxu1 }
 0x169   :  { %v1433_v6 = vmax.f32 %v1385_v56, 0.0  ;;  %v1435_v7 = vmax.f32 %v1387_v57, 0.0  ;;  %v1389_v8 = vadd.f32 %v2369_v60, %v984_v4  ;;  %v1391_v9 = vadd.f32 %v2371_v61, %v1170_v5 }
 0x16a   :  { %v1436_v10 = vmax.f32 %v1388_v2, 0.0  ;;  %v1438_v11 = vmax.f32 %v1390_v3, 0.0 }
 0x16b   :  { %v1774_v12 = vpack.c.bf16 %v1433_v6, %v1432_v0  ;;  %v1775_v13 = vpack.c.bf16 %v1435_v7, %v1434_v1  ;;  %v1437_v14 = vmax.f32 %v1389_v8, 0.0  ;;  %v1439_v15 = vmax.f32 %v1391_v9, 0.0 }
 0x16d   :  { %1608 = vst [vmem:[%s2496_s3 + $0x80] sm:$0xff] %v1774_v12  ;;  %1609 = vst [vmem:[%s2496_s3 + $0x88] sm:$0xff] %v1775_v13  ;;  %v1776_v16 = vpack.c.bf16 %v1437_v14, %v1436_v10  ;;  %v1777_v17 = vpack.c.bf16 %v1439_v15, %v1438_v11  ;;  %v988_v18 = vpop.f32.mrb[20].mxu0  ;;  %v1174_v19 = vpop.f32.mrb[20].mxu1 }
 0x16e   :  { %v1392_v20 = vadd.f32 %v2365_v58, %v988_v18  ;;  %v1394_v21 = vadd.f32 %v2367_v59, %v1174_v19  ;;  %v990_v22 = vpop.f32.mrb[21].mxu0  ;;  %v1176_v23 = vpop.f32.mrb[21].mxu1 }
 0x16f   :  { %1610 = vst [vmem:[%s2496_s3 + $0x90] sm:$0xff] %v1776_v16  ;;  %1611 = vst [vmem:[%s2496_s3 + $0x98] sm:$0xff] %v1777_v17  ;;  %v1393_v24 = vadd.f32 %v2369_v60, %v990_v22  ;;  %v1395_v25 = vadd.f32 %v2371_v61, %v1176_v23  ;;  %v992_v26 = vpop.f32.mrb[22].mxu0  ;;  %v1178_v27 = vpop.f32.mrb[22].mxu1 }
 0x170   :  { %v1440_v28 = vmax.f32 %v1392_v20, 0.0  ;;  %v1442_v29 = vmax.f32 %v1394_v21, 0.0  ;;  %v1396_v30 = vadd.f32 %v2365_v58, %v992_v26  ;;  %v1398_v31 = vadd.f32 %v2367_v59, %v1178_v27  ;;  %v994_v32 = vpop.f32.mrb[23].mxu0  ;;  %v1180_v33 = vpop.f32.mrb[23].mxu1 }
 0x171   :  { %v1441_v34 = vmax.f32 %v1393_v24, 0.0  ;;  %v1443_v35 = vmax.f32 %v1395_v25, 0.0  ;;  %v1397_v36 = vadd.f32 %v2369_v60, %v994_v32  ;;  %v1399_v37 = vadd.f32 %v2371_v61, %v1180_v33 }
 0x172   :  { %v1444_v38 = vmax.f32 %v1396_v30, 0.0  ;;  %v1446_v39 = vmax.f32 %v1398_v31, 0.0 }
 0x173   :  { %v1778_v40 = vpack.c.bf16 %v1441_v34, %v1440_v28  ;;  %v1779_v41 = vpack.c.bf16 %v1443_v35, %v1442_v29  ;;  %v1445_v42 = vmax.f32 %v1397_v36, 0.0  ;;  %v1447_v43 = vmax.f32 %v1399_v37, 0.0 }
 0x175   :  { %1612 = vst [vmem:[%s2496_s3 + $0xa0] sm:$0xff] %v1778_v40  ;;  %1613 = vst [vmem:[%s2496_s3 + $0xa8] sm:$0xff] %v1779_v41  ;;  %v1780_v58 = vpack.c.bf16 %v1445_v42, %v1444_v38  ;;  %v1781_v59 = vpack.c.bf16 %v1447_v43, %v1446_v39 }
 0x177   :  { %1614 = vst [vmem:[%s2496_s3 + $0xb0] sm:$0xff] %v1780_v58  ;;  %1615 = vst [vmem:[%s2496_s3 + $0xb8] sm:$0xff] %v1781_v59 }

// kernel: generator_for_video_forward.19
= control target key start
LH: loop header
LB: loop body
LE: loop exit
PB: predicated region body
PF: predicated region fallthrough
CT: control target
= control target key end

     0   :  { %s429_s6 = smov 0   ;;  %s431_s7 = smov 0   ;;  %s497_s0 = inlined_call_operand.vmem [shape: bf16[2,4,4,512], index: 0, kind: input, shape index: {}]   ;;  %s498_s1 = inlined_call_operand.vmem [shape: f32[2,1,512], index: 1, kind: output, shape index: {}]  }
   0x1   :  { %s433_s8 = smov 0  }
   0x2 LB: > { %s23_s9 = sadd.s32 1, %s411_s7  ;;  %p360_p0 = scmp.ge.s32.totalorder %s415_s8, 1  ;;  %s415_s8 = sphi %s433_s8, %s11_s8   ;;  %s411_s7 = sphi %s431_s7, %s502_s7   ;;  %s407_s6 = sphi %s429_s6, %s501_s6  }
   0x3   : > { %p25_p1 = scmp.ge.s32.totalorder %s23_s9, 2  ;;  %p107_p2 = scmp.lt.s32.totalorder %s415_s8, 3 }
   0x5   : > { %s504_s9 = smov (%p25_p1, %s23_s9), 0  ;;  %p108_p3 = pnand %p360_p0, %p107_p2 }
   0x6   : > { %p132_p4 = scmp.lt.s32.totalorder (!%p108_p3), %s407_s6, 1  ;;  %v150_v0 = vlaneseq (!%p108_p3)  ;;  %v417_v2 = vmov (!%p108_p3), 0.0   ;;  %vm192_vm1 = vcmask (!%p108_p3), 1043456   ;;  %v418_v59 = vmov (!%p108_p3), 1966171168  }
   0x7   : > { %111 = sbr.rel (%p108_p3) target bundleno = 66 (0x42), region = 24  ;;  %v252_v60 = vunpack.c.l.s4 (!%p108_p3), %v418_v59 }
   0x8   : > { %vm448_vm0 = vcmp.lt.s32.totalorder (!%p108_p3), %v150_v0, 512 }
   0xe   : > { %s506_s6 = smov (!%p132_p4, %s407_s6), 1 }
   0xf   : > { %s366_s10 = sshll.u32 %s506_s6, 5  ;;  %s363_s11 = sshll.u32 %s506_s6, 2 }
  0x10   : > { %s140_s14 = scalar_lea.vmem %s497_s0, %s366_s10  ;;  %s458_s17 = scalar_lea.vmem %s498_s1, %s363_s11 }
  0x11   : > { %154 = vst.msk [vmem:[%s458_s17] sm:$0xf] %vm448_vm0, %v417_v2  ;;  %v155_v3 = vld [vmem:[%s140_s14] sm:$0xff]  ;;  %v156_v4 = vld [vmem:[%s140_s14 + $0x8] sm:$0xff]  ;;  %v157_v5 = vld [vmem:[%s140_s14 + $0x10] sm:$0xff] }
  0x12   : > { %v158_v6 = vld [vmem:[%s140_s14 + $0x18] sm:$0xff]  ;;  %v159_v7 = vunpack.c.l.bf16 %v155_v3  ;;  %v160_v8 = vunpack.c.h.bf16 %v155_v3  ;;  %v161_v9 = vunpack.c.l.bf16 %v156_v4  ;;  %v162_v10 = vunpack.c.h.bf16 %v156_v4 }
  0x13   : > { %v163_v11 = vunpack.c.l.bf16 %v157_v5  ;;  %v164_v12 = vunpack.c.h.bf16 %v157_v5  ;;  %v165_v13 = vunpack.c.l.bf16 %v158_v6  ;;  %v166_v14 = vunpack.c.h.bf16 %v158_v6 }
  0x14   : > { %v176_v15 = vcombine.high %v159_v7, %v159_v7  ;;  %v177_v16 = vcombine.high %v160_v8, %v160_v8  ;;  %v178_v17 = vcombine.high %v161_v9, %v161_v9  ;;  %v179_v18 = vcombine.high %v162_v10, %v162_v10 }
  0x15   : > { %v180_v19 = vcombine.high %v163_v11, %v163_v11  ;;  %v181_v20 = vcombine.high %v164_v12, %v164_v12  ;;  %v182_v21 = vcombine.high %v165_v13, %v165_v13  ;;  %v183_v22 = vcombine.high %v166_v14, %v166_v14 }
  0x16   : > { %v193_v23 = vsel %vm192_vm1, %v159_v7, 0.0  ;;  %v194_v24 = vsel %vm192_vm1, %v161_v9, 0.0  ;;  %v196_v25 = vsel %vm192_vm1, %v163_v11, 0.0  ;;  %v198_v26 = vsel %vm192_vm1, %v165_v13, 0.0 }
  0x17   : > { %v195_v27 = vadd.f32 %v194_v24, %v193_v23  ;;  %v206_v28 = vsel %vm192_vm1, %v176_v15, 0.0  ;;  %v207_v29 = vsel %vm192_vm1, %v178_v17, 0.0  ;;  %v209_v30 = vsel %vm192_vm1, %v180_v19, 0.0 }
  0x18   : > { %v208_v31 = vadd.f32 %v207_v29, %v206_v28  ;;  %v211_v32 = vsel %vm192_vm1, %v182_v21, 0.0  ;;  %v219_v33 = vsel %vm192_vm1, %v160_v8, 0.0  ;;  %v220_v34 = vsel %vm192_vm1, %v162_v10, 0.0 }
  0x19   : > { %v197_v35 = vadd.f32 %v196_v25, %v195_v27  ;;  %v221_v36 = vadd.f32 %v220_v34, %v219_v33  ;;  %v222_v37 = vsel %vm192_vm1, %v164_v12, 0.0  ;;  %v224_v38 = vsel %vm192_vm1, %v166_v14, 0.0 }
  0x1a   : > { %v210_v39 = vadd.f32 %v209_v30, %v208_v31  ;;  %v232_v40 = vsel %vm192_vm1, %v177_v16, 0.0  ;;  %v233_v41 = vsel %vm192_vm1, %v179_v18, 0.0  ;;  %v235_v42 = vsel %vm192_vm1, %v181_v20, 0.0 }
  0x1b   : > { %v199_v43 = vadd.f32 %v198_v26, %v197_v35  ;;  %v223_v44 = vadd.f32 %v222_v37, %v221_v36  ;;  %v234_v45 = vadd.f32 %v233_v41, %v232_v40  ;;  %v237_v47 = vsel %vm192_vm1, %v183_v22, 0.0  ;;  %v167_v22 = vld [vmem:[%s458_s17] sm:$0xf] }
  0x1c   : > { %v212_v46 = vadd.f32 %v211_v32, %v210_v39  ;;  %v255_v4 = vshrl.u32 %v150_v0, 7  ;;  %v253_v8 = vunpack.c.0.s8 %v252_v60 }
  0x1d   : > { %v200_v48 = vrot.slane %v199_v43, 4  ;;  %v225_v49 = vadd.f32 %v224_v38, %v223_v44  ;;  %v236_v50 = vadd.f32 %v235_v42, %v234_v45 }
  0x1e   : > { %v213_v51 = vrot.slane %v212_v46, 4  ;;  %v256_v16 = vsub.s32 %v253_v8, %v255_v4 }
  0x1f   : > { %v201_v52 = vadd.f32 %v200_v48, %v199_v43  ;;  %v226_v53 = vrot.slane %v225_v49, 4  ;;  %v238_v54 = vadd.f32 %v237_v47, %v236_v50 }
  0x20   : > { %v214_v55 = vadd.f32 %v213_v51, %v212_v46 }
  0x21   : > { %v202_v56 = vrot.slane %v201_v52, 2  ;;  %v227_v57 = vadd.f32 %v226_v53, %v225_v49  ;;  %v239_v58 = vrot.slane %v238_v54, 4 }
  0x22   : > { %v215_v61 = vrot.slane %v214_v55, 2 }
  0x23   : > { %v203_v62 = vadd.f32 %v202_v56, %v201_v52  ;;  %v228_v63 = vrot.slane %v227_v57, 2  ;;  %v240_v2 = vadd.f32 %v239_v58, %v238_v54 }
  0x24   : > { %v216_v3 = vadd.f32 %v215_v61, %v214_v55 }
  0x25   : > { %v204_v5 = vrot.slane %v203_v62, 1  ;;  %v229_v6 = vadd.f32 %v228_v63, %v227_v57  ;;  %v241_v7 = vrot.slane %v240_v2, 2 }
  0x26   : > { %v217_v9 = vrot.slane %v216_v3, 1 }
  0x27   : > { %v205_v10 = vadd.f32 %v204_v5, %v203_v62  ;;  %v230_v11 = vrot.slane %v229_v6, 1  ;;  %v242_v12 = vadd.f32 %v241_v7, %v240_v2 }
  0x28   : > { %v218_v13 = vadd.f32 %v217_v9, %v216_v3 }
  0x29   : > { %v231_v14 = vadd.f32 %v230_v11, %v229_v6  ;;  %v243_v15 = vrot.slane %v242_v12, 1 }
  0x2a   : > { %v249_v17 = vcombine.low %v205_v10, %v218_v13 }
  0x2b   : > { %v244_v18 = vadd.f32 %v243_v15, %v242_v12 }
  0x2c   : > { %v257_v0 = vrot.slane %v249_v17, %v256_v16 }
  0x2d   : > { %v250_v19 = vcombine.low %v231_v14, %v244_v18 }
  0x2f   : > { %v264_v20 = vrot.slane %v250_v19, %v256_v16 }
  0x31   : > { %v265_v21 = vcombine.low %v257_v0, %v264_v20 }
  0x33   : > { %v272_v23 = vrot.slane %v265_v21, %v256_v16 }
  0x35   : > { %v274_v24 = vadd.f32 %v272_v23, %v167_v22 }
  0x37   : > { %279 = vst.msk [vmem:[%s458_s17] sm:$0xf] %vm448_vm0, %v274_v24 }
  0x3e   : > { %v283_v25 = vld [vmem:[%s458_s17] sm:$0xf] }
  0x3f   : > { %v284_v26 = vmul.f32 0.0625, %v283_v25 }
  0x41   : > { %285 = vst.msk [vmem:[%s458_s17] sm:$0xf] %vm448_vm0, %v284_v26 }
  0x42 PF: > { %s11_s8 = sadd.s32 1, %s415_s8   ;;  %s501_s6 = smov %s411_s7 }
  0x43   : > { %p8_p5 = scmp.ge.s32.totalorder %s11_s8, 4   ;;  %s502_s7 = smov %s504_s9 }
  0x45   :  { %10 = sbr.rel (!%p8_p5) target bundleno = 2 (0x2), region = 62 }

// kernel: generator_for_video_forward.17
= control target key start
LH: loop header
LB: loop body
LE: loop exit
PB: predicated region body
PF: predicated region fallthrough
CT: control target
= control target key end

     0   :  { %s2148_s12 = smov 0   ;;  %s2150_s13 = smov 0   ;;  %s2382_s0 = inlined_call_operand.vmem [shape: bf16[32,4608], index: 0, kind: input, shape index: {}]   ;;  %s2383_s1 = inlined_call_operand.vmem [shape: bf16[4608,512], index: 1, kind: input, shape index: {}]   ;;  %s2384_s2 = inlined_call_operand.vmem [shape: f32[1,512], index: 2, kind: input, shape index: {}]   ;;  %s2385_s3 = inlined_call_operand.vmem [shape: bf16[32,512], index: 3, kind: output, shape index: {}]  }
   0x1   :  { %s2152_s14 = smov 0   ;;  %s2154_s15 = smov 0  }
   0x2   :  { %s2156_s16 = smov 0  }
   0x3 LB: > { %s25_s17 = sadd.s32 1, %s2121_s15  ;;  %p48_p1 = scmp.ne.s32.totalorder %s2113_s13, %s2109_s12  ;;  %s2125_s16 = sphi %s2156_s16, %s13_s16   ;;  %s2121_s15 = sphi %s2154_s15, %s2389_s15   ;;  %s2117_s14 = sphi %s2152_s14, %s2388_s14   ;;  %s2113_s13 = sphi %s2150_s13, %s2387_s13   ;;  %s2109_s12 = sphi %s2148_s12, %s2386_s12  }
   0x4   : > { %p26_p0 = scmp.ge.s32.totalorder %s25_s17, 9  ;;  %p49_p2 = scmp.eq.s32.totalorder %s2125_s16, 0 }
   0x5   : > { %s41_s19 = sadd.s32 1, %s2113_s13  ;;  %p1657_p5 = scmp.ge.s32.totalorder %s2125_s16, 9 }
   0x6   : > { %s2391_s17 = smov (%p26_p0, %s25_s17), 0  ;;  %p50_p3 = por %p49_p2, %p48_p1 }
   0x7   : > { %s37_s18 = ssub.s32 %s2121_s15, %s2391_s17  ;;  %164 = sbr.rel (%p1657_p5) target bundleno = 22 (0x16), region = 20 }
   0x8   : > { %p39_p4 = scmp.eq.s32.totalorder %s37_s18, 0 }
   0xa   : > { %s2183_s20 = scalar_select %p39_p4, %s2113_s13, %s41_s19  }
   0xe   : > { %167 = sbr.rel (!%p50_p3) target bundleno = 22 (0x16), region = 24  ;;  %s169_s21 = sand.u32 (%p50_p3), 1, %s2113_s13  }
   0xf   : > { %s1816_s22 = sshll.u32 (%p50_p3), %s2121_s15, 4  ;;  %s1658_s23 = sshll.u32 (%p50_p3), %s169_s21, 6 }
  0x10   : > { %s177_s26 = scalar_lea.vmem (%p50_p3), %s2382_s0, %s1816_s22  ;;  %s171_s27 = scalar_lea.vmem (%p50_p3), [#allocation3], %s1658_s23 }
  0x11   : > { %v190_v0 = vld [vmem:[%s177_s26] sm:$0xff] (%p50_p3)  ;;  %v192_v1 = vld [vmem:[%s177_s26 + $0x8] sm:$0xff] (%p50_p3)  ;;  %v194_v2 = vld [vmem:[%s177_s26 + $0x90] sm:$0xff] (%p50_p3) }
  0x12   : > { %191 = vst [vmem:[%s171_s27] sm:$0xff] (%p50_p3), %v190_v0  ;;  %193 = vst [vmem:[%s171_s27 + $0x8] sm:$0xff] (%p50_p3), %v192_v1  ;;  %v196_v3 = vld [vmem:[%s177_s26 + $0x98] sm:$0xff] (%p50_p3)  ;;  %v198_v4 = vld [vmem:[%s177_s26 + $0x120] sm:$0xff] (%p50_p3) }
  0x13   : > { %195 = vst [vmem:[%s171_s27 + $0x10] sm:$0xff] (%p50_p3), %v194_v2  ;;  %v200_v5 = vld [vmem:[%s177_s26 + $0x128] sm:$0xff] (%p50_p3)  ;;  %197 = vst [vmem:[%s171_s27 + $0x18] sm:$0xff] (%p50_p3), %v196_v3  ;;  %v202_v6 = vld [vmem:[%s177_s26 + $0x1b0] sm:$0xff] (%p50_p3) }
  0x14   : > { %199 = vst [vmem:[%s171_s27 + $0x20] sm:$0xff] (%p50_p3), %v198_v4  ;;  %201 = vst [vmem:[%s171_s27 + $0x28] sm:$0xff] (%p50_p3), %v200_v5  ;;  %v204_v7 = vld [vmem:[%s177_s26 + $0x1b8] sm:$0xff] (%p50_p3) }
  0x15   : > { %203 = vst [vmem:[%s171_s27 + $0x30] sm:$0xff] %v202_v6  ;;  %205 = vst [vmem:[%s171_s27 + $0x38] sm:$0xff] %v204_v7 }
  0x16 PF: > { %p1661_p6 = scmp.ge.s32.totalorder %s2125_s16, 1  ;;  %p225_p7 = scmp.lt.s32.totalorder %s2125_s16, 10 }
  0x18   : > { %p226_p8 = pnand %p1661_p6, %p225_p7 }
  0x19   : > { %s232_s28 = sand.u32 (!%p226_p8), 1, %s2109_s12   ;;  %s1663_s29 = sshll.u32 (!%p226_p8), %s2117_s14, 6 }
  0x1a   : > { %229 = sbr.rel (%p226_p8) target bundleno = 412 (0x19c), region = 51  ;;  %s1662_s30 = sshll.u32 (!%p226_p8), %s232_s28, 6 }
  0x1b   : > { %p278_p9 = scmp.lt.s32.totalorder (!%p226_p8), %s1663_s29, 575  ;;  %s2200_s8 = scalar_lea.vmem (!%p226_p8), [#allocation3], %s1662_s30 }
  0x1c   : > { %p1666_p10 = scmp.ne.s32.totalorder (!%p226_p8), %s2117_s14, 0 }
  0x21   : > { %s2393_s29 = smov (!%p278_p9, %s1663_s29), 575  ;;  %308 = sbr.rel (%p1666_p10) target bundleno = 43 (0x2b), region = 59 }
  0x22   : > { %s1817_s4 = sshll.u32 %s2393_s29, 4  ;;  %v2127_v8 = vmov (!%p1666_p10), 0.0  }
  0x23   : > { %s2198_s7 = scalar_lea.vmem %s2383_s1, %s1817_s4  ;;  %309 = vst [vmem:[#allocation2] sm:$0xff] (!%p1666_p10), %v2127_v8  ;;  %310 = vst [vmem:[#allocation2 + $0x8] sm:$0xff] (!%p1666_p10), %v2127_v8 }
  0x24   : > { %311 = vst [vmem:[#allocation2 + $0x10] sm:$0xff] (!%p1666_p10), %v2127_v8  ;;  %312 = vst [vmem:[#allocation2 + $0x18] sm:$0xff] (!%p1666_p10), %v2127_v8 }
  0x25   : > { %313 = vst [vmem:[#allocation2 + $0x20] sm:$0xff] (!%p1666_p10), %v2127_v8  ;;  %314 = vst [vmem:[#allocation2 + $0x28] sm:$0xff] (!%p1666_p10), %v2127_v8 }
  0x26   : > { %315 = vst [vmem:[#allocation2 + $0x30] sm:$0xff] (!%p1666_p10), %v2127_v8  ;;  %316 = vst [vmem:[#allocation2 + $0x38] sm:$0xff] (!%p1666_p10), %v2127_v8 }
  0x27   : > { %317 = vst [vmem:[#allocation2 + $0x40] sm:$0xff] (!%p1666_p10), %v2127_v8  ;;  %318 = vst [vmem:[#allocation2 + $0x48] sm:$0xff] (!%p1666_p10), %v2127_v8 }
  0x28   : > { %319 = vst [vmem:[#allocation2 + $0x50] sm:$0xff] %v2127_v8  ;;  %320 = vst [vmem:[#allocation2 + $0x58] sm:$0xff] %v2127_v8 }
  0x29   : > { %321 = vst [vmem:[#allocation2 + $0x60] sm:$0xff] %v2127_v8  ;;  %322 = vst [vmem:[#allocation2 + $0x68] sm:$0xff] %v2127_v8 }
  0x2a   : > { %323 = vst [vmem:[#allocation2 + $0x70] sm:$0xff] %v2127_v8  ;;  %324 = vst [vmem:[#allocation2 + $0x78] sm:$0xff] %v2127_v8 }
  0x2b PF: > { %v1883_v9 = vld [vmem:[%s2198_s7 + $0x4] ss:$16 sps:$4 sm:$0xff]   ;;  %v1885_v10 = vld [vmem:[%s2198_s7 + $0xc] ss:$16 sps:$4 sm:$0xff]   ;;  %v1887_v11 = vld [vmem:[%s2198_s7] ss:$16 sps:$4 sm:$0xff]  }
  0x2c   : > { %1157 = vmatprep.subr.bf16.mxu0 %v1883_v9  ;;  %v1888_v12 = vld [vmem:[%s2198_s7 + $0x8] ss:$16 sps:$4 sm:$0xff]   ;;  %1263 = vmatprep.subr.bf16.mxu1 %v1885_v10  ;;  %v1889_v13 = vld [vmem:[%s2198_s7 + $0x24] ss:$16 sps:$4 sm:$0xff]   ;;  %v1891_v14 = vld [vmem:[%s2198_s7 + $0x2c] ss:$16 sps:$4 sm:$0xff]  }
  0x2d   : > { %1158 = vmatpush1.bf16.msra.mxu0 %v1887_v11  ;;  %1264 = vmatpush1.bf16.msra.mxu1 %v1888_v12  ;;  %v1893_v15 = vld [vmem:[%s2198_s7 + $0x20] ss:$16 sps:$4 sm:$0xff]   ;;  %v1894_v16 = vld [vmem:[%s2198_s7 + $0x28] ss:$16 sps:$4 sm:$0xff]   ;;  %v1895_v17 = vld [vmem:[%s2198_s7 + $0x44] ss:$16 sps:$4 sm:$0xff]  }
  0x2e   : > { %1159 = vmatprep.subr.bf16.mxu0 %v1889_v13  ;;  %1265 = vmatprep.subr.bf16.mxu1 %v1891_v14  ;;  %v1897_v18 = vld [vmem:[%s2198_s7 + $0x4c] ss:$16 sps:$4 sm:$0xff]   ;;  %v1899_v19 = vld [vmem:[%s2198_s7 + $0x40] ss:$16 sps:$4 sm:$0xff]   ;;  %v1900_v20 = vld [vmem:[%s2198_s7 + $0x48] ss:$16 sps:$4 sm:$0xff]  }
  0x2f   : > { %v1901_v21 = vld [vmem:[%s2198_s7 + $0x64] ss:$16 sps:$4 sm:$0xff]   ;;  %v1903_v22 = vld [vmem:[%s2198_s7 + $0x6c] ss:$16 sps:$4 sm:$0xff]   ;;  %v1905_v23 = vld [vmem:[%s2198_s7 + $0x60] ss:$16 sps:$4 sm:$0xff]  }
  0x30   : > { %v1906_v24 = vld [vmem:[%s2198_s7 + $0x68] ss:$16 sps:$4 sm:$0xff]   ;;  %v1907_v25 = vld [vmem:[%s2198_s7 + $0x84] ss:$16 sps:$4 sm:$0xff]   ;;  %v1909_v26 = vld [vmem:[%s2198_s7 + $0x8c] ss:$16 sps:$4 sm:$0xff]  }
  0x31   : > { %1160 = vmatpush1.bf16.msra.mxu0 %v1893_v15  ;;  %1266 = vmatpush1.bf16.msra.mxu1 %v1894_v16  ;;  %v1911_v27 = vld [vmem:[%s2198_s7 + $0x80] ss:$16 sps:$4 sm:$0xff]   ;;  %v1912_v28 = vld [vmem:[%s2198_s7 + $0x88] ss:$16 sps:$4 sm:$0xff]   ;;  %v1913_v29 = vld [vmem:[%s2198_s7 + $0xa4] ss:$16 sps:$4 sm:$0xff]  }
  0x32   : > { %1161 = vmatprep.subr.bf16.mxu0 %v1895_v17  ;;  %1267 = vmatprep.subr.bf16.mxu1 %v1897_v18  ;;  %v1915_v30 = vld [vmem:[%s2198_s7 + $0xac] ss:$16 sps:$4 sm:$0xff]   ;;  %v1917_v31 = vld [vmem:[%s2198_s7 + $0xa0] ss:$16 sps:$4 sm:$0xff]   ;;  %v1918_v32 = vld [vmem:[%s2198_s7 + $0xa8] ss:$16 sps:$4 sm:$0xff]  }
  0x33   : > { %v1919_v33 = vld [vmem:[%s2198_s7 + $0xc4] ss:$16 sps:$4 sm:$0xff]   ;;  %v1921_v34 = vld [vmem:[%s2198_s7 + $0xcc] ss:$16 sps:$4 sm:$0xff]   ;;  %v1923_v35 = vld [vmem:[%s2198_s7 + $0xc0] ss:$16 sps:$4 sm:$0xff]  }
  0x34   : > { %v1924_v36 = vld [vmem:[%s2198_s7 + $0xc8] ss:$16 sps:$4 sm:$0xff]   ;;  %v1925_v37 = vld [vmem:[%s2198_s7 + $0xe4] ss:$16 sps:$4 sm:$0xff]   ;;  %v1927_v38 = vld [vmem:[%s2198_s7 + $0xec] ss:$16 sps:$4 sm:$0xff]  }
  0x35   : > { %1162 = vmatpush1.bf16.msra.mxu0 %v1899_v19  ;;  %1268 = vmatpush1.bf16.msra.mxu1 %v1900_v20  ;;  %v1929_v39 = vld [vmem:[%s2198_s7 + $0xe0] ss:$16 sps:$4 sm:$0xff]   ;;  %v1930_v40 = vld [vmem:[%s2198_s7 + $0xe8] ss:$16 sps:$4 sm:$0xff]   ;;  %v1931_v41 = vld [vmem:[%s2198_s7 + $0x104] ss:$16 sps:$4 sm:$0xff]  }
  0x36   : > { %1163 = vmatprep.subr.bf16.mxu0 %v1901_v21  ;;  %1269 = vmatprep.subr.bf16.mxu1 %v1903_v22  ;;  %v1933_v42 = vld [vmem:[%s2198_s7 + $0x10c] ss:$16 sps:$4 sm:$0xff]   ;;  %v1935_v43 = vld [vmem:[%s2198_s7 + $0x100] ss:$16 sps:$4 sm:$0xff]   ;;  %v1936_v44 = vld [vmem:[%s2198_s7 + $0x108] ss:$16 sps:$4 sm:$0xff]  }
  0x37   : > { %v1937_v45 = vld [vmem:[%s2198_s7 + $0x124] ss:$16 sps:$4 sm:$0xff]   ;;  %v1939_v46 = vld [vmem:[%s2198_s7 + $0x12c] ss:$16 sps:$4 sm:$0xff]   ;;  %v1941_v47 = vld [vmem:[%s2198_s7 + $0x120] ss:$16 sps:$4 sm:$0xff]  }
  0x38   : > { %v1942_v48 = vld [vmem:[%s2198_s7 + $0x128] ss:$16 sps:$4 sm:$0xff]   ;;  %v1943_v49 = vld [vmem:[%s2198_s7 + $0x144] ss:$16 sps:$4 sm:$0xff]   ;;  %v1945_v50 = vld [vmem:[%s2198_s7 + $0x14c] ss:$16 sps:$4 sm:$0xff]  }
  0x39   : > { %1164 = vmatpush1.bf16.msra.mxu0 %v1905_v23  ;;  %1270 = vmatpush1.bf16.msra.mxu1 %v1906_v24  ;;  %v1947_v51 = vld [vmem:[%s2198_s7 + $0x140] ss:$16 sps:$4 sm:$0xff]   ;;  %v1948_v52 = vld [vmem:[%s2198_s7 + $0x148] ss:$16 sps:$4 sm:$0xff]   ;;  %v1949_v53 = vld [vmem:[%s2198_s7 + $0x164] ss:$16 sps:$4 sm:$0xff]  }
  0x3a   : > { %1165 = vmatprep.subr.bf16.mxu0 %v1907_v25  ;;  %1271 = vmatprep.subr.bf16.mxu1 %v1909_v26  ;;  %v1951_v54 = vld [vmem:[%s2198_s7 + $0x16c] ss:$16 sps:$4 sm:$0xff]   ;;  %v1953_v55 = vld [vmem:[%s2198_s7 + $0x160] ss:$16 sps:$4 sm:$0xff]   ;;  %v1954_v56 = vld [vmem:[%s2198_s7 + $0x168] ss:$16 sps:$4 sm:$0xff]  }
  0x3b   : > { %v1981_v57 = vld [vmem:[%s2200_s8 + $0x4] ss:$16 sps:$4 sm:$0xff]   ;;  %v1957_v59 = vld [vmem:[%s2198_s7 + $0x18c] ss:$16 sps:$4 sm:$0xff]   ;;  %v1959_v60 = vld [vmem:[%s2198_s7 + $0x180] ss:$16 sps:$4 sm:$0xff]  }
  0x3c   : > { %v1955_v58 = vld [vmem:[%s2198_s7 + $0x184] ss:$16 sps:$4 sm:$0xff]   ;;  %1189 = vmatprep.mubr.bf16.mxu0 %v1981_v57  ;;  %1295 = vmatprep.mubr.bf16.mxu1 %v1981_v57  ;;  %v1960_v61 = vld [vmem:[%s2198_s7 + $0x188] ss:$16 sps:$4 sm:$0xff]   ;;  %v1963_v63 = vld [vmem:[%s2198_s7 + $0x1ac] ss:$16 sps:$4 sm:$0xff]  }
  0x3d   : > { %1166 = vmatpush1.bf16.msra.mxu0 %v1911_v27  ;;  %1272 = vmatpush1.bf16.msra.mxu1 %v1912_v28  ;;  %v1961_v62 = vld [vmem:[%s2198_s7 + $0x1a4] ss:$16 sps:$4 sm:$0xff]   ;;  %v1965_v0 = vld [vmem:[%s2198_s7 + $0x1a0] ss:$16 sps:$4 sm:$0xff]   ;;  %v1966_v1 = vld [vmem:[%s2198_s7 + $0x1a8] ss:$16 sps:$4 sm:$0xff]  }
  0x3e   : > { %1167 = vmatprep.subr.bf16.mxu0 %v1913_v29  ;;  %1273 = vmatprep.subr.bf16.mxu1 %v1915_v30  ;;  %v1967_v2 = vld [vmem:[%s2198_s7 + $0x1c4] ss:$16 sps:$4 sm:$0xff]   ;;  %v1969_v3 = vld [vmem:[%s2198_s7 + $0x1cc] ss:$16 sps:$4 sm:$0xff]   ;;  %v1971_v4 = vld [vmem:[%s2198_s7 + $0x1c0] ss:$16 sps:$4 sm:$0xff]  }
  0x3f   : > { %v1972_v5 = vld [vmem:[%s2198_s7 + $0x1c8] ss:$16 sps:$4 sm:$0xff]   ;;  %v1973_v6 = vld [vmem:[%s2198_s7 + $0x1e4] ss:$16 sps:$4 sm:$0xff]   ;;  %v1975_v7 = vld [vmem:[%s2198_s7 + $0x1ec] ss:$16 sps:$4 sm:$0xff]  }
  0x40   : > { %v1977_v8 = vld [vmem:[%s2198_s7 + $0x1e0] ss:$16 sps:$4 sm:$0xff]   ;;  %v1978_v9 = vld [vmem:[%s2198_s7 + $0x1e8] ss:$16 sps:$4 sm:$0xff]   ;;  %v1984_v10 = vld [vmem:[%s2198_s7 + $0x204] ss:$16 sps:$4 sm:$0xff]  }
  0x41   : > { %1168 = vmatpush1.bf16.msra.mxu0 %v1917_v31  ;;  %1274 = vmatpush1.bf16.msra.mxu1 %v1918_v32  ;;  %v1987_v11 = vld [vmem:[%s2198_s7 + $0x20c] ss:$16 sps:$4 sm:$0xff]   ;;  %v1979_v12 = vld [vmem:[%s2200_s8] ss:$16 sps:$4 sm:$0xff]   ;;  %v1985_v14 = vld [vmem:[%s2198_s7 + $0x208] ss:$16 sps:$4 sm:$0xff]  }
  0x42   : > { %1169 = vmatprep.subr.bf16.mxu0 %v1919_v33  ;;  %1275 = vmatprep.subr.bf16.mxu1 %v1921_v34  ;;  %v1982_v13 = vld [vmem:[%s2198_s7 + $0x200] ss:$16 sps:$4 sm:$0xff]   ;;  %v1990_v15 = vld [vmem:[%s2198_s7 + $0x224] ss:$16 sps:$4 sm:$0xff]   ;;  %v1993_v16 = vld [vmem:[%s2198_s7 + $0x22c] ss:$16 sps:$4 sm:$0xff]  }
  0x43   : > { %v1988_v17 = vld [vmem:[%s2198_s7 + $0x220] ss:$16 sps:$4 sm:$0xff]   ;;  %v1991_v18 = vld [vmem:[%s2198_s7 + $0x228] ss:$16 sps:$4 sm:$0xff]   ;;  %v1996_v19 = vld [vmem:[%s2198_s7 + $0x244] ss:$16 sps:$4 sm:$0xff]  }
  0x44   : > { %v1999_v20 = vld [vmem:[%s2198_s7 + $0x24c] ss:$16 sps:$4 sm:$0xff]   ;;  %v1994_v21 = vld [vmem:[%s2198_s7 + $0x240] ss:$16 sps:$4 sm:$0xff]   ;;  %v1997_v22 = vld [vmem:[%s2198_s7 + $0x248] ss:$16 sps:$4 sm:$0xff]  }
  0x45   : > { %1170 = vmatpush1.bf16.msra.mxu0 %v1923_v35  ;;  %1276 = vmatpush1.bf16.msra.mxu1 %v1924_v36  ;;  %v2002_v23 = vld [vmem:[%s2198_s7 + $0x264] ss:$16 sps:$4 sm:$0xff]   ;;  %v2005_v24 = vld [vmem:[%s2198_s7 + $0x26c] ss:$16 sps:$4 sm:$0xff]   ;;  %v2000_v25 = vld [vmem:[%s2198_s7 + $0x260] ss:$16 sps:$4 sm:$0xff]  }
  0x46   : > { %1171 = vmatprep.subr.bf16.mxu0 %v1925_v37  ;;  %1277 = vmatprep.subr.bf16.mxu1 %v1927_v38  ;;  %v2003_v26 = vld [vmem:[%s2198_s7 + $0x268] ss:$16 sps:$4 sm:$0xff]   ;;  %v2008_v27 = vld [vmem:[%s2198_s7 + $0x284] ss:$16 sps:$4 sm:$0xff]   ;;  %v2011_v28 = vld [vmem:[%s2198_s7 + $0x28c] ss:$16 sps:$4 sm:$0xff]  }
  0x47   : > { %v2006_v29 = vld [vmem:[%s2198_s7 + $0x280] ss:$16 sps:$4 sm:$0xff]   ;;  %v2009_v30 = vld [vmem:[%s2198_s7 + $0x288] ss:$16 sps:$4 sm:$0xff]   ;;  %v2014_v31 = vld [vmem:[%s2198_s7 + $0x2a4] ss:$16 sps:$4 sm:$0xff]  }
  0x48   : > { %v2017_v32 = vld [vmem:[%s2198_s7 + $0x2ac] ss:$16 sps:$4 sm:$0xff]   ;;  %v2012_v33 = vld [vmem:[%s2198_s7 + $0x2a0] ss:$16 sps:$4 sm:$0xff]   ;;  %v2066_v34 = vld [vmem:[%s2200_s8 + $0x24] ss:$16 sps:$4 sm:$0xff]  }
  0x49   : > { %1172 = vmatpush1.bf16.msra.mxu0 %v1929_v39  ;;  %1278 = vmatpush1.bf16.msra.mxu1 %v1930_v40  ;;  %v2015_v35 = vld [vmem:[%s2198_s7 + $0x2a8] ss:$16 sps:$4 sm:$0xff]   ;;  %v2068_v36 = vld [vmem:[%s2200_s8 + $0x20] ss:$16 sps:$4 sm:$0xff]   ;;  %v2020_v37 = vld [vmem:[%s2198_s7 + $0x2c4] ss:$16 sps:$4 sm:$0xff]  }
  0x4a   : > { %1173 = vmatprep.subr.bf16.mxu0 %v1931_v41  ;;  %1279 = vmatprep.subr.bf16.mxu1 %v1933_v42  ;;  %v2023_v38 = vld [vmem:[%s2198_s7 + $0x2cc] ss:$16 sps:$4 sm:$0xff]   ;;  %v2018_v39 = vld [vmem:[%s2198_s7 + $0x2c0] ss:$16 sps:$4 sm:$0xff]   ;;  %v2021_v40 = vld [vmem:[%s2198_s7 + $0x2c8] ss:$16 sps:$4 sm:$0xff]  }
  0x4b   : > { %v2026_v41 = vld [vmem:[%s2198_s7 + $0x2e4] ss:$16 sps:$4 sm:$0xff]   ;;  %v2029_v42 = vld [vmem:[%s2198_s7 + $0x2ec] ss:$16 sps:$4 sm:$0xff]   ;;  %v2045_v57 = vld [vmem:[%s2198_s7 + $0x348] ss:$16 sps:$4 sm:$0xff]  }
  0x4c   : > { %p1803_p11 = scmp.ne.s32.totalorder %s2117_s14, 8 }
  0x4d   : > { %1174 = vmatpush1.bf16.msra.mxu0 %v1935_v43  ;;  %1280 = vmatpush1.bf16.msra.mxu1 %v1936_v44  ;;  %v2083_v43 = vld [vmem:[%s2200_s8 + $0xc] ss:$16 sps:$4 sm:$0xff]   ;;  %v2024_v44 = vld [vmem:[%s2198_s7 + $0x2e0] ss:$16 sps:$4 sm:$0xff]  }
  0x4e   : > { %1175 = vmatprep.subr.bf16.mxu0 %v1937_v45  ;;  %1281 = vmatprep.subr.bf16.mxu1 %v1939_v46  ;;  %v2027_v45 = vld [vmem:[%s2198_s7 + $0x2e8] ss:$16 sps:$4 sm:$0xff]   ;;  %v2032_v46 = vld [vmem:[%s2198_s7 + $0x304] ss:$16 sps:$4 sm:$0xff]  }
  0x51   : > { %1176 = vmatpush1.bf16.msra.mxu0 %v1941_v47  ;;  %1282 = vmatpush1.bf16.msra.mxu1 %v1942_v48  ;;  %v2035_v47 = vld [vmem:[%s2198_s7 + $0x30c] ss:$16 sps:$4 sm:$0xff]   ;;  %v2030_v48 = vld [vmem:[%s2198_s7 + $0x300] ss:$16 sps:$4 sm:$0xff]  }
  0x52   : > { %1177 = vmatprep.subr.bf16.mxu0 %v1943_v49  ;;  %1283 = vmatprep.subr.bf16.mxu1 %v1945_v50  ;;  %v2033_v49 = vld [vmem:[%s2198_s7 + $0x308] ss:$16 sps:$4 sm:$0xff]   ;;  %v2038_v50 = vld [vmem:[%s2198_s7 + $0x324] ss:$16 sps:$4 sm:$0xff]  }
  0x55   : > { %1178 = vmatpush1.bf16.msra.mxu0 %v1947_v51  ;;  %1284 = vmatpush1.bf16.msra.mxu1 %v1948_v52  ;;  %v2041_v51 = vld [vmem:[%s2198_s7 + $0x32c] ss:$16 sps:$4 sm:$0xff]   ;;  %v2036_v52 = vld [vmem:[%s2198_s7 + $0x320] ss:$16 sps:$4 sm:$0xff]  }
  0x56   : > { %1179 = vmatprep.subr.bf16.mxu0 %v1949_v53  ;;  %1285 = vmatprep.subr.bf16.mxu1 %v1951_v54  ;;  %v2039_v53 = vld [vmem:[%s2198_s7 + $0x328] ss:$16 sps:$4 sm:$0xff]   ;;  %v2044_v54 = vld [vmem:[%s2198_s7 + $0x344] ss:$16 sps:$4 sm:$0xff]  }
  0x59   : > { %1180 = vmatpush1.bf16.msra.mxu0 %v1953_v55  ;;  %1286 = vmatpush1.bf16.msra.mxu1 %v1954_v56  ;;  %v2047_v55 = vld [vmem:[%s2198_s7 + $0x34c] ss:$16 sps:$4 sm:$0xff]   ;;  %v2042_v56 = vld [vmem:[%s2198_s7 + $0x340] ss:$16 sps:$4 sm:$0xff]  }
  0x5a   : > { %1181 = vmatprep.subr.bf16.mxu0 %v1955_v58  ;;  %1287 = vmatprep.subr.bf16.mxu1 %v1957_v59  ;;  %v2050_v58 = vld [vmem:[%s2198_s7 + $0x364] ss:$16 sps:$4 sm:$0xff]   ;;  %v2053_v59 = vld [vmem:[%s2198_s7 + $0x36c] ss:$16 sps:$4 sm:$0xff]  }
  0x5d   : > { %1182 = vmatpush1.bf16.msra.mxu0 %v1959_v60  ;;  %1288 = vmatpush1.bf16.msra.mxu1 %v1960_v61  ;;  %v2048_v60 = vld [vmem:[%s2198_s7 + $0x360] ss:$16 sps:$4 sm:$0xff]   ;;  %v2051_v61 = vld [vmem:[%s2198_s7 + $0x368] ss:$16 sps:$4 sm:$0xff]  }
  0x5e   : > { %1183 = vmatprep.subr.bf16.mxu0 %v1961_v62  ;;  %1289 = vmatprep.subr.bf16.mxu1 %v1963_v63  ;;  %v2056_v62 = vld [vmem:[%s2198_s7 + $0x384] ss:$16 sps:$4 sm:$0xff]   ;;  %v2059_v63 = vld [vmem:[%s2198_s7 + $0x38c] ss:$16 sps:$4 sm:$0xff]  }
  0x61   : > { %1184 = vmatpush1.bf16.msra.mxu0 %v1965_v0  ;;  %1290 = vmatpush1.bf16.msra.mxu1 %v1966_v1  ;;  %v2054_v0 = vld [vmem:[%s2198_s7 + $0x380] ss:$16 sps:$4 sm:$0xff]   ;;  %v2057_v1 = vld [vmem:[%s2198_s7 + $0x388] ss:$16 sps:$4 sm:$0xff]  }
  0x62   : > { %1185 = vmatprep.subr.bf16.mxu0 %v1967_v2  ;;  %1291 = vmatprep.subr.bf16.mxu1 %v1969_v3  ;;  %v2062_v2 = vld [vmem:[%s2198_s7 + $0x3a4] ss:$16 sps:$4 sm:$0xff]   ;;  %v2065_v3 = vld [vmem:[%s2198_s7 + $0x3ac] ss:$16 sps:$4 sm:$0xff]  }
  0x65   : > { %1186 = vmatpush1.bf16.msra.mxu0 %v1971_v4  ;;  %1292 = vmatpush1.bf16.msra.mxu1 %v1972_v5  ;;  %v2060_v4 = vld [vmem:[%s2198_s7 + $0x3a0] ss:$16 sps:$4 sm:$0xff]   ;;  %v2063_v5 = vld [vmem:[%s2198_s7 + $0x3a8] ss:$16 sps:$4 sm:$0xff]  }
  0x66   : > { %1187 = vmatprep.subr.bf16.mxu0 %v1973_v6  ;;  %1293 = vmatprep.subr.bf16.mxu1 %v1975_v7  ;;  %v2071_v6 = vld [vmem:[%s2198_s7 + $0x3c4] ss:$16 sps:$4 sm:$0xff]   ;;  %v2074_v7 = vld [vmem:[%s2198_s7 + $0x3cc] ss:$16 sps:$4 sm:$0xff]  }
  0x69   : > { %1188 = vmatpush1.bf16.msra.mxu0 %v1977_v8  ;;  %1294 = vmatpush1.bf16.msra.mxu1 %v1978_v9  ;;  %v2069_v8 = vld [vmem:[%s2198_s7 + $0x3c0] ss:$16 sps:$4 sm:$0xff]   ;;  %v2072_v9 = vld [vmem:[%s2198_s7 + $0x3c8] ss:$16 sps:$4 sm:$0xff]  }
  0x6a   : > { %1210 = vmatprep.subr.bf16.mxu0 %v1984_v10  ;;  %1316 = vmatprep.subr.bf16.mxu1 %v1987_v11  ;;  %v2077_v10 = vld [vmem:[%s2198_s7 + $0x3e4] ss:$16 sps:$4 sm:$0xff]   ;;  %v2080_v11 = vld [vmem:[%s2198_s7 + $0x3ec] ss:$16 sps:$4 sm:$0xff]  }
  0x6c   : > { %1190 = vmatmul.mubr.bf16.vlgmr.msra.gmra.mrb[0].mxu0 %v1979_v12  ;;  %1296 = vmatmul.mubr.bf16.vlgmr.msra.gmra.mrb[0].mxu1 %v1979_v12  ;;  %v2075_v12 = vld [vmem:[%s2198_s7 + $0x3e0] ss:$16 sps:$4 sm:$0xff]  }
  0x6d   : > { %1211 = vmatpush1.bf16.msra.mxu0 %v1982_v13  ;;  %1317 = vmatpush1.bf16.msra.mxu1 %v1985_v14  ;;  %v2078_v13 = vld [vmem:[%s2198_s7 + $0x3e8] ss:$16 sps:$4 sm:$0xff]  }
  0x6e   : > { %1212 = vmatprep.subr.bf16.mxu0 %v1990_v15  ;;  %1318 = vmatprep.subr.bf16.mxu1 %v1993_v16  ;;  %v2081_v14 = vld [vmem:[%s2200_s8 + $0x8] ss:$16 sps:$4 sm:$0xff]   ;;  %v2084_v15 = vld [vmem:[%s2200_s8 + $0x2c] ss:$16 sps:$4 sm:$0xff]  }
  0x6f   : > { %1199 = vmatprep.mubr.bf16.mxu0 %v2066_v34  ;;  %1305 = vmatprep.mubr.bf16.mxu1 %v2066_v34  ;;  %v2086_v16 = vld [vmem:[%s2200_s8 + $0x28] ss:$16 sps:$4 sm:$0xff]  }
  0x71   : > { %1213 = vmatpush1.bf16.msra.mxu0 %v1988_v17  ;;  %1319 = vmatpush1.bf16.msra.mxu1 %v1991_v18  ;;  %v325_v17 = vld [vmem:[#allocation2] sm:$0xff]  ;;  %v327_v18 = vld [vmem:[#allocation2 + $0x10] sm:$0xff] }
  0x72   : > { %1214 = vmatprep.subr.bf16.mxu0 %v1996_v19  ;;  %1320 = vmatprep.subr.bf16.mxu1 %v1999_v20  ;;  %v326_v19 = vld [vmem:[#allocation2 + $0x8] sm:$0xff]  ;;  %v328_v20 = vld [vmem:[#allocation2 + $0x18] sm:$0xff] }
  0x74   : > { %1200 = vmatmul.mubr.bf16.gmra.mrb[4].mxu0 %v2068_v36  ;;  %1306 = vmatmul.mubr.bf16.gmra.mrb[4].mxu1 %v2068_v36 }
  0x75   : > { %1215 = vmatpush1.bf16.msra.mxu0 %v1994_v21  ;;  %1321 = vmatpush1.bf16.msra.mxu1 %v1997_v22 }
  0x76   : > { %1216 = vmatprep.subr.bf16.mxu0 %v2002_v23  ;;  %1322 = vmatprep.subr.bf16.mxu1 %v2005_v24  ;;  %v329_v23 = vld [vmem:[#allocation2 + $0x20] sm:$0xff]  ;;  %v331_v24 = vld [vmem:[#allocation2 + $0x30] sm:$0xff] }
  0x77   : > { %1242 = vmatprep.mubr.bf16.mxu0 %v2083_v43  ;;  %1348 = vmatprep.mubr.bf16.mxu1 %v2083_v43  ;;  %v334_v43 = vld [vmem:[#allocation2 + $0x48] sm:$0xff] }
  0x79   : > { %1217 = vmatpush1.bf16.msra.mxu0 %v2000_v25  ;;  %1323 = vmatpush1.bf16.msra.mxu1 %v2003_v26 }
  0x7a   : > { %1218 = vmatprep.subr.bf16.mxu0 %v2008_v27  ;;  %1324 = vmatprep.subr.bf16.mxu1 %v2011_v28 }
  0x7d   : > { %1219 = vmatpush1.bf16.msra.mxu0 %v2006_v29  ;;  %1325 = vmatpush1.bf16.msra.mxu1 %v2009_v30  ;;  %v330_v29 = vld [vmem:[#allocation2 + $0x28] sm:$0xff]  ;;  %v332_v30 = vld [vmem:[#allocation2 + $0x38] sm:$0xff] }
  0x7e   : > { %1220 = vmatprep.subr.bf16.mxu0 %v2014_v31  ;;  %1326 = vmatprep.subr.bf16.mxu1 %v2017_v32 }
  0x81   : > { %1221 = vmatpush1.bf16.msra.mxu0 %v2012_v33  ;;  %1327 = vmatpush1.bf16.msra.mxu1 %v2015_v35 }
  0x82   : > { %1222 = vmatprep.subr.bf16.mxu0 %v2020_v37  ;;  %1328 = vmatprep.subr.bf16.mxu1 %v2023_v38 }
  0x85   : > { %1223 = vmatpush1.bf16.msra.mxu0 %v2018_v39  ;;  %1329 = vmatpush1.bf16.msra.mxu1 %v2021_v40 }
  0x86   : > { %1224 = vmatprep.subr.bf16.mxu0 %v2026_v41  ;;  %1330 = vmatprep.subr.bf16.mxu1 %v2029_v42  ;;  %v333_v41 = vld [vmem:[#allocation2 + $0x40] sm:$0xff]  ;;  %v335_v42 = vld [vmem:[#allocation2 + $0x50] sm:$0xff] }
  0x89   : > { %1225 = vmatpush1.bf16.msra.mxu0 %v2024_v44  ;;  %1331 = vmatpush1.bf16.msra.mxu1 %v2027_v45  ;;  %v336_v44 = vld [vmem:[#allocation2 + $0x58] sm:$0xff] }
  0x8a   : > { %1226 = vmatprep.subr.bf16.mxu0 %v2032_v46  ;;  %1332 = vmatprep.subr.bf16.mxu1 %v2035_v47  ;;  %v337_v47 = vld [vmem:[#allocation2 + $0x60] sm:$0xff] }
  0x8d   : > { %1227 = vmatpush1.bf16.msra.mxu0 %v2030_v48  ;;  %1333 = vmatpush1.bf16.msra.mxu1 %v2033_v49  ;;  %v339_v48 = vld [vmem:[#allocation2 + $0x70] sm:$0xff] }
  0x8e   : > { %1228 = vmatprep.subr.bf16.mxu0 %v2038_v50  ;;  %1334 = vmatprep.subr.bf16.mxu1 %v2041_v51 }
  0x91   : > { %1229 = vmatpush1.bf16.msra.mxu0 %v2036_v52  ;;  %1335 = vmatpush1.bf16.msra.mxu1 %v2039_v53  ;;  %v338_v53 = vld [vmem:[#allocation2 + $0x68] sm:$0xff] }
  0x92   : > { %1230 = vmatprep.subr.bf16.mxu0 %v2044_v54  ;;  %1336 = vmatprep.subr.bf16.mxu1 %v2047_v55  ;;  %v340_v54 = vld [vmem:[#allocation2 + $0x78] sm:$0xff] }
  0x95   : > { %1231 = vmatpush1.bf16.msra.mxu0 %v2042_v56  ;;  %1337 = vmatpush1.bf16.msra.mxu1 %v2045_v57 }
  0x96   : > { %1232 = vmatprep.subr.bf16.mxu0 %v2050_v58  ;;  %1338 = vmatprep.subr.bf16.mxu1 %v2053_v59 }
  0x99   : > { %1233 = vmatpush1.bf16.msra.mxu0 %v2048_v60  ;;  %1339 = vmatpush1.bf16.msra.mxu1 %v2051_v61 }
  0x9a   : > { %1234 = vmatprep.subr.bf16.mxu0 %v2056_v62  ;;  %1340 = vmatprep.subr.bf16.mxu1 %v2059_v63 }
  0x9d   : > { %1235 = vmatpush1.bf16.msra.mxu0 %v2054_v0  ;;  %1341 = vmatpush1.bf16.msra.mxu1 %v2057_v1  ;;  %v1423_v1 = vlaneseq (!%p1803_p11) }
  0x9e   : > { %1236 = vmatprep.subr.bf16.mxu0 %v2062_v2  ;;  %1342 = vmatprep.subr.bf16.mxu1 %v2065_v3  ;;  %v1421_v3 = vld [vmem:[%s2384_s2] sm:$0xf] (!%p1803_p11) }
  0x9f   : > { %v1424_v2 = vshrl.u32 (!%p1803_p11), %v1423_v1, 7 }
  0xa1   : > { %1237 = vmatpush1.bf16.msra.mxu0 %v2060_v4  ;;  %1343 = vmatpush1.bf16.msra.mxu1 %v2063_v5 }
  0xa2   : > { %1238 = vmatprep.subr.bf16.mxu0 %v2071_v6  ;;  %1344 = vmatprep.subr.bf16.mxu1 %v2074_v7  ;;  %v1425_v6 = vsub.s32 (!%p1803_p11), 0, %v1424_v2  ;;  %v1429_v7 = vsub.s32 (!%p1803_p11), 1, %v1424_v2 }
  0xa5   : > { %1239 = vmatpush1.bf16.msra.mxu0 %v2069_v8  ;;  %1345 = vmatpush1.bf16.msra.mxu1 %v2072_v9  ;;  %v1433_v8 = vsub.s32 (!%p1803_p11), 2, %v1424_v2  ;;  %v1437_v9 = vsub.s32 (!%p1803_p11), 3, %v1424_v2 }
  0xa6   : > { %1240 = vmatprep.subr.bf16.mxu0 %v2077_v10  ;;  %1346 = vmatprep.subr.bf16.mxu1 %v2080_v11 }
  0xa9   : > { %1241 = vmatpush1.bf16.msra.mxu0 %v2075_v12  ;;  %1347 = vmatpush1.bf16.msra.mxu1 %v2078_v13  ;;  %v1426_v13 = vrot.slane (!%p1803_p11), %v1421_v3, %v1425_v6 }
  0xac   : > { %1243 = vmatmul.mubr.bf16.vlgmr.msra.gmra.mrb[0].mxu0 %v2081_v14  ;;  %1349 = vmatmul.mubr.bf16.vlgmr.msra.gmra.mrb[0].mxu1 %v2081_v14  ;;  %v1430_v14 = vrot.slane (!%p1803_p11), %v1421_v3, %v1429_v7 }
  0xad   : > { %1252 = vmatprep.mubr.bf16.mxu0 %v2084_v15  ;;  %1358 = vmatprep.mubr.bf16.mxu1 %v2084_v15  ;;  %v1434_v15 = vrot.slane (!%p1803_p11), %v1421_v3, %v1433_v8 }
  0xb4   : > { %1253 = vmatmul.mubr.bf16.gmra.mrb[4].mxu0 %v2086_v16  ;;  %1359 = vmatmul.mubr.bf16.gmra.mrb[4].mxu1 %v2086_v16  ;;  %v1438_v16 = vrot.slane (!%p1803_p11), %v1421_v3, %v1437_v9 }
 0x17f   : > { %v1244_v21 = vpop.f32.mrb[0].mxu0  ;;  %v1350_v22 = vpop.f32.mrb[0].mxu1 }
 0x180   : > { %v1369_v25 = vadd.f32 %v1244_v21, %v325_v17  ;;  %v1371_v26 = vadd.f32 %v1350_v22, %v327_v18  ;;  %v1246_v27 = vpop.f32.mrb[1].mxu0  ;;  %v1352_v28 = vpop.f32.mrb[1].mxu1 }
 0x181   : > { %v1370_v31 = vadd.f32 %v1246_v27, %v326_v19  ;;  %v1372_v32 = vadd.f32 %v1352_v28, %v328_v20  ;;  %v1248_v33 = vpop.f32.mrb[2].mxu0  ;;  %v1354_v34 = vpop.f32.mrb[2].mxu1 }
 0x182   : > { %1385 = vst [vmem:[#allocation2] sm:$0xff] %v1369_v25  ;;  %1387 = vst [vmem:[#allocation2 + $0x10] sm:$0xff] %v1371_v26  ;;  %v1373_v35 = vadd.f32 %v1248_v33, %v329_v23  ;;  %v1375_v36 = vadd.f32 %v1354_v34, %v331_v24  ;;  %v1250_v37 = vpop.f32.mrb[3].mxu0  ;;  %v1356_v38 = vpop.f32.mrb[3].mxu1 }
 0x183   : > { %1386 = vst [vmem:[#allocation2 + $0x8] sm:$0xff] %v1370_v31  ;;  %1388 = vst [vmem:[#allocation2 + $0x18] sm:$0xff] %v1372_v32  ;;  %v1374_v39 = vadd.f32 %v1250_v37, %v330_v29  ;;  %v1376_v40 = vadd.f32 %v1356_v38, %v332_v30 }
 0x184   : > { %1389 = vst [vmem:[#allocation2 + $0x20] sm:$0xff] %v1373_v35  ;;  %1391 = vst [vmem:[#allocation2 + $0x30] sm:$0xff] %v1375_v36 }
 0x185   : > { %1390 = vst [vmem:[#allocation2 + $0x28] sm:$0xff] %v1374_v39  ;;  %1392 = vst [vmem:[#allocation2 + $0x38] sm:$0xff] %v1376_v40 }
 0x187   : > { %v1254_v45 = vpop.f32.mrb[4].mxu0  ;;  %v1360_v46 = vpop.f32.mrb[4].mxu1  ;;  %1404 = sbr.rel (%p1803_p11) target bundleno = 412 (0x19c), region = 63 }
 0x188   : > { %v1377_v49 = vadd.f32 %v1254_v45, %v333_v41  ;;  %v1379_v50 = vadd.f32 %v1360_v46, %v335_v42  ;;  %v1256_v51 = vpop.f32.mrb[5].mxu0  ;;  %v1362_v52 = vpop.f32.mrb[5].mxu1 }
 0x189   : > { %v1378_v55 = vadd.f32 %v1256_v51, %v334_v43  ;;  %v1380_v56 = vadd.f32 %v1362_v52, %v336_v44  ;;  %v1258_v57 = vpop.f32.mrb[6].mxu0  ;;  %v1364_v58 = vpop.f32.mrb[6].mxu1  ;;  %v1405_v4 = vld [vmem:[#allocation2] sm:$0xff] (!%p1803_p11)  ;;  %v1407_v10 = vld [vmem:[#allocation2 + $0x10] sm:$0xff] (!%p1803_p11) }
 0x18a   : > { %1393 = vst [vmem:[#allocation2 + $0x40] sm:$0xff] %v1377_v49  ;;  %1395 = vst [vmem:[#allocation2 + $0x50] sm:$0xff] %v1379_v50  ;;  %v1381_v59 = vadd.f32 %v1258_v57, %v337_v47  ;;  %v1383_v60 = vadd.f32 %v1364_v58, %v339_v48  ;;  %v1260_v61 = vpop.f32.mrb[7].mxu0  ;;  %v1366_v62 = vpop.f32.mrb[7].mxu1  ;;  %v1406_v5 = vld [vmem:[#allocation2 + $0x8] sm:$0xff] (!%p1803_p11)  ;;  %v1408_v11 = vld [vmem:[#allocation2 + $0x18] sm:$0xff] (!%p1803_p11)  ;;  %v1443_v20 = vadd.f32 (!%p1803_p11), %v1426_v13, %v1405_v4 }
 0x18b   : > { %1394 = vst [vmem:[#allocation2 + $0x48] sm:$0xff] %v1378_v55  ;;  %1396 = vst [vmem:[#allocation2 + $0x58] sm:$0xff] %v1380_v56  ;;  %v1382_v63 = vadd.f32 %v1260_v61, %v338_v53  ;;  %v1384_v0 = vadd.f32 %v1366_v62, %v340_v54  ;;  %v1409_v12 = vld [vmem:[#allocation2 + $0x20] sm:$0xff] (!%p1803_p11)  ;;  %v1411_v18 = vld [vmem:[#allocation2 + $0x30] sm:$0xff] (!%p1803_p11)  ;;  %v1444_v21 = vadd.f32 (!%p1803_p11), %v1430_v14, %v1406_v5 }
 0x18c   : > { %1397 = vst [vmem:[#allocation2 + $0x60] sm:$0xff] %v1381_v59  ;;  %1399 = vst [vmem:[#allocation2 + $0x70] sm:$0xff] %v1383_v60  ;;  %v1410_v17 = vld [vmem:[#allocation2 + $0x28] sm:$0xff] (!%p1803_p11)  ;;  %v1412_v19 = vld [vmem:[#allocation2 + $0x38] sm:$0xff] (!%p1803_p11)  ;;  %v1445_v22 = vadd.f32 (!%p1803_p11), %v1434_v15, %v1407_v10  ;;  %v1446_v23 = vadd.f32 (!%p1803_p11), %v1438_v16, %v1408_v11  ;;  %v1447_v24 = vadd.f32 (!%p1803_p11), %v1426_v13, %v1409_v12  ;;  %v1459_v30 = vmax.f32 (!%p1803_p11), %v1443_v20, 0.0 }
 0x18d   : > { %1398 = vst [vmem:[#allocation2 + $0x68] sm:$0xff] %v1382_v63  ;;  %1400 = vst [vmem:[#allocation2 + $0x78] sm:$0xff] %v1384_v0  ;;  %v1448_v25 = vadd.f32 (!%p1803_p11), %v1430_v14, %v1410_v17  ;;  %v1449_v26 = vadd.f32 (!%p1803_p11), %v1434_v15, %v1411_v18  ;;  %v1450_v27 = vadd.f32 (!%p1803_p11), %v1438_v16, %v1412_v19  ;;  %v1460_v31 = vmax.f32 (!%p1803_p11), %v1444_v21, 0.0 }
 0x18e   : > { %v1461_v32 = vmax.f32 %v1445_v22, 0.0  ;;  %v1462_v33 = vmax.f32 %v1446_v23, 0.0  ;;  %v1463_v36 = vmax.f32 %v1447_v24, 0.0 }
 0x18f   : > { %v1464_v37 = vmax.f32 %v1448_v25, 0.0  ;;  %v1465_v38 = vmax.f32 %v1449_v26, 0.0  ;;  %v1466_v39 = vmax.f32 %v1450_v27, 0.0  ;;  %v1818_v42 = vpack.c.bf16 %v1460_v31, %v1459_v30 }
 0x190   : > { %v1819_v43 = vpack.c.bf16 %v1462_v33, %v1461_v32 }
 0x191   : > { %v1413_v28 = vld [vmem:[#allocation2 + $0x40] sm:$0xff]  ;;  %v1415_v34 = vld [vmem:[#allocation2 + $0x50] sm:$0xff]  ;;  %v1820_v48 = vpack.c.bf16 %v1464_v37, %v1463_v36  ;;  %v1821_v49 = vpack.c.bf16 %v1466_v39, %v1465_v38  ;;  %1523 = vst [vmem:[%s2385_s3] sm:$0xff] %v1818_v42 }
 0x192   : > { %v1414_v29 = vld [vmem:[#allocation2 + $0x48] sm:$0xff]  ;;  %v1416_v35 = vld [vmem:[#allocation2 + $0x58] sm:$0xff]  ;;  %v1451_v44 = vadd.f32 %v1426_v13, %v1413_v28  ;;  %v1453_v50 = vadd.f32 %v1434_v15, %v1415_v34  ;;  %1524 = vst [vmem:[%s2385_s3 + $0x8] sm:$0xff] %v1819_v43 }
 0x193   : > { %v1417_v40 = vld [vmem:[#allocation2 + $0x60] sm:$0xff]  ;;  %v1452_v45 = vadd.f32 %v1430_v14, %v1414_v29  ;;  %v1419_v46 = vld [vmem:[#allocation2 + $0x70] sm:$0xff]  ;;  %v1454_v51 = vadd.f32 %v1438_v16, %v1416_v35  ;;  %1525 = vst [vmem:[%s2385_s3 + $0x10] sm:$0xff] %v1820_v48  ;;  %1526 = vst [vmem:[%s2385_s3 + $0x18] sm:$0xff] %v1821_v49 }
 0x194   : > { %v1418_v41 = vld [vmem:[#allocation2 + $0x68] sm:$0xff]  ;;  %v1420_v47 = vld [vmem:[#allocation2 + $0x78] sm:$0xff]  ;;  %v1467_v52 = vmax.f32 %v1451_v44, 0.0  ;;  %v1455_v54 = vadd.f32 %v1426_v13, %v1417_v40  ;;  %v1469_v56 = vmax.f32 %v1453_v50, 0.0  ;;  %v1457_v58 = vadd.f32 %v1434_v15, %v1419_v46 }
 0x195   : > { %v1468_v53 = vmax.f32 %v1452_v45, 0.0  ;;  %v1456_v55 = vadd.f32 %v1430_v14, %v1418_v41  ;;  %v1470_v57 = vmax.f32 %v1454_v51, 0.0  ;;  %v1458_v59 = vadd.f32 %v1438_v16, %v1420_v47 }
 0x196   : > { %v1471_v61 = vmax.f32 %v1455_v54, 0.0  ;;  %v1473_v0 = vmax.f32 %v1457_v58, 0.0 }
 0x197   : > { %v1822_v60 = vpack.c.bf16 %v1468_v53, %v1467_v52  ;;  %v1472_v62 = vmax.f32 %v1456_v55, 0.0  ;;  %v1823_v63 = vpack.c.bf16 %v1470_v57, %v1469_v56  ;;  %v1474_v1 = vmax.f32 %v1458_v59, 0.0 }
 0x199   : > { %1527 = vst [vmem:[%s2385_s3 + $0x20] sm:$0xff] %v1822_v60  ;;  %v1824_v2 = vpack.c.bf16 %v1472_v62, %v1471_v61  ;;  %1528 = vst [vmem:[%s2385_s3 + $0x28] sm:$0xff] %v1823_v63  ;;  %v1825_v3 = vpack.c.bf16 %v1474_v1, %v1473_v0 }
 0x19b   : > { %1529 = vst [vmem:[%s2385_s3 + $0x30] sm:$0xff] %v1824_v2  ;;  %1530 = vst [vmem:[%s2385_s3 + $0x38] sm:$0xff] %v1825_v3 }
 0x19c PF: > { %s13_s16 = sadd.s32 1, %s2125_s16   ;;  %s2386_s12 = smov %s2113_s13 }
 0x19d   : > { %p10_p12 = scmp.ge.s32.totalorder %s13_s16, 11   ;;  %s2387_s13 = smov %s2183_s20 }
 0x19e   : > { %s2388_s14 = smov %s2121_s15  ;;  %s2389_s15 = smov %s2391_s17 }
 0x19f   :  { %12 = sbr.rel (!%p10_p12) target bundleno = 3 (0x3), region = 104 }

// kernel: generator_for_video_forward.20
= control target key start
LH: loop header
LB: loop body
LE: loop exit
PB: predicated region body
PF: predicated region fallthrough
CT: control target
= control target key end

     0   :  { %s1872_s1 = inlined_call_operand.vmem [shape: bf16[512,512], index: 1, kind: input, shape index: {}]   ;;  %s1873_s0 = inlined_call_operand.vmem [shape: bf16[16,512], index: 0, kind: input, shape index: {}]   ;;  %s1874_s2 = inlined_call_operand.vmem [shape: f32[1,512], index: 2, kind: input, shape index: {}]   ;;  %s1875_s3 = inlined_call_operand.vmem [shape: bf16[16,512], index: 3, kind: output, shape index: {}]  }
   0x1   :  { %v1243_v0 = vld [vmem:[%s1872_s1 + $0x4] ss:$16 sps:$4 sm:$0xff]   ;;  %v1245_v1 = vld [vmem:[%s1872_s1 + $0xc] ss:$16 sps:$4 sm:$0xff]   ;;  %v1247_v2 = vld [vmem:[%s1872_s1] ss:$16 sps:$4 sm:$0xff]  }
   0x2   :  { %826 = vmatprep.subr.bf16.mxu0 %v1243_v0  ;;  %v1248_v3 = vld [vmem:[%s1872_s1 + $0x8] ss:$16 sps:$4 sm:$0xff]   ;;  %912 = vmatprep.subr.bf16.mxu1 %v1245_v1  ;;  %v1249_v4 = vld [vmem:[%s1872_s1 + $0x24] ss:$16 sps:$4 sm:$0xff]   ;;  %v1251_v5 = vld [vmem:[%s1872_s1 + $0x2c] ss:$16 sps:$4 sm:$0xff]  }
   0x3   :  { %827 = vmatpush1.bf16.msra.mxu0 %v1247_v2  ;;  %913 = vmatpush1.bf16.msra.mxu1 %v1248_v3  ;;  %v1253_v6 = vld [vmem:[%s1872_s1 + $0x20] ss:$16 sps:$4 sm:$0xff]   ;;  %v1254_v7 = vld [vmem:[%s1872_s1 + $0x28] ss:$16 sps:$4 sm:$0xff]   ;;  %v1255_v8 = vld [vmem:[%s1872_s1 + $0x44] ss:$16 sps:$4 sm:$0xff]  }
   0x4   :  { %828 = vmatprep.subr.bf16.mxu0 %v1249_v4  ;;  %914 = vmatprep.subr.bf16.mxu1 %v1251_v5  ;;  %v1257_v9 = vld [vmem:[%s1872_s1 + $0x4c] ss:$16 sps:$4 sm:$0xff]   ;;  %v1259_v10 = vld [vmem:[%s1872_s1 + $0x40] ss:$16 sps:$4 sm:$0xff]   ;;  %v1260_v11 = vld [vmem:[%s1872_s1 + $0x48] ss:$16 sps:$4 sm:$0xff]  }
   0x5   :  { %v1261_v12 = vld [vmem:[%s1872_s1 + $0x64] ss:$16 sps:$4 sm:$0xff]   ;;  %v1263_v13 = vld [vmem:[%s1872_s1 + $0x6c] ss:$16 sps:$4 sm:$0xff]   ;;  %v1265_v14 = vld [vmem:[%s1872_s1 + $0x60] ss:$16 sps:$4 sm:$0xff]  }
   0x6   :  { %v1266_v15 = vld [vmem:[%s1872_s1 + $0x68] ss:$16 sps:$4 sm:$0xff]   ;;  %v1267_v16 = vld [vmem:[%s1872_s1 + $0x84] ss:$16 sps:$4 sm:$0xff]   ;;  %v1269_v17 = vld [vmem:[%s1872_s1 + $0x8c] ss:$16 sps:$4 sm:$0xff]  }
   0x7   :  { %829 = vmatpush1.bf16.msra.mxu0 %v1253_v6  ;;  %915 = vmatpush1.bf16.msra.mxu1 %v1254_v7  ;;  %v1271_v18 = vld [vmem:[%s1872_s1 + $0x80] ss:$16 sps:$4 sm:$0xff]   ;;  %v1272_v19 = vld [vmem:[%s1872_s1 + $0x88] ss:$16 sps:$4 sm:$0xff]   ;;  %v1273_v20 = vld [vmem:[%s1872_s1 + $0xa4] ss:$16 sps:$4 sm:$0xff]  }
   0x8   :  { %830 = vmatprep.subr.bf16.mxu0 %v1255_v8  ;;  %916 = vmatprep.subr.bf16.mxu1 %v1257_v9  ;;  %v1275_v21 = vld [vmem:[%s1872_s1 + $0xac] ss:$16 sps:$4 sm:$0xff]   ;;  %v1277_v22 = vld [vmem:[%s1872_s1 + $0xa0] ss:$16 sps:$4 sm:$0xff]   ;;  %v1278_v23 = vld [vmem:[%s1872_s1 + $0xa8] ss:$16 sps:$4 sm:$0xff]  }
   0x9   :  { %v1279_v24 = vld [vmem:[%s1872_s1 + $0xc4] ss:$16 sps:$4 sm:$0xff]   ;;  %v1281_v25 = vld [vmem:[%s1872_s1 + $0xcc] ss:$16 sps:$4 sm:$0xff]   ;;  %v1283_v26 = vld [vmem:[%s1872_s1 + $0xc0] ss:$16 sps:$4 sm:$0xff]  }
   0xa   :  { %v1284_v27 = vld [vmem:[%s1872_s1 + $0xc8] ss:$16 sps:$4 sm:$0xff]   ;;  %v1285_v28 = vld [vmem:[%s1872_s1 + $0xe4] ss:$16 sps:$4 sm:$0xff]   ;;  %v1287_v29 = vld [vmem:[%s1872_s1 + $0xec] ss:$16 sps:$4 sm:$0xff]  }
   0xb   :  { %831 = vmatpush1.bf16.msra.mxu0 %v1259_v10  ;;  %917 = vmatpush1.bf16.msra.mxu1 %v1260_v11  ;;  %v1289_v30 = vld [vmem:[%s1872_s1 + $0xe0] ss:$16 sps:$4 sm:$0xff]   ;;  %v1290_v31 = vld [vmem:[%s1872_s1 + $0xe8] ss:$16 sps:$4 sm:$0xff]   ;;  %v1291_v32 = vld [vmem:[%s1872_s1 + $0x104] ss:$16 sps:$4 sm:$0xff]  }
   0xc   :  { %832 = vmatprep.subr.bf16.mxu0 %v1261_v12  ;;  %918 = vmatprep.subr.bf16.mxu1 %v1263_v13  ;;  %v1293_v33 = vld [vmem:[%s1872_s1 + $0x10c] ss:$16 sps:$4 sm:$0xff]   ;;  %v1295_v34 = vld [vmem:[%s1872_s1 + $0x100] ss:$16 sps:$4 sm:$0xff]   ;;  %v1296_v35 = vld [vmem:[%s1872_s1 + $0x108] ss:$16 sps:$4 sm:$0xff]  }
   0xd   :  { %v1297_v36 = vld [vmem:[%s1872_s1 + $0x124] ss:$16 sps:$4 sm:$0xff]   ;;  %v1299_v37 = vld [vmem:[%s1872_s1 + $0x12c] ss:$16 sps:$4 sm:$0xff]   ;;  %v1301_v38 = vld [vmem:[%s1872_s1 + $0x120] ss:$16 sps:$4 sm:$0xff]  }
   0xe   :  { %v1302_v39 = vld [vmem:[%s1872_s1 + $0x128] ss:$16 sps:$4 sm:$0xff]   ;;  %v1303_v40 = vld [vmem:[%s1872_s1 + $0x144] ss:$16 sps:$4 sm:$0xff]   ;;  %v1305_v41 = vld [vmem:[%s1872_s1 + $0x14c] ss:$16 sps:$4 sm:$0xff]  }
   0xf   :  { %833 = vmatpush1.bf16.msra.mxu0 %v1265_v14  ;;  %919 = vmatpush1.bf16.msra.mxu1 %v1266_v15  ;;  %v1307_v42 = vld [vmem:[%s1872_s1 + $0x140] ss:$16 sps:$4 sm:$0xff]   ;;  %v1308_v43 = vld [vmem:[%s1872_s1 + $0x148] ss:$16 sps:$4 sm:$0xff]   ;;  %v1309_v44 = vld [vmem:[%s1872_s1 + $0x164] ss:$16 sps:$4 sm:$0xff]  }
  0x10   :  { %834 = vmatprep.subr.bf16.mxu0 %v1267_v16  ;;  %920 = vmatprep.subr.bf16.mxu1 %v1269_v17  ;;  %v1311_v45 = vld [vmem:[%s1872_s1 + $0x16c] ss:$16 sps:$4 sm:$0xff]   ;;  %v1313_v46 = vld [vmem:[%s1872_s1 + $0x160] ss:$16 sps:$4 sm:$0xff]   ;;  %v1314_v47 = vld [vmem:[%s1872_s1 + $0x168] ss:$16 sps:$4 sm:$0xff]  }
  0x11   :  { %v1341_v48 = vld [vmem:[%s1873_s0 + $0x4] ss:$16 sps:$4 sm:$0xff]   ;;  %v1317_v50 = vld [vmem:[%s1872_s1 + $0x18c] ss:$16 sps:$4 sm:$0xff]   ;;  %v1319_v51 = vld [vmem:[%s1872_s1 + $0x180] ss:$16 sps:$4 sm:$0xff]  }
  0x12   :  { %v1315_v49 = vld [vmem:[%s1872_s1 + $0x184] ss:$16 sps:$4 sm:$0xff]   ;;  %858 = vmatprep.mubr.bf16.mxu0 %v1341_v48  ;;  %944 = vmatprep.mubr.bf16.mxu1 %v1341_v48  ;;  %v1320_v52 = vld [vmem:[%s1872_s1 + $0x188] ss:$16 sps:$4 sm:$0xff]   ;;  %v1323_v54 = vld [vmem:[%s1872_s1 + $0x1ac] ss:$16 sps:$4 sm:$0xff]  }
  0x13   :  { %835 = vmatpush1.bf16.msra.mxu0 %v1271_v18  ;;  %921 = vmatpush1.bf16.msra.mxu1 %v1272_v19  ;;  %v1321_v53 = vld [vmem:[%s1872_s1 + $0x1a4] ss:$16 sps:$4 sm:$0xff]   ;;  %v1325_v55 = vld [vmem:[%s1872_s1 + $0x1a0] ss:$16 sps:$4 sm:$0xff]   ;;  %v1326_v56 = vld [vmem:[%s1872_s1 + $0x1a8] ss:$16 sps:$4 sm:$0xff]  }
  0x14   :  { %836 = vmatprep.subr.bf16.mxu0 %v1273_v20  ;;  %922 = vmatprep.subr.bf16.mxu1 %v1275_v21  ;;  %v1327_v57 = vld [vmem:[%s1872_s1 + $0x1c4] ss:$16 sps:$4 sm:$0xff]   ;;  %v1329_v58 = vld [vmem:[%s1872_s1 + $0x1cc] ss:$16 sps:$4 sm:$0xff]   ;;  %v1331_v59 = vld [vmem:[%s1872_s1 + $0x1c0] ss:$16 sps:$4 sm:$0xff]  }
  0x15   :  { %v1332_v60 = vld [vmem:[%s1872_s1 + $0x1c8] ss:$16 sps:$4 sm:$0xff]   ;;  %v1333_v61 = vld [vmem:[%s1872_s1 + $0x1e4] ss:$16 sps:$4 sm:$0xff]   ;;  %v1335_v62 = vld [vmem:[%s1872_s1 + $0x1ec] ss:$16 sps:$4 sm:$0xff]  }
  0x16   :  { %v1337_v63 = vld [vmem:[%s1872_s1 + $0x1e0] ss:$16 sps:$4 sm:$0xff]   ;;  %v1338_v0 = vld [vmem:[%s1872_s1 + $0x1e8] ss:$16 sps:$4 sm:$0xff]   ;;  %v1344_v1 = vld [vmem:[%s1872_s1 + $0x204] ss:$16 sps:$4 sm:$0xff]  }
  0x17   :  { %837 = vmatpush1.bf16.msra.mxu0 %v1277_v22  ;;  %923 = vmatpush1.bf16.msra.mxu1 %v1278_v23  ;;  %v1347_v2 = vld [vmem:[%s1872_s1 + $0x20c] ss:$16 sps:$4 sm:$0xff]   ;;  %v1339_v3 = vld [vmem:[%s1873_s0] ss:$16 sps:$4 sm:$0xff]   ;;  %v1345_v5 = vld [vmem:[%s1872_s1 + $0x208] ss:$16 sps:$4 sm:$0xff]  }
  0x18   :  { %838 = vmatprep.subr.bf16.mxu0 %v1279_v24  ;;  %924 = vmatprep.subr.bf16.mxu1 %v1281_v25  ;;  %v1342_v4 = vld [vmem:[%s1872_s1 + $0x200] ss:$16 sps:$4 sm:$0xff]   ;;  %v1350_v6 = vld [vmem:[%s1872_s1 + $0x224] ss:$16 sps:$4 sm:$0xff]   ;;  %v1353_v7 = vld [vmem:[%s1872_s1 + $0x22c] ss:$16 sps:$4 sm:$0xff]  }
  0x19   :  { %v1348_v8 = vld [vmem:[%s1872_s1 + $0x220] ss:$16 sps:$4 sm:$0xff]   ;;  %v1351_v9 = vld [vmem:[%s1872_s1 + $0x228] ss:$16 sps:$4 sm:$0xff]   ;;  %v1356_v10 = vld [vmem:[%s1872_s1 + $0x244] ss:$16 sps:$4 sm:$0xff]  }
  0x1a   :  { %v1359_v11 = vld [vmem:[%s1872_s1 + $0x24c] ss:$16 sps:$4 sm:$0xff]   ;;  %v1354_v12 = vld [vmem:[%s1872_s1 + $0x240] ss:$16 sps:$4 sm:$0xff]   ;;  %v1357_v13 = vld [vmem:[%s1872_s1 + $0x248] ss:$16 sps:$4 sm:$0xff]  }
  0x1b   :  { %839 = vmatpush1.bf16.msra.mxu0 %v1283_v26  ;;  %925 = vmatpush1.bf16.msra.mxu1 %v1284_v27  ;;  %v1362_v14 = vld [vmem:[%s1872_s1 + $0x264] ss:$16 sps:$4 sm:$0xff]   ;;  %v1365_v15 = vld [vmem:[%s1872_s1 + $0x26c] ss:$16 sps:$4 sm:$0xff]   ;;  %v1360_v16 = vld [vmem:[%s1872_s1 + $0x260] ss:$16 sps:$4 sm:$0xff]  }
  0x1c   :  { %840 = vmatprep.subr.bf16.mxu0 %v1285_v28  ;;  %926 = vmatprep.subr.bf16.mxu1 %v1287_v29  ;;  %v1363_v17 = vld [vmem:[%s1872_s1 + $0x268] ss:$16 sps:$4 sm:$0xff]   ;;  %v1368_v18 = vld [vmem:[%s1872_s1 + $0x284] ss:$16 sps:$4 sm:$0xff]   ;;  %v1371_v19 = vld [vmem:[%s1872_s1 + $0x28c] ss:$16 sps:$4 sm:$0xff]  }
  0x1d   :  { %v1366_v20 = vld [vmem:[%s1872_s1 + $0x280] ss:$16 sps:$4 sm:$0xff]   ;;  %v1369_v21 = vld [vmem:[%s1872_s1 + $0x288] ss:$16 sps:$4 sm:$0xff]   ;;  %v1374_v22 = vld [vmem:[%s1872_s1 + $0x2a4] ss:$16 sps:$4 sm:$0xff]  }
  0x1e   :  { %v1377_v23 = vld [vmem:[%s1872_s1 + $0x2ac] ss:$16 sps:$4 sm:$0xff]   ;;  %v1372_v24 = vld [vmem:[%s1872_s1 + $0x2a0] ss:$16 sps:$4 sm:$0xff]   ;;  %v1375_v25 = vld [vmem:[%s1872_s1 + $0x2a8] ss:$16 sps:$4 sm:$0xff]  }
  0x1f   :  { %841 = vmatpush1.bf16.msra.mxu0 %v1289_v30  ;;  %927 = vmatpush1.bf16.msra.mxu1 %v1290_v31  ;;  %v1380_v26 = vld [vmem:[%s1872_s1 + $0x2c4] ss:$16 sps:$4 sm:$0xff]   ;;  %v1383_v27 = vld [vmem:[%s1872_s1 + $0x2cc] ss:$16 sps:$4 sm:$0xff]   ;;  %v1378_v29 = vld [vmem:[%s1872_s1 + $0x2c0] ss:$16 sps:$4 sm:$0xff]  }
  0x20   :  { %842 = vmatprep.subr.bf16.mxu0 %v1291_v32  ;;  %928 = vmatprep.subr.bf16.mxu1 %v1293_v33  ;;  %v1440_v28 = vld [vmem:[%s1873_s0 + $0xc] ss:$16 sps:$4 sm:$0xff]   ;;  %v1381_v30 = vld [vmem:[%s1872_s1 + $0x2c8] ss:$16 sps:$4 sm:$0xff]   ;;  %v1386_v31 = vld [vmem:[%s1872_s1 + $0x2e4] ss:$16 sps:$4 sm:$0xff]  }
  0x21   :  { %v1389_v32 = vld [vmem:[%s1872_s1 + $0x2ec] ss:$16 sps:$4 sm:$0xff]   ;;  %v1384_v33 = vld [vmem:[%s1872_s1 + $0x2e0] ss:$16 sps:$4 sm:$0xff]  }
  0x22   :  { %v1413_v48 = vld [vmem:[%s1872_s1 + $0x36c] ss:$16 sps:$4 sm:$0xff]  }
  0x23   :  { %843 = vmatpush1.bf16.msra.mxu0 %v1295_v34  ;;  %929 = vmatpush1.bf16.msra.mxu1 %v1296_v35  ;;  %v1387_v34 = vld [vmem:[%s1872_s1 + $0x2e8] ss:$16 sps:$4 sm:$0xff]   ;;  %v1392_v35 = vld [vmem:[%s1872_s1 + $0x304] ss:$16 sps:$4 sm:$0xff]  }
  0x24   :  { %844 = vmatprep.subr.bf16.mxu0 %v1297_v36  ;;  %930 = vmatprep.subr.bf16.mxu1 %v1299_v37  ;;  %v1395_v36 = vld [vmem:[%s1872_s1 + $0x30c] ss:$16 sps:$4 sm:$0xff]   ;;  %v1390_v37 = vld [vmem:[%s1872_s1 + $0x300] ss:$16 sps:$4 sm:$0xff]  }
  0x27   :  { %845 = vmatpush1.bf16.msra.mxu0 %v1301_v38  ;;  %931 = vmatpush1.bf16.msra.mxu1 %v1302_v39  ;;  %v1393_v38 = vld [vmem:[%s1872_s1 + $0x308] ss:$16 sps:$4 sm:$0xff]   ;;  %v1398_v39 = vld [vmem:[%s1872_s1 + $0x324] ss:$16 sps:$4 sm:$0xff]  }
  0x28   :  { %846 = vmatprep.subr.bf16.mxu0 %v1303_v40  ;;  %932 = vmatprep.subr.bf16.mxu1 %v1305_v41  ;;  %v1401_v40 = vld [vmem:[%s1872_s1 + $0x32c] ss:$16 sps:$4 sm:$0xff]   ;;  %v1396_v41 = vld [vmem:[%s1872_s1 + $0x320] ss:$16 sps:$4 sm:$0xff]  }
  0x2b   :  { %847 = vmatpush1.bf16.msra.mxu0 %v1307_v42  ;;  %933 = vmatpush1.bf16.msra.mxu1 %v1308_v43  ;;  %v1399_v42 = vld [vmem:[%s1872_s1 + $0x328] ss:$16 sps:$4 sm:$0xff]   ;;  %v1404_v43 = vld [vmem:[%s1872_s1 + $0x344] ss:$16 sps:$4 sm:$0xff]  }
  0x2c   :  { %848 = vmatprep.subr.bf16.mxu0 %v1309_v44  ;;  %934 = vmatprep.subr.bf16.mxu1 %v1311_v45  ;;  %v1407_v44 = vld [vmem:[%s1872_s1 + $0x34c] ss:$16 sps:$4 sm:$0xff]   ;;  %v1402_v45 = vld [vmem:[%s1872_s1 + $0x340] ss:$16 sps:$4 sm:$0xff]  }
  0x2f   :  { %849 = vmatpush1.bf16.msra.mxu0 %v1313_v46  ;;  %935 = vmatpush1.bf16.msra.mxu1 %v1314_v47  ;;  %v1405_v46 = vld [vmem:[%s1872_s1 + $0x348] ss:$16 sps:$4 sm:$0xff]   ;;  %v1410_v47 = vld [vmem:[%s1872_s1 + $0x364] ss:$16 sps:$4 sm:$0xff]  }
  0x30   :  { %850 = vmatprep.subr.bf16.mxu0 %v1315_v49  ;;  %936 = vmatprep.subr.bf16.mxu1 %v1317_v50  ;;  %v1408_v49 = vld [vmem:[%s1872_s1 + $0x360] ss:$16 sps:$4 sm:$0xff]   ;;  %v1411_v50 = vld [vmem:[%s1872_s1 + $0x368] ss:$16 sps:$4 sm:$0xff]  }
  0x33   :  { %851 = vmatpush1.bf16.msra.mxu0 %v1319_v51  ;;  %937 = vmatpush1.bf16.msra.mxu1 %v1320_v52  ;;  %v1416_v51 = vld [vmem:[%s1872_s1 + $0x384] ss:$16 sps:$4 sm:$0xff]   ;;  %v1419_v52 = vld [vmem:[%s1872_s1 + $0x38c] ss:$16 sps:$4 sm:$0xff]  }
  0x34   :  { %852 = vmatprep.subr.bf16.mxu0 %v1321_v53  ;;  %938 = vmatprep.subr.bf16.mxu1 %v1323_v54  ;;  %v1414_v53 = vld [vmem:[%s1872_s1 + $0x380] ss:$16 sps:$4 sm:$0xff]   ;;  %v1417_v54 = vld [vmem:[%s1872_s1 + $0x388] ss:$16 sps:$4 sm:$0xff]  }
  0x37   :  { %853 = vmatpush1.bf16.msra.mxu0 %v1325_v55  ;;  %939 = vmatpush1.bf16.msra.mxu1 %v1326_v56  ;;  %v1422_v55 = vld [vmem:[%s1872_s1 + $0x3a4] ss:$16 sps:$4 sm:$0xff]   ;;  %v1425_v56 = vld [vmem:[%s1872_s1 + $0x3ac] ss:$16 sps:$4 sm:$0xff]  }
  0x38   :  { %854 = vmatprep.subr.bf16.mxu0 %v1327_v57  ;;  %940 = vmatprep.subr.bf16.mxu1 %v1329_v58  ;;  %v1420_v57 = vld [vmem:[%s1872_s1 + $0x3a0] ss:$16 sps:$4 sm:$0xff]   ;;  %v1423_v58 = vld [vmem:[%s1872_s1 + $0x3a8] ss:$16 sps:$4 sm:$0xff]  }
  0x3b   :  { %855 = vmatpush1.bf16.msra.mxu0 %v1331_v59  ;;  %941 = vmatpush1.bf16.msra.mxu1 %v1332_v60  ;;  %v1428_v59 = vld [vmem:[%s1872_s1 + $0x3c4] ss:$16 sps:$4 sm:$0xff]   ;;  %v1431_v60 = vld [vmem:[%s1872_s1 + $0x3cc] ss:$16 sps:$4 sm:$0xff]  }
  0x3c   :  { %856 = vmatprep.subr.bf16.mxu0 %v1333_v61  ;;  %942 = vmatprep.subr.bf16.mxu1 %v1335_v62  ;;  %v1426_v61 = vld [vmem:[%s1872_s1 + $0x3c0] ss:$16 sps:$4 sm:$0xff]   ;;  %v1429_v62 = vld [vmem:[%s1872_s1 + $0x3c8] ss:$16 sps:$4 sm:$0xff]  }
  0x3f   :  { %857 = vmatpush1.bf16.msra.mxu0 %v1337_v63  ;;  %943 = vmatpush1.bf16.msra.mxu1 %v1338_v0  ;;  %v1434_v63 = vld [vmem:[%s1872_s1 + $0x3e4] ss:$16 sps:$4 sm:$0xff]   ;;  %v1437_v0 = vld [vmem:[%s1872_s1 + $0x3ec] ss:$16 sps:$4 sm:$0xff]  }
  0x40   :  { %869 = vmatprep.subr.bf16.mxu0 %v1344_v1  ;;  %955 = vmatprep.subr.bf16.mxu1 %v1347_v2  ;;  %v1432_v1 = vld [vmem:[%s1872_s1 + $0x3e0] ss:$16 sps:$4 sm:$0xff]   ;;  %v1435_v2 = vld [vmem:[%s1872_s1 + $0x3e8] ss:$16 sps:$4 sm:$0xff]  }
  0x42   :  { %859 = vmatmul.mubr.bf16.vlgmr.msra.gmra.mrb[0].mxu0 %v1339_v3  ;;  %945 = vmatmul.mubr.bf16.vlgmr.msra.gmra.mrb[0].mxu1 %v1339_v3  ;;  %v1438_v3 = vld [vmem:[%s1873_s0 + $0x8] ss:$16 sps:$4 sm:$0xff]  }
  0x43   :  { %870 = vmatpush1.bf16.msra.mxu0 %v1342_v4  ;;  %956 = vmatpush1.bf16.msra.mxu1 %v1345_v5  ;;  %v1027_v4 = vlaneseq }
  0x44   :  { %871 = vmatprep.subr.bf16.mxu0 %v1350_v6  ;;  %957 = vmatprep.subr.bf16.mxu1 %v1353_v7 }
  0x45   :  { %901 = vmatprep.mubr.bf16.mxu0 %v1440_v28  ;;  %987 = vmatprep.mubr.bf16.mxu1 %v1440_v28  ;;  %v1028_v5 = vshrl.u32 %v1027_v4, 7 }
  0x47   :  { %872 = vmatpush1.bf16.msra.mxu0 %v1348_v8  ;;  %958 = vmatpush1.bf16.msra.mxu1 %v1351_v9  ;;  %v1029_v6 = vsub.s32 0, %v1028_v5  ;;  %v1037_v7 = vsub.s32 2, %v1028_v5  ;;  %v1025_v8 = vld [vmem:[%s1874_s2] sm:$0xf]  ;;  %v1033_v9 = vsub.s32 1, %v1028_v5 }
  0x48   :  { %873 = vmatprep.subr.bf16.mxu0 %v1356_v10  ;;  %959 = vmatprep.subr.bf16.mxu1 %v1359_v11  ;;  %v1041_v10 = vsub.s32 3, %v1028_v5 }
  0x49   :  { %v1030_v11 = vrot.slane %v1025_v8, %v1029_v6 }
  0x4b   :  { %874 = vmatpush1.bf16.msra.mxu0 %v1354_v12  ;;  %960 = vmatpush1.bf16.msra.mxu1 %v1357_v13  ;;  %v1038_v12 = vrot.slane %v1025_v8, %v1037_v7  ;;  %v1034_v13 = vrot.slane %v1025_v8, %v1033_v9 }
  0x4c   :  { %875 = vmatprep.subr.bf16.mxu0 %v1362_v14  ;;  %961 = vmatprep.subr.bf16.mxu1 %v1365_v15  ;;  %v1042_v14 = vrot.slane %v1025_v8, %v1041_v10 }
  0x4f   :  { %876 = vmatpush1.bf16.msra.mxu0 %v1360_v16  ;;  %962 = vmatpush1.bf16.msra.mxu1 %v1363_v17 }
  0x50   :  { %877 = vmatprep.subr.bf16.mxu0 %v1368_v18  ;;  %963 = vmatprep.subr.bf16.mxu1 %v1371_v19 }
  0x53   :  { %878 = vmatpush1.bf16.msra.mxu0 %v1366_v20  ;;  %964 = vmatpush1.bf16.msra.mxu1 %v1369_v21 }
  0x54   :  { %879 = vmatprep.subr.bf16.mxu0 %v1374_v22  ;;  %965 = vmatprep.subr.bf16.mxu1 %v1377_v23 }
  0x57   :  { %880 = vmatpush1.bf16.msra.mxu0 %v1372_v24  ;;  %966 = vmatpush1.bf16.msra.mxu1 %v1375_v25 }
  0x58   :  { %881 = vmatprep.subr.bf16.mxu0 %v1380_v26  ;;  %967 = vmatprep.subr.bf16.mxu1 %v1383_v27 }
  0x5b   :  { %882 = vmatpush1.bf16.msra.mxu0 %v1378_v29  ;;  %968 = vmatpush1.bf16.msra.mxu1 %v1381_v30 }
  0x5c   :  { %883 = vmatprep.subr.bf16.mxu0 %v1386_v31  ;;  %969 = vmatprep.subr.bf16.mxu1 %v1389_v32 }
  0x5f   :  { %884 = vmatpush1.bf16.msra.mxu0 %v1384_v33  ;;  %970 = vmatpush1.bf16.msra.mxu1 %v1387_v34 }
  0x60   :  { %885 = vmatprep.subr.bf16.mxu0 %v1392_v35  ;;  %971 = vmatprep.subr.bf16.mxu1 %v1395_v36 }
  0x63   :  { %886 = vmatpush1.bf16.msra.mxu0 %v1390_v37  ;;  %972 = vmatpush1.bf16.msra.mxu1 %v1393_v38 }
  0x64   :  { %887 = vmatprep.subr.bf16.mxu0 %v1398_v39  ;;  %973 = vmatprep.subr.bf16.mxu1 %v1401_v40 }
  0x67   :  { %888 = vmatpush1.bf16.msra.mxu0 %v1396_v41  ;;  %974 = vmatpush1.bf16.msra.mxu1 %v1399_v42 }
  0x68   :  { %889 = vmatprep.subr.bf16.mxu0 %v1404_v43  ;;  %975 = vmatprep.subr.bf16.mxu1 %v1407_v44 }
  0x6b   :  { %890 = vmatpush1.bf16.msra.mxu0 %v1402_v45  ;;  %976 = vmatpush1.bf16.msra.mxu1 %v1405_v46 }
  0x6c   :  { %891 = vmatprep.subr.bf16.mxu0 %v1410_v47  ;;  %977 = vmatprep.subr.bf16.mxu1 %v1413_v48 }
  0x6f   :  { %892 = vmatpush1.bf16.msra.mxu0 %v1408_v49  ;;  %978 = vmatpush1.bf16.msra.mxu1 %v1411_v50 }
  0x70   :  { %893 = vmatprep.subr.bf16.mxu0 %v1416_v51  ;;  %979 = vmatprep.subr.bf16.mxu1 %v1419_v52 }
  0x73   :  { %894 = vmatpush1.bf16.msra.mxu0 %v1414_v53  ;;  %980 = vmatpush1.bf16.msra.mxu1 %v1417_v54 }
  0x74   :  { %895 = vmatprep.subr.bf16.mxu0 %v1422_v55  ;;  %981 = vmatprep.subr.bf16.mxu1 %v1425_v56 }
  0x77   :  { %896 = vmatpush1.bf16.msra.mxu0 %v1420_v57  ;;  %982 = vmatpush1.bf16.msra.mxu1 %v1423_v58 }
  0x78   :  { %897 = vmatprep.subr.bf16.mxu0 %v1428_v59  ;;  %983 = vmatprep.subr.bf16.mxu1 %v1431_v60 }
  0x7b   :  { %898 = vmatpush1.bf16.msra.mxu0 %v1426_v61  ;;  %984 = vmatpush1.bf16.msra.mxu1 %v1429_v62 }
  0x7c   :  { %899 = vmatprep.subr.bf16.mxu0 %v1434_v63  ;;  %985 = vmatprep.subr.bf16.mxu1 %v1437_v0 }
  0x7f   :  { %900 = vmatpush1.bf16.msra.mxu0 %v1432_v1  ;;  %986 = vmatpush1.bf16.msra.mxu1 %v1435_v2 }
  0x82   :  { %902 = vmatmul.mubr.bf16.vlgmr.msra.gmra.mrb[0].mxu0 %v1438_v3  ;;  %988 = vmatmul.mubr.bf16.vlgmr.msra.gmra.mrb[0].mxu1 %v1438_v3 }
 0x155   :  { %v903_v15 = vpop.f32.mrb[0].mxu0  ;;  %v989_v16 = vpop.f32.mrb[0].mxu1 }
 0x156   :  { %v1047_v17 = vadd.f32 %v1030_v11, %v903_v15  ;;  %v1049_v18 = vadd.f32 %v1038_v12, %v989_v16  ;;  %v905_v19 = vpop.f32.mrb[1].mxu0  ;;  %v991_v20 = vpop.f32.mrb[1].mxu1 }
 0x157   :  { %v1048_v21 = vadd.f32 %v1034_v13, %v905_v19  ;;  %v1050_v22 = vadd.f32 %v1042_v14, %v991_v20  ;;  %v907_v23 = vpop.f32.mrb[2].mxu0  ;;  %v993_v24 = vpop.f32.mrb[2].mxu1 }
 0x158   :  { %v1055_v25 = vmax.f32 %v1047_v17, 0.0  ;;  %v1057_v26 = vmax.f32 %v1049_v18, 0.0  ;;  %v1051_v27 = vadd.f32 %v1030_v11, %v907_v23  ;;  %v1053_v28 = vadd.f32 %v1038_v12, %v993_v24  ;;  %v909_v29 = vpop.f32.mrb[3].mxu0  ;;  %v995_v30 = vpop.f32.mrb[3].mxu1 }
 0x159   :  { %v1056_v31 = vmax.f32 %v1048_v21, 0.0  ;;  %v1058_v32 = vmax.f32 %v1050_v22, 0.0  ;;  %v1052_v33 = vadd.f32 %v1034_v13, %v909_v29  ;;  %v1054_v34 = vadd.f32 %v1042_v14, %v995_v30 }
 0x15a   :  { %v1059_v35 = vmax.f32 %v1051_v27, 0.0  ;;  %v1061_v36 = vmax.f32 %v1053_v28, 0.0 }
 0x15b   :  { %v1231_v37 = vpack.c.bf16 %v1056_v31, %v1055_v25  ;;  %v1232_v38 = vpack.c.bf16 %v1058_v32, %v1057_v26  ;;  %v1060_v39 = vmax.f32 %v1052_v33, 0.0  ;;  %v1062_v40 = vmax.f32 %v1054_v34, 0.0 }
 0x15d   :  { %1087 = vst [vmem:[%s1875_s3] sm:$0xff] %v1231_v37  ;;  %1088 = vst [vmem:[%s1875_s3 + $0x8] sm:$0xff] %v1232_v38  ;;  %v1233_v41 = vpack.c.bf16 %v1060_v39, %v1059_v35  ;;  %v1234_v42 = vpack.c.bf16 %v1062_v40, %v1061_v36 }
 0x15f   :  { %1089 = vst [vmem:[%s1875_s3 + $0x10] sm:$0xff] %v1233_v41  ;;  %1090 = vst [vmem:[%s1875_s3 + $0x18] sm:$0xff] %v1234_v42 }

// kernel: generator_for_video_forward.16
= control target key start
LH: loop header
LB: loop body
LE: loop exit
PB: predicated region body
PF: predicated region fallthrough
CT: control target
= control target key end

     0   :  { %s2070_s1 = inlined_call_operand.vmem [shape: bf16[512,512], index: 1, kind: input, shape index: {}]   ;;  %s2071_s0 = inlined_call_operand.vmem [shape: bf16[32,512], index: 0, kind: input, shape index: {}]   ;;  %s2072_s2 = inlined_call_operand.vmem [shape: f32[1,512], index: 2, kind: input, shape index: {}]   ;;  %s2073_s3 = inlined_call_operand.vmem [shape: bf16[32,512], index: 3, kind: output, shape index: {}]  }
   0x1   :  { %v1411_v0 = vld [vmem:[%s2070_s1 + $0x4] ss:$16 sps:$4 sm:$0xff]   ;;  %v1413_v1 = vld [vmem:[%s2070_s1 + $0xc] ss:$16 sps:$4 sm:$0xff]   ;;  %v1415_v2 = vld [vmem:[%s2070_s1] ss:$16 sps:$4 sm:$0xff]  }
   0x2   :  { %866 = vmatprep.subr.bf16.mxu0 %v1411_v0  ;;  %v1416_v3 = vld [vmem:[%s2070_s1 + $0x8] ss:$16 sps:$4 sm:$0xff]   ;;  %972 = vmatprep.subr.bf16.mxu1 %v1413_v1  ;;  %v1417_v4 = vld [vmem:[%s2070_s1 + $0x24] ss:$16 sps:$4 sm:$0xff]   ;;  %v1419_v5 = vld [vmem:[%s2070_s1 + $0x2c] ss:$16 sps:$4 sm:$0xff]  }
   0x3   :  { %867 = vmatpush1.bf16.msra.mxu0 %v1415_v2  ;;  %973 = vmatpush1.bf16.msra.mxu1 %v1416_v3  ;;  %v1421_v6 = vld [vmem:[%s2070_s1 + $0x20] ss:$16 sps:$4 sm:$0xff]   ;;  %v1422_v7 = vld [vmem:[%s2070_s1 + $0x28] ss:$16 sps:$4 sm:$0xff]   ;;  %v1423_v8 = vld [vmem:[%s2070_s1 + $0x44] ss:$16 sps:$4 sm:$0xff]  }
   0x4   :  { %868 = vmatprep.subr.bf16.mxu0 %v1417_v4  ;;  %974 = vmatprep.subr.bf16.mxu1 %v1419_v5  ;;  %v1425_v9 = vld [vmem:[%s2070_s1 + $0x4c] ss:$16 sps:$4 sm:$0xff]   ;;  %v1427_v10 = vld [vmem:[%s2070_s1 + $0x40] ss:$16 sps:$4 sm:$0xff]   ;;  %v1428_v11 = vld [vmem:[%s2070_s1 + $0x48] ss:$16 sps:$4 sm:$0xff]  }
   0x5   :  { %v1429_v12 = vld [vmem:[%s2070_s1 + $0x64] ss:$16 sps:$4 sm:$0xff]   ;;  %v1431_v13 = vld [vmem:[%s2070_s1 + $0x6c] ss:$16 sps:$4 sm:$0xff]   ;;  %v1433_v14 = vld [vmem:[%s2070_s1 + $0x60] ss:$16 sps:$4 sm:$0xff]  }
   0x6   :  { %v1434_v15 = vld [vmem:[%s2070_s1 + $0x68] ss:$16 sps:$4 sm:$0xff]   ;;  %v1435_v16 = vld [vmem:[%s2070_s1 + $0x84] ss:$16 sps:$4 sm:$0xff]   ;;  %v1437_v17 = vld [vmem:[%s2070_s1 + $0x8c] ss:$16 sps:$4 sm:$0xff]  }
   0x7   :  { %869 = vmatpush1.bf16.msra.mxu0 %v1421_v6  ;;  %975 = vmatpush1.bf16.msra.mxu1 %v1422_v7  ;;  %v1439_v18 = vld [vmem:[%s2070_s1 + $0x80] ss:$16 sps:$4 sm:$0xff]   ;;  %v1440_v19 = vld [vmem:[%s2070_s1 + $0x88] ss:$16 sps:$4 sm:$0xff]   ;;  %v1441_v20 = vld [vmem:[%s2070_s1 + $0xa4] ss:$16 sps:$4 sm:$0xff]  }
   0x8   :  { %870 = vmatprep.subr.bf16.mxu0 %v1423_v8  ;;  %976 = vmatprep.subr.bf16.mxu1 %v1425_v9  ;;  %v1443_v21 = vld [vmem:[%s2070_s1 + $0xac] ss:$16 sps:$4 sm:$0xff]   ;;  %v1445_v22 = vld [vmem:[%s2070_s1 + $0xa0] ss:$16 sps:$4 sm:$0xff]   ;;  %v1446_v23 = vld [vmem:[%s2070_s1 + $0xa8] ss:$16 sps:$4 sm:$0xff]  }
   0x9   :  { %v1447_v24 = vld [vmem:[%s2070_s1 + $0xc4] ss:$16 sps:$4 sm:$0xff]   ;;  %v1449_v25 = vld [vmem:[%s2070_s1 + $0xcc] ss:$16 sps:$4 sm:$0xff]   ;;  %v1451_v26 = vld [vmem:[%s2070_s1 + $0xc0] ss:$16 sps:$4 sm:$0xff]  }
   0xa   :  { %v1452_v27 = vld [vmem:[%s2070_s1 + $0xc8] ss:$16 sps:$4 sm:$0xff]   ;;  %v1453_v28 = vld [vmem:[%s2070_s1 + $0xe4] ss:$16 sps:$4 sm:$0xff]   ;;  %v1455_v29 = vld [vmem:[%s2070_s1 + $0xec] ss:$16 sps:$4 sm:$0xff]  }
   0xb   :  { %871 = vmatpush1.bf16.msra.mxu0 %v1427_v10  ;;  %977 = vmatpush1.bf16.msra.mxu1 %v1428_v11  ;;  %v1457_v30 = vld [vmem:[%s2070_s1 + $0xe0] ss:$16 sps:$4 sm:$0xff]   ;;  %v1458_v31 = vld [vmem:[%s2070_s1 + $0xe8] ss:$16 sps:$4 sm:$0xff]   ;;  %v1459_v32 = vld [vmem:[%s2070_s1 + $0x104] ss:$16 sps:$4 sm:$0xff]  }
   0xc   :  { %872 = vmatprep.subr.bf16.mxu0 %v1429_v12  ;;  %978 = vmatprep.subr.bf16.mxu1 %v1431_v13  ;;  %v1461_v33 = vld [vmem:[%s2070_s1 + $0x10c] ss:$16 sps:$4 sm:$0xff]   ;;  %v1463_v34 = vld [vmem:[%s2070_s1 + $0x100] ss:$16 sps:$4 sm:$0xff]   ;;  %v1464_v35 = vld [vmem:[%s2070_s1 + $0x108] ss:$16 sps:$4 sm:$0xff]  }
   0xd   :  { %v1465_v36 = vld [vmem:[%s2070_s1 + $0x124] ss:$16 sps:$4 sm:$0xff]   ;;  %v1467_v37 = vld [vmem:[%s2070_s1 + $0x12c] ss:$16 sps:$4 sm:$0xff]   ;;  %v1469_v38 = vld [vmem:[%s2070_s1 + $0x120] ss:$16 sps:$4 sm:$0xff]  }
   0xe   :  { %v1470_v39 = vld [vmem:[%s2070_s1 + $0x128] ss:$16 sps:$4 sm:$0xff]   ;;  %v1471_v40 = vld [vmem:[%s2070_s1 + $0x144] ss:$16 sps:$4 sm:$0xff]   ;;  %v1473_v41 = vld [vmem:[%s2070_s1 + $0x14c] ss:$16 sps:$4 sm:$0xff]  }
   0xf   :  { %873 = vmatpush1.bf16.msra.mxu0 %v1433_v14  ;;  %979 = vmatpush1.bf16.msra.mxu1 %v1434_v15  ;;  %v1475_v42 = vld [vmem:[%s2070_s1 + $0x140] ss:$16 sps:$4 sm:$0xff]   ;;  %v1476_v43 = vld [vmem:[%s2070_s1 + $0x148] ss:$16 sps:$4 sm:$0xff]   ;;  %v1477_v44 = vld [vmem:[%s2070_s1 + $0x164] ss:$16 sps:$4 sm:$0xff]  }
  0x10   :  { %874 = vmatprep.subr.bf16.mxu0 %v1435_v16  ;;  %980 = vmatprep.subr.bf16.mxu1 %v1437_v17  ;;  %v1479_v45 = vld [vmem:[%s2070_s1 + $0x16c] ss:$16 sps:$4 sm:$0xff]   ;;  %v1481_v46 = vld [vmem:[%s2070_s1 + $0x160] ss:$16 sps:$4 sm:$0xff]   ;;  %v1482_v47 = vld [vmem:[%s2070_s1 + $0x168] ss:$16 sps:$4 sm:$0xff]  }
  0x11   :  { %v1509_v48 = vld [vmem:[%s2071_s0 + $0x4] ss:$16 sps:$4 sm:$0xff]   ;;  %v1485_v50 = vld [vmem:[%s2070_s1 + $0x18c] ss:$16 sps:$4 sm:$0xff]   ;;  %v1487_v51 = vld [vmem:[%s2070_s1 + $0x180] ss:$16 sps:$4 sm:$0xff]  }
  0x12   :  { %v1483_v49 = vld [vmem:[%s2070_s1 + $0x184] ss:$16 sps:$4 sm:$0xff]   ;;  %898 = vmatprep.mubr.bf16.mxu0 %v1509_v48  ;;  %1004 = vmatprep.mubr.bf16.mxu1 %v1509_v48  ;;  %v1488_v52 = vld [vmem:[%s2070_s1 + $0x188] ss:$16 sps:$4 sm:$0xff]   ;;  %v1491_v54 = vld [vmem:[%s2070_s1 + $0x1ac] ss:$16 sps:$4 sm:$0xff]  }
  0x13   :  { %875 = vmatpush1.bf16.msra.mxu0 %v1439_v18  ;;  %981 = vmatpush1.bf16.msra.mxu1 %v1440_v19  ;;  %v1489_v53 = vld [vmem:[%s2070_s1 + $0x1a4] ss:$16 sps:$4 sm:$0xff]   ;;  %v1493_v55 = vld [vmem:[%s2070_s1 + $0x1a0] ss:$16 sps:$4 sm:$0xff]   ;;  %v1494_v56 = vld [vmem:[%s2070_s1 + $0x1a8] ss:$16 sps:$4 sm:$0xff]  }
  0x14   :  { %876 = vmatprep.subr.bf16.mxu0 %v1441_v20  ;;  %982 = vmatprep.subr.bf16.mxu1 %v1443_v21  ;;  %v1495_v57 = vld [vmem:[%s2070_s1 + $0x1c4] ss:$16 sps:$4 sm:$0xff]   ;;  %v1497_v58 = vld [vmem:[%s2070_s1 + $0x1cc] ss:$16 sps:$4 sm:$0xff]   ;;  %v1499_v59 = vld [vmem:[%s2070_s1 + $0x1c0] ss:$16 sps:$4 sm:$0xff]  }
  0x15   :  { %v1500_v60 = vld [vmem:[%s2070_s1 + $0x1c8] ss:$16 sps:$4 sm:$0xff]   ;;  %v1501_v61 = vld [vmem:[%s2070_s1 + $0x1e4] ss:$16 sps:$4 sm:$0xff]   ;;  %v1503_v62 = vld [vmem:[%s2070_s1 + $0x1ec] ss:$16 sps:$4 sm:$0xff]  }
  0x16   :  { %v1505_v63 = vld [vmem:[%s2070_s1 + $0x1e0] ss:$16 sps:$4 sm:$0xff]   ;;  %v1506_v0 = vld [vmem:[%s2070_s1 + $0x1e8] ss:$16 sps:$4 sm:$0xff]   ;;  %v1512_v1 = vld [vmem:[%s2070_s1 + $0x204] ss:$16 sps:$4 sm:$0xff]  }
  0x17   :  { %877 = vmatpush1.bf16.msra.mxu0 %v1445_v22  ;;  %983 = vmatpush1.bf16.msra.mxu1 %v1446_v23  ;;  %v1515_v2 = vld [vmem:[%s2070_s1 + $0x20c] ss:$16 sps:$4 sm:$0xff]   ;;  %v1507_v3 = vld [vmem:[%s2071_s0] ss:$16 sps:$4 sm:$0xff]   ;;  %v1513_v5 = vld [vmem:[%s2070_s1 + $0x208] ss:$16 sps:$4 sm:$0xff]  }
  0x18   :  { %878 = vmatprep.subr.bf16.mxu0 %v1447_v24  ;;  %984 = vmatprep.subr.bf16.mxu1 %v1449_v25  ;;  %v1510_v4 = vld [vmem:[%s2070_s1 + $0x200] ss:$16 sps:$4 sm:$0xff]   ;;  %v1518_v6 = vld [vmem:[%s2070_s1 + $0x224] ss:$16 sps:$4 sm:$0xff]   ;;  %v1521_v7 = vld [vmem:[%s2070_s1 + $0x22c] ss:$16 sps:$4 sm:$0xff]  }
  0x19   :  { %v1516_v8 = vld [vmem:[%s2070_s1 + $0x220] ss:$16 sps:$4 sm:$0xff]   ;;  %v1519_v9 = vld [vmem:[%s2070_s1 + $0x228] ss:$16 sps:$4 sm:$0xff]   ;;  %v1524_v10 = vld [vmem:[%s2070_s1 + $0x244] ss:$16 sps:$4 sm:$0xff]  }
  0x1a   :  { %v1527_v11 = vld [vmem:[%s2070_s1 + $0x24c] ss:$16 sps:$4 sm:$0xff]   ;;  %v1522_v12 = vld [vmem:[%s2070_s1 + $0x240] ss:$16 sps:$4 sm:$0xff]   ;;  %v1525_v13 = vld [vmem:[%s2070_s1 + $0x248] ss:$16 sps:$4 sm:$0xff]  }
  0x1b   :  { %879 = vmatpush1.bf16.msra.mxu0 %v1451_v26  ;;  %985 = vmatpush1.bf16.msra.mxu1 %v1452_v27  ;;  %v1530_v14 = vld [vmem:[%s2070_s1 + $0x264] ss:$16 sps:$4 sm:$0xff]   ;;  %v1533_v15 = vld [vmem:[%s2070_s1 + $0x26c] ss:$16 sps:$4 sm:$0xff]   ;;  %v1528_v16 = vld [vmem:[%s2070_s1 + $0x260] ss:$16 sps:$4 sm:$0xff]  }
  0x1c   :  { %880 = vmatprep.subr.bf16.mxu0 %v1453_v28  ;;  %986 = vmatprep.subr.bf16.mxu1 %v1455_v29  ;;  %v1531_v17 = vld [vmem:[%s2070_s1 + $0x268] ss:$16 sps:$4 sm:$0xff]   ;;  %v1536_v18 = vld [vmem:[%s2070_s1 + $0x284] ss:$16 sps:$4 sm:$0xff]   ;;  %v1539_v19 = vld [vmem:[%s2070_s1 + $0x28c] ss:$16 sps:$4 sm:$0xff]  }
  0x1d   :  { %v1534_v20 = vld [vmem:[%s2070_s1 + $0x280] ss:$16 sps:$4 sm:$0xff]   ;;  %v1537_v21 = vld [vmem:[%s2070_s1 + $0x288] ss:$16 sps:$4 sm:$0xff]   ;;  %v1542_v22 = vld [vmem:[%s2070_s1 + $0x2a4] ss:$16 sps:$4 sm:$0xff]  }
  0x1e   :  { %v1545_v23 = vld [vmem:[%s2070_s1 + $0x2ac] ss:$16 sps:$4 sm:$0xff]   ;;  %v1540_v24 = vld [vmem:[%s2070_s1 + $0x2a0] ss:$16 sps:$4 sm:$0xff]   ;;  %v1594_v25 = vld [vmem:[%s2071_s0 + $0x24] ss:$16 sps:$4 sm:$0xff]  }
  0x1f   :  { %881 = vmatpush1.bf16.msra.mxu0 %v1457_v30  ;;  %987 = vmatpush1.bf16.msra.mxu1 %v1458_v31  ;;  %v1543_v26 = vld [vmem:[%s2070_s1 + $0x2a8] ss:$16 sps:$4 sm:$0xff]   ;;  %v1596_v27 = vld [vmem:[%s2071_s0 + $0x20] ss:$16 sps:$4 sm:$0xff]   ;;  %v1548_v28 = vld [vmem:[%s2070_s1 + $0x2c4] ss:$16 sps:$4 sm:$0xff]  }
  0x20   :  { %882 = vmatprep.subr.bf16.mxu0 %v1459_v32  ;;  %988 = vmatprep.subr.bf16.mxu1 %v1461_v33  ;;  %v1551_v29 = vld [vmem:[%s2070_s1 + $0x2cc] ss:$16 sps:$4 sm:$0xff]   ;;  %v1546_v30 = vld [vmem:[%s2070_s1 + $0x2c0] ss:$16 sps:$4 sm:$0xff]   ;;  %v1549_v31 = vld [vmem:[%s2070_s1 + $0x2c8] ss:$16 sps:$4 sm:$0xff]  }
  0x21   :  { %v1554_v32 = vld [vmem:[%s2070_s1 + $0x2e4] ss:$16 sps:$4 sm:$0xff]   ;;  %v1557_v33 = vld [vmem:[%s2070_s1 + $0x2ec] ss:$16 sps:$4 sm:$0xff]   ;;  %v1573_v48 = vld [vmem:[%s2070_s1 + $0x348] ss:$16 sps:$4 sm:$0xff]  }
  0x23   :  { %883 = vmatpush1.bf16.msra.mxu0 %v1463_v34  ;;  %989 = vmatpush1.bf16.msra.mxu1 %v1464_v35  ;;  %v1611_v34 = vld [vmem:[%s2071_s0 + $0xc] ss:$16 sps:$4 sm:$0xff]   ;;  %v1552_v35 = vld [vmem:[%s2070_s1 + $0x2e0] ss:$16 sps:$4 sm:$0xff]  }
  0x24   :  { %884 = vmatprep.subr.bf16.mxu0 %v1465_v36  ;;  %990 = vmatprep.subr.bf16.mxu1 %v1467_v37  ;;  %v1555_v36 = vld [vmem:[%s2070_s1 + $0x2e8] ss:$16 sps:$4 sm:$0xff]   ;;  %v1560_v37 = vld [vmem:[%s2070_s1 + $0x304] ss:$16 sps:$4 sm:$0xff]  }
  0x27   :  { %885 = vmatpush1.bf16.msra.mxu0 %v1469_v38  ;;  %991 = vmatpush1.bf16.msra.mxu1 %v1470_v39  ;;  %v1563_v38 = vld [vmem:[%s2070_s1 + $0x30c] ss:$16 sps:$4 sm:$0xff]   ;;  %v1558_v39 = vld [vmem:[%s2070_s1 + $0x300] ss:$16 sps:$4 sm:$0xff]  }
  0x28   :  { %886 = vmatprep.subr.bf16.mxu0 %v1471_v40  ;;  %992 = vmatprep.subr.bf16.mxu1 %v1473_v41  ;;  %v1561_v40 = vld [vmem:[%s2070_s1 + $0x308] ss:$16 sps:$4 sm:$0xff]   ;;  %v1566_v41 = vld [vmem:[%s2070_s1 + $0x324] ss:$16 sps:$4 sm:$0xff]  }
  0x2b   :  { %887 = vmatpush1.bf16.msra.mxu0 %v1475_v42  ;;  %993 = vmatpush1.bf16.msra.mxu1 %v1476_v43  ;;  %v1569_v42 = vld [vmem:[%s2070_s1 + $0x32c] ss:$16 sps:$4 sm:$0xff]   ;;  %v1564_v43 = vld [vmem:[%s2070_s1 + $0x320] ss:$16 sps:$4 sm:$0xff]  }
  0x2c   :  { %888 = vmatprep.subr.bf16.mxu0 %v1477_v44  ;;  %994 = vmatprep.subr.bf16.mxu1 %v1479_v45  ;;  %v1567_v44 = vld [vmem:[%s2070_s1 + $0x328] ss:$16 sps:$4 sm:$0xff]   ;;  %v1572_v45 = vld [vmem:[%s2070_s1 + $0x344] ss:$16 sps:$4 sm:$0xff]  }
  0x2f   :  { %889 = vmatpush1.bf16.msra.mxu0 %v1481_v46  ;;  %995 = vmatpush1.bf16.msra.mxu1 %v1482_v47  ;;  %v1575_v46 = vld [vmem:[%s2070_s1 + $0x34c] ss:$16 sps:$4 sm:$0xff]   ;;  %v1570_v47 = vld [vmem:[%s2070_s1 + $0x340] ss:$16 sps:$4 sm:$0xff]  }
  0x30   :  { %890 = vmatprep.subr.bf16.mxu0 %v1483_v49  ;;  %996 = vmatprep.subr.bf16.mxu1 %v1485_v50  ;;  %v1578_v49 = vld [vmem:[%s2070_s1 + $0x364] ss:$16 sps:$4 sm:$0xff]   ;;  %v1581_v50 = vld [vmem:[%s2070_s1 + $0x36c] ss:$16 sps:$4 sm:$0xff]  }
  0x33   :  { %891 = vmatpush1.bf16.msra.mxu0 %v1487_v51  ;;  %997 = vmatpush1.bf16.msra.mxu1 %v1488_v52  ;;  %v1576_v51 = vld [vmem:[%s2070_s1 + $0x360] ss:$16 sps:$4 sm:$0xff]   ;;  %v1579_v52 = vld [vmem:[%s2070_s1 + $0x368] ss:$16 sps:$4 sm:$0xff]  }
  0x34   :  { %892 = vmatprep.subr.bf16.mxu0 %v1489_v53  ;;  %998 = vmatprep.subr.bf16.mxu1 %v1491_v54  ;;  %v1584_v53 = vld [vmem:[%s2070_s1 + $0x384] ss:$16 sps:$4 sm:$0xff]   ;;  %v1587_v54 = vld [vmem:[%s2070_s1 + $0x38c] ss:$16 sps:$4 sm:$0xff]  }
  0x37   :  { %893 = vmatpush1.bf16.msra.mxu0 %v1493_v55  ;;  %999 = vmatpush1.bf16.msra.mxu1 %v1494_v56  ;;  %v1582_v55 = vld [vmem:[%s2070_s1 + $0x380] ss:$16 sps:$4 sm:$0xff]   ;;  %v1585_v56 = vld [vmem:[%s2070_s1 + $0x388] ss:$16 sps:$4 sm:$0xff]  }
  0x38   :  { %894 = vmatprep.subr.bf16.mxu0 %v1495_v57  ;;  %1000 = vmatprep.subr.bf16.mxu1 %v1497_v58  ;;  %v1590_v57 = vld [vmem:[%s2070_s1 + $0x3a4] ss:$16 sps:$4 sm:$0xff]   ;;  %v1593_v58 = vld [vmem:[%s2070_s1 + $0x3ac] ss:$16 sps:$4 sm:$0xff]  }
  0x3b   :  { %895 = vmatpush1.bf16.msra.mxu0 %v1499_v59  ;;  %1001 = vmatpush1.bf16.msra.mxu1 %v1500_v60  ;;  %v1588_v59 = vld [vmem:[%s2070_s1 + $0x3a0] ss:$16 sps:$4 sm:$0xff]   ;;  %v1591_v60 = vld [vmem:[%s2070_s1 + $0x3a8] ss:$16 sps:$4 sm:$0xff]  }
  0x3c   :  { %896 = vmatprep.subr.bf16.mxu0 %v1501_v61  ;;  %1002 = vmatprep.subr.bf16.mxu1 %v1503_v62  ;;  %v1599_v61 = vld [vmem:[%s2070_s1 + $0x3c4] ss:$16 sps:$4 sm:$0xff]   ;;  %v1602_v62 = vld [vmem:[%s2070_s1 + $0x3cc] ss:$16 sps:$4 sm:$0xff]  }
  0x3f   :  { %897 = vmatpush1.bf16.msra.mxu0 %v1505_v63  ;;  %1003 = vmatpush1.bf16.msra.mxu1 %v1506_v0  ;;  %v1597_v63 = vld [vmem:[%s2070_s1 + $0x3c0] ss:$16 sps:$4 sm:$0xff]   ;;  %v1600_v0 = vld [vmem:[%s2070_s1 + $0x3c8] ss:$16 sps:$4 sm:$0xff]  }
  0x40   :  { %919 = vmatprep.subr.bf16.mxu0 %v1512_v1  ;;  %1025 = vmatprep.subr.bf16.mxu1 %v1515_v2  ;;  %v1605_v1 = vld [vmem:[%s2070_s1 + $0x3e4] ss:$16 sps:$4 sm:$0xff]   ;;  %v1608_v2 = vld [vmem:[%s2070_s1 + $0x3ec] ss:$16 sps:$4 sm:$0xff]  }
  0x42   :  { %899 = vmatmul.mubr.bf16.vlgmr.msra.gmra.mrb[0].mxu0 %v1507_v3  ;;  %1005 = vmatmul.mubr.bf16.vlgmr.msra.gmra.mrb[0].mxu1 %v1507_v3  ;;  %v1603_v3 = vld [vmem:[%s2070_s1 + $0x3e0] ss:$16 sps:$4 sm:$0xff]  }
  0x43   :  { %920 = vmatpush1.bf16.msra.mxu0 %v1510_v4  ;;  %1026 = vmatpush1.bf16.msra.mxu1 %v1513_v5  ;;  %v1606_v4 = vld [vmem:[%s2070_s1 + $0x3e8] ss:$16 sps:$4 sm:$0xff]  }
  0x44   :  { %921 = vmatprep.subr.bf16.mxu0 %v1518_v6  ;;  %1027 = vmatprep.subr.bf16.mxu1 %v1521_v7  ;;  %v1609_v5 = vld [vmem:[%s2071_s0 + $0x8] ss:$16 sps:$4 sm:$0xff]   ;;  %v1612_v6 = vld [vmem:[%s2071_s0 + $0x2c] ss:$16 sps:$4 sm:$0xff]  }
  0x45   :  { %908 = vmatprep.mubr.bf16.mxu0 %v1594_v25  ;;  %1014 = vmatprep.mubr.bf16.mxu1 %v1594_v25  ;;  %v1614_v7 = vld [vmem:[%s2071_s0 + $0x28] ss:$16 sps:$4 sm:$0xff]  }
  0x47   :  { %922 = vmatpush1.bf16.msra.mxu0 %v1516_v8  ;;  %1028 = vmatpush1.bf16.msra.mxu1 %v1519_v9  ;;  %v1131_v8 = vlaneseq }
  0x48   :  { %923 = vmatprep.subr.bf16.mxu0 %v1524_v10  ;;  %1029 = vmatprep.subr.bf16.mxu1 %v1527_v11 }
  0x49   :  { %v1132_v9 = vshrl.u32 %v1131_v8, 7 }
  0x4a   :  { %909 = vmatmul.mubr.bf16.gmra.mrb[4].mxu0 %v1596_v27  ;;  %1015 = vmatmul.mubr.bf16.gmra.mrb[4].mxu1 %v1596_v27 }
  0x4b   :  { %924 = vmatpush1.bf16.msra.mxu0 %v1522_v12  ;;  %1030 = vmatpush1.bf16.msra.mxu1 %v1525_v13  ;;  %v1133_v10 = vsub.s32 0, %v1132_v9  ;;  %v1141_v11 = vsub.s32 2, %v1132_v9  ;;  %v1129_v12 = vld [vmem:[%s2072_s2] sm:$0xf]  ;;  %v1137_v13 = vsub.s32 1, %v1132_v9 }
  0x4c   :  { %925 = vmatprep.subr.bf16.mxu0 %v1530_v14  ;;  %1031 = vmatprep.subr.bf16.mxu1 %v1533_v15  ;;  %v1145_v14 = vsub.s32 3, %v1132_v9 }
  0x4d   :  { %951 = vmatprep.mubr.bf16.mxu0 %v1611_v34  ;;  %1057 = vmatprep.mubr.bf16.mxu1 %v1611_v34  ;;  %v1134_v15 = vrot.slane %v1129_v12, %v1133_v10 }
  0x4f   :  { %926 = vmatpush1.bf16.msra.mxu0 %v1528_v16  ;;  %1032 = vmatpush1.bf16.msra.mxu1 %v1531_v17  ;;  %v1142_v16 = vrot.slane %v1129_v12, %v1141_v11  ;;  %v1138_v17 = vrot.slane %v1129_v12, %v1137_v13 }
  0x50   :  { %927 = vmatprep.subr.bf16.mxu0 %v1536_v18  ;;  %1033 = vmatprep.subr.bf16.mxu1 %v1539_v19  ;;  %v1146_v18 = vrot.slane %v1129_v12, %v1145_v14 }
  0x53   :  { %928 = vmatpush1.bf16.msra.mxu0 %v1534_v20  ;;  %1034 = vmatpush1.bf16.msra.mxu1 %v1537_v21 }
  0x54   :  { %929 = vmatprep.subr.bf16.mxu0 %v1542_v22  ;;  %1035 = vmatprep.subr.bf16.mxu1 %v1545_v23 }
  0x57   :  { %930 = vmatpush1.bf16.msra.mxu0 %v1540_v24  ;;  %1036 = vmatpush1.bf16.msra.mxu1 %v1543_v26 }
  0x58   :  { %931 = vmatprep.subr.bf16.mxu0 %v1548_v28  ;;  %1037 = vmatprep.subr.bf16.mxu1 %v1551_v29 }
  0x5b   :  { %932 = vmatpush1.bf16.msra.mxu0 %v1546_v30  ;;  %1038 = vmatpush1.bf16.msra.mxu1 %v1549_v31 }
  0x5c   :  { %933 = vmatprep.subr.bf16.mxu0 %v1554_v32  ;;  %1039 = vmatprep.subr.bf16.mxu1 %v1557_v33 }
  0x5f   :  { %934 = vmatpush1.bf16.msra.mxu0 %v1552_v35  ;;  %1040 = vmatpush1.bf16.msra.mxu1 %v1555_v36 }
  0x60   :  { %935 = vmatprep.subr.bf16.mxu0 %v1560_v37  ;;  %1041 = vmatprep.subr.bf16.mxu1 %v1563_v38 }
  0x63   :  { %936 = vmatpush1.bf16.msra.mxu0 %v1558_v39  ;;  %1042 = vmatpush1.bf16.msra.mxu1 %v1561_v40 }
  0x64   :  { %937 = vmatprep.subr.bf16.mxu0 %v1566_v41  ;;  %1043 = vmatprep.subr.bf16.mxu1 %v1569_v42 }
  0x67   :  { %938 = vmatpush1.bf16.msra.mxu0 %v1564_v43  ;;  %1044 = vmatpush1.bf16.msra.mxu1 %v1567_v44 }
  0x68   :  { %939 = vmatprep.subr.bf16.mxu0 %v1572_v45  ;;  %1045 = vmatprep.subr.bf16.mxu1 %v1575_v46 }
  0x6b   :  { %940 = vmatpush1.bf16.msra.mxu0 %v1570_v47  ;;  %1046 = vmatpush1.bf16.msra.mxu1 %v1573_v48 }
  0x6c   :  { %941 = vmatprep.subr.bf16.mxu0 %v1578_v49  ;;  %1047 = vmatprep.subr.bf16.mxu1 %v1581_v50 }
  0x6f   :  { %942 = vmatpush1.bf16.msra.mxu0 %v1576_v51  ;;  %1048 = vmatpush1.bf16.msra.mxu1 %v1579_v52 }
  0x70   :  { %943 = vmatprep.subr.bf16.mxu0 %v1584_v53  ;;  %1049 = vmatprep.subr.bf16.mxu1 %v1587_v54 }
  0x73   :  { %944 = vmatpush1.bf16.msra.mxu0 %v1582_v55  ;;  %1050 = vmatpush1.bf16.msra.mxu1 %v1585_v56 }
  0x74   :  { %945 = vmatprep.subr.bf16.mxu0 %v1590_v57  ;;  %1051 = vmatprep.subr.bf16.mxu1 %v1593_v58 }
  0x77   :  { %946 = vmatpush1.bf16.msra.mxu0 %v1588_v59  ;;  %1052 = vmatpush1.bf16.msra.mxu1 %v1591_v60 }
  0x78   :  { %947 = vmatprep.subr.bf16.mxu0 %v1599_v61  ;;  %1053 = vmatprep.subr.bf16.mxu1 %v1602_v62 }
  0x7b   :  { %948 = vmatpush1.bf16.msra.mxu0 %v1597_v63  ;;  %1054 = vmatpush1.bf16.msra.mxu1 %v1600_v0 }
  0x7c   :  { %949 = vmatprep.subr.bf16.mxu0 %v1605_v1  ;;  %1055 = vmatprep.subr.bf16.mxu1 %v1608_v2 }
  0x7f   :  { %950 = vmatpush1.bf16.msra.mxu0 %v1603_v3  ;;  %1056 = vmatpush1.bf16.msra.mxu1 %v1606_v4 }
  0x82   :  { %952 = vmatmul.mubr.bf16.vlgmr.msra.gmra.mrb[0].mxu0 %v1609_v5  ;;  %1058 = vmatmul.mubr.bf16.vlgmr.msra.gmra.mrb[0].mxu1 %v1609_v5 }
  0x83   :  { %961 = vmatprep.mubr.bf16.mxu0 %v1612_v6  ;;  %1067 = vmatprep.mubr.bf16.mxu1 %v1612_v6 }
  0x8a   :  { %962 = vmatmul.mubr.bf16.gmra.mrb[4].mxu0 %v1614_v7  ;;  %1068 = vmatmul.mubr.bf16.gmra.mrb[4].mxu1 %v1614_v7 }
 0x155   :  { %v953_v19 = vpop.f32.mrb[0].mxu0  ;;  %v1059_v20 = vpop.f32.mrb[0].mxu1 }
 0x156   :  { %v1151_v21 = vadd.f32 %v1134_v15, %v953_v19  ;;  %v1153_v22 = vadd.f32 %v1142_v16, %v1059_v20  ;;  %v955_v23 = vpop.f32.mrb[1].mxu0  ;;  %v1061_v24 = vpop.f32.mrb[1].mxu1 }
 0x157   :  { %v1152_v25 = vadd.f32 %v1138_v17, %v955_v23  ;;  %v1154_v26 = vadd.f32 %v1146_v18, %v1061_v24  ;;  %v957_v27 = vpop.f32.mrb[2].mxu0  ;;  %v1063_v28 = vpop.f32.mrb[2].mxu1 }
 0x158   :  { %v1167_v29 = vmax.f32 %v1151_v21, 0.0  ;;  %v1169_v30 = vmax.f32 %v1153_v22, 0.0  ;;  %v1155_v31 = vadd.f32 %v1134_v15, %v957_v27  ;;  %v1157_v32 = vadd.f32 %v1142_v16, %v1063_v28  ;;  %v959_v33 = vpop.f32.mrb[3].mxu0  ;;  %v1065_v34 = vpop.f32.mrb[3].mxu1 }
 0x159   :  { %v1168_v35 = vmax.f32 %v1152_v25, 0.0  ;;  %v1170_v36 = vmax.f32 %v1154_v26, 0.0  ;;  %v1156_v37 = vadd.f32 %v1138_v17, %v959_v33  ;;  %v1158_v38 = vadd.f32 %v1146_v18, %v1065_v34 }
 0x15a   :  { %v1171_v39 = vmax.f32 %v1155_v31, 0.0  ;;  %v1173_v40 = vmax.f32 %v1157_v32, 0.0 }
 0x15b   :  { %v1387_v41 = vpack.c.bf16 %v1168_v35, %v1167_v29  ;;  %v1388_v42 = vpack.c.bf16 %v1170_v36, %v1169_v30  ;;  %v1172_v43 = vmax.f32 %v1156_v37, 0.0  ;;  %v1174_v44 = vmax.f32 %v1158_v38, 0.0 }
 0x15d   :  { %1231 = vst [vmem:[%s2073_s3] sm:$0xff] %v1387_v41  ;;  %1232 = vst [vmem:[%s2073_s3 + $0x8] sm:$0xff] %v1388_v42  ;;  %v1389_v45 = vpack.c.bf16 %v1172_v43, %v1171_v39  ;;  %v1390_v46 = vpack.c.bf16 %v1174_v44, %v1173_v40  ;;  %v963_v47 = vpop.f32.mrb[4].mxu0  ;;  %v1069_v48 = vpop.f32.mrb[4].mxu1 }
 0x15e   :  { %v1159_v49 = vadd.f32 %v1134_v15, %v963_v47  ;;  %v1161_v50 = vadd.f32 %v1142_v16, %v1069_v48  ;;  %v965_v51 = vpop.f32.mrb[5].mxu0  ;;  %v1071_v52 = vpop.f32.mrb[5].mxu1 }
 0x15f   :  { %1233 = vst [vmem:[%s2073_s3 + $0x10] sm:$0xff] %v1389_v45  ;;  %1234 = vst [vmem:[%s2073_s3 + $0x18] sm:$0xff] %v1390_v46  ;;  %v1160_v53 = vadd.f32 %v1138_v17, %v965_v51  ;;  %v1162_v54 = vadd.f32 %v1146_v18, %v1071_v52  ;;  %v967_v55 = vpop.f32.mrb[6].mxu0  ;;  %v1073_v56 = vpop.f32.mrb[6].mxu1 }
 0x160   :  { %v1175_v57 = vmax.f32 %v1159_v49, 0.0  ;;  %v1177_v58 = vmax.f32 %v1161_v50, 0.0  ;;  %v1163_v59 = vadd.f32 %v1134_v15, %v967_v55  ;;  %v1165_v60 = vadd.f32 %v1142_v16, %v1073_v56  ;;  %v969_v61 = vpop.f32.mrb[7].mxu0  ;;  %v1075_v62 = vpop.f32.mrb[7].mxu1 }
 0x161   :  { %v1176_v63 = vmax.f32 %v1160_v53, 0.0  ;;  %v1178_v0 = vmax.f32 %v1162_v54, 0.0  ;;  %v1164_v1 = vadd.f32 %v1138_v17, %v969_v61  ;;  %v1166_v2 = vadd.f32 %v1146_v18, %v1075_v62 }
 0x162   :  { %v1179_v3 = vmax.f32 %v1163_v59, 0.0  ;;  %v1181_v4 = vmax.f32 %v1165_v60, 0.0 }
 0x163   :  { %v1391_v5 = vpack.c.bf16 %v1176_v63, %v1175_v57  ;;  %v1392_v6 = vpack.c.bf16 %v1178_v0, %v1177_v58  ;;  %v1180_v7 = vmax.f32 %v1164_v1, 0.0  ;;  %v1182_v8 = vmax.f32 %v1166_v2, 0.0 }
 0x165   :  { %1235 = vst [vmem:[%s2073_s3 + $0x20] sm:$0xff] %v1391_v5  ;;  %1236 = vst [vmem:[%s2073_s3 + $0x28] sm:$0xff] %v1392_v6  ;;  %v1393_v9 = vpack.c.bf16 %v1180_v7, %v1179_v3  ;;  %v1394_v10 = vpack.c.bf16 %v1182_v8, %v1181_v4 }
 0x167   :  { %1237 = vst [vmem:[%s2073_s3 + $0x30] sm:$0xff] %v1393_v9  ;;  %1238 = vst [vmem:[%s2073_s3 + $0x38] sm:$0xff] %v1394_v10 }

// kernel: generator_for_video_forward.22
= control target key start
LH: loop header
LB: loop body
LE: loop exit
PB: predicated region body
PF: predicated region fallthrough
CT: control target
= control target key end

     0   :  { %s792_s1 = inlined_call_operand.vmem [shape: bf16[512,128], index: 1, kind: input, shape index: {}]   ;;  %s793_s0 = inlined_call_operand.vmem [shape: bf16[32,512], index: 0, kind: input, shape index: {}]   ;;  %s794_s2 = inlined_call_operand.vmem [shape: f32[1,128], index: 2, kind: input, shape index: {}]   ;;  %s795_s3 = inlined_call_operand.vmem [shape: bf16[32,128], index: 3, kind: output, shape index: {}]  }
   0x1   :  { %v599_v0 = vld [vmem:[%s792_s1 + $0x40] sm:$0xff]   ;;  %v603_v4 = vld [vmem:[%s792_s1 + $0x48] sm:$0xff]   ;;  %v607_v8 = vld [vmem:[%s792_s1 + $0x50] sm:$0xff]  }
   0x2   :  { %v600_v1 = vld [vmem:[%s792_s1 + $0xc0] sm:$0xff]   ;;  %543 = vmatprep.subr.bf16.mxu0 %v599_v0  ;;  %v604_v5 = vld [vmem:[%s792_s1 + $0xc8] sm:$0xff]   ;;  %v608_v9 = vld [vmem:[%s792_s1 + $0xd0] sm:$0xff]  }
   0x3   :  { %v601_v2 = vld [vmem:[%s792_s1] sm:$0xff]   ;;  %571 = vmatprep.subr.bf16.mxu1 %v600_v1  ;;  %v605_v6 = vld [vmem:[%s792_s1 + $0x8] sm:$0xff]   ;;  %v609_v10 = vld [vmem:[%s792_s1 + $0x10] sm:$0xff]  }
   0x4   :  { %v602_v3 = vld [vmem:[%s792_s1 + $0x80] sm:$0xff]   ;;  %544 = vmatpush3.bf16.msra.mxu0 %v601_v2  ;;  %v606_v7 = vld [vmem:[%s792_s1 + $0x88] sm:$0xff]   ;;  %v610_v11 = vld [vmem:[%s792_s1 + $0x90] sm:$0xff]  }
   0x5   :  { %572 = vmatpush3.bf16.msra.mxu1 %v602_v3  ;;  %545 = vmatprep.subr.bf16.mxu0 %v603_v4  ;;  %v611_v12 = vld [vmem:[%s792_s1 + $0x58] sm:$0xff]   ;;  %v615_v16 = vld [vmem:[%s792_s1 + $0x60] sm:$0xff]   ;;  %v619_v20 = vld [vmem:[%s792_s1 + $0x68] sm:$0xff]  }
   0x6   :  { %573 = vmatprep.subr.bf16.mxu1 %v604_v5  ;;  %v612_v13 = vld [vmem:[%s792_s1 + $0xd8] sm:$0xff]   ;;  %v616_v17 = vld [vmem:[%s792_s1 + $0xe0] sm:$0xff]   ;;  %v620_v21 = vld [vmem:[%s792_s1 + $0xe8] sm:$0xff]  }
   0x7   :  { %v613_v14 = vld [vmem:[%s792_s1 + $0x18] sm:$0xff]   ;;  %v617_v18 = vld [vmem:[%s792_s1 + $0x20] sm:$0xff]   ;;  %v621_v22 = vld [vmem:[%s792_s1 + $0x28] sm:$0xff]  }
   0x8   :  { %546 = vmatpush3.bf16.msra.mxu0 %v605_v6  ;;  %v614_v15 = vld [vmem:[%s792_s1 + $0x98] sm:$0xff]   ;;  %v618_v19 = vld [vmem:[%s792_s1 + $0xa0] sm:$0xff]   ;;  %v622_v23 = vld [vmem:[%s792_s1 + $0xa8] sm:$0xff]  }
   0x9   :  { %574 = vmatpush3.bf16.msra.mxu1 %v606_v7  ;;  %547 = vmatprep.subr.bf16.mxu0 %v607_v8  ;;  %v623_v24 = vld [vmem:[%s792_s1 + $0x70] sm:$0xff]   ;;  %v627_v28 = vld [vmem:[%s792_s1 + $0x78] sm:$0xff]   ;;  %v523_v49 = vld [vmem:[%s794_s2] ss:$0 sm:$0xff] }
   0xa   :  { %575 = vmatprep.subr.bf16.mxu1 %v608_v9  ;;  %v624_v25 = vld [vmem:[%s792_s1 + $0xf0] sm:$0xff]   ;;  %v628_v29 = vld [vmem:[%s792_s1 + $0xf8] sm:$0xff]  }
   0xb   :  { %v625_v26 = vld [vmem:[%s792_s1 + $0x30] sm:$0xff]   ;;  %v629_v30 = vld [vmem:[%s792_s1 + $0x38] sm:$0xff]  }
   0xc   :  { %548 = vmatpush3.bf16.msra.mxu0 %v609_v10  ;;  %v626_v27 = vld [vmem:[%s792_s1 + $0xb0] sm:$0xff]   ;;  %v630_v31 = vld [vmem:[%s792_s1 + $0xb8] sm:$0xff]  }
   0xd   :  { %576 = vmatpush3.bf16.msra.mxu1 %v610_v11  ;;  %549 = vmatprep.subr.bf16.mxu0 %v611_v12  ;;  %v631_v32 = vld [vmem:[%s793_s0] ss:$16 sps:$4 sm:$0xff]   ;;  %v633_v33 = vld [vmem:[%s793_s0 + $0x4] ss:$16 sps:$4 sm:$0xff]   ;;  %v634_v34 = vld [vmem:[%s793_s0 + $0x8] ss:$16 sps:$4 sm:$0xff]  }
   0xe   :  { %577 = vmatprep.subr.bf16.mxu1 %v612_v13  ;;  %v636_v35 = vld [vmem:[%s793_s0 + $0xc] ss:$16 sps:$4 sm:$0xff]   ;;  %363 = vmatprep.mubr.bf16.mxu0 %v633_v33  ;;  %v637_v36 = vld [vmem:[%s793_s0 + $0x24] ss:$16 sps:$4 sm:$0xff]   ;;  %v641_v38 = vld [vmem:[%s793_s0 + $0x20] ss:$16 sps:$4 sm:$0xff]  }
   0xf   :  { %412 = vmatprep.mubr.bf16.mxu1 %v636_v35  ;;  %v639_v37 = vld [vmem:[%s793_s0 + $0x2c] ss:$16 sps:$4 sm:$0xff]   ;;  %v642_v39 = vld [vmem:[%s793_s0 + $0x28] ss:$16 sps:$4 sm:$0xff]  }
  0x10   :  { %550 = vmatpush3.bf16.msra.mxu0 %v613_v14 }
  0x11   :  { %578 = vmatpush3.bf16.msra.mxu1 %v614_v15  ;;  %551 = vmatprep.subr.bf16.mxu0 %v615_v16 }
  0x12   :  { %579 = vmatprep.subr.bf16.mxu1 %v616_v17 }
  0x14   :  { %552 = vmatpush3.bf16.msra.mxu0 %v617_v18 }
  0x15   :  { %580 = vmatpush3.bf16.msra.mxu1 %v618_v19  ;;  %553 = vmatprep.subr.bf16.mxu0 %v619_v20 }
  0x16   :  { %581 = vmatprep.subr.bf16.mxu1 %v620_v21 }
  0x18   :  { %554 = vmatpush3.bf16.msra.mxu0 %v621_v22 }
  0x19   :  { %582 = vmatpush3.bf16.msra.mxu1 %v622_v23  ;;  %555 = vmatprep.subr.bf16.mxu0 %v623_v24 }
  0x1a   :  { %583 = vmatprep.subr.bf16.mxu1 %v624_v25 }
  0x1c   :  { %556 = vmatpush3.bf16.msra.mxu0 %v625_v26 }
  0x1d   :  { %584 = vmatpush3.bf16.msra.mxu1 %v626_v27  ;;  %557 = vmatprep.subr.bf16.mxu0 %v627_v28 }
  0x1e   :  { %585 = vmatprep.subr.bf16.mxu1 %v628_v29 }
  0x20   :  { %558 = vmatpush3.bf16.msra.mxu0 %v629_v30 }
  0x21   :  { %586 = vmatpush3.bf16.msra.mxu1 %v630_v31 }
  0x23   :  { %364 = vmatmul.mubr.bf16.vlgmr.msra.gmra.mrb[0].mxu0 %v631_v32 }
  0x24   :  { %413 = vmatmul.mubr.bf16.vlgmr.msra.gmra.mrb[0].mxu1 %v634_v34  ;;  %371 = vmatprep.mubr.bf16.mxu0 %v637_v36 }
  0x25   :  { %420 = vmatprep.mubr.bf16.mxu1 %v639_v37 }
  0x2b   :  { %372 = vmatmul.mubr.bf16.gmra.mrb[4].mxu0 %v641_v38 }
  0x2c   :  { %421 = vmatmul.mubr.bf16.gmra.mrb[4].mxu1 %v642_v39 }
  0xf6   :  { %v559_v40 = vpop.f32.mrb[0].mxu0 }
  0xf7   :  { %v587_v41 = vpop.f32.mrb[0].mxu1  ;;  %v560_v42 = vpop.f32.mrb[1].mxu0 }
  0xf8   :  { %v561_v43 = vadd.f32 %v560_v42, %v559_v40  ;;  %v588_v44 = vpop.f32.mrb[1].mxu1  ;;  %v562_v45 = vpop.f32.mrb[2].mxu0 }
  0xf9   :  { %v589_v46 = vadd.f32 %v588_v44, %v587_v41  ;;  %v590_v47 = vpop.f32.mrb[2].mxu1  ;;  %v563_v48 = vpop.f32.mrb[3].mxu0 }
  0xfa   :  { %v564_v50 = vadd.f32 %v563_v48, %v562_v45  ;;  %v591_v51 = vpop.f32.mrb[3].mxu1 }
  0xfb   :  { %v415_v52 = vadd.f32 %v589_v46, %v561_v43  ;;  %v592_v53 = vadd.f32 %v591_v51, %v590_v47 }
  0xfd   :  { %v451_v54 = vadd.f32 %v523_v49, %v415_v52  ;;  %v418_v55 = vadd.f32 %v592_v53, %v564_v50 }
  0xfe   :  { %v565_v56 = vpop.f32.mrb[4].mxu0 }
  0xff   :  { %v452_v57 = vadd.f32 %v523_v49, %v418_v55  ;;  %v593_v58 = vpop.f32.mrb[4].mxu1  ;;  %v566_v59 = vpop.f32.mrb[5].mxu0  ;;  %v455_v63 = vmax.f32 %v451_v54, 0.0 }
 0x100   :  { %v567_v60 = vadd.f32 %v566_v59, %v565_v56  ;;  %v594_v61 = vpop.f32.mrb[5].mxu1  ;;  %v568_v62 = vpop.f32.mrb[6].mxu0 }
 0x101   :  { %v456_v0 = vmax.f32 %v452_v57, 0.0  ;;  %v595_v1 = vadd.f32 %v594_v61, %v593_v58  ;;  %v596_v2 = vpop.f32.mrb[6].mxu1  ;;  %v569_v3 = vpop.f32.mrb[7].mxu0 }
 0x102   :  { %v570_v4 = vadd.f32 %v569_v3, %v568_v62  ;;  %v597_v5 = vpop.f32.mrb[7].mxu1 }
 0x103   :  { %v535_v6 = vpack.c.bf16 %v456_v0, %v455_v63  ;;  %v423_v7 = vadd.f32 %v595_v1, %v567_v60  ;;  %v598_v8 = vadd.f32 %v597_v5, %v596_v2 }
 0x105   :  { %536 = vst [vmem:[%s795_s3] sm:$0xff] %v535_v6   ;;  %v453_v9 = vadd.f32 %v523_v49, %v423_v7  ;;  %v426_v10 = vadd.f32 %v598_v8, %v570_v4 }
 0x107   :  { %v454_v11 = vadd.f32 %v523_v49, %v426_v10  ;;  %v457_v12 = vmax.f32 %v453_v9, 0.0 }
 0x109   :  { %v458_v13 = vmax.f32 %v454_v11, 0.0 }
 0x10b   :  { %v540_v14 = vpack.c.bf16 %v458_v13, %v457_v12 }
 0x10d   :  { %542 = vst [vmem:[%s795_s3 + $0x8] sm:$0xff] %v540_v14  }

// kernel: generator_for_video_forward.21
= control target key start
LH: loop header
LB: loop body
LE: loop exit
PB: predicated region body
PF: predicated region fallthrough
CT: control target
= control target key end

     0   :  { %s7590_s1 = inlined_call_operand.vmem [shape: bf16[512,512], index: 1, kind: input, shape index: {}]   ;;  %s7591_s0 = inlined_call_operand.vmem [shape: bf16[32,512], index: 0, kind: input, shape index: {}]   ;;  %s7592_s3 = inlined_call_operand.vmem [shape: bf16[512,512], index: 3, kind: input, shape index: {}]   ;;  %s7593_s2 = inlined_call_operand.vmem [shape: bf16[32,512], index: 2, kind: input, shape index: {}]   ;;  %s7594_s5 = inlined_call_operand.vmem [shape: bf16[512,512], index: 5, kind: input, shape index: {}]   ;;  %s7595_s4 = inlined_call_operand.vmem [shape: bf16[32,512], index: 4, kind: input, shape index: {}]   ;;  %s7596_s7 = inlined_call_operand.vmem [shape: bf16[512,512], index: 7, kind: input, shape index: {}]   ;;  %s7597_s6 = inlined_call_operand.vmem [shape: bf16[32,512], index: 6, kind: input, shape index: {}]   ;;  %s7598_s8 = inlined_call_operand.vmem [shape: f32[1,512], index: 8, kind: input, shape index: {}]   ;;  %s7599_s9 = inlined_call_operand.vmem [shape: bf16[32,512], index: 9, kind: output, shape index: {}]  }
   0x1   :  { %v5065_v0 = vld [vmem:[%s7590_s1 + $0x4] ss:$16 sps:$4 sm:$0xff]   ;;  %v5067_v1 = vld [vmem:[%s7590_s1 + $0xc] ss:$16 sps:$4 sm:$0xff]   ;;  %v5069_v2 = vld [vmem:[%s7590_s1] ss:$16 sps:$4 sm:$0xff]  }
   0x2   :  { %884 = vmatprep.subr.bf16.mxu0 %v5065_v0  ;;  %v5070_v3 = vld [vmem:[%s7590_s1 + $0x8] ss:$16 sps:$4 sm:$0xff]   ;;  %990 = vmatprep.subr.bf16.mxu1 %v5067_v1  ;;  %v5071_v4 = vld [vmem:[%s7590_s1 + $0x24] ss:$16 sps:$4 sm:$0xff]   ;;  %v5073_v5 = vld [vmem:[%s7590_s1 + $0x2c] ss:$16 sps:$4 sm:$0xff]  }
   0x3   :  { %885 = vmatpush1.bf16.msra.mxu0 %v5069_v2  ;;  %991 = vmatpush1.bf16.msra.mxu1 %v5070_v3  ;;  %v5075_v6 = vld [vmem:[%s7590_s1 + $0x20] ss:$16 sps:$4 sm:$0xff]   ;;  %v5076_v7 = vld [vmem:[%s7590_s1 + $0x28] ss:$16 sps:$4 sm:$0xff]   ;;  %v5077_v8 = vld [vmem:[%s7590_s1 + $0x44] ss:$16 sps:$4 sm:$0xff]  }
   0x4   :  { %886 = vmatprep.subr.bf16.mxu0 %v5071_v4  ;;  %992 = vmatprep.subr.bf16.mxu1 %v5073_v5  ;;  %v5079_v9 = vld [vmem:[%s7590_s1 + $0x4c] ss:$16 sps:$4 sm:$0xff]   ;;  %v5081_v10 = vld [vmem:[%s7590_s1 + $0x40] ss:$16 sps:$4 sm:$0xff]   ;;  %v5082_v11 = vld [vmem:[%s7590_s1 + $0x48] ss:$16 sps:$4 sm:$0xff]  }
   0x5   :  { %v5083_v12 = vld [vmem:[%s7590_s1 + $0x64] ss:$16 sps:$4 sm:$0xff]   ;;  %v5085_v13 = vld [vmem:[%s7590_s1 + $0x6c] ss:$16 sps:$4 sm:$0xff]   ;;  %v5087_v14 = vld [vmem:[%s7590_s1 + $0x60] ss:$16 sps:$4 sm:$0xff]  }
   0x6   :  { %v5088_v15 = vld [vmem:[%s7590_s1 + $0x68] ss:$16 sps:$4 sm:$0xff]   ;;  %v5089_v16 = vld [vmem:[%s7590_s1 + $0x84] ss:$16 sps:$4 sm:$0xff]   ;;  %v5091_v17 = vld [vmem:[%s7590_s1 + $0x8c] ss:$16 sps:$4 sm:$0xff]  }
   0x7   :  { %887 = vmatpush1.bf16.msra.mxu0 %v5075_v6  ;;  %993 = vmatpush1.bf16.msra.mxu1 %v5076_v7  ;;  %v5093_v18 = vld [vmem:[%s7590_s1 + $0x80] ss:$16 sps:$4 sm:$0xff]   ;;  %v5094_v19 = vld [vmem:[%s7590_s1 + $0x88] ss:$16 sps:$4 sm:$0xff]   ;;  %v5095_v20 = vld [vmem:[%s7590_s1 + $0xa4] ss:$16 sps:$4 sm:$0xff]  }
   0x8   :  { %888 = vmatprep.subr.bf16.mxu0 %v5077_v8  ;;  %994 = vmatprep.subr.bf16.mxu1 %v5079_v9  ;;  %v5097_v21 = vld [vmem:[%s7590_s1 + $0xac] ss:$16 sps:$4 sm:$0xff]   ;;  %v5099_v22 = vld [vmem:[%s7590_s1 + $0xa0] ss:$16 sps:$4 sm:$0xff]   ;;  %v5100_v23 = vld [vmem:[%s7590_s1 + $0xa8] ss:$16 sps:$4 sm:$0xff]  }
   0x9   :  { %v5101_v24 = vld [vmem:[%s7590_s1 + $0xc4] ss:$16 sps:$4 sm:$0xff]   ;;  %v5103_v25 = vld [vmem:[%s7590_s1 + $0xcc] ss:$16 sps:$4 sm:$0xff]   ;;  %v5105_v26 = vld [vmem:[%s7590_s1 + $0xc0] ss:$16 sps:$4 sm:$0xff]  }
   0xa   :  { %v5106_v27 = vld [vmem:[%s7590_s1 + $0xc8] ss:$16 sps:$4 sm:$0xff]   ;;  %v5107_v28 = vld [vmem:[%s7590_s1 + $0xe4] ss:$16 sps:$4 sm:$0xff]   ;;  %v5109_v29 = vld [vmem:[%s7590_s1 + $0xec] ss:$16 sps:$4 sm:$0xff]  }
   0xb   :  { %889 = vmatpush1.bf16.msra.mxu0 %v5081_v10  ;;  %995 = vmatpush1.bf16.msra.mxu1 %v5082_v11  ;;  %v5111_v30 = vld [vmem:[%s7590_s1 + $0xe0] ss:$16 sps:$4 sm:$0xff]   ;;  %v5112_v31 = vld [vmem:[%s7590_s1 + $0xe8] ss:$16 sps:$4 sm:$0xff]   ;;  %v5113_v32 = vld [vmem:[%s7590_s1 + $0x104] ss:$16 sps:$4 sm:$0xff]  }
   0xc   :  { %890 = vmatprep.subr.bf16.mxu0 %v5083_v12  ;;  %996 = vmatprep.subr.bf16.mxu1 %v5085_v13  ;;  %v5115_v33 = vld [vmem:[%s7590_s1 + $0x10c] ss:$16 sps:$4 sm:$0xff]   ;;  %v5117_v34 = vld [vmem:[%s7590_s1 + $0x100] ss:$16 sps:$4 sm:$0xff]   ;;  %v5118_v35 = vld [vmem:[%s7590_s1 + $0x108] ss:$16 sps:$4 sm:$0xff]  }
   0xd   :  { %v5119_v36 = vld [vmem:[%s7590_s1 + $0x124] ss:$16 sps:$4 sm:$0xff]   ;;  %v5121_v37 = vld [vmem:[%s7590_s1 + $0x12c] ss:$16 sps:$4 sm:$0xff]   ;;  %v5123_v38 = vld [vmem:[%s7590_s1 + $0x120] ss:$16 sps:$4 sm:$0xff]  }
   0xe   :  { %v5124_v39 = vld [vmem:[%s7590_s1 + $0x128] ss:$16 sps:$4 sm:$0xff]   ;;  %v5125_v40 = vld [vmem:[%s7590_s1 + $0x144] ss:$16 sps:$4 sm:$0xff]   ;;  %v5127_v41 = vld [vmem:[%s7590_s1 + $0x14c] ss:$16 sps:$4 sm:$0xff]  }
   0xf   :  { %891 = vmatpush1.bf16.msra.mxu0 %v5087_v14  ;;  %997 = vmatpush1.bf16.msra.mxu1 %v5088_v15  ;;  %v5129_v42 = vld [vmem:[%s7590_s1 + $0x140] ss:$16 sps:$4 sm:$0xff]   ;;  %v5130_v43 = vld [vmem:[%s7590_s1 + $0x148] ss:$16 sps:$4 sm:$0xff]   ;;  %v5131_v44 = vld [vmem:[%s7590_s1 + $0x164] ss:$16 sps:$4 sm:$0xff]  }
  0x10   :  { %892 = vmatprep.subr.bf16.mxu0 %v5089_v16  ;;  %998 = vmatprep.subr.bf16.mxu1 %v5091_v17  ;;  %v5133_v45 = vld [vmem:[%s7590_s1 + $0x16c] ss:$16 sps:$4 sm:$0xff]   ;;  %v5135_v46 = vld [vmem:[%s7590_s1 + $0x160] ss:$16 sps:$4 sm:$0xff]   ;;  %v5136_v47 = vld [vmem:[%s7590_s1 + $0x168] ss:$16 sps:$4 sm:$0xff]  }
  0x11   :  { %v5163_v48 = vld [vmem:[%s7591_s0 + $0x4] ss:$16 sps:$4 sm:$0xff]   ;;  %v5139_v50 = vld [vmem:[%s7590_s1 + $0x18c] ss:$16 sps:$4 sm:$0xff]   ;;  %v5141_v51 = vld [vmem:[%s7590_s1 + $0x180] ss:$16 sps:$4 sm:$0xff]  }
  0x12   :  { %v5137_v49 = vld [vmem:[%s7590_s1 + $0x184] ss:$16 sps:$4 sm:$0xff]   ;;  %916 = vmatprep.mubr.bf16.mxu0 %v5163_v48  ;;  %1022 = vmatprep.mubr.bf16.mxu1 %v5163_v48  ;;  %v5142_v52 = vld [vmem:[%s7590_s1 + $0x188] ss:$16 sps:$4 sm:$0xff]   ;;  %v5145_v54 = vld [vmem:[%s7590_s1 + $0x1ac] ss:$16 sps:$4 sm:$0xff]  }
  0x13   :  { %893 = vmatpush1.bf16.msra.mxu0 %v5093_v18  ;;  %999 = vmatpush1.bf16.msra.mxu1 %v5094_v19  ;;  %v5143_v53 = vld [vmem:[%s7590_s1 + $0x1a4] ss:$16 sps:$4 sm:$0xff]   ;;  %v5147_v55 = vld [vmem:[%s7590_s1 + $0x1a0] ss:$16 sps:$4 sm:$0xff]   ;;  %v5148_v56 = vld [vmem:[%s7590_s1 + $0x1a8] ss:$16 sps:$4 sm:$0xff]  }
  0x14   :  { %894 = vmatprep.subr.bf16.mxu0 %v5095_v20  ;;  %1000 = vmatprep.subr.bf16.mxu1 %v5097_v21  ;;  %v5149_v57 = vld [vmem:[%s7590_s1 + $0x1c4] ss:$16 sps:$4 sm:$0xff]   ;;  %v5151_v58 = vld [vmem:[%s7590_s1 + $0x1cc] ss:$16 sps:$4 sm:$0xff]   ;;  %v5153_v59 = vld [vmem:[%s7590_s1 + $0x1c0] ss:$16 sps:$4 sm:$0xff]  }
  0x15   :  { %v5154_v60 = vld [vmem:[%s7590_s1 + $0x1c8] ss:$16 sps:$4 sm:$0xff]   ;;  %v5155_v61 = vld [vmem:[%s7590_s1 + $0x1e4] ss:$16 sps:$4 sm:$0xff]   ;;  %v5157_v62 = vld [vmem:[%s7590_s1 + $0x1ec] ss:$16 sps:$4 sm:$0xff]  }
  0x16   :  { %v5159_v63 = vld [vmem:[%s7590_s1 + $0x1e0] ss:$16 sps:$4 sm:$0xff]   ;;  %v5160_v0 = vld [vmem:[%s7590_s1 + $0x1e8] ss:$16 sps:$4 sm:$0xff]   ;;  %v5166_v1 = vld [vmem:[%s7590_s1 + $0x204] ss:$16 sps:$4 sm:$0xff]  }
  0x17   :  { %895 = vmatpush1.bf16.msra.mxu0 %v5099_v22  ;;  %1001 = vmatpush1.bf16.msra.mxu1 %v5100_v23  ;;  %v5169_v2 = vld [vmem:[%s7590_s1 + $0x20c] ss:$16 sps:$4 sm:$0xff]   ;;  %v5161_v3 = vld [vmem:[%s7591_s0] ss:$16 sps:$4 sm:$0xff]   ;;  %v5167_v5 = vld [vmem:[%s7590_s1 + $0x208] ss:$16 sps:$4 sm:$0xff]  }
  0x18   :  { %896 = vmatprep.subr.bf16.mxu0 %v5101_v24  ;;  %1002 = vmatprep.subr.bf16.mxu1 %v5103_v25  ;;  %v5164_v4 = vld [vmem:[%s7590_s1 + $0x200] ss:$16 sps:$4 sm:$0xff]   ;;  %v5172_v6 = vld [vmem:[%s7590_s1 + $0x224] ss:$16 sps:$4 sm:$0xff]   ;;  %v5175_v7 = vld [vmem:[%s7590_s1 + $0x22c] ss:$16 sps:$4 sm:$0xff]  }
  0x19   :  { %v5170_v8 = vld [vmem:[%s7590_s1 + $0x220] ss:$16 sps:$4 sm:$0xff]   ;;  %v5173_v9 = vld [vmem:[%s7590_s1 + $0x228] ss:$16 sps:$4 sm:$0xff]   ;;  %v5178_v10 = vld [vmem:[%s7590_s1 + $0x244] ss:$16 sps:$4 sm:$0xff]  }
  0x1a   :  { %v5181_v11 = vld [vmem:[%s7590_s1 + $0x24c] ss:$16 sps:$4 sm:$0xff]   ;;  %v5176_v12 = vld [vmem:[%s7590_s1 + $0x240] ss:$16 sps:$4 sm:$0xff]   ;;  %v5179_v13 = vld [vmem:[%s7590_s1 + $0x248] ss:$16 sps:$4 sm:$0xff]  }
  0x1b   :  { %897 = vmatpush1.bf16.msra.mxu0 %v5105_v26  ;;  %1003 = vmatpush1.bf16.msra.mxu1 %v5106_v27  ;;  %v5184_v14 = vld [vmem:[%s7590_s1 + $0x264] ss:$16 sps:$4 sm:$0xff]   ;;  %v5187_v15 = vld [vmem:[%s7590_s1 + $0x26c] ss:$16 sps:$4 sm:$0xff]   ;;  %v5182_v16 = vld [vmem:[%s7590_s1 + $0x260] ss:$16 sps:$4 sm:$0xff]  }
  0x1c   :  { %898 = vmatprep.subr.bf16.mxu0 %v5107_v28  ;;  %1004 = vmatprep.subr.bf16.mxu1 %v5109_v29  ;;  %v5185_v17 = vld [vmem:[%s7590_s1 + $0x268] ss:$16 sps:$4 sm:$0xff]   ;;  %v5190_v18 = vld [vmem:[%s7590_s1 + $0x284] ss:$16 sps:$4 sm:$0xff]   ;;  %v5193_v19 = vld [vmem:[%s7590_s1 + $0x28c] ss:$16 sps:$4 sm:$0xff]  }
  0x1d   :  { %v5188_v20 = vld [vmem:[%s7590_s1 + $0x280] ss:$16 sps:$4 sm:$0xff]   ;;  %v5191_v21 = vld [vmem:[%s7590_s1 + $0x288] ss:$16 sps:$4 sm:$0xff]   ;;  %v5196_v22 = vld [vmem:[%s7590_s1 + $0x2a4] ss:$16 sps:$4 sm:$0xff]  }
  0x1e   :  { %v5199_v23 = vld [vmem:[%s7590_s1 + $0x2ac] ss:$16 sps:$4 sm:$0xff]   ;;  %v5248_v24 = vld [vmem:[%s7591_s0 + $0x24] ss:$16 sps:$4 sm:$0xff]   ;;  %v5194_v25 = vld [vmem:[%s7590_s1 + $0x2a0] ss:$16 sps:$4 sm:$0xff]  }
  0x1f   :  { %899 = vmatpush1.bf16.msra.mxu0 %v5111_v30  ;;  %1005 = vmatpush1.bf16.msra.mxu1 %v5112_v31  ;;  %v5197_v26 = vld [vmem:[%s7590_s1 + $0x2a8] ss:$16 sps:$4 sm:$0xff]   ;;  %v5202_v27 = vld [vmem:[%s7590_s1 + $0x2c4] ss:$16 sps:$4 sm:$0xff]   ;;  %v5205_v28 = vld [vmem:[%s7590_s1 + $0x2cc] ss:$16 sps:$4 sm:$0xff]  }
  0x20   :  { %900 = vmatprep.subr.bf16.mxu0 %v5113_v32  ;;  %1006 = vmatprep.subr.bf16.mxu1 %v5115_v33  ;;  %v5256_v29 = vld [vmem:[%s7591_s0 + $0x20] ss:$16 sps:$4 sm:$0xff]   ;;  %v5203_v31 = vld [vmem:[%s7590_s1 + $0x2c8] ss:$16 sps:$4 sm:$0xff]   ;;  %v5208_v32 = vld [vmem:[%s7590_s1 + $0x2e4] ss:$16 sps:$4 sm:$0xff]  }
  0x21   :  { %v5200_v30 = vld [vmem:[%s7590_s1 + $0x2c0] ss:$16 sps:$4 sm:$0xff]   ;;  %v5211_v33 = vld [vmem:[%s7590_s1 + $0x2ec] ss:$16 sps:$4 sm:$0xff]   ;;  %v5227_v48 = vld [vmem:[%s7590_s1 + $0x348] ss:$16 sps:$4 sm:$0xff]  }
  0x23   :  { %901 = vmatpush1.bf16.msra.mxu0 %v5117_v34  ;;  %1007 = vmatpush1.bf16.msra.mxu1 %v5118_v35  ;;  %v5265_v34 = vld [vmem:[%s7591_s0 + $0xc] ss:$16 sps:$4 sm:$0xff]   ;;  %v5206_v35 = vld [vmem:[%s7590_s1 + $0x2e0] ss:$16 sps:$4 sm:$0xff]  }
  0x24   :  { %902 = vmatprep.subr.bf16.mxu0 %v5119_v36  ;;  %1008 = vmatprep.subr.bf16.mxu1 %v5121_v37  ;;  %v5209_v36 = vld [vmem:[%s7590_s1 + $0x2e8] ss:$16 sps:$4 sm:$0xff]   ;;  %v5214_v37 = vld [vmem:[%s7590_s1 + $0x304] ss:$16 sps:$4 sm:$0xff]  }
  0x27   :  { %903 = vmatpush1.bf16.msra.mxu0 %v5123_v38  ;;  %1009 = vmatpush1.bf16.msra.mxu1 %v5124_v39  ;;  %v5217_v38 = vld [vmem:[%s7590_s1 + $0x30c] ss:$16 sps:$4 sm:$0xff]   ;;  %v5212_v39 = vld [vmem:[%s7590_s1 + $0x300] ss:$16 sps:$4 sm:$0xff]  }
  0x28   :  { %904 = vmatprep.subr.bf16.mxu0 %v5125_v40  ;;  %1010 = vmatprep.subr.bf16.mxu1 %v5127_v41  ;;  %v5215_v40 = vld [vmem:[%s7590_s1 + $0x308] ss:$16 sps:$4 sm:$0xff]   ;;  %v5220_v41 = vld [vmem:[%s7590_s1 + $0x324] ss:$16 sps:$4 sm:$0xff]  }
  0x2b   :  { %905 = vmatpush1.bf16.msra.mxu0 %v5129_v42  ;;  %1011 = vmatpush1.bf16.msra.mxu1 %v5130_v43  ;;  %v5223_v42 = vld [vmem:[%s7590_s1 + $0x32c] ss:$16 sps:$4 sm:$0xff]   ;;  %v5218_v43 = vld [vmem:[%s7590_s1 + $0x320] ss:$16 sps:$4 sm:$0xff]  }
  0x2c   :  { %906 = vmatprep.subr.bf16.mxu0 %v5131_v44  ;;  %1012 = vmatprep.subr.bf16.mxu1 %v5133_v45  ;;  %v5221_v44 = vld [vmem:[%s7590_s1 + $0x328] ss:$16 sps:$4 sm:$0xff]   ;;  %v5226_v45 = vld [vmem:[%s7590_s1 + $0x344] ss:$16 sps:$4 sm:$0xff]  }
  0x2f   :  { %907 = vmatpush1.bf16.msra.mxu0 %v5135_v46  ;;  %1013 = vmatpush1.bf16.msra.mxu1 %v5136_v47  ;;  %v5229_v46 = vld [vmem:[%s7590_s1 + $0x34c] ss:$16 sps:$4 sm:$0xff]   ;;  %v5224_v47 = vld [vmem:[%s7590_s1 + $0x340] ss:$16 sps:$4 sm:$0xff]  }
  0x30   :  { %908 = vmatprep.subr.bf16.mxu0 %v5137_v49  ;;  %1014 = vmatprep.subr.bf16.mxu1 %v5139_v50  ;;  %v5232_v49 = vld [vmem:[%s7590_s1 + $0x364] ss:$16 sps:$4 sm:$0xff]   ;;  %v5235_v50 = vld [vmem:[%s7590_s1 + $0x36c] ss:$16 sps:$4 sm:$0xff]  }
  0x33   :  { %909 = vmatpush1.bf16.msra.mxu0 %v5141_v51  ;;  %1015 = vmatpush1.bf16.msra.mxu1 %v5142_v52  ;;  %v5230_v51 = vld [vmem:[%s7590_s1 + $0x360] ss:$16 sps:$4 sm:$0xff]   ;;  %v5233_v52 = vld [vmem:[%s7590_s1 + $0x368] ss:$16 sps:$4 sm:$0xff]  }
  0x34   :  { %910 = vmatprep.subr.bf16.mxu0 %v5143_v53  ;;  %1016 = vmatprep.subr.bf16.mxu1 %v5145_v54  ;;  %v5238_v53 = vld [vmem:[%s7590_s1 + $0x384] ss:$16 sps:$4 sm:$0xff]   ;;  %v5241_v54 = vld [vmem:[%s7590_s1 + $0x38c] ss:$16 sps:$4 sm:$0xff]  }
  0x37   :  { %911 = vmatpush1.bf16.msra.mxu0 %v5147_v55  ;;  %1017 = vmatpush1.bf16.msra.mxu1 %v5148_v56  ;;  %v5236_v55 = vld [vmem:[%s7590_s1 + $0x380] ss:$16 sps:$4 sm:$0xff]   ;;  %v5239_v56 = vld [vmem:[%s7590_s1 + $0x388] ss:$16 sps:$4 sm:$0xff]  }
  0x38   :  { %912 = vmatprep.subr.bf16.mxu0 %v5149_v57  ;;  %1018 = vmatprep.subr.bf16.mxu1 %v5151_v58  ;;  %v5244_v57 = vld [vmem:[%s7590_s1 + $0x3a4] ss:$16 sps:$4 sm:$0xff]   ;;  %v5247_v58 = vld [vmem:[%s7590_s1 + $0x3ac] ss:$16 sps:$4 sm:$0xff]  }
  0x3b   :  { %913 = vmatpush1.bf16.msra.mxu0 %v5153_v59  ;;  %1019 = vmatpush1.bf16.msra.mxu1 %v5154_v60  ;;  %v5242_v59 = vld [vmem:[%s7590_s1 + $0x3a0] ss:$16 sps:$4 sm:$0xff]   ;;  %v5245_v60 = vld [vmem:[%s7590_s1 + $0x3a8] ss:$16 sps:$4 sm:$0xff]  }
  0x3c   :  { %914 = vmatprep.subr.bf16.mxu0 %v5155_v61  ;;  %1020 = vmatprep.subr.bf16.mxu1 %v5157_v62  ;;  %v5252_v61 = vld [vmem:[%s7590_s1 + $0x3c4] ss:$16 sps:$4 sm:$0xff]   ;;  %v5255_v62 = vld [vmem:[%s7590_s1 + $0x3cc] ss:$16 sps:$4 sm:$0xff]  }
  0x3f   :  { %915 = vmatpush1.bf16.msra.mxu0 %v5159_v63  ;;  %1021 = vmatpush1.bf16.msra.mxu1 %v5160_v0  ;;  %v5250_v63 = vld [vmem:[%s7590_s1 + $0x3c0] ss:$16 sps:$4 sm:$0xff]   ;;  %v5253_v0 = vld [vmem:[%s7590_s1 + $0x3c8] ss:$16 sps:$4 sm:$0xff]  }
  0x40   :  { %937 = vmatprep.subr.bf16.mxu0 %v5166_v1  ;;  %1043 = vmatprep.subr.bf16.mxu1 %v5169_v2  ;;  %v5259_v1 = vld [vmem:[%s7590_s1 + $0x3e4] ss:$16 sps:$4 sm:$0xff]   ;;  %v5262_v2 = vld [vmem:[%s7590_s1 + $0x3ec] ss:$16 sps:$4 sm:$0xff]  }
  0x42   :  { %917 = vmatmul.mubr.bf16.vlgmr.msra.gmra.mrb[0].mxu0 %v5161_v3  ;;  %1023 = vmatmul.mubr.bf16.vlgmr.msra.gmra.mrb[0].mxu1 %v5161_v3  ;;  %v5257_v3 = vld [vmem:[%s7590_s1 + $0x3e0] ss:$16 sps:$4 sm:$0xff]  }
  0x43   :  { %938 = vmatpush1.bf16.msra.mxu0 %v5164_v4  ;;  %1044 = vmatpush1.bf16.msra.mxu1 %v5167_v5  ;;  %v5260_v4 = vld [vmem:[%s7590_s1 + $0x3e8] ss:$16 sps:$4 sm:$0xff]   ;;  %v5268_v5 = vld [vmem:[%s7592_s3 + $0x4] ss:$16 sps:$4 sm:$0xff]  }
  0x44   :  { %939 = vmatprep.subr.bf16.mxu0 %v5172_v6  ;;  %1045 = vmatprep.subr.bf16.mxu1 %v5175_v7  ;;  %v5271_v6 = vld [vmem:[%s7592_s3 + $0xc] ss:$16 sps:$4 sm:$0xff]   ;;  %v5263_v7 = vld [vmem:[%s7591_s0 + $0x8] ss:$16 sps:$4 sm:$0xff]  }
  0x45   :  { %926 = vmatprep.mubr.bf16.mxu0 %v5248_v24  ;;  %1032 = vmatprep.mubr.bf16.mxu1 %v5248_v24  ;;  %v5287_v24 = vld [vmem:[%s7592_s3 + $0x68] ss:$16 sps:$4 sm:$0xff]  }
  0x47   :  { %940 = vmatpush1.bf16.msra.mxu0 %v5170_v8  ;;  %1046 = vmatpush1.bf16.msra.mxu1 %v5173_v9  ;;  %v5266_v8 = vld [vmem:[%s7592_s3] ss:$16 sps:$4 sm:$0xff]   ;;  %v5269_v9 = vld [vmem:[%s7592_s3 + $0x8] ss:$16 sps:$4 sm:$0xff]  }
  0x48   :  { %941 = vmatprep.subr.bf16.mxu0 %v5178_v10  ;;  %1047 = vmatprep.subr.bf16.mxu1 %v5181_v11  ;;  %v5274_v10 = vld [vmem:[%s7592_s3 + $0x24] ss:$16 sps:$4 sm:$0xff]   ;;  %v5277_v11 = vld [vmem:[%s7592_s3 + $0x2c] ss:$16 sps:$4 sm:$0xff]  }
  0x4a   :  { %927 = vmatmul.mubr.bf16.gmra.mrb[4].mxu0 %v5256_v29  ;;  %1033 = vmatmul.mubr.bf16.gmra.mrb[4].mxu1 %v5256_v29  ;;  %v5298_v29 = vld [vmem:[%s7592_s3 + $0xa4] ss:$16 sps:$4 sm:$0xff]  }
  0x4b   :  { %942 = vmatpush1.bf16.msra.mxu0 %v5176_v12  ;;  %1048 = vmatpush1.bf16.msra.mxu1 %v5179_v13  ;;  %v5350_v12 = vld [vmem:[%s7591_s0 + $0x2c] ss:$16 sps:$4 sm:$0xff]   ;;  %v5272_v13 = vld [vmem:[%s7592_s3 + $0x20] ss:$16 sps:$4 sm:$0xff]  }
  0x4c   :  { %943 = vmatprep.subr.bf16.mxu0 %v5184_v14  ;;  %1049 = vmatprep.subr.bf16.mxu1 %v5187_v15  ;;  %v5275_v14 = vld [vmem:[%s7592_s3 + $0x28] ss:$16 sps:$4 sm:$0xff]   ;;  %v5280_v15 = vld [vmem:[%s7592_s3 + $0x44] ss:$16 sps:$4 sm:$0xff]  }
  0x4d   :  { %969 = vmatprep.mubr.bf16.mxu0 %v5265_v34  ;;  %1075 = vmatprep.mubr.bf16.mxu1 %v5265_v34  ;;  %v5307_v34 = vld [vmem:[%s7592_s3 + $0xcc] ss:$16 sps:$4 sm:$0xff]  }
  0x4f   :  { %944 = vmatpush1.bf16.msra.mxu0 %v5182_v16  ;;  %1050 = vmatpush1.bf16.msra.mxu1 %v5185_v17  ;;  %v5283_v16 = vld [vmem:[%s7592_s3 + $0x4c] ss:$16 sps:$4 sm:$0xff]   ;;  %v5278_v17 = vld [vmem:[%s7592_s3 + $0x40] ss:$16 sps:$4 sm:$0xff]  }
  0x50   :  { %945 = vmatprep.subr.bf16.mxu0 %v5190_v18  ;;  %1051 = vmatprep.subr.bf16.mxu1 %v5193_v19  ;;  %v5281_v18 = vld [vmem:[%s7592_s3 + $0x48] ss:$16 sps:$4 sm:$0xff]  }
  0x51   :  { %v5358_v19 = vld [vmem:[%s7591_s0 + $0x28] ss:$16 sps:$4 sm:$0xff]  }
  0x53   :  { %946 = vmatpush1.bf16.msra.mxu0 %v5188_v20  ;;  %1052 = vmatpush1.bf16.msra.mxu1 %v5191_v21  ;;  %v5286_v20 = vld [vmem:[%s7592_s3 + $0x64] ss:$16 sps:$4 sm:$0xff]   ;;  %v5289_v21 = vld [vmem:[%s7592_s3 + $0x6c] ss:$16 sps:$4 sm:$0xff]  }
  0x54   :  { %947 = vmatprep.subr.bf16.mxu0 %v5196_v22  ;;  %1053 = vmatprep.subr.bf16.mxu1 %v5199_v23  ;;  %v5367_v22 = vld [vmem:[%s7593_s2 + $0x4] ss:$16 sps:$4 sm:$0xff]   ;;  %v5284_v23 = vld [vmem:[%s7592_s3 + $0x60] ss:$16 sps:$4 sm:$0xff]  }
  0x57   :  { %948 = vmatpush1.bf16.msra.mxu0 %v5194_v25  ;;  %1054 = vmatpush1.bf16.msra.mxu1 %v5197_v26  ;;  %v5292_v25 = vld [vmem:[%s7592_s3 + $0x84] ss:$16 sps:$4 sm:$0xff]   ;;  %v5295_v26 = vld [vmem:[%s7592_s3 + $0x8c] ss:$16 sps:$4 sm:$0xff]  }
  0x58   :  { %949 = vmatprep.subr.bf16.mxu0 %v5202_v27  ;;  %1055 = vmatprep.subr.bf16.mxu1 %v5205_v28  ;;  %v5290_v27 = vld [vmem:[%s7592_s3 + $0x80] ss:$16 sps:$4 sm:$0xff]   ;;  %v5293_v28 = vld [vmem:[%s7592_s3 + $0x88] ss:$16 sps:$4 sm:$0xff]  }
  0x5b   :  { %950 = vmatpush1.bf16.msra.mxu0 %v5200_v30  ;;  %1056 = vmatpush1.bf16.msra.mxu1 %v5203_v31  ;;  %v5301_v30 = vld [vmem:[%s7592_s3 + $0xac] ss:$16 sps:$4 sm:$0xff]   ;;  %v5296_v31 = vld [vmem:[%s7592_s3 + $0xa0] ss:$16 sps:$4 sm:$0xff]  }
  0x5c   :  { %951 = vmatprep.subr.bf16.mxu0 %v5208_v32  ;;  %1057 = vmatprep.subr.bf16.mxu1 %v5211_v33  ;;  %v5299_v32 = vld [vmem:[%s7592_s3 + $0xa8] ss:$16 sps:$4 sm:$0xff]   ;;  %v5304_v33 = vld [vmem:[%s7592_s3 + $0xc4] ss:$16 sps:$4 sm:$0xff]  }
  0x5f   :  { %952 = vmatpush1.bf16.msra.mxu0 %v5206_v35  ;;  %1058 = vmatpush1.bf16.msra.mxu1 %v5209_v36  ;;  %v5302_v35 = vld [vmem:[%s7592_s3 + $0xc0] ss:$16 sps:$4 sm:$0xff]   ;;  %v5305_v36 = vld [vmem:[%s7592_s3 + $0xc8] ss:$16 sps:$4 sm:$0xff]  }
  0x60   :  { %953 = vmatprep.subr.bf16.mxu0 %v5214_v37  ;;  %1059 = vmatprep.subr.bf16.mxu1 %v5217_v38  ;;  %v5310_v37 = vld [vmem:[%s7592_s3 + $0xe4] ss:$16 sps:$4 sm:$0xff]   ;;  %v5313_v38 = vld [vmem:[%s7592_s3 + $0xec] ss:$16 sps:$4 sm:$0xff]  }
  0x63   :  { %954 = vmatpush1.bf16.msra.mxu0 %v5212_v39  ;;  %1060 = vmatpush1.bf16.msra.mxu1 %v5215_v40  ;;  %v5308_v39 = vld [vmem:[%s7592_s3 + $0xe0] ss:$16 sps:$4 sm:$0xff]   ;;  %v5311_v40 = vld [vmem:[%s7592_s3 + $0xe8] ss:$16 sps:$4 sm:$0xff]  }
  0x64   :  { %955 = vmatprep.subr.bf16.mxu0 %v5220_v41  ;;  %1061 = vmatprep.subr.bf16.mxu1 %v5223_v42  ;;  %v5316_v41 = vld [vmem:[%s7592_s3 + $0x104] ss:$16 sps:$4 sm:$0xff]   ;;  %v5319_v42 = vld [vmem:[%s7592_s3 + $0x10c] ss:$16 sps:$4 sm:$0xff]  }
  0x67   :  { %956 = vmatpush1.bf16.msra.mxu0 %v5218_v43  ;;  %1062 = vmatpush1.bf16.msra.mxu1 %v5221_v44  ;;  %v5314_v43 = vld [vmem:[%s7592_s3 + $0x100] ss:$16 sps:$4 sm:$0xff]   ;;  %v5317_v44 = vld [vmem:[%s7592_s3 + $0x108] ss:$16 sps:$4 sm:$0xff]  }
  0x68   :  { %957 = vmatprep.subr.bf16.mxu0 %v5226_v45  ;;  %1063 = vmatprep.subr.bf16.mxu1 %v5229_v46  ;;  %v5322_v45 = vld [vmem:[%s7592_s3 + $0x124] ss:$16 sps:$4 sm:$0xff]   ;;  %v5325_v46 = vld [vmem:[%s7592_s3 + $0x12c] ss:$16 sps:$4 sm:$0xff]  }
  0x6b   :  { %958 = vmatpush1.bf16.msra.mxu0 %v5224_v47  ;;  %1064 = vmatpush1.bf16.msra.mxu1 %v5227_v48  ;;  %v5320_v47 = vld [vmem:[%s7592_s3 + $0x120] ss:$16 sps:$4 sm:$0xff]   ;;  %v5323_v48 = vld [vmem:[%s7592_s3 + $0x128] ss:$16 sps:$4 sm:$0xff]  }
  0x6c   :  { %959 = vmatprep.subr.bf16.mxu0 %v5232_v49  ;;  %1065 = vmatprep.subr.bf16.mxu1 %v5235_v50  ;;  %v5328_v49 = vld [vmem:[%s7592_s3 + $0x144] ss:$16 sps:$4 sm:$0xff]   ;;  %v5331_v50 = vld [vmem:[%s7592_s3 + $0x14c] ss:$16 sps:$4 sm:$0xff]  }
  0x6f   :  { %960 = vmatpush1.bf16.msra.mxu0 %v5230_v51  ;;  %1066 = vmatpush1.bf16.msra.mxu1 %v5233_v52  ;;  %v5326_v51 = vld [vmem:[%s7592_s3 + $0x140] ss:$16 sps:$4 sm:$0xff]   ;;  %v5329_v52 = vld [vmem:[%s7592_s3 + $0x148] ss:$16 sps:$4 sm:$0xff]  }
  0x70   :  { %961 = vmatprep.subr.bf16.mxu0 %v5238_v53  ;;  %1067 = vmatprep.subr.bf16.mxu1 %v5241_v54  ;;  %v5334_v53 = vld [vmem:[%s7592_s3 + $0x164] ss:$16 sps:$4 sm:$0xff]   ;;  %v5337_v54 = vld [vmem:[%s7592_s3 + $0x16c] ss:$16 sps:$4 sm:$0xff]  }
  0x73   :  { %962 = vmatpush1.bf16.msra.mxu0 %v5236_v55  ;;  %1068 = vmatpush1.bf16.msra.mxu1 %v5239_v56  ;;  %v5332_v55 = vld [vmem:[%s7592_s3 + $0x160] ss:$16 sps:$4 sm:$0xff]   ;;  %v5335_v56 = vld [vmem:[%s7592_s3 + $0x168] ss:$16 sps:$4 sm:$0xff]  }
  0x74   :  { %963 = vmatprep.subr.bf16.mxu0 %v5244_v57  ;;  %1069 = vmatprep.subr.bf16.mxu1 %v5247_v58  ;;  %v5340_v57 = vld [vmem:[%s7592_s3 + $0x184] ss:$16 sps:$4 sm:$0xff]   ;;  %v5343_v58 = vld [vmem:[%s7592_s3 + $0x18c] ss:$16 sps:$4 sm:$0xff]  }
  0x77   :  { %964 = vmatpush1.bf16.msra.mxu0 %v5242_v59  ;;  %1070 = vmatpush1.bf16.msra.mxu1 %v5245_v60  ;;  %v5338_v59 = vld [vmem:[%s7592_s3 + $0x180] ss:$16 sps:$4 sm:$0xff]   ;;  %v5341_v60 = vld [vmem:[%s7592_s3 + $0x188] ss:$16 sps:$4 sm:$0xff]  }
  0x78   :  { %965 = vmatprep.subr.bf16.mxu0 %v5252_v61  ;;  %1071 = vmatprep.subr.bf16.mxu1 %v5255_v62  ;;  %v5346_v61 = vld [vmem:[%s7592_s3 + $0x1a4] ss:$16 sps:$4 sm:$0xff]   ;;  %v5349_v62 = vld [vmem:[%s7592_s3 + $0x1ac] ss:$16 sps:$4 sm:$0xff]  }
  0x7b   :  { %966 = vmatpush1.bf16.msra.mxu0 %v5250_v63  ;;  %1072 = vmatpush1.bf16.msra.mxu1 %v5253_v0  ;;  %v5344_v63 = vld [vmem:[%s7592_s3 + $0x1a0] ss:$16 sps:$4 sm:$0xff]   ;;  %v5347_v0 = vld [vmem:[%s7592_s3 + $0x1a8] ss:$16 sps:$4 sm:$0xff]  }
  0x7c   :  { %967 = vmatprep.subr.bf16.mxu0 %v5259_v1  ;;  %1073 = vmatprep.subr.bf16.mxu1 %v5262_v2  ;;  %v5354_v1 = vld [vmem:[%s7592_s3 + $0x1c4] ss:$16 sps:$4 sm:$0xff]   ;;  %v5357_v2 = vld [vmem:[%s7592_s3 + $0x1cc] ss:$16 sps:$4 sm:$0xff]  }
  0x7f   :  { %968 = vmatpush1.bf16.msra.mxu0 %v5257_v3  ;;  %1074 = vmatpush1.bf16.msra.mxu1 %v5260_v4  ;;  %v5352_v3 = vld [vmem:[%s7592_s3 + $0x1c0] ss:$16 sps:$4 sm:$0xff]   ;;  %v5355_v4 = vld [vmem:[%s7592_s3 + $0x1c8] ss:$16 sps:$4 sm:$0xff]  }
  0x80   :  { %1928 = vmatprep.subr.bf16.mxu0 %v5268_v5  ;;  %2034 = vmatprep.subr.bf16.mxu1 %v5271_v6  ;;  %v5361_v5 = vld [vmem:[%s7592_s3 + $0x1e4] ss:$16 sps:$4 sm:$0xff]   ;;  %v5364_v6 = vld [vmem:[%s7592_s3 + $0x1ec] ss:$16 sps:$4 sm:$0xff]  }
  0x82   :  { %970 = vmatmul.mubr.bf16.vlgmr.msra.gmra.mrb[0].mxu0 %v5263_v7  ;;  %1076 = vmatmul.mubr.bf16.vlgmr.msra.gmra.mrb[0].mxu1 %v5263_v7  ;;  %v5359_v7 = vld [vmem:[%s7592_s3 + $0x1e0] ss:$16 sps:$4 sm:$0xff]  }
  0x83   :  { %1929 = vmatpush1.bf16.msra.mxu0 %v5266_v8  ;;  %2035 = vmatpush1.bf16.msra.mxu1 %v5269_v9  ;;  %v5362_v8 = vld [vmem:[%s7592_s3 + $0x1e8] ss:$16 sps:$4 sm:$0xff]   ;;  %v5370_v9 = vld [vmem:[%s7592_s3 + $0x204] ss:$16 sps:$4 sm:$0xff]  }
  0x84   :  { %1930 = vmatprep.subr.bf16.mxu0 %v5274_v10  ;;  %2036 = vmatprep.subr.bf16.mxu1 %v5277_v11  ;;  %v5373_v10 = vld [vmem:[%s7592_s3 + $0x20c] ss:$16 sps:$4 sm:$0xff]   ;;  %v5365_v11 = vld [vmem:[%s7593_s2] ss:$16 sps:$4 sm:$0xff]  }
  0x85   :  { %979 = vmatprep.mubr.bf16.mxu0 %v5350_v12  ;;  %1085 = vmatprep.mubr.bf16.mxu1 %v5350_v12  ;;  %v5368_v12 = vld [vmem:[%s7592_s3 + $0x200] ss:$16 sps:$4 sm:$0xff]  }
  0x87   :  { %1931 = vmatpush1.bf16.msra.mxu0 %v5272_v13  ;;  %2037 = vmatpush1.bf16.msra.mxu1 %v5275_v14  ;;  %v5371_v13 = vld [vmem:[%s7592_s3 + $0x208] ss:$16 sps:$4 sm:$0xff]   ;;  %v5376_v14 = vld [vmem:[%s7592_s3 + $0x224] ss:$16 sps:$4 sm:$0xff]  }
  0x88   :  { %1932 = vmatprep.subr.bf16.mxu0 %v5280_v15  ;;  %2038 = vmatprep.subr.bf16.mxu1 %v5283_v16  ;;  %v5379_v15 = vld [vmem:[%s7592_s3 + $0x22c] ss:$16 sps:$4 sm:$0xff]   ;;  %v5452_v16 = vld [vmem:[%s7593_s2 + $0x24] ss:$16 sps:$4 sm:$0xff]  }
  0x8a   :  { %980 = vmatmul.mubr.bf16.gmra.mrb[4].mxu0 %v5358_v19  ;;  %1086 = vmatmul.mubr.bf16.gmra.mrb[4].mxu1 %v5358_v19  ;;  %v5382_v19 = vld [vmem:[%s7592_s3 + $0x244] ss:$16 sps:$4 sm:$0xff]  }
  0x8b   :  { %1933 = vmatpush1.bf16.msra.mxu0 %v5278_v17  ;;  %2039 = vmatpush1.bf16.msra.mxu1 %v5281_v18  ;;  %v5374_v17 = vld [vmem:[%s7592_s3 + $0x220] ss:$16 sps:$4 sm:$0xff]   ;;  %v5377_v18 = vld [vmem:[%s7592_s3 + $0x228] ss:$16 sps:$4 sm:$0xff]  }
  0x8c   :  { %1934 = vmatprep.subr.bf16.mxu0 %v5286_v20  ;;  %2040 = vmatprep.subr.bf16.mxu1 %v5289_v21  ;;  %v5385_v20 = vld [vmem:[%s7592_s3 + $0x24c] ss:$16 sps:$4 sm:$0xff]   ;;  %v5380_v21 = vld [vmem:[%s7592_s3 + $0x240] ss:$16 sps:$4 sm:$0xff]  }
  0x8d   :  { %1960 = vmatprep.mubr.bf16.mxu0 %v5367_v22  ;;  %2066 = vmatprep.mubr.bf16.mxu1 %v5367_v22  ;;  %v5383_v22 = vld [vmem:[%s7592_s3 + $0x248] ss:$16 sps:$4 sm:$0xff]  }
  0x8f   :  { %1935 = vmatpush1.bf16.msra.mxu0 %v5284_v23  ;;  %2041 = vmatpush1.bf16.msra.mxu1 %v5287_v24  ;;  %v5460_v23 = vld [vmem:[%s7593_s2 + $0x20] ss:$16 sps:$4 sm:$0xff]   ;;  %v5388_v24 = vld [vmem:[%s7592_s3 + $0x264] ss:$16 sps:$4 sm:$0xff]  }
  0x90   :  { %1936 = vmatprep.subr.bf16.mxu0 %v5292_v25  ;;  %2042 = vmatprep.subr.bf16.mxu1 %v5295_v26  ;;  %v5391_v25 = vld [vmem:[%s7592_s3 + $0x26c] ss:$16 sps:$4 sm:$0xff]  }
  0x91   :  { %v5469_v26 = vld [vmem:[%s7593_s2 + $0xc] ss:$16 sps:$4 sm:$0xff]  }
  0x93   :  { %1937 = vmatpush1.bf16.msra.mxu0 %v5290_v27  ;;  %2043 = vmatpush1.bf16.msra.mxu1 %v5293_v28  ;;  %v5386_v27 = vld [vmem:[%s7592_s3 + $0x260] ss:$16 sps:$4 sm:$0xff]   ;;  %v5389_v28 = vld [vmem:[%s7592_s3 + $0x268] ss:$16 sps:$4 sm:$0xff]  }
  0x94   :  { %1938 = vmatprep.subr.bf16.mxu0 %v5298_v29  ;;  %2044 = vmatprep.subr.bf16.mxu1 %v5301_v30  ;;  %v5394_v29 = vld [vmem:[%s7592_s3 + $0x284] ss:$16 sps:$4 sm:$0xff]   ;;  %v5397_v30 = vld [vmem:[%s7592_s3 + $0x28c] ss:$16 sps:$4 sm:$0xff]  }
  0x97   :  { %1939 = vmatpush1.bf16.msra.mxu0 %v5296_v31  ;;  %2045 = vmatpush1.bf16.msra.mxu1 %v5299_v32  ;;  %v5392_v31 = vld [vmem:[%s7592_s3 + $0x280] ss:$16 sps:$4 sm:$0xff]   ;;  %v5395_v32 = vld [vmem:[%s7592_s3 + $0x288] ss:$16 sps:$4 sm:$0xff]  }
  0x98   :  { %1940 = vmatprep.subr.bf16.mxu0 %v5304_v33  ;;  %2046 = vmatprep.subr.bf16.mxu1 %v5307_v34  ;;  %v5400_v33 = vld [vmem:[%s7592_s3 + $0x2a4] ss:$16 sps:$4 sm:$0xff]   ;;  %v5403_v34 = vld [vmem:[%s7592_s3 + $0x2ac] ss:$16 sps:$4 sm:$0xff]  }
  0x9b   :  { %1941 = vmatpush1.bf16.msra.mxu0 %v5302_v35  ;;  %2047 = vmatpush1.bf16.msra.mxu1 %v5305_v36  ;;  %v5398_v35 = vld [vmem:[%s7592_s3 + $0x2a0] ss:$16 sps:$4 sm:$0xff]   ;;  %v5401_v36 = vld [vmem:[%s7592_s3 + $0x2a8] ss:$16 sps:$4 sm:$0xff]  }
  0x9c   :  { %1942 = vmatprep.subr.bf16.mxu0 %v5310_v37  ;;  %2048 = vmatprep.subr.bf16.mxu1 %v5313_v38  ;;  %v5406_v37 = vld [vmem:[%s7592_s3 + $0x2c4] ss:$16 sps:$4 sm:$0xff]   ;;  %v5409_v38 = vld [vmem:[%s7592_s3 + $0x2cc] ss:$16 sps:$4 sm:$0xff]  }
  0x9f   :  { %1943 = vmatpush1.bf16.msra.mxu0 %v5308_v39  ;;  %2049 = vmatpush1.bf16.msra.mxu1 %v5311_v40  ;;  %v5404_v39 = vld [vmem:[%s7592_s3 + $0x2c0] ss:$16 sps:$4 sm:$0xff]   ;;  %v5407_v40 = vld [vmem:[%s7592_s3 + $0x2c8] ss:$16 sps:$4 sm:$0xff]  }
  0xa0   :  { %1944 = vmatprep.subr.bf16.mxu0 %v5316_v41  ;;  %2050 = vmatprep.subr.bf16.mxu1 %v5319_v42  ;;  %v5412_v41 = vld [vmem:[%s7592_s3 + $0x2e4] ss:$16 sps:$4 sm:$0xff]   ;;  %v5415_v42 = vld [vmem:[%s7592_s3 + $0x2ec] ss:$16 sps:$4 sm:$0xff]  }
  0xa3   :  { %1945 = vmatpush1.bf16.msra.mxu0 %v5314_v43  ;;  %2051 = vmatpush1.bf16.msra.mxu1 %v5317_v44  ;;  %v5410_v43 = vld [vmem:[%s7592_s3 + $0x2e0] ss:$16 sps:$4 sm:$0xff]   ;;  %v5413_v44 = vld [vmem:[%s7592_s3 + $0x2e8] ss:$16 sps:$4 sm:$0xff]  }
  0xa4   :  { %1946 = vmatprep.subr.bf16.mxu0 %v5322_v45  ;;  %2052 = vmatprep.subr.bf16.mxu1 %v5325_v46  ;;  %v5418_v45 = vld [vmem:[%s7592_s3 + $0x304] ss:$16 sps:$4 sm:$0xff]   ;;  %v5421_v46 = vld [vmem:[%s7592_s3 + $0x30c] ss:$16 sps:$4 sm:$0xff]  }
  0xa7   :  { %1947 = vmatpush1.bf16.msra.mxu0 %v5320_v47  ;;  %2053 = vmatpush1.bf16.msra.mxu1 %v5323_v48  ;;  %v5416_v47 = vld [vmem:[%s7592_s3 + $0x300] ss:$16 sps:$4 sm:$0xff]   ;;  %v5419_v48 = vld [vmem:[%s7592_s3 + $0x308] ss:$16 sps:$4 sm:$0xff]  }
  0xa8   :  { %1948 = vmatprep.subr.bf16.mxu0 %v5328_v49  ;;  %2054 = vmatprep.subr.bf16.mxu1 %v5331_v50  ;;  %v5424_v49 = vld [vmem:[%s7592_s3 + $0x324] ss:$16 sps:$4 sm:$0xff]   ;;  %v5427_v50 = vld [vmem:[%s7592_s3 + $0x32c] ss:$16 sps:$4 sm:$0xff]  }
  0xab   :  { %1949 = vmatpush1.bf16.msra.mxu0 %v5326_v51  ;;  %2055 = vmatpush1.bf16.msra.mxu1 %v5329_v52  ;;  %v5422_v51 = vld [vmem:[%s7592_s3 + $0x320] ss:$16 sps:$4 sm:$0xff]   ;;  %v5425_v52 = vld [vmem:[%s7592_s3 + $0x328] ss:$16 sps:$4 sm:$0xff]  }
  0xac   :  { %1950 = vmatprep.subr.bf16.mxu0 %v5334_v53  ;;  %2056 = vmatprep.subr.bf16.mxu1 %v5337_v54  ;;  %v5430_v53 = vld [vmem:[%s7592_s3 + $0x344] ss:$16 sps:$4 sm:$0xff]   ;;  %v5433_v54 = vld [vmem:[%s7592_s3 + $0x34c] ss:$16 sps:$4 sm:$0xff]  }
  0xaf   :  { %1951 = vmatpush1.bf16.msra.mxu0 %v5332_v55  ;;  %2057 = vmatpush1.bf16.msra.mxu1 %v5335_v56  ;;  %v5428_v55 = vld [vmem:[%s7592_s3 + $0x340] ss:$16 sps:$4 sm:$0xff]   ;;  %v5431_v56 = vld [vmem:[%s7592_s3 + $0x348] ss:$16 sps:$4 sm:$0xff]  }
  0xb0   :  { %1952 = vmatprep.subr.bf16.mxu0 %v5340_v57  ;;  %2058 = vmatprep.subr.bf16.mxu1 %v5343_v58  ;;  %v5436_v57 = vld [vmem:[%s7592_s3 + $0x364] ss:$16 sps:$4 sm:$0xff]   ;;  %v5439_v58 = vld [vmem:[%s7592_s3 + $0x36c] ss:$16 sps:$4 sm:$0xff]  }
  0xb3   :  { %1953 = vmatpush1.bf16.msra.mxu0 %v5338_v59  ;;  %2059 = vmatpush1.bf16.msra.mxu1 %v5341_v60  ;;  %v5434_v59 = vld [vmem:[%s7592_s3 + $0x360] ss:$16 sps:$4 sm:$0xff]   ;;  %v5437_v60 = vld [vmem:[%s7592_s3 + $0x368] ss:$16 sps:$4 sm:$0xff]  }
  0xb4   :  { %1954 = vmatprep.subr.bf16.mxu0 %v5346_v61  ;;  %2060 = vmatprep.subr.bf16.mxu1 %v5349_v62  ;;  %v5442_v61 = vld [vmem:[%s7592_s3 + $0x384] ss:$16 sps:$4 sm:$0xff]   ;;  %v5445_v62 = vld [vmem:[%s7592_s3 + $0x38c] ss:$16 sps:$4 sm:$0xff]  }
  0xb7   :  { %1955 = vmatpush1.bf16.msra.mxu0 %v5344_v63  ;;  %2061 = vmatpush1.bf16.msra.mxu1 %v5347_v0  ;;  %v5440_v63 = vld [vmem:[%s7592_s3 + $0x380] ss:$16 sps:$4 sm:$0xff]   ;;  %v5443_v0 = vld [vmem:[%s7592_s3 + $0x388] ss:$16 sps:$4 sm:$0xff]  }
  0xb8   :  { %1956 = vmatprep.subr.bf16.mxu0 %v5354_v1  ;;  %2062 = vmatprep.subr.bf16.mxu1 %v5357_v2  ;;  %v5448_v1 = vld [vmem:[%s7592_s3 + $0x3a4] ss:$16 sps:$4 sm:$0xff]   ;;  %v5451_v2 = vld [vmem:[%s7592_s3 + $0x3ac] ss:$16 sps:$4 sm:$0xff]  }
  0xbb   :  { %1957 = vmatpush1.bf16.msra.mxu0 %v5352_v3  ;;  %2063 = vmatpush1.bf16.msra.mxu1 %v5355_v4  ;;  %v5446_v3 = vld [vmem:[%s7592_s3 + $0x3a0] ss:$16 sps:$4 sm:$0xff]   ;;  %v5449_v4 = vld [vmem:[%s7592_s3 + $0x3a8] ss:$16 sps:$4 sm:$0xff]  }
  0xbc   :  { %1958 = vmatprep.subr.bf16.mxu0 %v5361_v5  ;;  %2064 = vmatprep.subr.bf16.mxu1 %v5364_v6  ;;  %v5456_v5 = vld [vmem:[%s7592_s3 + $0x3c4] ss:$16 sps:$4 sm:$0xff]   ;;  %v5459_v6 = vld [vmem:[%s7592_s3 + $0x3cc] ss:$16 sps:$4 sm:$0xff]  }
  0xbf   :  { %1959 = vmatpush1.bf16.msra.mxu0 %v5359_v7  ;;  %2065 = vmatpush1.bf16.msra.mxu1 %v5362_v8  ;;  %v5454_v7 = vld [vmem:[%s7592_s3 + $0x3c0] ss:$16 sps:$4 sm:$0xff]   ;;  %v5457_v8 = vld [vmem:[%s7592_s3 + $0x3c8] ss:$16 sps:$4 sm:$0xff]  }
  0xc0   :  { %1981 = vmatprep.subr.bf16.mxu0 %v5370_v9  ;;  %2087 = vmatprep.subr.bf16.mxu1 %v5373_v10  ;;  %v5463_v9 = vld [vmem:[%s7592_s3 + $0x3e4] ss:$16 sps:$4 sm:$0xff]   ;;  %v5466_v10 = vld [vmem:[%s7592_s3 + $0x3ec] ss:$16 sps:$4 sm:$0xff]  }
  0xc2   :  { %1961 = vmatmul.mubr.bf16.vlgmr.msra.gmra.mrb[0].mxu0 %v5365_v11  ;;  %2067 = vmatmul.mubr.bf16.vlgmr.msra.gmra.mrb[0].mxu1 %v5365_v11  ;;  %v5461_v11 = vld [vmem:[%s7592_s3 + $0x3e0] ss:$16 sps:$4 sm:$0xff]  }
  0xc3   :  { %1982 = vmatpush1.bf16.msra.mxu0 %v5368_v12  ;;  %2088 = vmatpush1.bf16.msra.mxu1 %v5371_v13  ;;  %v5464_v12 = vld [vmem:[%s7592_s3 + $0x3e8] ss:$16 sps:$4 sm:$0xff]   ;;  %v5472_v13 = vld [vmem:[%s7594_s5 + $0x4] ss:$16 sps:$4 sm:$0xff]  }
  0xc4   :  { %1983 = vmatprep.subr.bf16.mxu0 %v5376_v14  ;;  %2089 = vmatprep.subr.bf16.mxu1 %v5379_v15  ;;  %v5475_v14 = vld [vmem:[%s7594_s5 + $0xc] ss:$16 sps:$4 sm:$0xff]   ;;  %v5467_v15 = vld [vmem:[%s7593_s2 + $0x8] ss:$16 sps:$4 sm:$0xff]  }
  0xc5   :  { %1970 = vmatprep.mubr.bf16.mxu0 %v5452_v16  ;;  %2076 = vmatprep.mubr.bf16.mxu1 %v5452_v16  ;;  %v5470_v16 = vld [vmem:[%s7594_s5] ss:$16 sps:$4 sm:$0xff]  }
  0xc7   :  { %1984 = vmatpush1.bf16.msra.mxu0 %v5374_v17  ;;  %2090 = vmatpush1.bf16.msra.mxu1 %v5377_v18  ;;  %v5473_v17 = vld [vmem:[%s7594_s5 + $0x8] ss:$16 sps:$4 sm:$0xff]   ;;  %v5478_v18 = vld [vmem:[%s7594_s5 + $0x24] ss:$16 sps:$4 sm:$0xff]  }
  0xc8   :  { %1985 = vmatprep.subr.bf16.mxu0 %v5382_v19  ;;  %2091 = vmatprep.subr.bf16.mxu1 %v5385_v20  ;;  %v5481_v19 = vld [vmem:[%s7594_s5 + $0x2c] ss:$16 sps:$4 sm:$0xff]  }
  0xc9   :  { %v5554_v20 = vld [vmem:[%s7593_s2 + $0x2c] ss:$16 sps:$4 sm:$0xff]  }
  0xca   :  { %1971 = vmatmul.mubr.bf16.gmra.mrb[4].mxu0 %v5460_v23  ;;  %2077 = vmatmul.mubr.bf16.gmra.mrb[4].mxu1 %v5460_v23  ;;  %v5484_v23 = vld [vmem:[%s7594_s5 + $0x44] ss:$16 sps:$4 sm:$0xff]  }
  0xcb   :  { %1986 = vmatpush1.bf16.msra.mxu0 %v5380_v21  ;;  %2092 = vmatpush1.bf16.msra.mxu1 %v5383_v22  ;;  %v5476_v21 = vld [vmem:[%s7594_s5 + $0x20] ss:$16 sps:$4 sm:$0xff]   ;;  %v5479_v22 = vld [vmem:[%s7594_s5 + $0x28] ss:$16 sps:$4 sm:$0xff]  }
  0xcc   :  { %1987 = vmatprep.subr.bf16.mxu0 %v5388_v24  ;;  %2093 = vmatprep.subr.bf16.mxu1 %v5391_v25  ;;  %v5487_v24 = vld [vmem:[%s7594_s5 + $0x4c] ss:$16 sps:$4 sm:$0xff]   ;;  %v5482_v25 = vld [vmem:[%s7594_s5 + $0x40] ss:$16 sps:$4 sm:$0xff]  }
  0xcd   :  { %2013 = vmatprep.mubr.bf16.mxu0 %v5469_v26  ;;  %2119 = vmatprep.mubr.bf16.mxu1 %v5469_v26  ;;  %v5562_v26 = vld [vmem:[%s7593_s2 + $0x28] ss:$16 sps:$4 sm:$0xff]  }
  0xcf   :  { %1988 = vmatpush1.bf16.msra.mxu0 %v5386_v27  ;;  %2094 = vmatpush1.bf16.msra.mxu1 %v5389_v28  ;;  %v5485_v27 = vld [vmem:[%s7594_s5 + $0x48] ss:$16 sps:$4 sm:$0xff]   ;;  %v5490_v28 = vld [vmem:[%s7594_s5 + $0x64] ss:$16 sps:$4 sm:$0xff]  }
  0xd0   :  { %1989 = vmatprep.subr.bf16.mxu0 %v5394_v29  ;;  %2095 = vmatprep.subr.bf16.mxu1 %v5397_v30  ;;  %v5493_v29 = vld [vmem:[%s7594_s5 + $0x6c] ss:$16 sps:$4 sm:$0xff]   ;;  %v5571_v30 = vld [vmem:[%s7595_s4 + $0x4] ss:$16 sps:$4 sm:$0xff]  }
  0xd3   :  { %1990 = vmatpush1.bf16.msra.mxu0 %v5392_v31  ;;  %2096 = vmatpush1.bf16.msra.mxu1 %v5395_v32  ;;  %v5488_v31 = vld [vmem:[%s7594_s5 + $0x60] ss:$16 sps:$4 sm:$0xff]   ;;  %v5491_v32 = vld [vmem:[%s7594_s5 + $0x68] ss:$16 sps:$4 sm:$0xff]  }
  0xd4   :  { %1991 = vmatprep.subr.bf16.mxu0 %v5400_v33  ;;  %2097 = vmatprep.subr.bf16.mxu1 %v5403_v34  ;;  %v5496_v33 = vld [vmem:[%s7594_s5 + $0x84] ss:$16 sps:$4 sm:$0xff]   ;;  %v5499_v34 = vld [vmem:[%s7594_s5 + $0x8c] ss:$16 sps:$4 sm:$0xff]  }
  0xd7   :  { %1992 = vmatpush1.bf16.msra.mxu0 %v5398_v35  ;;  %2098 = vmatpush1.bf16.msra.mxu1 %v5401_v36  ;;  %v5494_v35 = vld [vmem:[%s7594_s5 + $0x80] ss:$16 sps:$4 sm:$0xff]   ;;  %v5497_v36 = vld [vmem:[%s7594_s5 + $0x88] ss:$16 sps:$4 sm:$0xff]  }
  0xd8   :  { %1993 = vmatprep.subr.bf16.mxu0 %v5406_v37  ;;  %2099 = vmatprep.subr.bf16.mxu1 %v5409_v38  ;;  %v5502_v37 = vld [vmem:[%s7594_s5 + $0xa4] ss:$16 sps:$4 sm:$0xff]   ;;  %v5505_v38 = vld [vmem:[%s7594_s5 + $0xac] ss:$16 sps:$4 sm:$0xff]  }
  0xdb   :  { %1994 = vmatpush1.bf16.msra.mxu0 %v5404_v39  ;;  %2100 = vmatpush1.bf16.msra.mxu1 %v5407_v40  ;;  %v5500_v39 = vld [vmem:[%s7594_s5 + $0xa0] ss:$16 sps:$4 sm:$0xff]   ;;  %v5503_v40 = vld [vmem:[%s7594_s5 + $0xa8] ss:$16 sps:$4 sm:$0xff]  }
  0xdc   :  { %1995 = vmatprep.subr.bf16.mxu0 %v5412_v41  ;;  %2101 = vmatprep.subr.bf16.mxu1 %v5415_v42  ;;  %v5508_v41 = vld [vmem:[%s7594_s5 + $0xc4] ss:$16 sps:$4 sm:$0xff]   ;;  %v5511_v42 = vld [vmem:[%s7594_s5 + $0xcc] ss:$16 sps:$4 sm:$0xff]  }
  0xdf   :  { %1996 = vmatpush1.bf16.msra.mxu0 %v5410_v43  ;;  %2102 = vmatpush1.bf16.msra.mxu1 %v5413_v44  ;;  %v5506_v43 = vld [vmem:[%s7594_s5 + $0xc0] ss:$16 sps:$4 sm:$0xff]   ;;  %v5509_v44 = vld [vmem:[%s7594_s5 + $0xc8] ss:$16 sps:$4 sm:$0xff]  }
  0xe0   :  { %1997 = vmatprep.subr.bf16.mxu0 %v5418_v45  ;;  %2103 = vmatprep.subr.bf16.mxu1 %v5421_v46  ;;  %v5514_v45 = vld [vmem:[%s7594_s5 + $0xe4] ss:$16 sps:$4 sm:$0xff]   ;;  %v5517_v46 = vld [vmem:[%s7594_s5 + $0xec] ss:$16 sps:$4 sm:$0xff]  }
  0xe3   :  { %1998 = vmatpush1.bf16.msra.mxu0 %v5416_v47  ;;  %2104 = vmatpush1.bf16.msra.mxu1 %v5419_v48  ;;  %v5512_v47 = vld [vmem:[%s7594_s5 + $0xe0] ss:$16 sps:$4 sm:$0xff]   ;;  %v5515_v48 = vld [vmem:[%s7594_s5 + $0xe8] ss:$16 sps:$4 sm:$0xff]  }
  0xe4   :  { %1999 = vmatprep.subr.bf16.mxu0 %v5424_v49  ;;  %2105 = vmatprep.subr.bf16.mxu1 %v5427_v50  ;;  %v5520_v49 = vld [vmem:[%s7594_s5 + $0x104] ss:$16 sps:$4 sm:$0xff]   ;;  %v5523_v50 = vld [vmem:[%s7594_s5 + $0x10c] ss:$16 sps:$4 sm:$0xff]  }
  0xe7   :  { %2000 = vmatpush1.bf16.msra.mxu0 %v5422_v51  ;;  %2106 = vmatpush1.bf16.msra.mxu1 %v5425_v52  ;;  %v5518_v51 = vld [vmem:[%s7594_s5 + $0x100] ss:$16 sps:$4 sm:$0xff]   ;;  %v5521_v52 = vld [vmem:[%s7594_s5 + $0x108] ss:$16 sps:$4 sm:$0xff]  }
  0xe8   :  { %2001 = vmatprep.subr.bf16.mxu0 %v5430_v53  ;;  %2107 = vmatprep.subr.bf16.mxu1 %v5433_v54  ;;  %v5526_v53 = vld [vmem:[%s7594_s5 + $0x124] ss:$16 sps:$4 sm:$0xff]   ;;  %v5529_v54 = vld [vmem:[%s7594_s5 + $0x12c] ss:$16 sps:$4 sm:$0xff]  }
  0xeb   :  { %2002 = vmatpush1.bf16.msra.mxu0 %v5428_v55  ;;  %2108 = vmatpush1.bf16.msra.mxu1 %v5431_v56  ;;  %v5524_v55 = vld [vmem:[%s7594_s5 + $0x120] ss:$16 sps:$4 sm:$0xff]   ;;  %v5527_v56 = vld [vmem:[%s7594_s5 + $0x128] ss:$16 sps:$4 sm:$0xff]  }
  0xec   :  { %2003 = vmatprep.subr.bf16.mxu0 %v5436_v57  ;;  %2109 = vmatprep.subr.bf16.mxu1 %v5439_v58  ;;  %v5532_v57 = vld [vmem:[%s7594_s5 + $0x144] ss:$16 sps:$4 sm:$0xff]   ;;  %v5535_v58 = vld [vmem:[%s7594_s5 + $0x14c] ss:$16 sps:$4 sm:$0xff]  }
  0xef   :  { %2004 = vmatpush1.bf16.msra.mxu0 %v5434_v59  ;;  %2110 = vmatpush1.bf16.msra.mxu1 %v5437_v60  ;;  %v5530_v59 = vld [vmem:[%s7594_s5 + $0x140] ss:$16 sps:$4 sm:$0xff]   ;;  %v5533_v60 = vld [vmem:[%s7594_s5 + $0x148] ss:$16 sps:$4 sm:$0xff]  }
  0xf0   :  { %2005 = vmatprep.subr.bf16.mxu0 %v5442_v61  ;;  %2111 = vmatprep.subr.bf16.mxu1 %v5445_v62  ;;  %v5538_v61 = vld [vmem:[%s7594_s5 + $0x164] ss:$16 sps:$4 sm:$0xff]   ;;  %v5541_v62 = vld [vmem:[%s7594_s5 + $0x16c] ss:$16 sps:$4 sm:$0xff]  }
  0xf3   :  { %2006 = vmatpush1.bf16.msra.mxu0 %v5440_v63  ;;  %2112 = vmatpush1.bf16.msra.mxu1 %v5443_v0  ;;  %v5536_v63 = vld [vmem:[%s7594_s5 + $0x160] ss:$16 sps:$4 sm:$0xff]   ;;  %v5539_v0 = vld [vmem:[%s7594_s5 + $0x168] ss:$16 sps:$4 sm:$0xff]  }
  0xf4   :  { %2007 = vmatprep.subr.bf16.mxu0 %v5448_v1  ;;  %2113 = vmatprep.subr.bf16.mxu1 %v5451_v2  ;;  %v5544_v1 = vld [vmem:[%s7594_s5 + $0x184] ss:$16 sps:$4 sm:$0xff]   ;;  %v5547_v2 = vld [vmem:[%s7594_s5 + $0x18c] ss:$16 sps:$4 sm:$0xff]  }
  0xf7   :  { %2008 = vmatpush1.bf16.msra.mxu0 %v5446_v3  ;;  %2114 = vmatpush1.bf16.msra.mxu1 %v5449_v4  ;;  %v5542_v3 = vld [vmem:[%s7594_s5 + $0x180] ss:$16 sps:$4 sm:$0xff]   ;;  %v5545_v4 = vld [vmem:[%s7594_s5 + $0x188] ss:$16 sps:$4 sm:$0xff]  }
  0xf8   :  { %2009 = vmatprep.subr.bf16.mxu0 %v5456_v5  ;;  %2115 = vmatprep.subr.bf16.mxu1 %v5459_v6  ;;  %v5550_v5 = vld [vmem:[%s7594_s5 + $0x1a4] ss:$16 sps:$4 sm:$0xff]   ;;  %v5553_v6 = vld [vmem:[%s7594_s5 + $0x1ac] ss:$16 sps:$4 sm:$0xff]  }
  0xfb   :  { %2010 = vmatpush1.bf16.msra.mxu0 %v5454_v7  ;;  %2116 = vmatpush1.bf16.msra.mxu1 %v5457_v8  ;;  %v5548_v7 = vld [vmem:[%s7594_s5 + $0x1a0] ss:$16 sps:$4 sm:$0xff]   ;;  %v5551_v8 = vld [vmem:[%s7594_s5 + $0x1a8] ss:$16 sps:$4 sm:$0xff]  }
  0xfc   :  { %2011 = vmatprep.subr.bf16.mxu0 %v5463_v9  ;;  %2117 = vmatprep.subr.bf16.mxu1 %v5466_v10  ;;  %v5558_v9 = vld [vmem:[%s7594_s5 + $0x1c4] ss:$16 sps:$4 sm:$0xff]   ;;  %v5561_v10 = vld [vmem:[%s7594_s5 + $0x1cc] ss:$16 sps:$4 sm:$0xff]  }
  0xff   :  { %2012 = vmatpush1.bf16.msra.mxu0 %v5461_v11  ;;  %2118 = vmatpush1.bf16.msra.mxu1 %v5464_v12  ;;  %v5556_v11 = vld [vmem:[%s7594_s5 + $0x1c0] ss:$16 sps:$4 sm:$0xff]   ;;  %v5559_v12 = vld [vmem:[%s7594_s5 + $0x1c8] ss:$16 sps:$4 sm:$0xff]  }
 0x100   :  { %2972 = vmatprep.subr.bf16.mxu0 %v5472_v13  ;;  %3078 = vmatprep.subr.bf16.mxu1 %v5475_v14  ;;  %v5565_v13 = vld [vmem:[%s7594_s5 + $0x1e4] ss:$16 sps:$4 sm:$0xff]   ;;  %v5568_v14 = vld [vmem:[%s7594_s5 + $0x1ec] ss:$16 sps:$4 sm:$0xff]  }
 0x102   :  { %2014 = vmatmul.mubr.bf16.vlgmr.msra.gmra.mrb[0].mxu0 %v5467_v15  ;;  %2120 = vmatmul.mubr.bf16.vlgmr.msra.gmra.mrb[0].mxu1 %v5467_v15  ;;  %v5563_v15 = vld [vmem:[%s7594_s5 + $0x1e0] ss:$16 sps:$4 sm:$0xff]  }
 0x103   :  { %2973 = vmatpush1.bf16.msra.mxu0 %v5470_v16  ;;  %3079 = vmatpush1.bf16.msra.mxu1 %v5473_v17  ;;  %v5566_v16 = vld [vmem:[%s7594_s5 + $0x1e8] ss:$16 sps:$4 sm:$0xff]   ;;  %v5569_v17 = vld [vmem:[%s7595_s4] ss:$16 sps:$4 sm:$0xff]  }
 0x104   :  { %2974 = vmatprep.subr.bf16.mxu0 %v5478_v18  ;;  %3080 = vmatprep.subr.bf16.mxu1 %v5481_v19  ;;  %v5574_v18 = vld [vmem:[%s7594_s5 + $0x204] ss:$16 sps:$4 sm:$0xff]   ;;  %v5577_v19 = vld [vmem:[%s7594_s5 + $0x20c] ss:$16 sps:$4 sm:$0xff]  }
 0x105   :  { %2023 = vmatprep.mubr.bf16.mxu0 %v5554_v20  ;;  %2129 = vmatprep.mubr.bf16.mxu1 %v5554_v20  ;;  %v5572_v20 = vld [vmem:[%s7594_s5 + $0x200] ss:$16 sps:$4 sm:$0xff]  }
 0x107   :  { %2975 = vmatpush1.bf16.msra.mxu0 %v5476_v21  ;;  %3081 = vmatpush1.bf16.msra.mxu1 %v5479_v22  ;;  %v5575_v21 = vld [vmem:[%s7594_s5 + $0x208] ss:$16 sps:$4 sm:$0xff]   ;;  %v5580_v22 = vld [vmem:[%s7594_s5 + $0x224] ss:$16 sps:$4 sm:$0xff]  }
 0x108   :  { %2976 = vmatprep.subr.bf16.mxu0 %v5484_v23  ;;  %3082 = vmatprep.subr.bf16.mxu1 %v5487_v24  ;;  %v5583_v23 = vld [vmem:[%s7594_s5 + $0x22c] ss:$16 sps:$4 sm:$0xff]   ;;  %v5578_v24 = vld [vmem:[%s7594_s5 + $0x220] ss:$16 sps:$4 sm:$0xff]  }
 0x10a   :  { %2024 = vmatmul.mubr.bf16.gmra.mrb[4].mxu0 %v5562_v26  ;;  %2130 = vmatmul.mubr.bf16.gmra.mrb[4].mxu1 %v5562_v26  ;;  %v5581_v26 = vld [vmem:[%s7594_s5 + $0x228] ss:$16 sps:$4 sm:$0xff]  }
 0x10b   :  { %2977 = vmatpush1.bf16.msra.mxu0 %v5482_v25  ;;  %3083 = vmatpush1.bf16.msra.mxu1 %v5485_v27  ;;  %v5656_v25 = vld [vmem:[%s7595_s4 + $0x24] ss:$16 sps:$4 sm:$0xff]  }
 0x10c   :  { %2978 = vmatprep.subr.bf16.mxu0 %v5490_v28  ;;  %3084 = vmatprep.subr.bf16.mxu1 %v5493_v29  ;;  %v5586_v27 = vld [vmem:[%s7594_s5 + $0x244] ss:$16 sps:$4 sm:$0xff]   ;;  %v5589_v28 = vld [vmem:[%s7594_s5 + $0x24c] ss:$16 sps:$4 sm:$0xff]   ;;  %v5664_v29 = vld [vmem:[%s7595_s4 + $0x20] ss:$16 sps:$4 sm:$0xff]  }
 0x10d   :  { %3004 = vmatprep.mubr.bf16.mxu0 %v5571_v30  ;;  %3110 = vmatprep.mubr.bf16.mxu1 %v5571_v30  ;;  %v5584_v30 = vld [vmem:[%s7594_s5 + $0x240] ss:$16 sps:$4 sm:$0xff]  }
 0x10f   :  { %2979 = vmatpush1.bf16.msra.mxu0 %v5488_v31  ;;  %3085 = vmatpush1.bf16.msra.mxu1 %v5491_v32  ;;  %v5587_v31 = vld [vmem:[%s7594_s5 + $0x248] ss:$16 sps:$4 sm:$0xff]   ;;  %v5592_v32 = vld [vmem:[%s7594_s5 + $0x264] ss:$16 sps:$4 sm:$0xff]  }
 0x110   :  { %2980 = vmatprep.subr.bf16.mxu0 %v5496_v33  ;;  %3086 = vmatprep.subr.bf16.mxu1 %v5499_v34  ;;  %v5595_v33 = vld [vmem:[%s7594_s5 + $0x26c] ss:$16 sps:$4 sm:$0xff]  }
 0x111   :  { %v5673_v34 = vld [vmem:[%s7595_s4 + $0xc] ss:$16 sps:$4 sm:$0xff]  }
 0x113   :  { %2981 = vmatpush1.bf16.msra.mxu0 %v5494_v35  ;;  %3087 = vmatpush1.bf16.msra.mxu1 %v5497_v36  ;;  %v5590_v35 = vld [vmem:[%s7594_s5 + $0x260] ss:$16 sps:$4 sm:$0xff]   ;;  %v5593_v36 = vld [vmem:[%s7594_s5 + $0x268] ss:$16 sps:$4 sm:$0xff]  }
 0x114   :  { %2982 = vmatprep.subr.bf16.mxu0 %v5502_v37  ;;  %3088 = vmatprep.subr.bf16.mxu1 %v5505_v38  ;;  %v5598_v37 = vld [vmem:[%s7594_s5 + $0x284] ss:$16 sps:$4 sm:$0xff]   ;;  %v5601_v38 = vld [vmem:[%s7594_s5 + $0x28c] ss:$16 sps:$4 sm:$0xff]  }
 0x117   :  { %2983 = vmatpush1.bf16.msra.mxu0 %v5500_v39  ;;  %3089 = vmatpush1.bf16.msra.mxu1 %v5503_v40  ;;  %v5596_v39 = vld [vmem:[%s7594_s5 + $0x280] ss:$16 sps:$4 sm:$0xff]   ;;  %v5599_v40 = vld [vmem:[%s7594_s5 + $0x288] ss:$16 sps:$4 sm:$0xff]  }
 0x118   :  { %2984 = vmatprep.subr.bf16.mxu0 %v5508_v41  ;;  %3090 = vmatprep.subr.bf16.mxu1 %v5511_v42  ;;  %v5604_v41 = vld [vmem:[%s7594_s5 + $0x2a4] ss:$16 sps:$4 sm:$0xff]   ;;  %v5607_v42 = vld [vmem:[%s7594_s5 + $0x2ac] ss:$16 sps:$4 sm:$0xff]  }
 0x11b   :  { %2985 = vmatpush1.bf16.msra.mxu0 %v5506_v43  ;;  %3091 = vmatpush1.bf16.msra.mxu1 %v5509_v44  ;;  %v5602_v43 = vld [vmem:[%s7594_s5 + $0x2a0] ss:$16 sps:$4 sm:$0xff]   ;;  %v5605_v44 = vld [vmem:[%s7594_s5 + $0x2a8] ss:$16 sps:$4 sm:$0xff]  }
 0x11c   :  { %2986 = vmatprep.subr.bf16.mxu0 %v5514_v45  ;;  %3092 = vmatprep.subr.bf16.mxu1 %v5517_v46  ;;  %v5610_v45 = vld [vmem:[%s7594_s5 + $0x2c4] ss:$16 sps:$4 sm:$0xff]   ;;  %v5613_v46 = vld [vmem:[%s7594_s5 + $0x2cc] ss:$16 sps:$4 sm:$0xff]  }
 0x11f   :  { %2987 = vmatpush1.bf16.msra.mxu0 %v5512_v47  ;;  %3093 = vmatpush1.bf16.msra.mxu1 %v5515_v48  ;;  %v5608_v47 = vld [vmem:[%s7594_s5 + $0x2c0] ss:$16 sps:$4 sm:$0xff]   ;;  %v5611_v48 = vld [vmem:[%s7594_s5 + $0x2c8] ss:$16 sps:$4 sm:$0xff]  }
 0x120   :  { %2988 = vmatprep.subr.bf16.mxu0 %v5520_v49  ;;  %3094 = vmatprep.subr.bf16.mxu1 %v5523_v50  ;;  %v5616_v49 = vld [vmem:[%s7594_s5 + $0x2e4] ss:$16 sps:$4 sm:$0xff]   ;;  %v5619_v50 = vld [vmem:[%s7594_s5 + $0x2ec] ss:$16 sps:$4 sm:$0xff]  }
 0x123   :  { %2989 = vmatpush1.bf16.msra.mxu0 %v5518_v51  ;;  %3095 = vmatpush1.bf16.msra.mxu1 %v5521_v52  ;;  %v5614_v51 = vld [vmem:[%s7594_s5 + $0x2e0] ss:$16 sps:$4 sm:$0xff]   ;;  %v5617_v52 = vld [vmem:[%s7594_s5 + $0x2e8] ss:$16 sps:$4 sm:$0xff]  }
 0x124   :  { %2990 = vmatprep.subr.bf16.mxu0 %v5526_v53  ;;  %3096 = vmatprep.subr.bf16.mxu1 %v5529_v54  ;;  %v5622_v53 = vld [vmem:[%s7594_s5 + $0x304] ss:$16 sps:$4 sm:$0xff]   ;;  %v5625_v54 = vld [vmem:[%s7594_s5 + $0x30c] ss:$16 sps:$4 sm:$0xff]  }
 0x127   :  { %2991 = vmatpush1.bf16.msra.mxu0 %v5524_v55  ;;  %3097 = vmatpush1.bf16.msra.mxu1 %v5527_v56  ;;  %v5620_v55 = vld [vmem:[%s7594_s5 + $0x300] ss:$16 sps:$4 sm:$0xff]   ;;  %v5623_v56 = vld [vmem:[%s7594_s5 + $0x308] ss:$16 sps:$4 sm:$0xff]  }
 0x128   :  { %2992 = vmatprep.subr.bf16.mxu0 %v5532_v57  ;;  %3098 = vmatprep.subr.bf16.mxu1 %v5535_v58  ;;  %v5628_v57 = vld [vmem:[%s7594_s5 + $0x324] ss:$16 sps:$4 sm:$0xff]   ;;  %v5631_v58 = vld [vmem:[%s7594_s5 + $0x32c] ss:$16 sps:$4 sm:$0xff]  }
 0x12b   :  { %2993 = vmatpush1.bf16.msra.mxu0 %v5530_v59  ;;  %3099 = vmatpush1.bf16.msra.mxu1 %v5533_v60  ;;  %v5626_v59 = vld [vmem:[%s7594_s5 + $0x320] ss:$16 sps:$4 sm:$0xff]   ;;  %v5629_v60 = vld [vmem:[%s7594_s5 + $0x328] ss:$16 sps:$4 sm:$0xff]  }
 0x12c   :  { %2994 = vmatprep.subr.bf16.mxu0 %v5538_v61  ;;  %3100 = vmatprep.subr.bf16.mxu1 %v5541_v62  ;;  %v5634_v61 = vld [vmem:[%s7594_s5 + $0x344] ss:$16 sps:$4 sm:$0xff]   ;;  %v5637_v62 = vld [vmem:[%s7594_s5 + $0x34c] ss:$16 sps:$4 sm:$0xff]  }
 0x12f   :  { %2995 = vmatpush1.bf16.msra.mxu0 %v5536_v63  ;;  %3101 = vmatpush1.bf16.msra.mxu1 %v5539_v0  ;;  %v5632_v63 = vld [vmem:[%s7594_s5 + $0x340] ss:$16 sps:$4 sm:$0xff]   ;;  %v5635_v0 = vld [vmem:[%s7594_s5 + $0x348] ss:$16 sps:$4 sm:$0xff]  }
 0x130   :  { %2996 = vmatprep.subr.bf16.mxu0 %v5544_v1  ;;  %3102 = vmatprep.subr.bf16.mxu1 %v5547_v2  ;;  %v5640_v1 = vld [vmem:[%s7594_s5 + $0x364] ss:$16 sps:$4 sm:$0xff]   ;;  %v5643_v2 = vld [vmem:[%s7594_s5 + $0x36c] ss:$16 sps:$4 sm:$0xff]  }
 0x133   :  { %2997 = vmatpush1.bf16.msra.mxu0 %v5542_v3  ;;  %3103 = vmatpush1.bf16.msra.mxu1 %v5545_v4  ;;  %v5638_v3 = vld [vmem:[%s7594_s5 + $0x360] ss:$16 sps:$4 sm:$0xff]   ;;  %v5641_v4 = vld [vmem:[%s7594_s5 + $0x368] ss:$16 sps:$4 sm:$0xff]  }
 0x134   :  { %2998 = vmatprep.subr.bf16.mxu0 %v5550_v5  ;;  %3104 = vmatprep.subr.bf16.mxu1 %v5553_v6  ;;  %v5646_v5 = vld [vmem:[%s7594_s5 + $0x384] ss:$16 sps:$4 sm:$0xff]   ;;  %v5649_v6 = vld [vmem:[%s7594_s5 + $0x38c] ss:$16 sps:$4 sm:$0xff]  }
 0x137   :  { %2999 = vmatpush1.bf16.msra.mxu0 %v5548_v7  ;;  %3105 = vmatpush1.bf16.msra.mxu1 %v5551_v8  ;;  %v5644_v7 = vld [vmem:[%s7594_s5 + $0x380] ss:$16 sps:$4 sm:$0xff]   ;;  %v5647_v8 = vld [vmem:[%s7594_s5 + $0x388] ss:$16 sps:$4 sm:$0xff]  }
 0x138   :  { %3000 = vmatprep.subr.bf16.mxu0 %v5558_v9  ;;  %3106 = vmatprep.subr.bf16.mxu1 %v5561_v10  ;;  %v5652_v9 = vld [vmem:[%s7594_s5 + $0x3a4] ss:$16 sps:$4 sm:$0xff]   ;;  %v5655_v10 = vld [vmem:[%s7594_s5 + $0x3ac] ss:$16 sps:$4 sm:$0xff]  }
 0x13b   :  { %3001 = vmatpush1.bf16.msra.mxu0 %v5556_v11  ;;  %3107 = vmatpush1.bf16.msra.mxu1 %v5559_v12  ;;  %v5650_v11 = vld [vmem:[%s7594_s5 + $0x3a0] ss:$16 sps:$4 sm:$0xff]   ;;  %v5653_v12 = vld [vmem:[%s7594_s5 + $0x3a8] ss:$16 sps:$4 sm:$0xff]  }
 0x13c   :  { %3002 = vmatprep.subr.bf16.mxu0 %v5565_v13  ;;  %3108 = vmatprep.subr.bf16.mxu1 %v5568_v14  ;;  %v5660_v13 = vld [vmem:[%s7594_s5 + $0x3c4] ss:$16 sps:$4 sm:$0xff]   ;;  %v5663_v14 = vld [vmem:[%s7594_s5 + $0x3cc] ss:$16 sps:$4 sm:$0xff]  }
 0x13f   :  { %3003 = vmatpush1.bf16.msra.mxu0 %v5563_v15  ;;  %3109 = vmatpush1.bf16.msra.mxu1 %v5566_v16  ;;  %v5658_v15 = vld [vmem:[%s7594_s5 + $0x3c0] ss:$16 sps:$4 sm:$0xff]   ;;  %v5661_v16 = vld [vmem:[%s7594_s5 + $0x3c8] ss:$16 sps:$4 sm:$0xff]  }
 0x140   :  { %3025 = vmatprep.subr.bf16.mxu0 %v5574_v18  ;;  %3131 = vmatprep.subr.bf16.mxu1 %v5577_v19  ;;  %v5670_v18 = vld [vmem:[%s7594_s5 + $0x3ec] ss:$16 sps:$4 sm:$0xff]   ;;  %v5665_v19 = vld [vmem:[%s7594_s5 + $0x3e0] ss:$16 sps:$4 sm:$0xff]  }
 0x142   :  { %3005 = vmatmul.mubr.bf16.vlgmr.msra.gmra.mrb[0].mxu0 %v5569_v17  ;;  %3111 = vmatmul.mubr.bf16.vlgmr.msra.gmra.mrb[0].mxu1 %v5569_v17  ;;  %v5667_v17 = vld [vmem:[%s7594_s5 + $0x3e4] ss:$16 sps:$4 sm:$0xff]  }
 0x143   :  { %3026 = vmatpush1.bf16.msra.mxu0 %v5572_v20  ;;  %3132 = vmatpush1.bf16.msra.mxu1 %v5575_v21  ;;  %v5668_v20 = vld [vmem:[%s7594_s5 + $0x3e8] ss:$16 sps:$4 sm:$0xff]   ;;  %v5676_v21 = vld [vmem:[%s7596_s7 + $0x4] ss:$16 sps:$4 sm:$0xff]  }
 0x144   :  { %3027 = vmatprep.subr.bf16.mxu0 %v5580_v22  ;;  %3133 = vmatprep.subr.bf16.mxu1 %v5583_v23  ;;  %v5679_v22 = vld [vmem:[%s7596_s7 + $0xc] ss:$16 sps:$4 sm:$0xff]   ;;  %v5671_v23 = vld [vmem:[%s7595_s4 + $0x8] ss:$16 sps:$4 sm:$0xff]  }
 0x145   :  { %3014 = vmatprep.mubr.bf16.mxu0 %v5656_v25  ;;  %3120 = vmatprep.mubr.bf16.mxu1 %v5656_v25  ;;  %v5677_v25 = vld [vmem:[%s7596_s7 + $0x8] ss:$16 sps:$4 sm:$0xff]  }
 0x147   :  { %3028 = vmatpush1.bf16.msra.mxu0 %v5578_v24  ;;  %3134 = vmatpush1.bf16.msra.mxu1 %v5581_v26  ;;  %v5674_v24 = vld [vmem:[%s7596_s7] ss:$16 sps:$4 sm:$0xff]   ;;  %v5682_v26 = vld [vmem:[%s7596_s7 + $0x24] ss:$16 sps:$4 sm:$0xff]  }
 0x148   :  { %3029 = vmatprep.subr.bf16.mxu0 %v5586_v27  ;;  %3135 = vmatprep.subr.bf16.mxu1 %v5589_v28  ;;  %v5685_v27 = vld [vmem:[%s7596_s7 + $0x2c] ss:$16 sps:$4 sm:$0xff]  }
 0x149   :  { %v5758_v28 = vld [vmem:[%s7595_s4 + $0x2c] ss:$16 sps:$4 sm:$0xff]  }
 0x14a   :  { %3015 = vmatmul.mubr.bf16.gmra.mrb[4].mxu0 %v5664_v29  ;;  %3121 = vmatmul.mubr.bf16.gmra.mrb[4].mxu1 %v5664_v29  ;;  %v5680_v29 = vld [vmem:[%s7596_s7 + $0x20] ss:$16 sps:$4 sm:$0xff]  }
 0x14b   :  { %3030 = vmatpush1.bf16.msra.mxu0 %v5584_v30  ;;  %3136 = vmatpush1.bf16.msra.mxu1 %v5587_v31  ;;  %v5683_v30 = vld [vmem:[%s7596_s7 + $0x28] ss:$16 sps:$4 sm:$0xff]   ;;  %v5688_v31 = vld [vmem:[%s7596_s7 + $0x44] ss:$16 sps:$4 sm:$0xff]  }
 0x14c   :  { %3031 = vmatprep.subr.bf16.mxu0 %v5592_v32  ;;  %3137 = vmatprep.subr.bf16.mxu1 %v5595_v33  ;;  %v5691_v32 = vld [vmem:[%s7596_s7 + $0x4c] ss:$16 sps:$4 sm:$0xff]   ;;  %v5766_v33 = vld [vmem:[%s7595_s4 + $0x28] ss:$16 sps:$4 sm:$0xff]  }
 0x14d   :  { %3057 = vmatprep.mubr.bf16.mxu0 %v5673_v34  ;;  %3163 = vmatprep.mubr.bf16.mxu1 %v5673_v34  ;;  %v5686_v34 = vld [vmem:[%s7596_s7 + $0x40] ss:$16 sps:$4 sm:$0xff]  }
 0x14f   :  { %3032 = vmatpush1.bf16.msra.mxu0 %v5590_v35  ;;  %3138 = vmatpush1.bf16.msra.mxu1 %v5593_v36  ;;  %v5689_v35 = vld [vmem:[%s7596_s7 + $0x48] ss:$16 sps:$4 sm:$0xff]   ;;  %v5694_v36 = vld [vmem:[%s7596_s7 + $0x64] ss:$16 sps:$4 sm:$0xff]  }
 0x150   :  { %3033 = vmatprep.subr.bf16.mxu0 %v5598_v37  ;;  %3139 = vmatprep.subr.bf16.mxu1 %v5601_v38  ;;  %v5697_v37 = vld [vmem:[%s7596_s7 + $0x6c] ss:$16 sps:$4 sm:$0xff]   ;;  %v5775_v38 = vld [vmem:[%s7597_s6 + $0x4] ss:$16 sps:$4 sm:$0xff]  }
 0x153   :  { %3034 = vmatpush1.bf16.msra.mxu0 %v5596_v39  ;;  %3140 = vmatpush1.bf16.msra.mxu1 %v5599_v40  ;;  %v5692_v39 = vld [vmem:[%s7596_s7 + $0x60] ss:$16 sps:$4 sm:$0xff]   ;;  %v5695_v40 = vld [vmem:[%s7596_s7 + $0x68] ss:$16 sps:$4 sm:$0xff]  }
 0x154   :  { %3035 = vmatprep.subr.bf16.mxu0 %v5604_v41  ;;  %3141 = vmatprep.subr.bf16.mxu1 %v5607_v42  ;;  %v5700_v41 = vld [vmem:[%s7596_s7 + $0x84] ss:$16 sps:$4 sm:$0xff]   ;;  %v5703_v42 = vld [vmem:[%s7596_s7 + $0x8c] ss:$16 sps:$4 sm:$0xff]  }
 0x157   :  { %3036 = vmatpush1.bf16.msra.mxu0 %v5602_v43  ;;  %3142 = vmatpush1.bf16.msra.mxu1 %v5605_v44  ;;  %v5698_v43 = vld [vmem:[%s7596_s7 + $0x80] ss:$16 sps:$4 sm:$0xff]   ;;  %v5701_v44 = vld [vmem:[%s7596_s7 + $0x88] ss:$16 sps:$4 sm:$0xff]  }
 0x158   :  { %3037 = vmatprep.subr.bf16.mxu0 %v5610_v45  ;;  %3143 = vmatprep.subr.bf16.mxu1 %v5613_v46  ;;  %v5706_v45 = vld [vmem:[%s7596_s7 + $0xa4] ss:$16 sps:$4 sm:$0xff]   ;;  %v5709_v46 = vld [vmem:[%s7596_s7 + $0xac] ss:$16 sps:$4 sm:$0xff]  }
 0x15b   :  { %3038 = vmatpush1.bf16.msra.mxu0 %v5608_v47  ;;  %3144 = vmatpush1.bf16.msra.mxu1 %v5611_v48  ;;  %v5704_v47 = vld [vmem:[%s7596_s7 + $0xa0] ss:$16 sps:$4 sm:$0xff]   ;;  %v5707_v48 = vld [vmem:[%s7596_s7 + $0xa8] ss:$16 sps:$4 sm:$0xff]  }
 0x15c   :  { %3039 = vmatprep.subr.bf16.mxu0 %v5616_v49  ;;  %3145 = vmatprep.subr.bf16.mxu1 %v5619_v50  ;;  %v5712_v49 = vld [vmem:[%s7596_s7 + $0xc4] ss:$16 sps:$4 sm:$0xff]   ;;  %v5715_v50 = vld [vmem:[%s7596_s7 + $0xcc] ss:$16 sps:$4 sm:$0xff]  }
 0x15f   :  { %3040 = vmatpush1.bf16.msra.mxu0 %v5614_v51  ;;  %3146 = vmatpush1.bf16.msra.mxu1 %v5617_v52  ;;  %v5710_v51 = vld [vmem:[%s7596_s7 + $0xc0] ss:$16 sps:$4 sm:$0xff]   ;;  %v5713_v52 = vld [vmem:[%s7596_s7 + $0xc8] ss:$16 sps:$4 sm:$0xff]  }
 0x160   :  { %3041 = vmatprep.subr.bf16.mxu0 %v5622_v53  ;;  %3147 = vmatprep.subr.bf16.mxu1 %v5625_v54  ;;  %v5718_v53 = vld [vmem:[%s7596_s7 + $0xe4] ss:$16 sps:$4 sm:$0xff]   ;;  %v5721_v54 = vld [vmem:[%s7596_s7 + $0xec] ss:$16 sps:$4 sm:$0xff]  }
 0x163   :  { %3042 = vmatpush1.bf16.msra.mxu0 %v5620_v55  ;;  %3148 = vmatpush1.bf16.msra.mxu1 %v5623_v56  ;;  %v5716_v55 = vld [vmem:[%s7596_s7 + $0xe0] ss:$16 sps:$4 sm:$0xff]   ;;  %v5719_v56 = vld [vmem:[%s7596_s7 + $0xe8] ss:$16 sps:$4 sm:$0xff]  }
 0x164   :  { %3043 = vmatprep.subr.bf16.mxu0 %v5628_v57  ;;  %3149 = vmatprep.subr.bf16.mxu1 %v5631_v58  ;;  %v5724_v57 = vld [vmem:[%s7596_s7 + $0x104] ss:$16 sps:$4 sm:$0xff]   ;;  %v5727_v58 = vld [vmem:[%s7596_s7 + $0x10c] ss:$16 sps:$4 sm:$0xff]  }
 0x167   :  { %3044 = vmatpush1.bf16.msra.mxu0 %v5626_v59  ;;  %3150 = vmatpush1.bf16.msra.mxu1 %v5629_v60  ;;  %v5722_v59 = vld [vmem:[%s7596_s7 + $0x100] ss:$16 sps:$4 sm:$0xff]   ;;  %v5725_v60 = vld [vmem:[%s7596_s7 + $0x108] ss:$16 sps:$4 sm:$0xff]  }
 0x168   :  { %3045 = vmatprep.subr.bf16.mxu0 %v5634_v61  ;;  %3151 = vmatprep.subr.bf16.mxu1 %v5637_v62  ;;  %v5730_v61 = vld [vmem:[%s7596_s7 + $0x124] ss:$16 sps:$4 sm:$0xff]   ;;  %v5733_v62 = vld [vmem:[%s7596_s7 + $0x12c] ss:$16 sps:$4 sm:$0xff]  }
 0x16b   :  { %3046 = vmatpush1.bf16.msra.mxu0 %v5632_v63  ;;  %3152 = vmatpush1.bf16.msra.mxu1 %v5635_v0  ;;  %v5728_v63 = vld [vmem:[%s7596_s7 + $0x120] ss:$16 sps:$4 sm:$0xff]   ;;  %v5731_v0 = vld [vmem:[%s7596_s7 + $0x128] ss:$16 sps:$4 sm:$0xff]  }
 0x16c   :  { %3047 = vmatprep.subr.bf16.mxu0 %v5640_v1  ;;  %3153 = vmatprep.subr.bf16.mxu1 %v5643_v2  ;;  %v5736_v1 = vld [vmem:[%s7596_s7 + $0x144] ss:$16 sps:$4 sm:$0xff]   ;;  %v5739_v2 = vld [vmem:[%s7596_s7 + $0x14c] ss:$16 sps:$4 sm:$0xff]  }
 0x16f   :  { %3048 = vmatpush1.bf16.msra.mxu0 %v5638_v3  ;;  %3154 = vmatpush1.bf16.msra.mxu1 %v5641_v4  ;;  %v5734_v3 = vld [vmem:[%s7596_s7 + $0x140] ss:$16 sps:$4 sm:$0xff]   ;;  %v5737_v4 = vld [vmem:[%s7596_s7 + $0x148] ss:$16 sps:$4 sm:$0xff]  }
 0x170   :  { %3049 = vmatprep.subr.bf16.mxu0 %v5646_v5  ;;  %3155 = vmatprep.subr.bf16.mxu1 %v5649_v6  ;;  %v5742_v5 = vld [vmem:[%s7596_s7 + $0x164] ss:$16 sps:$4 sm:$0xff]   ;;  %v5745_v6 = vld [vmem:[%s7596_s7 + $0x16c] ss:$16 sps:$4 sm:$0xff]  }
 0x173   :  { %3050 = vmatpush1.bf16.msra.mxu0 %v5644_v7  ;;  %3156 = vmatpush1.bf16.msra.mxu1 %v5647_v8  ;;  %v5740_v7 = vld [vmem:[%s7596_s7 + $0x160] ss:$16 sps:$4 sm:$0xff]   ;;  %v5743_v8 = vld [vmem:[%s7596_s7 + $0x168] ss:$16 sps:$4 sm:$0xff]  }
 0x174   :  { %3051 = vmatprep.subr.bf16.mxu0 %v5652_v9  ;;  %3157 = vmatprep.subr.bf16.mxu1 %v5655_v10  ;;  %v5748_v9 = vld [vmem:[%s7596_s7 + $0x184] ss:$16 sps:$4 sm:$0xff]   ;;  %v5751_v10 = vld [vmem:[%s7596_s7 + $0x18c] ss:$16 sps:$4 sm:$0xff]  }
 0x177   :  { %3052 = vmatpush1.bf16.msra.mxu0 %v5650_v11  ;;  %3158 = vmatpush1.bf16.msra.mxu1 %v5653_v12  ;;  %v5746_v11 = vld [vmem:[%s7596_s7 + $0x180] ss:$16 sps:$4 sm:$0xff]   ;;  %v5749_v12 = vld [vmem:[%s7596_s7 + $0x188] ss:$16 sps:$4 sm:$0xff]  }
 0x178   :  { %3053 = vmatprep.subr.bf16.mxu0 %v5660_v13  ;;  %3159 = vmatprep.subr.bf16.mxu1 %v5663_v14  ;;  %v5754_v13 = vld [vmem:[%s7596_s7 + $0x1a4] ss:$16 sps:$4 sm:$0xff]   ;;  %v5757_v14 = vld [vmem:[%s7596_s7 + $0x1ac] ss:$16 sps:$4 sm:$0xff]  }
 0x17b   :  { %3054 = vmatpush1.bf16.msra.mxu0 %v5658_v15  ;;  %3160 = vmatpush1.bf16.msra.mxu1 %v5661_v16  ;;  %v5752_v15 = vld [vmem:[%s7596_s7 + $0x1a0] ss:$16 sps:$4 sm:$0xff]   ;;  %v5755_v16 = vld [vmem:[%s7596_s7 + $0x1a8] ss:$16 sps:$4 sm:$0xff]  }
 0x17c   :  { %3055 = vmatprep.subr.bf16.mxu0 %v5667_v17  ;;  %3161 = vmatprep.subr.bf16.mxu1 %v5670_v18  ;;  %v5762_v17 = vld [vmem:[%s7596_s7 + $0x1c4] ss:$16 sps:$4 sm:$0xff]   ;;  %v5765_v18 = vld [vmem:[%s7596_s7 + $0x1cc] ss:$16 sps:$4 sm:$0xff]  }
 0x17f   :  { %3056 = vmatpush1.bf16.msra.mxu0 %v5665_v19  ;;  %3162 = vmatpush1.bf16.msra.mxu1 %v5668_v20  ;;  %v5760_v19 = vld [vmem:[%s7596_s7 + $0x1c0] ss:$16 sps:$4 sm:$0xff]   ;;  %v5763_v20 = vld [vmem:[%s7596_s7 + $0x1c8] ss:$16 sps:$4 sm:$0xff]  }
 0x180   :  { %4016 = vmatprep.subr.bf16.mxu0 %v5676_v21  ;;  %4122 = vmatprep.subr.bf16.mxu1 %v5679_v22  ;;  %v5769_v21 = vld [vmem:[%s7596_s7 + $0x1e4] ss:$16 sps:$4 sm:$0xff]   ;;  %v5772_v22 = vld [vmem:[%s7596_s7 + $0x1ec] ss:$16 sps:$4 sm:$0xff]  }
 0x182   :  { %3058 = vmatmul.mubr.bf16.vlgmr.msra.gmra.mrb[0].mxu0 %v5671_v23  ;;  %3164 = vmatmul.mubr.bf16.vlgmr.msra.gmra.mrb[0].mxu1 %v5671_v23  ;;  %v5767_v23 = vld [vmem:[%s7596_s7 + $0x1e0] ss:$16 sps:$4 sm:$0xff]  }
 0x183   :  { %4017 = vmatpush1.bf16.msra.mxu0 %v5674_v24  ;;  %4123 = vmatpush1.bf16.msra.mxu1 %v5677_v25  ;;  %v5770_v24 = vld [vmem:[%s7596_s7 + $0x1e8] ss:$16 sps:$4 sm:$0xff]   ;;  %v5778_v25 = vld [vmem:[%s7596_s7 + $0x204] ss:$16 sps:$4 sm:$0xff]  }
 0x184   :  { %4018 = vmatprep.subr.bf16.mxu0 %v5682_v26  ;;  %4124 = vmatprep.subr.bf16.mxu1 %v5685_v27  ;;  %v5781_v26 = vld [vmem:[%s7596_s7 + $0x20c] ss:$16 sps:$4 sm:$0xff]   ;;  %v5773_v27 = vld [vmem:[%s7597_s6] ss:$16 sps:$4 sm:$0xff]  }
 0x185   :  { %3067 = vmatprep.mubr.bf16.mxu0 %v5758_v28  ;;  %3173 = vmatprep.mubr.bf16.mxu1 %v5758_v28  ;;  %v5776_v28 = vld [vmem:[%s7596_s7 + $0x200] ss:$16 sps:$4 sm:$0xff]  }
 0x187   :  { %4019 = vmatpush1.bf16.msra.mxu0 %v5680_v29  ;;  %4125 = vmatpush1.bf16.msra.mxu1 %v5683_v30  ;;  %v5779_v29 = vld [vmem:[%s7596_s7 + $0x208] ss:$16 sps:$4 sm:$0xff]   ;;  %v5784_v30 = vld [vmem:[%s7596_s7 + $0x224] ss:$16 sps:$4 sm:$0xff]  }
 0x188   :  { %4020 = vmatprep.subr.bf16.mxu0 %v5688_v31  ;;  %4126 = vmatprep.subr.bf16.mxu1 %v5691_v32  ;;  %v5787_v31 = vld [vmem:[%s7596_s7 + $0x22c] ss:$16 sps:$4 sm:$0xff]   ;;  %v5860_v32 = vld [vmem:[%s7597_s6 + $0x24] ss:$16 sps:$4 sm:$0xff]  }
 0x18a   :  { %3068 = vmatmul.mubr.bf16.gmra.mrb[4].mxu0 %v5766_v33  ;;  %3174 = vmatmul.mubr.bf16.gmra.mrb[4].mxu1 %v5766_v33  ;;  %v5782_v33 = vld [vmem:[%s7596_s7 + $0x220] ss:$16 sps:$4 sm:$0xff]  }
 0x18b   :  { %4021 = vmatpush1.bf16.msra.mxu0 %v5686_v34  ;;  %4127 = vmatpush1.bf16.msra.mxu1 %v5689_v35  ;;  %v5785_v34 = vld [vmem:[%s7596_s7 + $0x228] ss:$16 sps:$4 sm:$0xff]   ;;  %v5790_v35 = vld [vmem:[%s7596_s7 + $0x244] ss:$16 sps:$4 sm:$0xff]  }
 0x18c   :  { %4022 = vmatprep.subr.bf16.mxu0 %v5694_v36  ;;  %4128 = vmatprep.subr.bf16.mxu1 %v5697_v37  ;;  %v5793_v36 = vld [vmem:[%s7596_s7 + $0x24c] ss:$16 sps:$4 sm:$0xff]   ;;  %v5862_v37 = vld [vmem:[%s7597_s6 + $0x20] ss:$16 sps:$4 sm:$0xff]  }
 0x18d   :  { %4048 = vmatprep.mubr.bf16.mxu0 %v5775_v38  ;;  %4154 = vmatprep.mubr.bf16.mxu1 %v5775_v38  ;;  %v5788_v38 = vld [vmem:[%s7596_s7 + $0x240] ss:$16 sps:$4 sm:$0xff]  }
 0x18f   :  { %4023 = vmatpush1.bf16.msra.mxu0 %v5692_v39  ;;  %4129 = vmatpush1.bf16.msra.mxu1 %v5695_v40  ;;  %v5791_v39 = vld [vmem:[%s7596_s7 + $0x248] ss:$16 sps:$4 sm:$0xff]   ;;  %v5796_v40 = vld [vmem:[%s7596_s7 + $0x264] ss:$16 sps:$4 sm:$0xff]  }
 0x190   :  { %4024 = vmatprep.subr.bf16.mxu0 %v5700_v41  ;;  %4130 = vmatprep.subr.bf16.mxu1 %v5703_v42  ;;  %v5799_v41 = vld [vmem:[%s7596_s7 + $0x26c] ss:$16 sps:$4 sm:$0xff]  }
 0x191   :  { %v5877_v42 = vld [vmem:[%s7597_s6 + $0xc] ss:$16 sps:$4 sm:$0xff]  }
 0x193   :  { %4025 = vmatpush1.bf16.msra.mxu0 %v5698_v43  ;;  %4131 = vmatpush1.bf16.msra.mxu1 %v5701_v44  ;;  %v5794_v43 = vld [vmem:[%s7596_s7 + $0x260] ss:$16 sps:$4 sm:$0xff]   ;;  %v5797_v44 = vld [vmem:[%s7596_s7 + $0x268] ss:$16 sps:$4 sm:$0xff]  }
 0x194   :  { %4026 = vmatprep.subr.bf16.mxu0 %v5706_v45  ;;  %4132 = vmatprep.subr.bf16.mxu1 %v5709_v46  ;;  %v5802_v45 = vld [vmem:[%s7596_s7 + $0x284] ss:$16 sps:$4 sm:$0xff]   ;;  %v5805_v46 = vld [vmem:[%s7596_s7 + $0x28c] ss:$16 sps:$4 sm:$0xff]  }
 0x197   :  { %4027 = vmatpush1.bf16.msra.mxu0 %v5704_v47  ;;  %4133 = vmatpush1.bf16.msra.mxu1 %v5707_v48  ;;  %v5800_v47 = vld [vmem:[%s7596_s7 + $0x280] ss:$16 sps:$4 sm:$0xff]   ;;  %v5803_v48 = vld [vmem:[%s7596_s7 + $0x288] ss:$16 sps:$4 sm:$0xff]  }
 0x198   :  { %4028 = vmatprep.subr.bf16.mxu0 %v5712_v49  ;;  %4134 = vmatprep.subr.bf16.mxu1 %v5715_v50  ;;  %v5808_v49 = vld [vmem:[%s7596_s7 + $0x2a4] ss:$16 sps:$4 sm:$0xff]   ;;  %v5811_v50 = vld [vmem:[%s7596_s7 + $0x2ac] ss:$16 sps:$4 sm:$0xff]  }
 0x19b   :  { %4029 = vmatpush1.bf16.msra.mxu0 %v5710_v51  ;;  %4135 = vmatpush1.bf16.msra.mxu1 %v5713_v52  ;;  %v5806_v51 = vld [vmem:[%s7596_s7 + $0x2a0] ss:$16 sps:$4 sm:$0xff]   ;;  %v5809_v52 = vld [vmem:[%s7596_s7 + $0x2a8] ss:$16 sps:$4 sm:$0xff]  }
 0x19c   :  { %4030 = vmatprep.subr.bf16.mxu0 %v5718_v53  ;;  %4136 = vmatprep.subr.bf16.mxu1 %v5721_v54  ;;  %v5814_v53 = vld [vmem:[%s7596_s7 + $0x2c4] ss:$16 sps:$4 sm:$0xff]   ;;  %v5817_v54 = vld [vmem:[%s7596_s7 + $0x2cc] ss:$16 sps:$4 sm:$0xff]  }
 0x19f   :  { %4031 = vmatpush1.bf16.msra.mxu0 %v5716_v55  ;;  %4137 = vmatpush1.bf16.msra.mxu1 %v5719_v56  ;;  %v5812_v55 = vld [vmem:[%s7596_s7 + $0x2c0] ss:$16 sps:$4 sm:$0xff]   ;;  %v5815_v56 = vld [vmem:[%s7596_s7 + $0x2c8] ss:$16 sps:$4 sm:$0xff]  }
 0x1a0   :  { %4032 = vmatprep.subr.bf16.mxu0 %v5724_v57  ;;  %4138 = vmatprep.subr.bf16.mxu1 %v5727_v58  ;;  %v5820_v57 = vld [vmem:[%s7596_s7 + $0x2e4] ss:$16 sps:$4 sm:$0xff]   ;;  %v5823_v58 = vld [vmem:[%s7596_s7 + $0x2ec] ss:$16 sps:$4 sm:$0xff]  }
 0x1a3   :  { %4033 = vmatpush1.bf16.msra.mxu0 %v5722_v59  ;;  %4139 = vmatpush1.bf16.msra.mxu1 %v5725_v60  ;;  %v5818_v59 = vld [vmem:[%s7596_s7 + $0x2e0] ss:$16 sps:$4 sm:$0xff]   ;;  %v5821_v60 = vld [vmem:[%s7596_s7 + $0x2e8] ss:$16 sps:$4 sm:$0xff]  }
 0x1a4   :  { %4034 = vmatprep.subr.bf16.mxu0 %v5730_v61  ;;  %4140 = vmatprep.subr.bf16.mxu1 %v5733_v62  ;;  %v5826_v61 = vld [vmem:[%s7596_s7 + $0x304] ss:$16 sps:$4 sm:$0xff]   ;;  %v5829_v62 = vld [vmem:[%s7596_s7 + $0x30c] ss:$16 sps:$4 sm:$0xff]  }
 0x1a7   :  { %4035 = vmatpush1.bf16.msra.mxu0 %v5728_v63  ;;  %4141 = vmatpush1.bf16.msra.mxu1 %v5731_v0  ;;  %v5824_v63 = vld [vmem:[%s7596_s7 + $0x300] ss:$16 sps:$4 sm:$0xff]   ;;  %v5827_v0 = vld [vmem:[%s7596_s7 + $0x308] ss:$16 sps:$4 sm:$0xff]  }
 0x1a8   :  { %4036 = vmatprep.subr.bf16.mxu0 %v5736_v1  ;;  %4142 = vmatprep.subr.bf16.mxu1 %v5739_v2  ;;  %v5832_v1 = vld [vmem:[%s7596_s7 + $0x324] ss:$16 sps:$4 sm:$0xff]   ;;  %v5835_v2 = vld [vmem:[%s7596_s7 + $0x32c] ss:$16 sps:$4 sm:$0xff]  }
 0x1ab   :  { %4037 = vmatpush1.bf16.msra.mxu0 %v5734_v3  ;;  %4143 = vmatpush1.bf16.msra.mxu1 %v5737_v4  ;;  %v5830_v3 = vld [vmem:[%s7596_s7 + $0x320] ss:$16 sps:$4 sm:$0xff]   ;;  %v5833_v4 = vld [vmem:[%s7596_s7 + $0x328] ss:$16 sps:$4 sm:$0xff]  }
 0x1ac   :  { %4038 = vmatprep.subr.bf16.mxu0 %v5742_v5  ;;  %4144 = vmatprep.subr.bf16.mxu1 %v5745_v6  ;;  %v5838_v5 = vld [vmem:[%s7596_s7 + $0x344] ss:$16 sps:$4 sm:$0xff]   ;;  %v5841_v6 = vld [vmem:[%s7596_s7 + $0x34c] ss:$16 sps:$4 sm:$0xff]  }
 0x1af   :  { %4039 = vmatpush1.bf16.msra.mxu0 %v5740_v7  ;;  %4145 = vmatpush1.bf16.msra.mxu1 %v5743_v8  ;;  %v5836_v7 = vld [vmem:[%s7596_s7 + $0x340] ss:$16 sps:$4 sm:$0xff]   ;;  %v5839_v8 = vld [vmem:[%s7596_s7 + $0x348] ss:$16 sps:$4 sm:$0xff]  }
 0x1b0   :  { %4040 = vmatprep.subr.bf16.mxu0 %v5748_v9  ;;  %4146 = vmatprep.subr.bf16.mxu1 %v5751_v10  ;;  %v5844_v9 = vld [vmem:[%s7596_s7 + $0x364] ss:$16 sps:$4 sm:$0xff]   ;;  %v5847_v10 = vld [vmem:[%s7596_s7 + $0x36c] ss:$16 sps:$4 sm:$0xff]  }
 0x1b3   :  { %4041 = vmatpush1.bf16.msra.mxu0 %v5746_v11  ;;  %4147 = vmatpush1.bf16.msra.mxu1 %v5749_v12  ;;  %v5842_v11 = vld [vmem:[%s7596_s7 + $0x360] ss:$16 sps:$4 sm:$0xff]   ;;  %v5845_v12 = vld [vmem:[%s7596_s7 + $0x368] ss:$16 sps:$4 sm:$0xff]  }
 0x1b4   :  { %4042 = vmatprep.subr.bf16.mxu0 %v5754_v13  ;;  %4148 = vmatprep.subr.bf16.mxu1 %v5757_v14  ;;  %v5850_v13 = vld [vmem:[%s7596_s7 + $0x384] ss:$16 sps:$4 sm:$0xff]   ;;  %v5853_v14 = vld [vmem:[%s7596_s7 + $0x38c] ss:$16 sps:$4 sm:$0xff]  }
 0x1b7   :  { %4043 = vmatpush1.bf16.msra.mxu0 %v5752_v15  ;;  %4149 = vmatpush1.bf16.msra.mxu1 %v5755_v16  ;;  %v5848_v15 = vld [vmem:[%s7596_s7 + $0x380] ss:$16 sps:$4 sm:$0xff]   ;;  %v5851_v16 = vld [vmem:[%s7596_s7 + $0x388] ss:$16 sps:$4 sm:$0xff]  }
 0x1b8   :  { %4044 = vmatprep.subr.bf16.mxu0 %v5762_v17  ;;  %4150 = vmatprep.subr.bf16.mxu1 %v5765_v18  ;;  %v5856_v17 = vld [vmem:[%s7596_s7 + $0x3a4] ss:$16 sps:$4 sm:$0xff]   ;;  %v5859_v18 = vld [vmem:[%s7596_s7 + $0x3ac] ss:$16 sps:$4 sm:$0xff]  }
 0x1bb   :  { %4045 = vmatpush1.bf16.msra.mxu0 %v5760_v19  ;;  %4151 = vmatpush1.bf16.msra.mxu1 %v5763_v20  ;;  %v5854_v19 = vld [vmem:[%s7596_s7 + $0x3a0] ss:$16 sps:$4 sm:$0xff]   ;;  %v5857_v20 = vld [vmem:[%s7596_s7 + $0x3a8] ss:$16 sps:$4 sm:$0xff]  }
 0x1bc   :  { %4046 = vmatprep.subr.bf16.mxu0 %v5769_v21  ;;  %4152 = vmatprep.subr.bf16.mxu1 %v5772_v22  ;;  %v5865_v21 = vld [vmem:[%s7596_s7 + $0x3c4] ss:$16 sps:$4 sm:$0xff]   ;;  %v5868_v22 = vld [vmem:[%s7596_s7 + $0x3cc] ss:$16 sps:$4 sm:$0xff]  }
 0x1bf   :  { %4047 = vmatpush1.bf16.msra.mxu0 %v5767_v23  ;;  %4153 = vmatpush1.bf16.msra.mxu1 %v5770_v24  ;;  %v5863_v23 = vld [vmem:[%s7596_s7 + $0x3c0] ss:$16 sps:$4 sm:$0xff]   ;;  %v5866_v24 = vld [vmem:[%s7596_s7 + $0x3c8] ss:$16 sps:$4 sm:$0xff]  }
 0x1c0   :  { %4069 = vmatprep.subr.bf16.mxu0 %v5778_v25  ;;  %4175 = vmatprep.subr.bf16.mxu1 %v5781_v26  ;;  %v5871_v25 = vld [vmem:[%s7596_s7 + $0x3e4] ss:$16 sps:$4 sm:$0xff]   ;;  %v5874_v26 = vld [vmem:[%s7596_s7 + $0x3ec] ss:$16 sps:$4 sm:$0xff]  }
 0x1c2   :  { %4049 = vmatmul.mubr.bf16.vlgmr.msra.gmra.mrb[0].mxu0 %v5773_v27  ;;  %4155 = vmatmul.mubr.bf16.vlgmr.msra.gmra.mrb[0].mxu1 %v5773_v27  ;;  %v5869_v27 = vld [vmem:[%s7596_s7 + $0x3e0] ss:$16 sps:$4 sm:$0xff]  }
 0x1c3   :  { %4070 = vmatpush1.bf16.msra.mxu0 %v5776_v28  ;;  %4176 = vmatpush1.bf16.msra.mxu1 %v5779_v29  ;;  %v5872_v28 = vld [vmem:[%s7596_s7 + $0x3e8] ss:$16 sps:$4 sm:$0xff]  }
 0x1c4   :  { %4071 = vmatprep.subr.bf16.mxu0 %v5784_v30  ;;  %4177 = vmatprep.subr.bf16.mxu1 %v5787_v31  ;;  %v5875_v29 = vld [vmem:[%s7597_s6 + $0x8] ss:$16 sps:$4 sm:$0xff]   ;;  %v5878_v30 = vld [vmem:[%s7597_s6 + $0x2c] ss:$16 sps:$4 sm:$0xff]  }
 0x1c5   :  { %4058 = vmatprep.mubr.bf16.mxu0 %v5860_v32  ;;  %4164 = vmatprep.mubr.bf16.mxu1 %v5860_v32  ;;  %v5880_v31 = vld [vmem:[%s7597_s6 + $0x28] ss:$16 sps:$4 sm:$0xff]   ;;  %v4281_v32 = vlaneseq }
 0x1c7   :  { %4072 = vmatpush1.bf16.msra.mxu0 %v5782_v33  ;;  %4178 = vmatpush1.bf16.msra.mxu1 %v5785_v34  ;;  %v4282_v33 = vshrl.u32 %v4281_v32, 7 }
 0x1c8   :  { %4073 = vmatprep.subr.bf16.mxu0 %v5790_v35  ;;  %4179 = vmatprep.subr.bf16.mxu1 %v5793_v36  ;;  %v4279_v36 = vld [vmem:[%s7598_s8] sm:$0xf] }
 0x1c9   :  { %v4283_v34 = vsub.s32 0, %v4282_v33  ;;  %v4291_v35 = vsub.s32 2, %v4282_v33 }
 0x1ca   :  { %4059 = vmatmul.mubr.bf16.gmra.mrb[4].mxu0 %v5862_v37  ;;  %4165 = vmatmul.mubr.bf16.gmra.mrb[4].mxu1 %v5862_v37  ;;  %v4287_v37 = vsub.s32 1, %v4282_v33 }
 0x1cb   :  { %4074 = vmatpush1.bf16.msra.mxu0 %v5788_v38  ;;  %4180 = vmatpush1.bf16.msra.mxu1 %v5791_v39  ;;  %v4295_v38 = vsub.s32 3, %v4282_v33  ;;  %v4284_v39 = vrot.slane %v4279_v36, %v4283_v34 }
 0x1cc   :  { %4075 = vmatprep.subr.bf16.mxu0 %v5796_v40  ;;  %4181 = vmatprep.subr.bf16.mxu1 %v5799_v41  ;;  %v4292_v40 = vrot.slane %v4279_v36, %v4291_v35  ;;  %v4288_v41 = vrot.slane %v4279_v36, %v4287_v37 }
 0x1cd   :  { %4101 = vmatprep.mubr.bf16.mxu0 %v5877_v42  ;;  %4207 = vmatprep.mubr.bf16.mxu1 %v5877_v42  ;;  %v4296_v42 = vrot.slane %v4279_v36, %v4295_v38 }
 0x1cf   :  { %4076 = vmatpush1.bf16.msra.mxu0 %v5794_v43  ;;  %4182 = vmatpush1.bf16.msra.mxu1 %v5797_v44 }
 0x1d0   :  { %4077 = vmatprep.subr.bf16.mxu0 %v5802_v45  ;;  %4183 = vmatprep.subr.bf16.mxu1 %v5805_v46 }
 0x1d3   :  { %4078 = vmatpush1.bf16.msra.mxu0 %v5800_v47  ;;  %4184 = vmatpush1.bf16.msra.mxu1 %v5803_v48 }
 0x1d4   :  { %4079 = vmatprep.subr.bf16.mxu0 %v5808_v49  ;;  %4185 = vmatprep.subr.bf16.mxu1 %v5811_v50 }
 0x1d7   :  { %4080 = vmatpush1.bf16.msra.mxu0 %v5806_v51  ;;  %4186 = vmatpush1.bf16.msra.mxu1 %v5809_v52 }
 0x1d8   :  { %4081 = vmatprep.subr.bf16.mxu0 %v5814_v53  ;;  %4187 = vmatprep.subr.bf16.mxu1 %v5817_v54 }
 0x1db   :  { %4082 = vmatpush1.bf16.msra.mxu0 %v5812_v55  ;;  %4188 = vmatpush1.bf16.msra.mxu1 %v5815_v56 }
 0x1dc   :  { %4083 = vmatprep.subr.bf16.mxu0 %v5820_v57  ;;  %4189 = vmatprep.subr.bf16.mxu1 %v5823_v58 }
 0x1df   :  { %4084 = vmatpush1.bf16.msra.mxu0 %v5818_v59  ;;  %4190 = vmatpush1.bf16.msra.mxu1 %v5821_v60 }
 0x1e0   :  { %4085 = vmatprep.subr.bf16.mxu0 %v5826_v61  ;;  %4191 = vmatprep.subr.bf16.mxu1 %v5829_v62 }
 0x1e3   :  { %4086 = vmatpush1.bf16.msra.mxu0 %v5824_v63  ;;  %4192 = vmatpush1.bf16.msra.mxu1 %v5827_v0 }
 0x1e4   :  { %4087 = vmatprep.subr.bf16.mxu0 %v5832_v1  ;;  %4193 = vmatprep.subr.bf16.mxu1 %v5835_v2 }
 0x1e7   :  { %4088 = vmatpush1.bf16.msra.mxu0 %v5830_v3  ;;  %4194 = vmatpush1.bf16.msra.mxu1 %v5833_v4 }
 0x1e8   :  { %4089 = vmatprep.subr.bf16.mxu0 %v5838_v5  ;;  %4195 = vmatprep.subr.bf16.mxu1 %v5841_v6 }
 0x1eb   :  { %4090 = vmatpush1.bf16.msra.mxu0 %v5836_v7  ;;  %4196 = vmatpush1.bf16.msra.mxu1 %v5839_v8 }
 0x1ec   :  { %4091 = vmatprep.subr.bf16.mxu0 %v5844_v9  ;;  %4197 = vmatprep.subr.bf16.mxu1 %v5847_v10 }
 0x1ef   :  { %4092 = vmatpush1.bf16.msra.mxu0 %v5842_v11  ;;  %4198 = vmatpush1.bf16.msra.mxu1 %v5845_v12 }
 0x1f0   :  { %4093 = vmatprep.subr.bf16.mxu0 %v5850_v13  ;;  %4199 = vmatprep.subr.bf16.mxu1 %v5853_v14 }
 0x1f3   :  { %4094 = vmatpush1.bf16.msra.mxu0 %v5848_v15  ;;  %4200 = vmatpush1.bf16.msra.mxu1 %v5851_v16 }
 0x1f4   :  { %4095 = vmatprep.subr.bf16.mxu0 %v5856_v17  ;;  %4201 = vmatprep.subr.bf16.mxu1 %v5859_v18 }
 0x1f7   :  { %4096 = vmatpush1.bf16.msra.mxu0 %v5854_v19  ;;  %4202 = vmatpush1.bf16.msra.mxu1 %v5857_v20 }
 0x1f8   :  { %4097 = vmatprep.subr.bf16.mxu0 %v5865_v21  ;;  %4203 = vmatprep.subr.bf16.mxu1 %v5868_v22 }
 0x1fb   :  { %4098 = vmatpush1.bf16.msra.mxu0 %v5863_v23  ;;  %4204 = vmatpush1.bf16.msra.mxu1 %v5866_v24 }
 0x1fc   :  { %4099 = vmatprep.subr.bf16.mxu0 %v5871_v25  ;;  %4205 = vmatprep.subr.bf16.mxu1 %v5874_v26 }
 0x1ff   :  { %4100 = vmatpush1.bf16.msra.mxu0 %v5869_v27  ;;  %4206 = vmatpush1.bf16.msra.mxu1 %v5872_v28 }
 0x202   :  { %4102 = vmatmul.mubr.bf16.vlgmr.msra.gmra.mrb[0].mxu0 %v5875_v29  ;;  %4208 = vmatmul.mubr.bf16.vlgmr.msra.gmra.mrb[0].mxu1 %v5875_v29 }
 0x203   :  { %4111 = vmatprep.mubr.bf16.mxu0 %v5878_v30  ;;  %4217 = vmatprep.mubr.bf16.mxu1 %v5878_v30 }
 0x20a   :  { %4112 = vmatmul.mubr.bf16.gmra.mrb[4].mxu0 %v5880_v31  ;;  %4218 = vmatmul.mubr.bf16.gmra.mrb[4].mxu1 %v5880_v31 }
 0x2d5   :  { %v4103_v43 = vpop.f32.mrb[0].mxu0  ;;  %v4209_v44 = vpop.f32.mrb[0].mxu1 }
 0x2d6   :  { %v4301_v45 = vadd.f32 %v4284_v39, %v4103_v43  ;;  %v4303_v46 = vadd.f32 %v4292_v40, %v4209_v44  ;;  %v4105_v47 = vpop.f32.mrb[1].mxu0  ;;  %v4211_v48 = vpop.f32.mrb[1].mxu1 }
 0x2d7   :  { %v4302_v49 = vadd.f32 %v4288_v41, %v4105_v47  ;;  %v4304_v50 = vadd.f32 %v4296_v42, %v4211_v48  ;;  %v4107_v51 = vpop.f32.mrb[2].mxu0  ;;  %v4213_v52 = vpop.f32.mrb[2].mxu1 }
 0x2d8   :  { %v4317_v53 = vmax.f32 %v4301_v45, 0.0  ;;  %v4319_v54 = vmax.f32 %v4303_v46, 0.0  ;;  %v4305_v55 = vadd.f32 %v4284_v39, %v4107_v51  ;;  %v4307_v56 = vadd.f32 %v4292_v40, %v4213_v52  ;;  %v4109_v57 = vpop.f32.mrb[3].mxu0  ;;  %v4215_v58 = vpop.f32.mrb[3].mxu1 }
 0x2d9   :  { %v4318_v59 = vmax.f32 %v4302_v49, 0.0  ;;  %v4320_v60 = vmax.f32 %v4304_v50, 0.0  ;;  %v4306_v61 = vadd.f32 %v4288_v41, %v4109_v57  ;;  %v4308_v62 = vadd.f32 %v4296_v42, %v4215_v58 }
 0x2da   :  { %v4321_v63 = vmax.f32 %v4305_v55, 0.0  ;;  %v4323_v0 = vmax.f32 %v4307_v56, 0.0 }
 0x2db   :  { %v4945_v1 = vpack.c.bf16 %v4318_v59, %v4317_v53  ;;  %v4946_v2 = vpack.c.bf16 %v4320_v60, %v4319_v54  ;;  %v4322_v3 = vmax.f32 %v4306_v61, 0.0  ;;  %v4324_v4 = vmax.f32 %v4308_v62, 0.0 }
 0x2dd   :  { %4381 = vst [vmem:[%s7599_s9] sm:$0xff] %v4945_v1  ;;  %4382 = vst [vmem:[%s7599_s9 + $0x8] sm:$0xff] %v4946_v2  ;;  %v4947_v5 = vpack.c.bf16 %v4322_v3, %v4321_v63  ;;  %v4948_v6 = vpack.c.bf16 %v4324_v4, %v4323_v0  ;;  %v4113_v7 = vpop.f32.mrb[4].mxu0  ;;  %v4219_v8 = vpop.f32.mrb[4].mxu1 }
 0x2de   :  { %v4309_v9 = vadd.f32 %v4284_v39, %v4113_v7  ;;  %v4311_v10 = vadd.f32 %v4292_v40, %v4219_v8  ;;  %v4115_v11 = vpop.f32.mrb[5].mxu0  ;;  %v4221_v12 = vpop.f32.mrb[5].mxu1 }
 0x2df   :  { %4383 = vst [vmem:[%s7599_s9 + $0x10] sm:$0xff] %v4947_v5  ;;  %4384 = vst [vmem:[%s7599_s9 + $0x18] sm:$0xff] %v4948_v6  ;;  %v4310_v13 = vadd.f32 %v4288_v41, %v4115_v11  ;;  %v4312_v14 = vadd.f32 %v4296_v42, %v4221_v12  ;;  %v4117_v15 = vpop.f32.mrb[6].mxu0  ;;  %v4223_v16 = vpop.f32.mrb[6].mxu1 }
 0x2e0   :  { %v4325_v17 = vmax.f32 %v4309_v9, 0.0  ;;  %v4327_v18 = vmax.f32 %v4311_v10, 0.0  ;;  %v4313_v19 = vadd.f32 %v4284_v39, %v4117_v15  ;;  %v4315_v20 = vadd.f32 %v4292_v40, %v4223_v16  ;;  %v4119_v21 = vpop.f32.mrb[7].mxu0  ;;  %v4225_v22 = vpop.f32.mrb[7].mxu1 }
 0x2e1   :  { %v4326_v23 = vmax.f32 %v4310_v13, 0.0  ;;  %v4328_v24 = vmax.f32 %v4312_v14, 0.0  ;;  %v4314_v25 = vadd.f32 %v4288_v41, %v4119_v21  ;;  %v4316_v26 = vadd.f32 %v4296_v42, %v4225_v22 }
 0x2e2   :  { %v4329_v27 = vmax.f32 %v4313_v19, 0.0  ;;  %v4331_v28 = vmax.f32 %v4315_v20, 0.0 }
 0x2e3   :  { %v4949_v29 = vpack.c.bf16 %v4326_v23, %v4325_v17  ;;  %v4950_v30 = vpack.c.bf16 %v4328_v24, %v4327_v18  ;;  %v4330_v31 = vmax.f32 %v4314_v25, 0.0  ;;  %v4332_v32 = vmax.f32 %v4316_v26, 0.0 }
 0x2e5   :  { %4385 = vst [vmem:[%s7599_s9 + $0x20] sm:$0xff] %v4949_v29  ;;  %4386 = vst [vmem:[%s7599_s9 + $0x28] sm:$0xff] %v4950_v30  ;;  %v4951_v33 = vpack.c.bf16 %v4330_v31, %v4329_v27  ;;  %v4952_v34 = vpack.c.bf16 %v4332_v32, %v4331_v28 }
 0x2e7   :  { %4387 = vst [vmem:[%s7599_s9 + $0x30] sm:$0xff] %v4951_v33  ;;  %4388 = vst [vmem:[%s7599_s9 + $0x38] sm:$0xff] %v4952_v34 }

// kernel: generator_for_video_forward.23
= control target key start
LH: loop header
LB: loop body
LE: loop exit
PB: predicated region body
PF: predicated region fallthrough
CT: control target
= control target key end

     0   :  { %s2358_s1 = inlined_call_operand.vmem [shape: bf16[384,128], index: 1, kind: input, shape index: {}]   ;;  %s2359_s3 = inlined_call_operand.vmem [shape: bf16[384,128], index: 3, kind: input, shape index: {}]   ;;  %s2360_s0 = inlined_call_operand.vmem [shape: bf16[128,384], index: 0, kind: input, shape index: {}]   ;;  %s2361_s2 = inlined_call_operand.vmem [shape: bf16[128,384], index: 2, kind: input, shape index: {}]   ;;  %s2362_s4 = inlined_call_operand.vmem [shape: f32[1,128], index: 4, kind: input, shape index: {}]   ;;  %s2363_s5 = inlined_call_operand.vmem [shape: bf16[128,128], index: 5, kind: output, shape index: {}]  }
   0x1   :  { %v1787_v0 = vld [vmem:[%s2358_s1 + $0x40] sm:$0xff]   ;;  %v1791_v4 = vld [vmem:[%s2358_s1 + $0x48] sm:$0xff]   ;;  %v1795_v8 = vld [vmem:[%s2358_s1 + $0x50] sm:$0xff]  }
   0x2   :  { %v1788_v1 = vld [vmem:[%s2358_s1] sm:$0xff]   ;;  %1515 = vmatprep.subr.bf16.mxu0 %v1787_v0  ;;  %v1792_v5 = vld [vmem:[%s2358_s1 + $0x8] sm:$0xff]   ;;  %v1796_v9 = vld [vmem:[%s2358_s1 + $0x10] sm:$0xff]  }
   0x3   :  { %v1789_v2 = vld [vmem:[%s2359_s3 + $0x40] sm:$0xff]   ;;  %1516 = vmatpush3.bf16.msra.mxu0 %v1788_v1  ;;  %v1793_v6 = vld [vmem:[%s2359_s3 + $0x48] sm:$0xff]   ;;  %v1797_v10 = vld [vmem:[%s2359_s3 + $0x50] sm:$0xff]  }
   0x4   :  { %v1790_v3 = vld [vmem:[%s2359_s3] sm:$0xff]   ;;  %1595 = vmatprep.subr.bf16.mxu1 %v1789_v2  ;;  %1517 = vmatprep.subr.bf16.mxu0 %v1791_v4  ;;  %v1794_v7 = vld [vmem:[%s2359_s3 + $0x8] sm:$0xff]   ;;  %v1798_v11 = vld [vmem:[%s2359_s3 + $0x10] sm:$0xff]  }
   0x5   :  { %1596 = vmatpush3.bf16.msra.mxu1 %v1790_v3  ;;  %v1799_v12 = vld [vmem:[%s2358_s1 + $0x58] sm:$0xff]   ;;  %v1803_v16 = vld [vmem:[%s2358_s1 + $0x60] sm:$0xff]   ;;  %v1807_v20 = vld [vmem:[%s2358_s1 + $0x68] sm:$0xff]  }
   0x6   :  { %1597 = vmatprep.subr.bf16.mxu1 %v1793_v6  ;;  %v1800_v13 = vld [vmem:[%s2358_s1 + $0x18] sm:$0xff]   ;;  %v1804_v17 = vld [vmem:[%s2358_s1 + $0x20] sm:$0xff]   ;;  %v1808_v21 = vld [vmem:[%s2358_s1 + $0x28] sm:$0xff]  }
   0x7   :  { %1518 = vmatpush3.bf16.msra.mxu0 %v1792_v5  ;;  %v1801_v14 = vld [vmem:[%s2359_s3 + $0x58] sm:$0xff]   ;;  %v1805_v18 = vld [vmem:[%s2359_s3 + $0x60] sm:$0xff]   ;;  %v1809_v22 = vld [vmem:[%s2359_s3 + $0x68] sm:$0xff]  }
   0x8   :  { %1519 = vmatprep.subr.bf16.mxu0 %v1795_v8  ;;  %v1802_v15 = vld [vmem:[%s2359_s3 + $0x18] sm:$0xff]   ;;  %v1806_v19 = vld [vmem:[%s2359_s3 + $0x20] sm:$0xff]   ;;  %v1810_v23 = vld [vmem:[%s2359_s3 + $0x28] sm:$0xff]  }
   0x9   :  { %1598 = vmatpush3.bf16.msra.mxu1 %v1794_v7  ;;  %v1811_v24 = vld [vmem:[%s2358_s1 + $0x70] sm:$0xff]   ;;  %v1815_v28 = vld [vmem:[%s2358_s1 + $0x78] sm:$0xff]   ;;  %v1818_v31 = vld [vmem:[%s2360_s0] ss:$12 sps:$4 sm:$0xff]  }
   0xa   :  { %1599 = vmatprep.subr.bf16.mxu1 %v1797_v10  ;;  %v1812_v25 = vld [vmem:[%s2358_s1 + $0x30] sm:$0xff]   ;;  %v1816_v29 = vld [vmem:[%s2358_s1 + $0x38] sm:$0xff]   ;;  %v1822_v34 = vld [vmem:[%s2358_s1 + $0x80] sm:$0xff]  }
   0xb   :  { %1520 = vmatpush3.bf16.msra.mxu0 %v1796_v9  ;;  %v1813_v26 = vld [vmem:[%s2359_s3 + $0x70] sm:$0xff]   ;;  %v1817_v30 = vld [vmem:[%s2359_s3 + $0x78] sm:$0xff]   ;;  %v1823_v35 = vld [vmem:[%s2361_s2] ss:$12 sps:$4 sm:$0xff]  }
   0xc   :  { %1521 = vmatprep.subr.bf16.mxu0 %v1799_v12  ;;  %v1814_v27 = vld [vmem:[%s2359_s3 + $0x30] sm:$0xff]   ;;  %v1821_v33 = vld [vmem:[%s2359_s3 + $0x38] sm:$0xff]   ;;  %v1826_v37 = vld [vmem:[%s2359_s3 + $0x80] sm:$0xff]  }
   0xd   :  { %1600 = vmatpush3.bf16.msra.mxu1 %v1798_v11  ;;  %v1820_v32 = vld [vmem:[%s2360_s0 + $0x4] ss:$12 sps:$4 sm:$0xff]   ;;  %v1827_v38 = vld [vmem:[%s2360_s0 + $0x1c] ss:$12 sps:$4 sm:$0xff]   ;;  %v1835_v44 = vld [vmem:[%s2360_s0 + $0x34] ss:$12 sps:$4 sm:$0xff]  }
   0xe   :  { %1601 = vmatprep.subr.bf16.mxu1 %v1801_v14  ;;  %441 = vmatprep.mubr.bf16.mxu0 %v1820_v32  ;;  %v1825_v36 = vld [vmem:[%s2361_s2 + $0x4] ss:$12 sps:$4 sm:$0xff]   ;;  %v1830_v40 = vld [vmem:[%s2358_s1 + $0x88] sm:$0xff]   ;;  %v1839_v46 = vld [vmem:[%s2361_s2 + $0x34] ss:$12 sps:$4 sm:$0xff]  }
   0xf   :  { %1522 = vmatpush3.bf16.msra.mxu0 %v1800_v13  ;;  %1003 = vmatprep.mubr.bf16.mxu1 %v1825_v36  ;;  %v1829_v39 = vld [vmem:[%s2360_s0 + $0x18] ss:$12 sps:$4 sm:$0xff]   ;;  %v1831_v41 = vld [vmem:[%s2361_s2 + $0x1c] ss:$12 sps:$4 sm:$0xff]   ;;  %v1838_v45 = vld [vmem:[%s2358_s1 + $0x90] sm:$0xff]  }
  0x10   :  { %1523 = vmatprep.subr.bf16.mxu0 %v1803_v16  ;;  %v1834_v42 = vld [vmem:[%s2359_s3 + $0x88] sm:$0xff]   ;;  %v1833_v43 = vld [vmem:[%s2361_s2 + $0x18] ss:$12 sps:$4 sm:$0xff]   ;;  %v1842_v47 = vld [vmem:[%s2359_s3 + $0x90] sm:$0xff]  }
  0x11   :  { %1602 = vmatpush3.bf16.msra.mxu1 %v1802_v15  ;;  %v1837_v48 = vld [vmem:[%s2360_s0 + $0x30] ss:$12 sps:$4 sm:$0xff]   ;;  %v1843_v49 = vld [vmem:[%s2360_s0 + $0x4c] ss:$12 sps:$4 sm:$0xff]   ;;  %v1854_v54 = vld [vmem:[%s2358_s1 + $0xa0] sm:$0xff]  }
  0x12   :  { %1603 = vmatprep.subr.bf16.mxu1 %v1805_v18  ;;  %v1846_v50 = vld [vmem:[%s2358_s1 + $0x98] sm:$0xff]   ;;  %v1845_v55 = vld [vmem:[%s2360_s0 + $0x48] ss:$12 sps:$4 sm:$0xff]   ;;  %v1858_v56 = vld [vmem:[%s2359_s3 + $0xa0] sm:$0xff]  }
  0x13   :  { %1524 = vmatpush3.bf16.msra.mxu0 %v1804_v17  ;;  %v1841_v51 = vld [vmem:[%s2361_s2 + $0x30] ss:$12 sps:$4 sm:$0xff]   ;;  %v1847_v53 = vld [vmem:[%s2361_s2 + $0x4c] ss:$12 sps:$4 sm:$0xff]   ;;  %v1849_v59 = vld [vmem:[%s2361_s2 + $0x48] ss:$12 sps:$4 sm:$0xff]  }
  0x14   :  { %1525 = vmatprep.subr.bf16.mxu0 %v1807_v20  ;;  %v1850_v52 = vld [vmem:[%s2359_s3 + $0x98] sm:$0xff]   ;;  %v1851_v57 = vld [vmem:[%s2360_s0 + $0x64] ss:$12 sps:$4 sm:$0xff]   ;;  %v1862_v58 = vld [vmem:[%s2358_s1 + $0xa8] sm:$0xff]  }
  0x15   :  { %1604 = vmatpush3.bf16.msra.mxu1 %v1806_v19  ;;  %v1855_v60 = vld [vmem:[%s2361_s2 + $0x64] ss:$12 sps:$4 sm:$0xff]   ;;  %v1866_v61 = vld [vmem:[%s2359_s3 + $0xa8] sm:$0xff]   ;;  %v1878_v3 = vld [vmem:[%s2358_s1 + $0xb8] sm:$0xff]  }
  0x16   :  { %1605 = vmatprep.subr.bf16.mxu1 %v1809_v22  ;;  %v1870_v62 = vld [vmem:[%s2358_s1 + $0xb0] sm:$0xff]   ;;  %v1853_v63 = vld [vmem:[%s2360_s0 + $0x60] ss:$12 sps:$4 sm:$0xff]   ;;  %v1859_v0 = vld [vmem:[%s2360_s0 + $0x7c] ss:$12 sps:$4 sm:$0xff]  }
  0x17   :  { %1526 = vmatpush3.bf16.msra.mxu0 %v1808_v21  ;;  %v1874_v1 = vld [vmem:[%s2359_s3 + $0xb0] sm:$0xff]   ;;  %v1857_v2 = vld [vmem:[%s2361_s2 + $0x60] ss:$12 sps:$4 sm:$0xff]   ;;  %v1863_v4 = vld [vmem:[%s2361_s2 + $0x7c] ss:$12 sps:$4 sm:$0xff]  }
  0x18   :  { %1527 = vmatprep.subr.bf16.mxu0 %v1811_v24  ;;  %v1882_v5 = vld [vmem:[%s2359_s3 + $0xb8] sm:$0xff]   ;;  %v1867_v7 = vld [vmem:[%s2360_s0 + $0x94] ss:$12 sps:$4 sm:$0xff]  }
  0x19   :  { %1606 = vmatpush3.bf16.msra.mxu1 %v1810_v23  ;;  %v1861_v6 = vld [vmem:[%s2360_s0 + $0x78] ss:$12 sps:$4 sm:$0xff]   ;;  %v1871_v9 = vld [vmem:[%s2361_s2 + $0x94] ss:$12 sps:$4 sm:$0xff]   ;;  %v1869_v10 = vld [vmem:[%s2360_s0 + $0x90] ss:$12 sps:$4 sm:$0xff]  }
  0x1a   :  { %1607 = vmatprep.subr.bf16.mxu1 %v1813_v26  ;;  %v1865_v8 = vld [vmem:[%s2361_s2 + $0x78] ss:$12 sps:$4 sm:$0xff]   ;;  %v1873_v12 = vld [vmem:[%s2361_s2 + $0x90] ss:$12 sps:$4 sm:$0xff]   ;;  %v1877_v14 = vld [vmem:[%s2360_s0 + $0xa8] ss:$12 sps:$4 sm:$0xff]  }
  0x1b   :  { %1528 = vmatpush3.bf16.msra.mxu0 %v1812_v25  ;;  %v1875_v11 = vld [vmem:[%s2360_s0 + $0xac] ss:$12 sps:$4 sm:$0xff]   ;;  %v1883_v15 = vld [vmem:[%s2360_s0 + $0x8] ss:$12 sps:$4 sm:$0xff]   ;;  %v1888_v22 = vld [vmem:[%s2360_s0 + $0x50] ss:$12 sps:$4 sm:$0xff]  }
  0x1c   :  { %1529 = vmatprep.subr.bf16.mxu0 %v1815_v28  ;;  %v1879_v13 = vld [vmem:[%s2361_s2 + $0xac] ss:$12 sps:$4 sm:$0xff]   ;;  %v1881_v16 = vld [vmem:[%s2361_s2 + $0xa8] ss:$12 sps:$4 sm:$0xff]   ;;  %v1890_v24 = vld [vmem:[%s2361_s2 + $0x50] ss:$12 sps:$4 sm:$0xff]  }
  0x1d   :  { %1608 = vmatpush3.bf16.msra.mxu1 %v1814_v27  ;;  %v1885_v17 = vld [vmem:[%s2361_s2 + $0x8] ss:$12 sps:$4 sm:$0xff]   ;;  %v1884_v18 = vld [vmem:[%s2360_s0 + $0x20] ss:$12 sps:$4 sm:$0xff]   ;;  %v1887_v19 = vld [vmem:[%s2360_s0 + $0x38] ss:$12 sps:$4 sm:$0xff]  }
  0x1e   :  { %1609 = vmatprep.subr.bf16.mxu1 %v1817_v30  ;;  %v1886_v20 = vld [vmem:[%s2361_s2 + $0x20] ss:$12 sps:$4 sm:$0xff]   ;;  %v1889_v21 = vld [vmem:[%s2361_s2 + $0x38] ss:$12 sps:$4 sm:$0xff]   ;;  %v1891_v23 = vld [vmem:[%s2360_s0 + $0x68] ss:$12 sps:$4 sm:$0xff]  }
  0x1f   :  { %1530 = vmatpush3.bf16.msra.mxu0 %v1816_v29  ;;  %v1893_v25 = vld [vmem:[%s2361_s2 + $0x68] ss:$12 sps:$4 sm:$0xff]   ;;  %v1892_v26 = vld [vmem:[%s2360_s0 + $0x80] ss:$12 sps:$4 sm:$0xff]   ;;  %v1895_v27 = vld [vmem:[%s2360_s0 + $0x98] ss:$12 sps:$4 sm:$0xff]  }
  0x20   :  { %1675 = vmatprep.subr.bf16.mxu0 %v1822_v34  ;;  %v1894_v28 = vld [vmem:[%s2361_s2 + $0x80] ss:$12 sps:$4 sm:$0xff]   ;;  %v1897_v29 = vld [vmem:[%s2361_s2 + $0x98] ss:$12 sps:$4 sm:$0xff]   ;;  %v1896_v30 = vld [vmem:[%s2360_s0 + $0xb0] ss:$12 sps:$4 sm:$0xff]  }
  0x21   :  { %1610 = vmatpush3.bf16.msra.mxu1 %v1821_v33 }
  0x22   :  { %442 = vmatmul.mubr.bf16.vlgmr.msra.gmra.mrb[0].mxu0 %v1818_v31  ;;  %1707 = vmatprep.subr.bf16.mxu1 %v1826_v37  ;;  %v1898_v31 = vld [vmem:[%s2361_s2 + $0xb0] ss:$12 sps:$4 sm:$0xff]  }
  0x23   :  { %1676 = vmatpush3.bf16.msra.mxu0 %v1822_v34  ;;  %449 = vmatprep.mubr.bf16.mxu0 %v1827_v38 }
  0x24   :  { %1004 = vmatmul.mubr.bf16.vlgmr.msra.gmra.mrb[0].mxu1 %v1823_v35  ;;  %1677 = vmatprep.subr.bf16.mxu0 %v1830_v40 }
  0x25   :  { %1708 = vmatpush3.bf16.msra.mxu1 %v1826_v37  ;;  %1011 = vmatprep.mubr.bf16.mxu1 %v1831_v41 }
  0x26   :  { %1709 = vmatprep.subr.bf16.mxu1 %v1834_v42 }
  0x27   :  { %1678 = vmatpush3.bf16.msra.mxu0 %v1830_v40 }
  0x28   :  { %1679 = vmatprep.subr.bf16.mxu0 %v1838_v45 }
  0x29   :  { %1710 = vmatpush3.bf16.msra.mxu1 %v1834_v42 }
  0x2a   :  { %450 = vmatmul.mubr.bf16.gmra.mrb[4].mxu0 %v1829_v39  ;;  %1711 = vmatprep.subr.bf16.mxu1 %v1842_v47 }
  0x2b   :  { %457 = vmatprep.mubr.bf16.mxu0 %v1835_v44  ;;  %1680 = vmatpush3.bf16.msra.mxu0 %v1838_v45 }
  0x2c   :  { %1012 = vmatmul.mubr.bf16.gmra.mrb[4].mxu1 %v1833_v43  ;;  %1681 = vmatprep.subr.bf16.mxu0 %v1846_v50 }
  0x2d   :  { %1019 = vmatprep.mubr.bf16.mxu1 %v1839_v46  ;;  %1712 = vmatpush3.bf16.msra.mxu1 %v1842_v47 }
  0x2e   :  { %1713 = vmatprep.subr.bf16.mxu1 %v1850_v52 }
  0x2f   :  { %1682 = vmatpush3.bf16.msra.mxu0 %v1846_v50 }
  0x30   :  { %1683 = vmatprep.subr.bf16.mxu0 %v1854_v54 }
  0x31   :  { %1714 = vmatpush3.bf16.msra.mxu1 %v1850_v52 }
  0x32   :  { %458 = vmatmul.mubr.bf16.gmra.mrb[8].mxu0 %v1837_v48  ;;  %1715 = vmatprep.subr.bf16.mxu1 %v1858_v56 }
  0x33   :  { %465 = vmatprep.mubr.bf16.mxu0 %v1843_v49  ;;  %1684 = vmatpush3.bf16.msra.mxu0 %v1854_v54 }
  0x34   :  { %1020 = vmatmul.mubr.bf16.gmra.mrb[8].mxu1 %v1841_v51  ;;  %1685 = vmatprep.subr.bf16.mxu0 %v1862_v58 }
  0x35   :  { %1027 = vmatprep.mubr.bf16.mxu1 %v1847_v53  ;;  %1716 = vmatpush3.bf16.msra.mxu1 %v1858_v56 }
  0x36   :  { %1717 = vmatprep.subr.bf16.mxu1 %v1866_v61 }
  0x37   :  { %1686 = vmatpush3.bf16.msra.mxu0 %v1862_v58 }
  0x38   :  { %1687 = vmatprep.subr.bf16.mxu0 %v1870_v62 }
  0x39   :  { %1718 = vmatpush3.bf16.msra.mxu1 %v1866_v61 }
  0x3a   :  { %466 = vmatmul.mubr.bf16.gmra.mrb[12].mxu0 %v1845_v55  ;;  %1719 = vmatprep.subr.bf16.mxu1 %v1874_v1 }
  0x3b   :  { %473 = vmatprep.mubr.bf16.mxu0 %v1851_v57  ;;  %1688 = vmatpush3.bf16.msra.mxu0 %v1870_v62 }
  0x3c   :  { %1028 = vmatmul.mubr.bf16.gmra.mrb[12].mxu1 %v1849_v59  ;;  %1689 = vmatprep.subr.bf16.mxu0 %v1878_v3 }
  0x3d   :  { %1035 = vmatprep.mubr.bf16.mxu1 %v1855_v60  ;;  %1720 = vmatpush3.bf16.msra.mxu1 %v1874_v1 }
  0x3e   :  { %1721 = vmatprep.subr.bf16.mxu1 %v1882_v5 }
  0x3f   :  { %1690 = vmatpush3.bf16.msra.mxu0 %v1878_v3 }
  0x41   :  { %1722 = vmatpush3.bf16.msra.mxu1 %v1882_v5 }
  0x42   :  { %474 = vmatmul.mubr.bf16.gmra.mrb[16].mxu0 %v1853_v63 }
  0x43   :  { %481 = vmatprep.mubr.bf16.mxu0 %v1859_v0 }
  0x44   :  { %1036 = vmatmul.mubr.bf16.gmra.mrb[16].mxu1 %v1857_v2 }
  0x45   :  { %1043 = vmatprep.mubr.bf16.mxu1 %v1863_v4 }
  0x4a   :  { %482 = vmatmul.mubr.bf16.gmra.mrb[20].mxu0 %v1861_v6 }
  0x4b   :  { %489 = vmatprep.mubr.bf16.mxu0 %v1867_v7 }
  0x4c   :  { %1044 = vmatmul.mubr.bf16.gmra.mrb[20].mxu1 %v1865_v8 }
  0x4d   :  { %1051 = vmatprep.mubr.bf16.mxu1 %v1871_v9 }
  0x52   :  { %490 = vmatmul.mubr.bf16.gmra.mrb[24].mxu0 %v1869_v10 }
  0x53   :  { %497 = vmatprep.mubr.bf16.mxu0 %v1875_v11 }
  0x54   :  { %1052 = vmatmul.mubr.bf16.gmra.mrb[24].mxu1 %v1873_v12 }
  0x55   :  { %1059 = vmatprep.mubr.bf16.mxu1 %v1879_v13 }
  0x5a   :  { %498 = vmatmul.mubr.bf16.gmra.mrb[28].mxu0 %v1877_v14 }
  0x5b   :  { %1691 = vmatprep.mubr.bf16.mxu0 %v1883_v15 }
  0x5c   :  { %1060 = vmatmul.mubr.bf16.gmra.mrb[28].mxu1 %v1881_v16 }
  0x5d   :  { %1723 = vmatprep.mubr.bf16.mxu1 %v1885_v17 }
  0x62   :  { %1692 = vmatmul.mubr.bf16.vlgmr.msra.gmra.mrb[32].mxu0 %v1884_v18 }
  0x63   :  { %1695 = vmatprep.mubr.bf16.mxu0 %v1887_v19 }
  0x64   :  { %1724 = vmatmul.mubr.bf16.vlgmr.msra.gmra.mrb[32].mxu1 %v1886_v20 }
  0x65   :  { %1727 = vmatprep.mubr.bf16.mxu1 %v1889_v21 }
  0x6a   :  { %1696 = vmatmul.mubr.bf16.gmra.mrb[36].mxu0 %v1888_v22 }
  0x6b   :  { %1699 = vmatprep.mubr.bf16.mxu0 %v1891_v23 }
  0x6c   :  { %1728 = vmatmul.mubr.bf16.gmra.mrb[36].mxu1 %v1890_v24 }
  0x6d   :  { %1731 = vmatprep.mubr.bf16.mxu1 %v1893_v25 }
  0x72   :  { %1700 = vmatmul.mubr.bf16.gmra.mrb[40].mxu0 %v1892_v26 }
  0x73   :  { %1703 = vmatprep.mubr.bf16.mxu0 %v1895_v27 }
  0x74   :  { %1732 = vmatmul.mubr.bf16.gmra.mrb[40].mxu1 %v1894_v28 }
  0x75   :  { %1735 = vmatprep.mubr.bf16.mxu1 %v1897_v29 }
  0x7a   :  { %1704 = vmatmul.mubr.bf16.gmra.mrb[44].mxu0 %v1896_v30 }
  0x7c   :  { %1736 = vmatmul.mubr.bf16.gmra.mrb[44].mxu1 %v1898_v31 }
  0xf5   :  { %v1531_v32 = vpop.f32.mrb[0].mxu0 }
  0xf6   :  { %v1532_v33 = vpop.f32.mrb[1].mxu0 }
  0xf7   :  { %v2217_v34 = vadd.f32 %v1532_v33, %v1531_v32  ;;  %v1534_v35 = vpop.f32.mrb[2].mxu0  ;;  %v1611_v36 = vpop.f32.mrb[0].mxu1 }
  0xf8   :  { %v1535_v37 = vpop.f32.mrb[3].mxu0  ;;  %v1612_v39 = vpop.f32.mrb[1].mxu1 }
  0xf9   :  { %v2219_v38 = vadd.f32 %v1535_v37, %v1534_v35  ;;  %v2221_v40 = vadd.f32 %v1612_v39, %v1611_v36  ;;  %v1614_v41 = vpop.f32.mrb[2].mxu1 }
  0xfa   :  { %v1615_v42 = vpop.f32.mrb[3].mxu1 }
  0xfb   :  { %v2223_v43 = vadd.f32 %v1615_v42, %v1614_v41 }
  0xfd   :  { %v1537_v44 = vpop.f32.mrb[4].mxu0 }
  0xfe   :  { %v1538_v45 = vpop.f32.mrb[5].mxu0 }
  0xff   :  { %v2225_v46 = vadd.f32 %v1538_v45, %v1537_v44  ;;  %v1540_v47 = vpop.f32.mrb[6].mxu0  ;;  %v1617_v48 = vpop.f32.mrb[4].mxu1 }
 0x100   :  { %v1541_v49 = vpop.f32.mrb[7].mxu0  ;;  %v1618_v51 = vpop.f32.mrb[5].mxu1 }
 0x101   :  { %v2227_v50 = vadd.f32 %v1541_v49, %v1540_v47  ;;  %v2229_v52 = vadd.f32 %v1618_v51, %v1617_v48  ;;  %v1620_v53 = vpop.f32.mrb[6].mxu1 }
 0x102   :  { %v1621_v54 = vpop.f32.mrb[7].mxu1 }
 0x103   :  { %v2231_v55 = vadd.f32 %v1621_v54, %v1620_v53 }
 0x105   :  { %v1543_v56 = vpop.f32.mrb[8].mxu0 }
 0x106   :  { %v1544_v57 = vpop.f32.mrb[9].mxu0 }
 0x107   :  { %v2233_v58 = vadd.f32 %v1544_v57, %v1543_v56  ;;  %v1546_v59 = vpop.f32.mrb[10].mxu0  ;;  %v1623_v60 = vpop.f32.mrb[8].mxu1 }
 0x108   :  { %v1547_v61 = vpop.f32.mrb[11].mxu0  ;;  %v1624_v63 = vpop.f32.mrb[9].mxu1 }
 0x109   :  { %v2235_v62 = vadd.f32 %v1547_v61, %v1546_v59  ;;  %v2237_v0 = vadd.f32 %v1624_v63, %v1623_v60  ;;  %v1626_v1 = vpop.f32.mrb[10].mxu1 }
 0x10a   :  { %v1627_v2 = vpop.f32.mrb[11].mxu1 }
 0x10b   :  { %v2239_v3 = vadd.f32 %v1627_v2, %v1626_v1 }
 0x10d   :  { %v1549_v4 = vpop.f32.mrb[12].mxu0 }
 0x10e   :  { %v1550_v5 = vpop.f32.mrb[13].mxu0 }
 0x10f   :  { %v2241_v6 = vadd.f32 %v1550_v5, %v1549_v4  ;;  %v1552_v7 = vpop.f32.mrb[14].mxu0  ;;  %v1629_v8 = vpop.f32.mrb[12].mxu1 }
 0x110   :  { %v1553_v9 = vpop.f32.mrb[15].mxu0  ;;  %v1630_v11 = vpop.f32.mrb[13].mxu1 }
 0x111   :  { %v2243_v10 = vadd.f32 %v1553_v9, %v1552_v7  ;;  %v2245_v12 = vadd.f32 %v1630_v11, %v1629_v8  ;;  %v1632_v13 = vpop.f32.mrb[14].mxu1 }
 0x112   :  { %v1633_v14 = vpop.f32.mrb[15].mxu1 }
 0x113   :  { %v2247_v15 = vadd.f32 %v1633_v14, %v1632_v13 }
 0x115   :  { %v1555_v16 = vpop.f32.mrb[16].mxu0 }
 0x116   :  { %v1556_v17 = vpop.f32.mrb[17].mxu0 }
 0x117   :  { %v2249_v18 = vadd.f32 %v1556_v17, %v1555_v16  ;;  %v1558_v19 = vpop.f32.mrb[18].mxu0  ;;  %v1635_v20 = vpop.f32.mrb[16].mxu1 }
 0x118   :  { %v1559_v21 = vpop.f32.mrb[19].mxu0  ;;  %v1636_v23 = vpop.f32.mrb[17].mxu1 }
 0x119   :  { %v2251_v22 = vadd.f32 %v1559_v21, %v1558_v19  ;;  %v2253_v24 = vadd.f32 %v1636_v23, %v1635_v20  ;;  %v1638_v25 = vpop.f32.mrb[18].mxu1 }
 0x11a   :  { %v1639_v26 = vpop.f32.mrb[19].mxu1 }
 0x11b   :  { %v2255_v27 = vadd.f32 %v1639_v26, %v1638_v25 }
 0x11d   :  { %v1561_v28 = vpop.f32.mrb[20].mxu0 }
 0x11e   :  { %v1562_v29 = vpop.f32.mrb[21].mxu0 }
 0x11f   :  { %v2257_v30 = vadd.f32 %v1562_v29, %v1561_v28  ;;  %v1564_v31 = vpop.f32.mrb[22].mxu0  ;;  %v1641_v32 = vpop.f32.mrb[20].mxu1  ;;  %v2288_v29 = vld [vmem:[%s2362_s4] ss:$0 sm:$0xff] }
 0x120   :  { %v1565_v33 = vpop.f32.mrb[23].mxu0  ;;  %v1642_v36 = vpop.f32.mrb[21].mxu1 }
 0x121   :  { %v2259_v35 = vadd.f32 %v1565_v33, %v1564_v31  ;;  %v2261_v37 = vadd.f32 %v1642_v36, %v1641_v32  ;;  %v1644_v39 = vpop.f32.mrb[22].mxu1 }
 0x122   :  { %v1645_v41 = vpop.f32.mrb[23].mxu1 }
 0x123   :  { %v2263_v42 = vadd.f32 %v1645_v41, %v1644_v39 }
 0x125   :  { %v1567_v44 = vpop.f32.mrb[24].mxu0 }
 0x126   :  { %v1568_v45 = vpop.f32.mrb[25].mxu0 }
 0x127   :  { %v2265_v47 = vadd.f32 %v1568_v45, %v1567_v44  ;;  %v1570_v48 = vpop.f32.mrb[26].mxu0  ;;  %v1647_v49 = vpop.f32.mrb[24].mxu1 }
 0x128   :  { %v1571_v51 = vpop.f32.mrb[27].mxu0  ;;  %v1648_v54 = vpop.f32.mrb[25].mxu1 }
 0x129   :  { %v2267_v53 = vadd.f32 %v1571_v51, %v1570_v48  ;;  %v2269_v56 = vadd.f32 %v1648_v54, %v1647_v49  ;;  %v1650_v57 = vpop.f32.mrb[26].mxu1 }
 0x12a   :  { %v1651_v59 = vpop.f32.mrb[27].mxu1 }
 0x12b   :  { %v2271_v60 = vadd.f32 %v1651_v59, %v1650_v57 }
 0x12d   :  { %v1573_v61 = vpop.f32.mrb[28].mxu0 }
 0x12e   :  { %v1574_v63 = vpop.f32.mrb[29].mxu0 }
 0x12f   :  { %v2273_v1 = vadd.f32 %v1574_v63, %v1573_v61  ;;  %v1576_v2 = vpop.f32.mrb[30].mxu0  ;;  %v1653_v4 = vpop.f32.mrb[28].mxu1 }
 0x130   :  { %v1577_v5 = vpop.f32.mrb[31].mxu0  ;;  %v1654_v8 = vpop.f32.mrb[29].mxu1 }
 0x131   :  { %v2275_v7 = vadd.f32 %v1577_v5, %v1576_v2  ;;  %v2277_v9 = vadd.f32 %v1654_v8, %v1653_v4  ;;  %v1656_v11 = vpop.f32.mrb[30].mxu1 }
 0x132   :  { %v1657_v13 = vpop.f32.mrb[31].mxu1 }
 0x133   :  { %v2279_v14 = vadd.f32 %v1657_v13, %v1656_v11 }
 0x135   :  { %v1693_v16 = vpop.f32.mrb[32].mxu0 }
 0x136   :  { %v549_v17 = vadd.f32 %v1693_v16, %v2225_v46  ;;  %v540_v19 = vpop.f32.mrb[33].mxu0 }
 0x137   :  { %v541_v20 = vadd.f32 %v2217_v34, %v540_v19  ;;  %v1694_v21 = vpop.f32.mrb[34].mxu0  ;;  %v1725_v25 = vpop.f32.mrb[32].mxu1 }
 0x138   :  { %v552_v23 = vadd.f32 %v1694_v21, %v2227_v50  ;;  %v1740_v26 = vadd.f32 %v2229_v52, %v549_v17  ;;  %v543_v28 = vpop.f32.mrb[35].mxu0  ;;  %v1102_v32 = vpop.f32.mrb[33].mxu1 }
 0x139   :  { %v544_v31 = vadd.f32 %v2219_v38, %v543_v28  ;;  %v1743_v46 = vadd.f32 %v2221_v40, %v541_v20  ;;  %v1726_v36 = vpop.f32.mrb[34].mxu1 }
 0x13a   :  { %v1741_v33 = vadd.f32 %v1740_v26, %v1725_v25  ;;  %v1746_v34 = vadd.f32 %v2231_v55, %v552_v23  ;;  %v1105_v50 = vpop.f32.mrb[35].mxu1 }
 0x13b   :  { %v1744_v39 = vadd.f32 %v1743_v46, %v1102_v32  ;;  %v1749_v41 = vadd.f32 %v2223_v43, %v544_v31 }
 0x13c   :  { %v1225_v52 = vadd.f32 %v1741_v33, %v2288_v29  ;;  %v1747_v44 = vadd.f32 %v1746_v34, %v1726_v36 }
 0x13d   :  { %v1223_v45 = vadd.f32 %v1744_v39, %v2288_v29  ;;  %v1750_v48 = vadd.f32 %v1749_v41, %v1105_v50  ;;  %v1697_v49 = vpop.f32.mrb[36].mxu0 }
 0x13e   :  { %v1226_v38 = vadd.f32 %v1747_v44, %v2288_v29  ;;  %v565_v51 = vadd.f32 %v1697_v49, %v2241_v6  ;;  %v556_v40 = vpop.f32.mrb[37].mxu0  ;;  %v1241_v59 = vmax.f32 %v1225_v52, 0.0 }
 0x13f   :  { %v1224_v54 = vadd.f32 %v1750_v48, %v2288_v29  ;;  %v557_v55 = vadd.f32 %v2233_v58, %v556_v40  ;;  %v1698_v57 = vpop.f32.mrb[38].mxu0  ;;  %v1729_v63 = vpop.f32.mrb[36].mxu1  ;;  %v1239_v5 = vmax.f32 %v1223_v45, 0.0 }
 0x140   :  { %v1242_v61 = vmax.f32 %v1226_v38, 0.0  ;;  %v568_v43 = vadd.f32 %v1698_v57, %v2243_v10  ;;  %v1752_v2 = vadd.f32 %v2245_v12, %v565_v51  ;;  %v559_v4 = vpop.f32.mrb[39].mxu0  ;;  %v1118_v13 = vpop.f32.mrb[37].mxu1 }
 0x141   :  { %v1240_v8 = vmax.f32 %v1224_v54, 0.0  ;;  %v560_v11 = vadd.f32 %v2235_v62, %v559_v4  ;;  %v1755_v6 = vadd.f32 %v2237_v0, %v557_v55  ;;  %v1730_v19 = vpop.f32.mrb[38].mxu1 }
 0x142   :  { %v1476_v16 = vpack.c.bf16 %v1242_v61, %v1241_v59  ;;  %v1753_v17 = vadd.f32 %v1752_v2, %v1729_v63  ;;  %v1758_v58 = vadd.f32 %v2247_v15, %v568_v43  ;;  %v1121_v23 = vpop.f32.mrb[39].mxu1 }
 0x143   :  { %v1471_v20 = vpack.c.bf16 %v1240_v8, %v1239_v5  ;;  %v1756_v21 = vadd.f32 %v1755_v6, %v1118_v13  ;;  %v1761_v10 = vadd.f32 %v2239_v3, %v560_v11 }
 0x144   :  { %1508 = vst [vmem:[%s2363_s5 + $0x8] sm:$0xff] %v1476_v16   ;;  %v1229_v12 = vadd.f32 %v1753_v17, %v2288_v29  ;;  %v1759_v62 = vadd.f32 %v1758_v58, %v1730_v19 }
 0x145   :  { %1472 = vst [vmem:[%s2363_s5] sm:$0xff] %v1471_v20   ;;  %v1227_v0 = vadd.f32 %v1756_v21, %v2288_v29  ;;  %v1762_v25 = vadd.f32 %v1761_v10, %v1121_v23  ;;  %v1701_v15 = vpop.f32.mrb[40].mxu0 }
 0x146   :  { %v1230_v26 = vadd.f32 %v1759_v62, %v2288_v29  ;;  %v581_v28 = vadd.f32 %v1701_v15, %v2257_v30  ;;  %v572_v3 = vpop.f32.mrb[41].mxu0  ;;  %v1245_v33 = vmax.f32 %v1229_v12, 0.0 }
 0x147   :  { %v1228_v31 = vadd.f32 %v1762_v25, %v2288_v29  ;;  %v573_v32 = vadd.f32 %v2249_v18, %v572_v3  ;;  %v1702_v46 = vpop.f32.mrb[42].mxu0  ;;  %v1733_v39 = vpop.f32.mrb[40].mxu1  ;;  %v1243_v52 = vmax.f32 %v1227_v0, 0.0 }
 0x148   :  { %v1246_v36 = vmax.f32 %v1230_v26, 0.0  ;;  %v584_v34 = vadd.f32 %v1702_v46, %v2259_v35  ;;  %v1764_v50 = vadd.f32 %v2261_v37, %v581_v28  ;;  %v575_v41 = vpop.f32.mrb[43].mxu0  ;;  %v1134_v48 = vpop.f32.mrb[41].mxu1 }
 0x149   :  { %v1244_v44 = vmax.f32 %v1228_v31, 0.0  ;;  %v576_v45 = vadd.f32 %v2251_v22, %v575_v41  ;;  %v1767_v30 = vadd.f32 %v2253_v24, %v573_v32  ;;  %v1734_v51 = vpop.f32.mrb[42].mxu1 }
 0x14a   :  { %v1486_v49 = vpack.c.bf16 %v1246_v36, %v1245_v33  ;;  %v1765_v38 = vadd.f32 %v1764_v50, %v1733_v39  ;;  %v1770_v18 = vadd.f32 %v2263_v42, %v584_v34  ;;  %v1137_v55 = vpop.f32.mrb[43].mxu1 }
 0x14b   :  { %v1481_v40 = vpack.c.bf16 %v1244_v44, %v1243_v52  ;;  %v1768_v54 = vadd.f32 %v1767_v30, %v1134_v48  ;;  %v1773_v35 = vadd.f32 %v2255_v27, %v576_v45 }
 0x14c   :  { %1510 = vst [vmem:[%s2363_s5 + $0x18] sm:$0xff] %v1486_v49   ;;  %v1233_v37 = vadd.f32 %v1765_v38, %v2288_v29  ;;  %v1771_v22 = vadd.f32 %v1770_v18, %v1734_v51 }
 0x14d   :  { %1509 = vst [vmem:[%s2363_s5 + $0x10] sm:$0xff] %v1481_v40   ;;  %v1231_v24 = vadd.f32 %v1768_v54, %v2288_v29  ;;  %v1774_v57 = vadd.f32 %v1773_v35, %v1137_v55  ;;  %v1705_v42 = vpop.f32.mrb[44].mxu0 }
 0x14e   :  { %v1234_v59 = vadd.f32 %v1771_v22, %v2288_v29  ;;  %v597_v61 = vadd.f32 %v1705_v42, %v2273_v1  ;;  %v588_v27 = vpop.f32.mrb[45].mxu0  ;;  %v1249_v4 = vmax.f32 %v1233_v37, 0.0 }
 0x14f   :  { %v1232_v43 = vadd.f32 %v1774_v57, %v2288_v29  ;;  %v589_v63 = vadd.f32 %v2265_v47, %v588_v27  ;;  %v1706_v2 = vpop.f32.mrb[46].mxu0  ;;  %v1737_v11 = vpop.f32.mrb[44].mxu1  ;;  %v1247_v16 = vmax.f32 %v1231_v24, 0.0 }
 0x150   :  { %v1250_v5 = vmax.f32 %v1234_v59, 0.0  ;;  %v600_v8 = vadd.f32 %v1706_v2, %v2275_v7  ;;  %v1776_v13 = vadd.f32 %v2277_v9, %v597_v61  ;;  %v591_v6 = vpop.f32.mrb[47].mxu0  ;;  %v1150_v58 = vpop.f32.mrb[45].mxu1 }
 0x151   :  { %v1248_v17 = vmax.f32 %v1232_v43, 0.0  ;;  %v592_v19 = vadd.f32 %v2267_v53, %v591_v6  ;;  %v1779_v1 = vadd.f32 %v2269_v56, %v589_v63  ;;  %v1738_v23 = vpop.f32.mrb[46].mxu1 }
 0x152   :  { %v1496_v20 = vpack.c.bf16 %v1250_v5, %v1249_v4  ;;  %v1777_v21 = vadd.f32 %v1776_v13, %v1737_v11  ;;  %v1782_v47 = vadd.f32 %v2279_v14, %v600_v8  ;;  %v1153_v62 = vpop.f32.mrb[47].mxu1 }
 0x153   :  { %v1491_v10 = vpack.c.bf16 %v1248_v17, %v1247_v16  ;;  %v1780_v12 = vadd.f32 %v1779_v1, %v1150_v58  ;;  %v1785_v7 = vadd.f32 %v2271_v60, %v592_v19 }
 0x154   :  { %1512 = vst [vmem:[%s2363_s5 + $0x28] sm:$0xff] %v1496_v20   ;;  %v1237_v9 = vadd.f32 %v1777_v21, %v2288_v29  ;;  %v1783_v53 = vadd.f32 %v1782_v47, %v1738_v23 }
 0x155   :  { %1511 = vst [vmem:[%s2363_s5 + $0x20] sm:$0xff] %v1491_v10   ;;  %v1235_v56 = vadd.f32 %v1780_v12, %v2288_v29  ;;  %v1786_v0 = vadd.f32 %v1785_v7, %v1153_v62 }
 0x156   :  { %v1238_v14 = vadd.f32 %v1783_v53, %v2288_v29  ;;  %v1253_v15 = vmax.f32 %v1237_v9, 0.0 }
 0x157   :  { %v1236_v25 = vadd.f32 %v1786_v0, %v2288_v29  ;;  %v1251_v26 = vmax.f32 %v1235_v56, 0.0 }
 0x158   :  { %v1254_v60 = vmax.f32 %v1238_v14, 0.0 }
 0x159   :  { %v1252_v28 = vmax.f32 %v1236_v25, 0.0 }
 0x15a   :  { %v1506_v3 = vpack.c.bf16 %v1254_v60, %v1253_v15 }
 0x15b   :  { %v1501_v31 = vpack.c.bf16 %v1252_v28, %v1251_v26 }
 0x15c   :  { %1514 = vst [vmem:[%s2363_s5 + $0x38] sm:$0xff] %v1506_v3  }
 0x15d   :  { %1513 = vst [vmem:[%s2363_s5 + $0x30] sm:$0xff] %v1501_v31  }

// kernel: generator_for_video_forward.24
= control target key start
LH: loop header
LB: loop body
LE: loop exit
PB: predicated region body
PF: predicated region fallthrough
CT: control target
= control target key end

     0   :  { %s2216_s12 = smov 0   ;;  %s2218_s13 = smov 0   ;;  %s2460_s0 = inlined_call_operand.vmem [shape: bf16[512,384], index: 0, kind: input, shape index: {}]   ;;  %s2461_s1 = inlined_call_operand.vmem [shape: bf16[384,128], index: 1, kind: input, shape index: {}]   ;;  %s2462_s2 = inlined_call_operand.vmem [shape: f32[1,128], index: 2, kind: input, shape index: {}]   ;;  %s2463_s3 = inlined_call_operand.vmem [shape: bf16[512,128], index: 3, kind: output, shape index: {}]  }
   0x1   :  { %s2220_s14 = smov 0  }
   0x2 LB: > { %s32_s15 = sadd.s32 1, %s2190_s13  ;;  %p1620_p0 = scmp.ge.s32.totalorder %s2194_s14, 1  ;;  %s2194_s14 = sphi %s2220_s14, %s13_s14   ;;  %s2190_s13 = sphi %s2218_s13, %s2465_s13   ;;  %s2186_s12 = sphi %s2216_s12, %s2464_s12  }
   0x3   : > { %p34_p1 = scmp.ge.s32.totalorder %s32_s15, 2  ;;  %p191_p2 = scmp.lt.s32.totalorder %s2194_s14, 3 }
   0x5   : > { %s2467_s15 = smov (%p34_p1, %s32_s15), 0  ;;  %p192_p3 = pnand %p1620_p0, %p191_p2 }
   0x6   : > { %v2084_v0 = vld [vmem:[%s2461_s1 + $0x40] sm:$0xff] (!%p192_p3)   ;;  %s1621_s18 = sshll.u32 (!%p192_p3), %s2186_s12, 5  ;;  %v2086_v2 = vld [vmem:[%s2461_s1 + $0x48] sm:$0xff] (!%p192_p3)   ;;  %v2088_v4 = vld [vmem:[%s2461_s1 + $0x50] sm:$0xff] (!%p192_p3)  }
   0x7   : > { %195 = sbr.rel (%p192_p3) target bundleno = 353 (0x161), region = 32  ;;  %v2085_v1 = vld [vmem:[%s2461_s1] sm:$0xff] (!%p192_p3)   ;;  %1859 = vmatprep.subr.bf16.mxu0 (!%p192_p3), %v2084_v0  ;;  %2043 = vmatprep.subr.bf16.mxu1 (!%p192_p3), %v2084_v0  ;;  %p236_p4 = scmp.lt.s32.totalorder (!%p192_p3), %s1621_s18, 63  ;;  %v2087_v3 = vld [vmem:[%s2461_s1 + $0x8] sm:$0xff] (!%p192_p3)   ;;  %v2089_v5 = vld [vmem:[%s2461_s1 + $0x10] sm:$0xff] (!%p192_p3)  }
   0x8   : > { %1860 = vmatpush3.bf16.msra.mxu0 (!%p192_p3), %v2085_v1  ;;  %2051 = vmatpush3.bf16.msra.mxu1 (!%p192_p3), %v2085_v1  ;;  %v2090_v6 = vld [vmem:[%s2461_s1 + $0x58] sm:$0xff] (!%p192_p3)   ;;  %v2092_v8 = vld [vmem:[%s2461_s1 + $0x60] sm:$0xff] (!%p192_p3)   ;;  %v2094_v10 = vld [vmem:[%s2461_s1 + $0x68] sm:$0xff] (!%p192_p3)  }
   0x9   : > { %1861 = vmatprep.subr.bf16.mxu0 (!%p192_p3), %v2086_v2  ;;  %2044 = vmatprep.subr.bf16.mxu1 (!%p192_p3), %v2086_v2  ;;  %v2091_v7 = vld [vmem:[%s2461_s1 + $0x18] sm:$0xff] (!%p192_p3)   ;;  %v2093_v9 = vld [vmem:[%s2461_s1 + $0x20] sm:$0xff] (!%p192_p3)   ;;  %v2095_v13 = vld [vmem:[%s2461_s1 + $0x28] sm:$0xff] (!%p192_p3)  }
   0xa   : > { %v2096_v14 = vld [vmem:[%s2461_s1 + $0x70] sm:$0xff] (!%p192_p3)   ;;  %v2098_v16 = vld [vmem:[%s2461_s1 + $0x78] sm:$0xff] (!%p192_p3)   ;;  %v2106_v18 = vld [vmem:[%s2461_s1 + $0x80] sm:$0xff] (!%p192_p3)  }
   0xb   : > { %v2097_v15 = vld [vmem:[%s2461_s1 + $0x30] sm:$0xff] (!%p192_p3)   ;;  %v2099_v17 = vld [vmem:[%s2461_s1 + $0x38] sm:$0xff] (!%p192_p3)   ;;  %v2107_v22 = vld [vmem:[%s2461_s1 + $0x88] sm:$0xff] (!%p192_p3)  }
   0xc   : > { %1862 = vmatpush3.bf16.msra.mxu0 (!%p192_p3), %v2087_v3  ;;  %2052 = vmatpush3.bf16.msra.mxu1 (!%p192_p3), %v2087_v3  ;;  %v2114_v25 = vld [vmem:[%s2461_s1 + $0x90] sm:$0xff] (!%p192_p3)   ;;  %v2115_v27 = vld [vmem:[%s2461_s1 + $0x98] sm:$0xff] (!%p192_p3)   ;;  %v2122_v30 = vld [vmem:[%s2461_s1 + $0xa0] sm:$0xff] (!%p192_p3)  }
   0xd   : > { %1863 = vmatprep.subr.bf16.mxu0 (!%p192_p3), %v2088_v4  ;;  %2045 = vmatprep.subr.bf16.mxu1 (!%p192_p3), %v2088_v4  ;;  %v2123_v33 = vld [vmem:[%s2461_s1 + $0xa8] sm:$0xff] (!%p192_p3)   ;;  %v2130_v36 = vld [vmem:[%s2461_s1 + $0xb0] sm:$0xff] (!%p192_p3)   ;;  %v2131_v40 = vld [vmem:[%s2461_s1 + $0xb8] sm:$0xff] (!%p192_p3)  }
   0xe   : > { %s2469_s18 = smov (!%p236_p4, %s1621_s18), 63 }
   0xf   : > { %s2059_s4 = smul.u32 12, %s2469_s18  ;;  %s1624_s25 = sshll.u32 %s2469_s18, 2 }
  0x10   : > { %1864 = vmatpush3.bf16.msra.mxu0 %v2089_v5  ;;  %2053 = vmatpush3.bf16.msra.mxu1 %v2089_v5  ;;  %s2391_s28 = scalar_lea.vmem %s2463_s3, %s1624_s25 }
  0x11   : > { %1865 = vmatprep.subr.bf16.mxu0 %v2090_v6  ;;  %2046 = vmatprep.subr.bf16.mxu1 %v2090_v6  ;;  %s2267_s11 = scalar_lea.vmem %s2460_s0, %s2059_s4 }
  0x12   : > { %v2102_v11 = vld [vmem:[%s2267_s11 + $0x4] ss:$12 sps:$4 sm:$0xff]   ;;  %v2100_v19 = vld [vmem:[%s2267_s11] ss:$12 sps:$4 sm:$0xff]   ;;  %v2108_v21 = vld [vmem:[%s2267_s11 + $0x1c] ss:$12 sps:$4 sm:$0xff]  }
  0x13   : > { %v2105_v12 = vld [vmem:[%s2267_s11 + $0x124] ss:$12 sps:$4 sm:$0xff]   ;;  %880 = vmatprep.mubr.bf16.mxu0 %v2102_v11  ;;  %v2103_v20 = vld [vmem:[%s2267_s11 + $0x120] ss:$12 sps:$4 sm:$0xff]   ;;  %v2110_v23 = vld [vmem:[%s2267_s11 + $0x13c] ss:$12 sps:$4 sm:$0xff]  }
  0x14   : > { %1866 = vmatpush3.bf16.msra.mxu0 %v2091_v7  ;;  %2054 = vmatpush3.bf16.msra.mxu1 %v2091_v7  ;;  %v2112_v24 = vld [vmem:[%s2267_s11 + $0x18] ss:$12 sps:$4 sm:$0xff]   ;;  %v2116_v28 = vld [vmem:[%s2267_s11 + $0x34] ss:$12 sps:$4 sm:$0xff]   ;;  %v2120_v31 = vld [vmem:[%s2267_s11 + $0x30] ss:$12 sps:$4 sm:$0xff]  }
  0x15   : > { %1867 = vmatprep.subr.bf16.mxu0 %v2092_v8  ;;  %2047 = vmatprep.subr.bf16.mxu1 %v2092_v8  ;;  %v2113_v26 = vld [vmem:[%s2267_s11 + $0x138] ss:$12 sps:$4 sm:$0xff]   ;;  %v2118_v29 = vld [vmem:[%s2267_s11 + $0x154] ss:$12 sps:$4 sm:$0xff]   ;;  %v2121_v32 = vld [vmem:[%s2267_s11 + $0x150] ss:$12 sps:$4 sm:$0xff]  }
  0x16   : > { %976 = vmatprep.mubr.bf16.mxu1 %v2105_v12  ;;  %v2124_v34 = vld [vmem:[%s2267_s11 + $0x4c] ss:$12 sps:$4 sm:$0xff]   ;;  %v2128_v37 = vld [vmem:[%s2267_s11 + $0x48] ss:$12 sps:$4 sm:$0xff]   ;;  %v2132_v39 = vld [vmem:[%s2267_s11 + $0x64] ss:$12 sps:$4 sm:$0xff]  }
  0x17   : > { %v2126_v35 = vld [vmem:[%s2267_s11 + $0x16c] ss:$12 sps:$4 sm:$0xff]   ;;  %v2129_v38 = vld [vmem:[%s2267_s11 + $0x168] ss:$12 sps:$4 sm:$0xff]   ;;  %v2141_v47 = vld [vmem:[%s2267_s11 + $0x50] ss:$12 sps:$4 sm:$0xff]  }
  0x18   : > { %1868 = vmatpush3.bf16.msra.mxu0 %v2093_v9  ;;  %2055 = vmatpush3.bf16.msra.mxu1 %v2093_v9  ;;  %v2134_v41 = vld [vmem:[%s2267_s11 + $0x8] ss:$12 sps:$4 sm:$0xff]   ;;  %v2135_v42 = vld [vmem:[%s2267_s11 + $0x60] ss:$12 sps:$4 sm:$0xff]   ;;  %v2139_v45 = vld [vmem:[%s2267_s11 + $0x38] ss:$12 sps:$4 sm:$0xff]  }
  0x19   : > { %1869 = vmatprep.subr.bf16.mxu0 %v2094_v10  ;;  %2048 = vmatprep.subr.bf16.mxu1 %v2094_v10  ;;  %v2136_v43 = vld [vmem:[%s2267_s11 + $0x20] ss:$12 sps:$4 sm:$0xff]   ;;  %v2137_v44 = vld [vmem:[%s2267_s11 + $0x7c] ss:$12 sps:$4 sm:$0xff]   ;;  %v2140_v46 = vld [vmem:[%s2267_s11 + $0x78] ss:$12 sps:$4 sm:$0xff]  }
  0x1a   : > { %v2142_v48 = vld [vmem:[%s2267_s11 + $0x94] ss:$12 sps:$4 sm:$0xff]   ;;  %v2145_v50 = vld [vmem:[%s2267_s11 + $0x90] ss:$12 sps:$4 sm:$0xff]   ;;  %v2147_v52 = vld [vmem:[%s2267_s11 + $0xac] ss:$12 sps:$4 sm:$0xff]  }
  0x1b   : > { %v2144_v49 = vld [vmem:[%s2267_s11 + $0x68] ss:$12 sps:$4 sm:$0xff]   ;;  %v2146_v51 = vld [vmem:[%s2267_s11 + $0x80] ss:$12 sps:$4 sm:$0xff]   ;;  %v2149_v53 = vld [vmem:[%s2267_s11 + $0x98] ss:$12 sps:$4 sm:$0xff]  }
  0x1c   : > { %1870 = vmatpush3.bf16.msra.mxu0 %v2095_v13  ;;  %2056 = vmatpush3.bf16.msra.mxu1 %v2095_v13  ;;  %v2150_v54 = vld [vmem:[%s2267_s11 + $0xa8] ss:$12 sps:$4 sm:$0xff]   ;;  %v2151_v55 = vld [vmem:[%s2267_s11 + $0xb0] ss:$12 sps:$4 sm:$0xff]   ;;  %v2155_v58 = vld [vmem:[%s2267_s11 + $0xc0] ss:$12 sps:$4 sm:$0xff]  }
  0x1d   : > { %1871 = vmatprep.subr.bf16.mxu0 %v2096_v14  ;;  %2049 = vmatprep.subr.bf16.mxu1 %v2096_v14  ;;  %v2152_v56 = vld [vmem:[%s2267_s11 + $0xc4] ss:$12 sps:$4 sm:$0xff]   ;;  %v2154_v57 = vld [vmem:[%s2267_s11 + $0xc8] ss:$12 sps:$4 sm:$0xff]   ;;  %v2156_v59 = vld [vmem:[%s2267_s11 + $0xe0] ss:$12 sps:$4 sm:$0xff]  }
  0x1e   : > { %v2157_v60 = vld [vmem:[%s2267_s11 + $0xdc] ss:$12 sps:$4 sm:$0xff]   ;;  %v2159_v61 = vld [vmem:[%s2267_s11 + $0xf8] ss:$12 sps:$4 sm:$0xff]   ;;  %v2162_v0 = vld [vmem:[%s2267_s11 + $0xf4] ss:$12 sps:$4 sm:$0xff]  }
  0x1f   : > { %v2160_v62 = vld [vmem:[%s2267_s11 + $0xd8] ss:$12 sps:$4 sm:$0xff]   ;;  %v2161_v63 = vld [vmem:[%s2267_s11 + $0x110] ss:$12 sps:$4 sm:$0xff]   ;;  %v2164_v1 = vld [vmem:[%s2267_s11 + $0x128] ss:$12 sps:$4 sm:$0xff]  }
  0x20   : > { %1872 = vmatpush3.bf16.msra.mxu0 %v2097_v15  ;;  %2057 = vmatpush3.bf16.msra.mxu1 %v2097_v15  ;;  %v2165_v2 = vld [vmem:[%s2267_s11 + $0xf0] ss:$12 sps:$4 sm:$0xff]   ;;  %v2166_v3 = vld [vmem:[%s2267_s11 + $0x140] ss:$12 sps:$4 sm:$0xff]   ;;  %v2169_v5 = vld [vmem:[%s2267_s11 + $0x158] ss:$12 sps:$4 sm:$0xff]  }
  0x21   : > { %1873 = vmatprep.subr.bf16.mxu0 %v2098_v16  ;;  %2050 = vmatprep.subr.bf16.mxu1 %v2098_v16  ;;  %v2167_v4 = vld [vmem:[%s2267_s11 + $0x10c] ss:$12 sps:$4 sm:$0xff]   ;;  %v2170_v6 = vld [vmem:[%s2267_s11 + $0x108] ss:$12 sps:$4 sm:$0xff]   ;;  %v2171_v7 = vld [vmem:[%s2267_s11 + $0x170] ss:$12 sps:$4 sm:$0xff]  }
  0x24   : > { %1874 = vmatpush3.bf16.msra.mxu0 %v2099_v17  ;;  %2058 = vmatpush3.bf16.msra.mxu1 %v2099_v17 }
  0x25   : > { %1995 = vmatprep.subr.bf16.mxu1 %v2106_v18 }
  0x27   : > { %881 = vmatmul.mubr.bf16.vlgmr.msra.gmra.mrb[0].mxu0 %v2100_v19  ;;  %977 = vmatmul.mubr.bf16.vlgmr.msra.gmra.mrb[0].mxu1 %v2103_v20 }
  0x28   : > { %1996 = vmatpush3.bf16.msra.mxu1 %v2106_v18  ;;  %888 = vmatprep.mubr.bf16.mxu0 %v2108_v21 }
  0x29   : > { %1997 = vmatprep.subr.bf16.mxu1 %v2107_v22  ;;  %984 = vmatprep.mubr.bf16.mxu1 %v2110_v23 }
  0x2c   : > { %1998 = vmatpush3.bf16.msra.mxu1 %v2107_v22 }
  0x2d   : > { %1999 = vmatprep.subr.bf16.mxu1 %v2114_v25 }
  0x2f   : > { %889 = vmatmul.mubr.bf16.gmra.mrb[4].mxu0 %v2112_v24  ;;  %985 = vmatmul.mubr.bf16.gmra.mrb[4].mxu1 %v2113_v26 }
  0x30   : > { %2000 = vmatpush3.bf16.msra.mxu1 %v2114_v25  ;;  %896 = vmatprep.mubr.bf16.mxu0 %v2116_v28 }
  0x31   : > { %2001 = vmatprep.subr.bf16.mxu1 %v2115_v27  ;;  %992 = vmatprep.mubr.bf16.mxu1 %v2118_v29 }
  0x34   : > { %2002 = vmatpush3.bf16.msra.mxu1 %v2115_v27 }
  0x35   : > { %2003 = vmatprep.subr.bf16.mxu1 %v2122_v30 }
  0x37   : > { %897 = vmatmul.mubr.bf16.gmra.mrb[8].mxu0 %v2120_v31  ;;  %993 = vmatmul.mubr.bf16.gmra.mrb[8].mxu1 %v2121_v32 }
  0x38   : > { %2004 = vmatpush3.bf16.msra.mxu1 %v2122_v30  ;;  %904 = vmatprep.mubr.bf16.mxu0 %v2124_v34 }
  0x39   : > { %2005 = vmatprep.subr.bf16.mxu1 %v2123_v33  ;;  %1000 = vmatprep.mubr.bf16.mxu1 %v2126_v35 }
  0x3c   : > { %2006 = vmatpush3.bf16.msra.mxu1 %v2123_v33 }
  0x3d   : > { %2007 = vmatprep.subr.bf16.mxu1 %v2130_v36 }
  0x3f   : > { %905 = vmatmul.mubr.bf16.gmra.mrb[12].mxu0 %v2128_v37  ;;  %1001 = vmatmul.mubr.bf16.gmra.mrb[12].mxu1 %v2129_v38 }
  0x40   : > { %2008 = vmatpush3.bf16.msra.mxu1 %v2130_v36  ;;  %912 = vmatprep.mubr.bf16.mxu0 %v2132_v39 }
  0x41   : > { %2009 = vmatprep.subr.bf16.mxu1 %v2131_v40  ;;  %2011 = vmatprep.mubr.bf16.mxu1 %v2134_v41 }
  0x44   : > { %2010 = vmatpush3.bf16.msra.mxu1 %v2131_v40 }
  0x47   : > { %913 = vmatmul.mubr.bf16.gmra.mrb[16].mxu0 %v2135_v42  ;;  %2012 = vmatmul.mubr.bf16.vlgmr.msra.gmra.mrb[16].mxu1 %v2136_v43 }
  0x48   : > { %920 = vmatprep.mubr.bf16.mxu0 %v2137_v44  ;;  %2015 = vmatprep.mubr.bf16.mxu1 %v2139_v45 }
  0x4f   : > { %921 = vmatmul.mubr.bf16.gmra.mrb[20].mxu0 %v2140_v46  ;;  %2016 = vmatmul.mubr.bf16.gmra.mrb[20].mxu1 %v2141_v47 }
  0x50   : > { %928 = vmatprep.mubr.bf16.mxu0 %v2142_v48  ;;  %2019 = vmatprep.mubr.bf16.mxu1 %v2144_v49 }
  0x57   : > { %929 = vmatmul.mubr.bf16.gmra.mrb[24].mxu0 %v2145_v50  ;;  %2020 = vmatmul.mubr.bf16.gmra.mrb[24].mxu1 %v2146_v51 }
  0x58   : > { %936 = vmatprep.mubr.bf16.mxu0 %v2147_v52  ;;  %2023 = vmatprep.mubr.bf16.mxu1 %v2149_v53 }
  0x5f   : > { %937 = vmatmul.mubr.bf16.gmra.mrb[28].mxu0 %v2150_v54  ;;  %2024 = vmatmul.mubr.bf16.gmra.mrb[28].mxu1 %v2151_v55 }
  0x60   : > { %944 = vmatprep.mubr.bf16.mxu0 %v2152_v56  ;;  %2027 = vmatprep.mubr.bf16.mxu1 %v2154_v57 }
  0x67   : > { %945 = vmatmul.mubr.bf16.gmra.mrb[32].mxu0 %v2155_v58  ;;  %2028 = vmatmul.mubr.bf16.gmra.mrb[32].mxu1 %v2156_v59  ;;  %v2381_v58 = vld [vmem:[%s2462_s2] ss:$0 sm:$0xff] }
  0x68   : > { %952 = vmatprep.mubr.bf16.mxu0 %v2157_v60  ;;  %2031 = vmatprep.mubr.bf16.mxu1 %v2159_v61 }
  0x6f   : > { %953 = vmatmul.mubr.bf16.gmra.mrb[36].mxu0 %v2160_v62  ;;  %2032 = vmatmul.mubr.bf16.gmra.mrb[36].mxu1 %v2161_v63 }
  0x70   : > { %960 = vmatprep.mubr.bf16.mxu0 %v2162_v0  ;;  %2035 = vmatprep.mubr.bf16.mxu1 %v2164_v1 }
  0x77   : > { %961 = vmatmul.mubr.bf16.gmra.mrb[40].mxu0 %v2165_v2  ;;  %2036 = vmatmul.mubr.bf16.gmra.mrb[40].mxu1 %v2166_v3 }
  0x78   : > { %968 = vmatprep.mubr.bf16.mxu0 %v2167_v4  ;;  %2039 = vmatprep.mubr.bf16.mxu1 %v2169_v5 }
  0x7f   : > { %969 = vmatmul.mubr.bf16.gmra.mrb[44].mxu0 %v2170_v6  ;;  %2040 = vmatmul.mubr.bf16.gmra.mrb[44].mxu1 %v2171_v7 }
  0xfa   : > { %v1875_v8 = vpop.f32.mrb[0].mxu0  ;;  %v1947_v9 = vpop.f32.mrb[0].mxu1 }
  0xfb   : > { %v1876_v10 = vpop.f32.mrb[1].mxu0  ;;  %v1948_v11 = vpop.f32.mrb[1].mxu1 }
  0xfc   : > { %v1877_v12 = vadd.f32 %v1876_v10, %v1875_v8  ;;  %v2362_v13 = vadd.f32 %v1948_v11, %v1947_v9  ;;  %v1878_v14 = vpop.f32.mrb[2].mxu0  ;;  %v1950_v15 = vpop.f32.mrb[2].mxu1 }
  0xfd   : > { %v1879_v16 = vpop.f32.mrb[3].mxu0  ;;  %v1951_v17 = vpop.f32.mrb[3].mxu1 }
  0xfe   : > { %v1880_v18 = vadd.f32 %v1879_v16, %v1878_v14  ;;  %v2364_v19 = vadd.f32 %v1951_v17, %v1950_v15 }
 0x102   : > { %v1881_v20 = vpop.f32.mrb[4].mxu0  ;;  %v1953_v21 = vpop.f32.mrb[4].mxu1 }
 0x103   : > { %v1882_v22 = vpop.f32.mrb[5].mxu0  ;;  %v1954_v23 = vpop.f32.mrb[5].mxu1 }
 0x104   : > { %v1883_v24 = vadd.f32 %v1882_v22, %v1881_v20  ;;  %v2366_v25 = vadd.f32 %v1954_v23, %v1953_v21  ;;  %v1884_v26 = vpop.f32.mrb[6].mxu0  ;;  %v1956_v27 = vpop.f32.mrb[6].mxu1 }
 0x105   : > { %v1885_v28 = vpop.f32.mrb[7].mxu0  ;;  %v1957_v29 = vpop.f32.mrb[7].mxu1 }
 0x106   : > { %v1886_v30 = vadd.f32 %v1885_v28, %v1884_v26  ;;  %v2368_v31 = vadd.f32 %v1957_v29, %v1956_v27 }
 0x10a   : > { %v1887_v32 = vpop.f32.mrb[8].mxu0  ;;  %v1959_v33 = vpop.f32.mrb[8].mxu1 }
 0x10b   : > { %v1888_v34 = vpop.f32.mrb[9].mxu0  ;;  %v1960_v35 = vpop.f32.mrb[9].mxu1 }
 0x10c   : > { %v1889_v36 = vadd.f32 %v1888_v34, %v1887_v32  ;;  %v2370_v37 = vadd.f32 %v1960_v35, %v1959_v33  ;;  %v1890_v38 = vpop.f32.mrb[10].mxu0  ;;  %v1962_v39 = vpop.f32.mrb[10].mxu1 }
 0x10d   : > { %v1891_v40 = vpop.f32.mrb[11].mxu0  ;;  %v1963_v41 = vpop.f32.mrb[11].mxu1 }
 0x10e   : > { %v1892_v42 = vadd.f32 %v1891_v40, %v1890_v38  ;;  %v2372_v43 = vadd.f32 %v1963_v41, %v1962_v39 }
 0x112   : > { %v1893_v44 = vpop.f32.mrb[12].mxu0  ;;  %v1965_v45 = vpop.f32.mrb[12].mxu1 }
 0x113   : > { %v1894_v46 = vpop.f32.mrb[13].mxu0  ;;  %v1966_v47 = vpop.f32.mrb[13].mxu1 }
 0x114   : > { %v1895_v48 = vadd.f32 %v1894_v46, %v1893_v44  ;;  %v2374_v49 = vadd.f32 %v1966_v47, %v1965_v45  ;;  %v1896_v50 = vpop.f32.mrb[14].mxu0  ;;  %v1968_v51 = vpop.f32.mrb[14].mxu1 }
 0x115   : > { %v1897_v52 = vpop.f32.mrb[15].mxu0  ;;  %v1969_v53 = vpop.f32.mrb[15].mxu1 }
 0x116   : > { %v1898_v54 = vadd.f32 %v1897_v52, %v1896_v50  ;;  %v2376_v55 = vadd.f32 %v1969_v53, %v1968_v51 }
 0x11a   : > { %v1899_v56 = vpop.f32.mrb[16].mxu0  ;;  %v2013_v57 = vpop.f32.mrb[16].mxu1 }
 0x11b   : > { %v1052_v59 = vadd.f32 %v2013_v57, %v1883_v24  ;;  %v1900_v60 = vpop.f32.mrb[17].mxu0  ;;  %v1043_v61 = vpop.f32.mrb[17].mxu1 }
 0x11c   : > { %v1901_v62 = vadd.f32 %v1900_v60, %v1899_v56  ;;  %v1044_v63 = vadd.f32 %v1877_v12, %v1043_v61  ;;  %v1902_v0 = vpop.f32.mrb[18].mxu0  ;;  %v2014_v1 = vpop.f32.mrb[18].mxu1 }
 0x11d   : > { %v1278_v2 = vadd.f32 %v2381_v58, %v1052_v59  ;;  %v1055_v3 = vadd.f32 %v2014_v1, %v1886_v30  ;;  %v1903_v4 = vpop.f32.mrb[19].mxu0  ;;  %v1046_v5 = vpop.f32.mrb[19].mxu1 }
 0x11e   : > { %v1276_v6 = vadd.f32 %v2381_v58, %v1044_v63  ;;  %v1904_v7 = vadd.f32 %v1903_v4, %v1902_v0  ;;  %v1047_v8 = vadd.f32 %v1880_v18, %v1046_v5 }
 0x11f   : > { %v1279_v9 = vadd.f32 %v2381_v58, %v1055_v3  ;;  %v1310_v11 = vmax.f32 %v1278_v2, 0.0 }
 0x120   : > { %v1277_v10 = vadd.f32 %v2381_v58, %v1047_v8  ;;  %v1308_v15 = vmax.f32 %v1276_v6, 0.0 }
 0x121   : > { %v1311_v14 = vmax.f32 %v1279_v9, 0.0 }
 0x122   : > { %v1309_v12 = vmax.f32 %v1277_v10, 0.0  ;;  %v1905_v16 = vpop.f32.mrb[20].mxu0  ;;  %v2017_v17 = vpop.f32.mrb[20].mxu1 }
 0x123   : > { %v1772_v20 = vpack.c.bf16 %v1311_v14, %v1310_v11  ;;  %v1068_v18 = vadd.f32 %v2017_v17, %v1895_v48  ;;  %v1906_v21 = vpop.f32.mrb[21].mxu0  ;;  %v1059_v22 = vpop.f32.mrb[21].mxu1 }
 0x124   : > { %v1767_v23 = vpack.c.bf16 %v1309_v12, %v1308_v15  ;;  %v1907_v24 = vadd.f32 %v1906_v21, %v1905_v16  ;;  %v1060_v26 = vadd.f32 %v1889_v36, %v1059_v22  ;;  %v1908_v27 = vpop.f32.mrb[22].mxu0  ;;  %v2018_v28 = vpop.f32.mrb[22].mxu1 }
 0x125   : > { %1844 = vst [vmem:[%s2391_s28 + $0x8] sm:$0xff] %v1772_v20   ;;  %v1282_v29 = vadd.f32 %v2381_v58, %v1068_v18  ;;  %v1071_v30 = vadd.f32 %v2018_v28, %v1898_v54  ;;  %v1909_v32 = vpop.f32.mrb[23].mxu0  ;;  %v1062_v33 = vpop.f32.mrb[23].mxu1 }
 0x126   : > { %1768 = vst [vmem:[%s2391_s28] sm:$0xff] %v1767_v23   ;;  %v1280_v34 = vadd.f32 %v2381_v58, %v1060_v26  ;;  %v1910_v35 = vadd.f32 %v1909_v32, %v1908_v27  ;;  %v1063_v38 = vadd.f32 %v1892_v42, %v1062_v33 }
 0x127   : > { %v1283_v39 = vadd.f32 %v2381_v58, %v1071_v30  ;;  %v1314_v41 = vmax.f32 %v1282_v29, 0.0 }
 0x128   : > { %v1281_v40 = vadd.f32 %v2381_v58, %v1063_v38  ;;  %v1312_v44 = vmax.f32 %v1280_v34, 0.0 }
 0x129   : > { %v1315_v36 = vmax.f32 %v1283_v39, 0.0 }
 0x12a   : > { %v1313_v45 = vmax.f32 %v1281_v40, 0.0  ;;  %v1911_v46 = vpop.f32.mrb[24].mxu0  ;;  %v2021_v47 = vpop.f32.mrb[24].mxu1 }
 0x12b   : > { %v1782_v48 = vpack.c.bf16 %v1315_v36, %v1314_v41  ;;  %v1084_v50 = vadd.f32 %v2021_v47, %v1907_v24  ;;  %v1912_v51 = vpop.f32.mrb[25].mxu0  ;;  %v1075_v52 = vpop.f32.mrb[25].mxu1 }
 0x12c   : > { %v1777_v53 = vpack.c.bf16 %v1313_v45, %v1312_v44  ;;  %v1913_v54 = vadd.f32 %v1912_v51, %v1911_v46  ;;  %v1076_v56 = vadd.f32 %v1901_v62, %v1075_v52  ;;  %v1914_v42 = vpop.f32.mrb[26].mxu0  ;;  %v2022_v57 = vpop.f32.mrb[26].mxu1 }
 0x12d   : > { %1846 = vst [vmem:[%s2391_s28 + $0x18] sm:$0xff] %v1782_v48   ;;  %v1286_v59 = vadd.f32 %v2381_v58, %v1084_v50  ;;  %v1087_v60 = vadd.f32 %v2022_v57, %v1910_v35  ;;  %v1915_v61 = vpop.f32.mrb[27].mxu0  ;;  %v1078_v63 = vpop.f32.mrb[27].mxu1 }
 0x12e   : > { %1845 = vst [vmem:[%s2391_s28 + $0x10] sm:$0xff] %v1777_v53   ;;  %v1284_v0 = vadd.f32 %v2381_v58, %v1076_v56  ;;  %v1916_v1 = vadd.f32 %v1915_v61, %v1914_v42  ;;  %v1079_v2 = vadd.f32 %v1904_v7, %v1078_v63 }
 0x12f   : > { %v1287_v3 = vadd.f32 %v2381_v58, %v1087_v60  ;;  %v1318_v5 = vmax.f32 %v1286_v59, 0.0 }
 0x130   : > { %v1285_v4 = vadd.f32 %v2381_v58, %v1079_v2  ;;  %v1316_v6 = vmax.f32 %v1284_v0, 0.0 }
 0x131   : > { %v1319_v62 = vmax.f32 %v1287_v3, 0.0 }
 0x132   : > { %v1317_v8 = vmax.f32 %v1285_v4, 0.0  ;;  %v1917_v9 = vpop.f32.mrb[28].mxu0  ;;  %v2025_v10 = vpop.f32.mrb[28].mxu1 }
 0x133   : > { %v1792_v11 = vpack.c.bf16 %v1319_v62, %v1318_v5  ;;  %v1918_v14 = vpop.f32.mrb[29].mxu0  ;;  %v1091_v15 = vpop.f32.mrb[29].mxu1 }
 0x134   : > { %v1787_v12 = vpack.c.bf16 %v1317_v8, %v1316_v6  ;;  %v1919_v16 = vadd.f32 %v1918_v14, %v1917_v9  ;;  %v1092_v17 = vadd.f32 %v1913_v54, %v1091_v15  ;;  %v1920_v20 = vpop.f32.mrb[30].mxu0  ;;  %v2026_v7 = vpop.f32.mrb[30].mxu1 }
 0x135   : > { %1848 = vst [vmem:[%s2391_s28 + $0x28] sm:$0xff] %v1792_v11   ;;  %v1921_v18 = vpop.f32.mrb[31].mxu0  ;;  %v1094_v21 = vpop.f32.mrb[31].mxu1 }
 0x136   : > { %1847 = vst [vmem:[%s2391_s28 + $0x20] sm:$0xff] %v1787_v12   ;;  %v1100_v22 = vadd.f32 %v2025_v10, %v1919_v16  ;;  %v1288_v23 = vadd.f32 %v2381_v58, %v1092_v17  ;;  %v1922_v24 = vadd.f32 %v1921_v18, %v1920_v20  ;;  %v1095_v26 = vadd.f32 %v1916_v1, %v1094_v21 }
 0x138   : > { %v1290_v27 = vadd.f32 %v2381_v58, %v1100_v22  ;;  %v1103_v28 = vadd.f32 %v2026_v7, %v1922_v24  ;;  %v1289_v29 = vadd.f32 %v2381_v58, %v1095_v26  ;;  %v1320_v30 = vmax.f32 %v1288_v23, 0.0 }
 0x13a   : > { %v1291_v32 = vadd.f32 %v2381_v58, %v1103_v28  ;;  %v1321_v33 = vmax.f32 %v1289_v29, 0.0  ;;  %v1923_v34 = vpop.f32.mrb[32].mxu0  ;;  %v2029_v35 = vpop.f32.mrb[32].mxu1  ;;  %v1322_v40 = vmax.f32 %v1290_v27, 0.0 }
 0x13b   : > { %v1924_v38 = vpop.f32.mrb[33].mxu0  ;;  %v1107_v39 = vpop.f32.mrb[33].mxu1 }
 0x13c   : > { %v1323_v41 = vmax.f32 %v1291_v32, 0.0  ;;  %v1797_v36 = vpack.c.bf16 %v1321_v33, %v1320_v30  ;;  %v1925_v44 = vadd.f32 %v1924_v38, %v1923_v34  ;;  %v1926_v45 = vpop.f32.mrb[34].mxu0  ;;  %v2030_v46 = vpop.f32.mrb[34].mxu1 }
 0x13d   : > { %v1927_v47 = vpop.f32.mrb[35].mxu0  ;;  %v1110_v48 = vpop.f32.mrb[35].mxu1 }
 0x13e   : > { %v1802_v50 = vpack.c.bf16 %v1323_v41, %v1322_v40  ;;  %1849 = vst [vmem:[%s2391_s28 + $0x30] sm:$0xff] %v1797_v36   ;;  %v1108_v51 = vadd.f32 %v1925_v44, %v1107_v39  ;;  %v1928_v52 = vadd.f32 %v1927_v47, %v1926_v45 }
 0x140   : > { %1850 = vst [vmem:[%s2391_s28 + $0x38] sm:$0xff] %v1802_v50   ;;  %v1292_v53 = vadd.f32 %v2381_v58, %v1108_v51  ;;  %v1111_v54 = vadd.f32 %v1928_v52, %v1110_v48 }
 0x142   : > { %v1293_v56 = vadd.f32 %v2381_v58, %v1111_v54  ;;  %v1929_v42 = vpop.f32.mrb[36].mxu0  ;;  %v2415_v57 = vpop.f32.mrb[36].mxu1  ;;  %v1324_v61 = vmax.f32 %v1292_v53, 0.0 }
 0x143   : > { %v1930_v59 = vpop.f32.mrb[37].mxu0  ;;  %v1123_v60 = vpop.f32.mrb[37].mxu1 }
 0x144   : > { %v1325_v63 = vmax.f32 %v1293_v56, 0.0  ;;  %v1931_v0 = vadd.f32 %v1930_v59, %v1929_v42  ;;  %v1932_v1 = vpop.f32.mrb[38].mxu0  ;;  %v2417_v2 = vpop.f32.mrb[38].mxu1 }
 0x145   : > { %v1933_v3 = vpop.f32.mrb[39].mxu0  ;;  %v1126_v4 = vpop.f32.mrb[39].mxu1 }
 0x146   : > { %v1807_v5 = vpack.c.bf16 %v1325_v63, %v1324_v61  ;;  %v1116_v62 = vadd.f32 %v2029_v35, %v1931_v0  ;;  %v1934_v6 = vadd.f32 %v1933_v3, %v1932_v1 }
 0x148   : > { %1851 = vst [vmem:[%s2391_s28 + $0x40] sm:$0xff] %v1807_v5   ;;  %v1294_v8 = vadd.f32 %v2381_v58, %v1116_v62  ;;  %v1119_v9 = vadd.f32 %v2030_v46, %v1934_v6 }
 0x14a   : > { %v1295_v10 = vadd.f32 %v2381_v58, %v1119_v9  ;;  %v1935_v11 = vpop.f32.mrb[40].mxu0  ;;  %v2037_v14 = vpop.f32.mrb[40].mxu1  ;;  %v1326_v17 = vmax.f32 %v1294_v8, 0.0 }
 0x14b   : > { %v1148_v15 = vadd.f32 %v2037_v14, %v2366_v25  ;;  %v1936_v12 = vpop.f32.mrb[41].mxu0  ;;  %v1139_v16 = vpop.f32.mrb[41].mxu1 }
 0x14c   : > { %v1327_v20 = vmax.f32 %v1295_v10, 0.0  ;;  %v1937_v7 = vadd.f32 %v1936_v12, %v1935_v11  ;;  %v1140_v18 = vadd.f32 %v2362_v13, %v1139_v16  ;;  %v1938_v21 = vpop.f32.mrb[42].mxu0  ;;  %v2038_v22 = vpop.f32.mrb[42].mxu1 }
 0x14d   : > { %v1302_v23 = vadd.f32 %v2381_v58, %v1148_v15  ;;  %v1151_v24 = vadd.f32 %v2038_v22, %v2368_v31  ;;  %v1939_v26 = vpop.f32.mrb[43].mxu0  ;;  %v1142_v27 = vpop.f32.mrb[43].mxu1 }
 0x14e   : > { %v1812_v28 = vpack.c.bf16 %v1327_v20, %v1326_v17  ;;  %v1124_v29 = vadd.f32 %v1937_v7, %v1123_v60  ;;  %v1940_v30 = vadd.f32 %v1939_v26, %v1938_v21  ;;  %v1300_v25 = vadd.f32 %v2381_v58, %v1140_v18 }
 0x14f   : > { %v1303_v32 = vadd.f32 %v2381_v58, %v1151_v24  ;;  %v1143_v33 = vadd.f32 %v2364_v19, %v1142_v27  ;;  %v1334_v35 = vmax.f32 %v1302_v23, 0.0 }
 0x150   : > { %1852 = vst [vmem:[%s2391_s28 + $0x48] sm:$0xff] %v1812_v28   ;;  %v1296_v13 = vadd.f32 %v2381_v58, %v1124_v29  ;;  %v1127_v34 = vadd.f32 %v1940_v30, %v1126_v4  ;;  %v1332_v36 = vmax.f32 %v1300_v25, 0.0 }
 0x151   : > { %v1335_v38 = vmax.f32 %v1303_v32, 0.0  ;;  %v1301_v39 = vadd.f32 %v2381_v58, %v1143_v33 }
 0x152   : > { %v1297_v31 = vadd.f32 %v2381_v58, %v1127_v34  ;;  %v1941_v40 = vpop.f32.mrb[44].mxu0  ;;  %v2041_v41 = vpop.f32.mrb[44].mxu1  ;;  %v1328_v48 = vmax.f32 %v1296_v13, 0.0 }
 0x153   : > { %v1832_v44 = vpack.c.bf16 %v1335_v38, %v1334_v35  ;;  %v1333_v45 = vmax.f32 %v1301_v39, 0.0  ;;  %v1164_v46 = vadd.f32 %v2041_v41, %v2374_v49  ;;  %v1942_v47 = vpop.f32.mrb[45].mxu0  ;;  %v1155_v19 = vpop.f32.mrb[45].mxu1 }
 0x154   : > { %v1329_v50 = vmax.f32 %v1297_v31, 0.0  ;;  %v1943_v51 = vadd.f32 %v1942_v47, %v1941_v40  ;;  %v1156_v52 = vadd.f32 %v2370_v37, %v1155_v19  ;;  %v1944_v53 = vpop.f32.mrb[46].mxu0  ;;  %v2042_v54 = vpop.f32.mrb[46].mxu1 }
 0x155   : > { %1856 = vst [vmem:[%s2391_s28 + $0x68] sm:$0xff] %v1832_v44   ;;  %v1827_v56 = vpack.c.bf16 %v1333_v45, %v1332_v36  ;;  %v1306_v42 = vadd.f32 %v2381_v58, %v1164_v46  ;;  %v1167_v59 = vadd.f32 %v2042_v54, %v2376_v55  ;;  %v1945_v60 = vpop.f32.mrb[47].mxu0  ;;  %v1158_v61 = vpop.f32.mrb[47].mxu1 }
 0x156   : > { %v1817_v49 = vpack.c.bf16 %v1329_v50, %v1328_v48  ;;  %v1132_v63 = vadd.f32 %v2415_v57, %v1943_v51  ;;  %v1946_v0 = vadd.f32 %v1945_v60, %v1944_v53  ;;  %v1304_v1 = vadd.f32 %v2381_v58, %v1156_v52 }
 0x157   : > { %1855 = vst [vmem:[%s2391_s28 + $0x60] sm:$0xff] %v1827_v56   ;;  %v1307_v37 = vadd.f32 %v2381_v58, %v1167_v59  ;;  %v1159_v3 = vadd.f32 %v2372_v43, %v1158_v61  ;;  %v1338_v5 = vmax.f32 %v1306_v42, 0.0 }
 0x158   : > { %1853 = vst [vmem:[%s2391_s28 + $0x50] sm:$0xff] %v1817_v49   ;;  %v1298_v4 = vadd.f32 %v2381_v58, %v1132_v63  ;;  %v1135_v55 = vadd.f32 %v2417_v2, %v1946_v0  ;;  %v1336_v8 = vmax.f32 %v1304_v1, 0.0 }
 0x159   : > { %v1339_v62 = vmax.f32 %v1307_v37, 0.0  ;;  %v1305_v57 = vadd.f32 %v2381_v58, %v1159_v3 }
 0x15a   : > { %v1299_v6 = vadd.f32 %v2381_v58, %v1135_v55  ;;  %v1330_v11 = vmax.f32 %v1298_v4, 0.0 }
 0x15b   : > { %v1842_v9 = vpack.c.bf16 %v1339_v62, %v1338_v5  ;;  %v1337_v10 = vmax.f32 %v1305_v57, 0.0 }
 0x15c   : > { %v1331_v14 = vmax.f32 %v1299_v6, 0.0 }
 0x15d   : > { %1858 = vst [vmem:[%s2391_s28 + $0x78] sm:$0xff] %v1842_v9   ;;  %v1837_v43 = vpack.c.bf16 %v1337_v10, %v1336_v8 }
 0x15e   : > { %v1822_v15 = vpack.c.bf16 %v1331_v14, %v1330_v11 }
 0x15f   : > { %1857 = vst [vmem:[%s2391_s28 + $0x70] sm:$0xff] %v1837_v43  }
 0x160   : > { %1854 = vst [vmem:[%s2391_s28 + $0x58] sm:$0xff] %v1822_v15  }
 0x161 PF: > { %s13_s14 = sadd.s32 1, %s2194_s14   ;;  %s2464_s12 = smov %s2190_s13 }
 0x162   : > { %p10_p5 = scmp.ge.s32.totalorder %s13_s14, 4   ;;  %s2465_s13 = smov %s2467_s15 }
 0x164   :  { %12 = sbr.rel (!%p10_p5) target bundleno = 2 (0x2), region = 76 }

// kernel: generator_for_video_forward.25
= control target key start
LH: loop header
LB: loop body
LE: loop exit
PB: predicated region body
PF: predicated region fallthrough
CT: control target
= control target key end

     0   :  { %s1467_s12 = smov 0   ;;  %s1469_s13 = smov 0   ;;  %s1604_s0 = inlined_call_operand.vmem [shape: bf16[512,128], index: 0, kind: input, shape index: {}]   ;;  %s1605_s1 = inlined_call_operand.vmem [shape: bf16[128,128], index: 1, kind: input, shape index: {}]   ;;  %s1606_s2 = inlined_call_operand.vmem [shape: f32[1,128], index: 2, kind: input, shape index: {}]   ;;  %s1607_s3 = inlined_call_operand.vmem [shape: bf16[512,128], index: 3, kind: output, shape index: {}]  }
   0x1   :  { %s1471_s14 = smov 0  }
   0x2 LB: > { %s32_s15 = sadd.s32 1, %s1441_s13  ;;  %p1096_p0 = scmp.ge.s32.totalorder %s1445_s14, 1  ;;  %s1445_s14 = sphi %s1471_s14, %s13_s14   ;;  %s1441_s13 = sphi %s1469_s13, %s1609_s13   ;;  %s1437_s12 = sphi %s1467_s12, %s1608_s12  }
   0x3   : > { %p34_p1 = scmp.ge.s32.totalorder %s32_s15, 2  ;;  %p188_p2 = scmp.lt.s32.totalorder %s1445_s14, 3 }
   0x5   : > { %s1611_s15 = smov (%p34_p1, %s32_s15), 0  ;;  %p189_p3 = pnand %p1096_p0, %p188_p2 }
   0x6   : > { %v1399_v0 = vld [vmem:[%s1605_s1] sm:$0xff] (!%p189_p3)   ;;  %s1097_s18 = sshll.u32 (!%p189_p3), %s1437_s12, 5  ;;  %v1400_v1 = vld [vmem:[%s1605_s1 + $0x8] sm:$0xff] (!%p189_p3)   ;;  %v1401_v2 = vld [vmem:[%s1605_s1 + $0x10] sm:$0xff] (!%p189_p3)  }
   0x7   : > { %192 = sbr.rel (%p189_p3) target bundleno = 283 (0x11b), region = 32  ;;  %p230_p4 = scmp.lt.s32.totalorder (!%p189_p3), %s1097_s18, 63  ;;  %1311 = vmatprep.subr.bf16.mxu0 (!%p189_p3), %v1399_v0  ;;  %1359 = vmatprep.subr.bf16.mxu1 (!%p189_p3), %v1399_v0  ;;  %v1402_v3 = vld [vmem:[%s1605_s1 + $0x18] sm:$0xff] (!%p189_p3)   ;;  %v1403_v6 = vld [vmem:[%s1605_s1 + $0x20] sm:$0xff] (!%p189_p3)   ;;  %v1404_v7 = vld [vmem:[%s1605_s1 + $0x28] sm:$0xff] (!%p189_p3)  }
   0x8   : > { %1312 = vmatpush3.bf16.msra.mxu0 (!%p189_p3), %v1399_v0  ;;  %1367 = vmatpush3.bf16.msra.mxu1 (!%p189_p3), %v1399_v0  ;;  %v1405_v8 = vld [vmem:[%s1605_s1 + $0x30] sm:$0xff] (!%p189_p3)   ;;  %v1406_v9 = vld [vmem:[%s1605_s1 + $0x38] sm:$0xff] (!%p189_p3)   ;;  %v1538_v25 = vld [vmem:[%s1606_s2] ss:$0 sm:$0xff] (!%p189_p3) }
   0x9   : > { %1313 = vmatprep.subr.bf16.mxu0 (!%p189_p3), %v1400_v1  ;;  %1360 = vmatprep.subr.bf16.mxu1 (!%p189_p3), %v1400_v1 }
   0xc   : > { %1314 = vmatpush3.bf16.msra.mxu0 (!%p189_p3), %v1400_v1  ;;  %1368 = vmatpush3.bf16.msra.mxu1 (!%p189_p3), %v1400_v1 }
   0xd   : > { %1315 = vmatprep.subr.bf16.mxu0 (!%p189_p3), %v1401_v2  ;;  %1361 = vmatprep.subr.bf16.mxu1 (!%p189_p3), %v1401_v2 }
   0xe   : > { %s1613_s18 = smov (!%p230_p4, %s1097_s18), 63 }
   0xf   : > { %s1098_s23 = sshll.u32 %s1613_s18, 2 }
  0x10   : > { %s1502_s26 = scalar_lea.vmem %s1604_s0, %s1098_s23  ;;  %1316 = vmatpush3.bf16.msra.mxu0 %v1401_v2  ;;  %1369 = vmatpush3.bf16.msra.mxu1 %v1401_v2  ;;  %s1551_s17 = scalar_lea.vmem %s1607_s3, %s1098_s23 }
  0x11   : > { %v1407_v4 = vld [vmem:[%s1502_s26] sm:$0xff]   ;;  %1317 = vmatprep.subr.bf16.mxu0 %v1402_v3  ;;  %1362 = vmatprep.subr.bf16.mxu1 %v1402_v3  ;;  %v1409_v10 = vld [vmem:[%s1502_s26 + $0x8] sm:$0xff]   ;;  %v1411_v12 = vld [vmem:[%s1502_s26 + $0x10] sm:$0xff]  }
  0x12   : > { %v1408_v5 = vld [vmem:[%s1502_s26 + $0x40] sm:$0xff]   ;;  %1327 = vmatprep.mubr.bf16.mxu0 %v1407_v4  ;;  %v1410_v11 = vld [vmem:[%s1502_s26 + $0x48] sm:$0xff]   ;;  %v1412_v13 = vld [vmem:[%s1502_s26 + $0x50] sm:$0xff]  }
  0x13   : > { %1343 = vmatprep.mubr.bf16.mxu1 %v1408_v5  ;;  %v1413_v14 = vld [vmem:[%s1502_s26 + $0x18] sm:$0xff]   ;;  %v1415_v16 = vld [vmem:[%s1502_s26 + $0x20] sm:$0xff]   ;;  %v1417_v18 = vld [vmem:[%s1502_s26 + $0x28] sm:$0xff]  }
  0x14   : > { %1318 = vmatpush3.bf16.msra.mxu0 %v1402_v3  ;;  %1370 = vmatpush3.bf16.msra.mxu1 %v1402_v3  ;;  %v1414_v15 = vld [vmem:[%s1502_s26 + $0x58] sm:$0xff]   ;;  %v1416_v17 = vld [vmem:[%s1502_s26 + $0x60] sm:$0xff]   ;;  %v1418_v19 = vld [vmem:[%s1502_s26 + $0x68] sm:$0xff]  }
  0x15   : > { %1319 = vmatprep.subr.bf16.mxu0 %v1403_v6  ;;  %1363 = vmatprep.subr.bf16.mxu1 %v1403_v6  ;;  %v1419_v20 = vld [vmem:[%s1502_s26 + $0x30] sm:$0xff]   ;;  %v1421_v22 = vld [vmem:[%s1502_s26 + $0x38] sm:$0xff]  }
  0x16   : > { %v1420_v21 = vld [vmem:[%s1502_s26 + $0x70] sm:$0xff]   ;;  %v1422_v23 = vld [vmem:[%s1502_s26 + $0x78] sm:$0xff]  }
  0x18   : > { %1320 = vmatpush3.bf16.msra.mxu0 %v1403_v6  ;;  %1371 = vmatpush3.bf16.msra.mxu1 %v1403_v6 }
  0x19   : > { %1321 = vmatprep.subr.bf16.mxu0 %v1404_v7  ;;  %1364 = vmatprep.subr.bf16.mxu1 %v1404_v7 }
  0x1c   : > { %1322 = vmatpush3.bf16.msra.mxu0 %v1404_v7  ;;  %1372 = vmatpush3.bf16.msra.mxu1 %v1404_v7 }
  0x1d   : > { %1323 = vmatprep.subr.bf16.mxu0 %v1405_v8  ;;  %1365 = vmatprep.subr.bf16.mxu1 %v1405_v8 }
  0x20   : > { %1324 = vmatpush3.bf16.msra.mxu0 %v1405_v8  ;;  %1373 = vmatpush3.bf16.msra.mxu1 %v1405_v8 }
  0x21   : > { %1325 = vmatprep.subr.bf16.mxu0 %v1406_v9  ;;  %1366 = vmatprep.subr.bf16.mxu1 %v1406_v9 }
  0x24   : > { %1326 = vmatpush3.bf16.msra.mxu0 %v1406_v9  ;;  %1374 = vmatpush3.bf16.msra.mxu1 %v1406_v9 }
  0x27   : > { %1328 = vmatmul.mubr.bf16.vlgmr.msra.gmra.mrb[0].mxu0 %v1409_v10  ;;  %1344 = vmatmul.mubr.bf16.vlgmr.msra.gmra.mrb[0].mxu1 %v1410_v11 }
  0x28   : > { %1331 = vmatprep.mubr.bf16.mxu0 %v1411_v12  ;;  %1347 = vmatprep.mubr.bf16.mxu1 %v1412_v13 }
  0x2f   : > { %1332 = vmatmul.mubr.bf16.gmra.mrb[4].mxu0 %v1413_v14  ;;  %1348 = vmatmul.mubr.bf16.gmra.mrb[4].mxu1 %v1414_v15 }
  0x30   : > { %1335 = vmatprep.mubr.bf16.mxu0 %v1415_v16  ;;  %1351 = vmatprep.mubr.bf16.mxu1 %v1416_v17 }
  0x37   : > { %1336 = vmatmul.mubr.bf16.gmra.mrb[8].mxu0 %v1417_v18  ;;  %1352 = vmatmul.mubr.bf16.gmra.mrb[8].mxu1 %v1418_v19 }
  0x38   : > { %1339 = vmatprep.mubr.bf16.mxu0 %v1419_v20  ;;  %1355 = vmatprep.mubr.bf16.mxu1 %v1420_v21 }
  0x3f   : > { %1340 = vmatmul.mubr.bf16.gmra.mrb[12].mxu0 %v1421_v22  ;;  %1356 = vmatmul.mubr.bf16.gmra.mrb[12].mxu1 %v1422_v23 }
  0xfa   : > { %v1329_v24 = vpop.f32.mrb[0].mxu0  ;;  %v1345_v26 = vpop.f32.mrb[0].mxu1 }
  0xfb   : > { %v554_v27 = vpop.f32.mrb[1].mxu0  ;;  %v618_v28 = vpop.f32.mrb[1].mxu1  ;;  %v789_v31 = vadd.f32 %v1329_v24, %v1538_v25  ;;  %v805_v32 = vadd.f32 %v1345_v26, %v1538_v25 }
  0xfc   : > { %v1330_v29 = vpop.f32.mrb[2].mxu0  ;;  %v1346_v30 = vpop.f32.mrb[2].mxu1  ;;  %v787_v37 = vadd.f32 %v1538_v25, %v554_v27  ;;  %v803_v38 = vadd.f32 %v1538_v25, %v618_v28 }
  0xfd   : > { %v790_v33 = vadd.f32 %v1330_v29, %v1538_v25  ;;  %v806_v34 = vadd.f32 %v1346_v30, %v1538_v25  ;;  %v557_v35 = vpop.f32.mrb[3].mxu0  ;;  %v621_v36 = vpop.f32.mrb[3].mxu1 }
  0xfe   : > { %v788_v39 = vadd.f32 %v1538_v25, %v557_v35  ;;  %v804_v40 = vadd.f32 %v1538_v25, %v621_v36 }
  0xff   : > { %v1200_v41 = vpack.c.bf16 %v790_v33, %v789_v31  ;;  %v1240_v42 = vpack.c.bf16 %v806_v34, %v805_v32 }
 0x100   : > { %v1195_v43 = vpack.c.bf16 %v788_v39, %v787_v37  ;;  %v1235_v44 = vpack.c.bf16 %v804_v40, %v803_v38 }
 0x101   : > { %1272 = vst [vmem:[%s1551_s17 + $0x8] sm:$0xff] %v1200_v41   ;;  %1280 = vst [vmem:[%s1551_s17 + $0x48] sm:$0xff] %v1240_v42  }
 0x102   : > { %1196 = vst [vmem:[%s1551_s17] sm:$0xff] %v1195_v43   ;;  %1279 = vst [vmem:[%s1551_s17 + $0x40] sm:$0xff] %v1235_v44   ;;  %v1333_v45 = vpop.f32.mrb[4].mxu0  ;;  %v1349_v46 = vpop.f32.mrb[4].mxu1 }
 0x103   : > { %v570_v47 = vpop.f32.mrb[5].mxu0  ;;  %v634_v48 = vpop.f32.mrb[5].mxu1  ;;  %v793_v51 = vadd.f32 %v1333_v45, %v1538_v25  ;;  %v809_v52 = vadd.f32 %v1349_v46, %v1538_v25 }
 0x104   : > { %v1334_v49 = vpop.f32.mrb[6].mxu0  ;;  %v1350_v50 = vpop.f32.mrb[6].mxu1  ;;  %v791_v57 = vadd.f32 %v1538_v25, %v570_v47  ;;  %v807_v58 = vadd.f32 %v1538_v25, %v634_v48 }
 0x105   : > { %v794_v53 = vadd.f32 %v1334_v49, %v1538_v25  ;;  %v810_v54 = vadd.f32 %v1350_v50, %v1538_v25  ;;  %v573_v55 = vpop.f32.mrb[7].mxu0  ;;  %v637_v56 = vpop.f32.mrb[7].mxu1 }
 0x106   : > { %v792_v59 = vadd.f32 %v1538_v25, %v573_v55  ;;  %v808_v60 = vadd.f32 %v1538_v25, %v637_v56 }
 0x107   : > { %v1210_v61 = vpack.c.bf16 %v794_v53, %v793_v51  ;;  %v1250_v62 = vpack.c.bf16 %v810_v54, %v809_v52 }
 0x108   : > { %v1205_v63 = vpack.c.bf16 %v792_v59, %v791_v57  ;;  %v1245_v0 = vpack.c.bf16 %v808_v60, %v807_v58 }
 0x109   : > { %1274 = vst [vmem:[%s1551_s17 + $0x18] sm:$0xff] %v1210_v61   ;;  %1282 = vst [vmem:[%s1551_s17 + $0x58] sm:$0xff] %v1250_v62  }
 0x10a   : > { %1273 = vst [vmem:[%s1551_s17 + $0x10] sm:$0xff] %v1205_v63   ;;  %1281 = vst [vmem:[%s1551_s17 + $0x50] sm:$0xff] %v1245_v0   ;;  %v1337_v1 = vpop.f32.mrb[8].mxu0  ;;  %v1353_v2 = vpop.f32.mrb[8].mxu1 }
 0x10b   : > { %v586_v3 = vpop.f32.mrb[9].mxu0  ;;  %v650_v4 = vpop.f32.mrb[9].mxu1  ;;  %v797_v7 = vadd.f32 %v1337_v1, %v1538_v25  ;;  %v813_v8 = vadd.f32 %v1353_v2, %v1538_v25 }
 0x10c   : > { %v1338_v5 = vpop.f32.mrb[10].mxu0  ;;  %v1354_v6 = vpop.f32.mrb[10].mxu1  ;;  %v795_v13 = vadd.f32 %v1538_v25, %v586_v3  ;;  %v811_v14 = vadd.f32 %v1538_v25, %v650_v4 }
 0x10d   : > { %v798_v9 = vadd.f32 %v1338_v5, %v1538_v25  ;;  %v814_v10 = vadd.f32 %v1354_v6, %v1538_v25  ;;  %v589_v11 = vpop.f32.mrb[11].mxu0  ;;  %v653_v12 = vpop.f32.mrb[11].mxu1 }
 0x10e   : > { %v796_v15 = vadd.f32 %v1538_v25, %v589_v11  ;;  %v812_v16 = vadd.f32 %v1538_v25, %v653_v12 }
 0x10f   : > { %v1220_v17 = vpack.c.bf16 %v798_v9, %v797_v7  ;;  %v1260_v18 = vpack.c.bf16 %v814_v10, %v813_v8 }
 0x110   : > { %v1215_v19 = vpack.c.bf16 %v796_v15, %v795_v13  ;;  %v1255_v20 = vpack.c.bf16 %v812_v16, %v811_v14 }
 0x111   : > { %1276 = vst [vmem:[%s1551_s17 + $0x28] sm:$0xff] %v1220_v17   ;;  %1284 = vst [vmem:[%s1551_s17 + $0x68] sm:$0xff] %v1260_v18  }
 0x112   : > { %1275 = vst [vmem:[%s1551_s17 + $0x20] sm:$0xff] %v1215_v19   ;;  %1283 = vst [vmem:[%s1551_s17 + $0x60] sm:$0xff] %v1255_v20   ;;  %v1341_v21 = vpop.f32.mrb[12].mxu0  ;;  %v1357_v22 = vpop.f32.mrb[12].mxu1 }
 0x113   : > { %v602_v23 = vpop.f32.mrb[13].mxu0  ;;  %v666_v24 = vpop.f32.mrb[13].mxu1  ;;  %v801_v28 = vadd.f32 %v1341_v21, %v1538_v25  ;;  %v817_v29 = vadd.f32 %v1357_v22, %v1538_v25 }
 0x114   : > { %v1342_v26 = vpop.f32.mrb[14].mxu0  ;;  %v1358_v27 = vpop.f32.mrb[14].mxu1  ;;  %v799_v34 = vadd.f32 %v1538_v25, %v602_v23  ;;  %v815_v35 = vadd.f32 %v1538_v25, %v666_v24 }
 0x115   : > { %v802_v30 = vadd.f32 %v1342_v26, %v1538_v25  ;;  %v818_v31 = vadd.f32 %v1358_v27, %v1538_v25  ;;  %v605_v32 = vpop.f32.mrb[15].mxu0  ;;  %v669_v33 = vpop.f32.mrb[15].mxu1 }
 0x116   : > { %v800_v36 = vadd.f32 %v1538_v25, %v605_v32  ;;  %v816_v37 = vadd.f32 %v1538_v25, %v669_v33 }
 0x117   : > { %v1230_v38 = vpack.c.bf16 %v802_v30, %v801_v28  ;;  %v1270_v39 = vpack.c.bf16 %v818_v31, %v817_v29 }
 0x118   : > { %v1225_v40 = vpack.c.bf16 %v800_v36, %v799_v34  ;;  %v1265_v41 = vpack.c.bf16 %v816_v37, %v815_v35 }
 0x119   : > { %1278 = vst [vmem:[%s1551_s17 + $0x38] sm:$0xff] %v1230_v38   ;;  %1286 = vst [vmem:[%s1551_s17 + $0x78] sm:$0xff] %v1270_v39  }
 0x11a   : > { %1277 = vst [vmem:[%s1551_s17 + $0x30] sm:$0xff] %v1225_v40   ;;  %1285 = vst [vmem:[%s1551_s17 + $0x70] sm:$0xff] %v1265_v41  }
 0x11b PF: > { %s13_s14 = sadd.s32 1, %s1445_s14   ;;  %s1608_s12 = smov %s1441_s13 }
 0x11c   : > { %p10_p5 = scmp.ge.s32.totalorder %s13_s14, 4   ;;  %s1609_s13 = smov %s1611_s15 }
 0x11e   :  { %12 = sbr.rel (!%p10_p5) target bundleno = 2 (0x2), region = 76 }

</bundles_post_ra>
